<compile_context>
chip_gen: v7x
topology: tpu7x:2x2x1
jax: 0.10.0
libtpu: 0.0.40
codegen_flags: <defaults>
</compile_context>

<pallas_src>
import functools
import math

import jax
import jax.numpy as jnp
from jax import lax
from jax.experimental import pallas as pl
from jax.experimental.pallas import tpu as pltpu

_LANE = 128


def _round_up(x, m):
    return (x + m - 1) // m * m


def _pick_batch_fold(n, m_unit, m_cap):
    """Largest divisor NB of n such that NB * m_unit <= m_cap (>= 1)."""
    nb = 1
    for cand in range(1, n + 1):
        if n % cand == 0 and cand * m_unit <= m_cap:
            nb = cand
    return nb


def _estimate_vmem_bytes(nb, h, w, cin, k, m, tn, use_im2col):
    """Rough per-step VMEM footprint (double-buffered BlockSpec operands)."""
    x_blk = nb * h * _round_up(w, 16) * _round_up(cin, _LANE) * 2      # bf16
    w_blk = _round_up(k, 16) * _round_up(tn, _LANE) * 2                # bf16
    o_blk = _round_up(m, 16) * _round_up(tn, _LANE) * 2                # bf16
    b_blk = 8 * _round_up(tn, _LANE) * 4                               # f32
    acc = _round_up(m, 8) * _round_up(tn, _LANE) * 4                   # f32 result
    total = 2 * (x_blk + w_blk + o_blk + b_blk) + acc
    if use_im2col:
        total += _round_up(m, 16) * _round_up(k, _LANE) * 2            # patch slab
    return total


def _conv_im2col_kernel(x_ref, w_ref, b_ref, o_ref, patches_ref, *, ksh, ksw, ho, wo):
    """Small-Cin path: one big (M, K)x(K, TN) matmul from a reusable patch slab.

    x_ref:       (NB, H, W, Cin)       bf16
    w_ref:       (ksh*ksw*Cin, TN)     bf16  (BN scale already folded in)
    b_ref:       (1, TN)               f32   per-channel shift (folded BN)
    o_ref:       (1, NB*Ho*Wo, TN)     bf16  lane-dense output slab
    patches_ref: (NB*Ho*Wo, ksh*ksw*Cin) bf16 VMEM scratch, reused across j
    """
    nb = x_ref.shape[0]
    cin = x_ref.shape[-1]
    m = nb * ho * wo

    # Build the im2col slab ONCE per batch-block (j == 0) and reuse it for
    # every Cout tile j — this was previously recomputed num_j times.
    @pl.when(pl.program_id(1) == 0)
    def _build_patches():
        x = x_ref[...]                                     # (NB, H, W, Cin)
        t = 0
        for dh in range(ksh):
            for dw in range(ksw):
                patches_ref[:, pl.ds(t * cin, cin)] = (
                    x[:, dh:dh + ho, dw:dw + wo, :].reshape(m, cin))
                t += 1

    acc = jnp.dot(patches_ref[...], w_ref[...],
                  preferred_element_type=jnp.float32)       # (M, TN) f32
    acc = acc + b_ref[...]                                  # bias-only epilogue
    o_ref[0] = jnp.maximum(acc, 0.0).astype(o_ref.dtype)


def _conv_taps_kernel(x_ref, w_ref, b_ref, o_ref, *, ksh, ksw, ho, wo):
    """Large-Cin path: accumulate ksh*ksw matmuls (one per tap) in f32."""
    nb = x_ref.shape[0]
    cin = x_ref.shape[-1]
    m = nb * ho * wo

    x = x_ref[...]                                          # (NB, H, W, Cin)
    acc = None
    t = 0
    for dh in range(ksh):
        for dw in range(ksw):
            xt = x[:, dh:dh + ho, dw:dw + wo, :].reshape(m, cin)
            wt = w_ref[pl.ds(t * cin, cin), :]              # static slice view
            p = jnp.dot(xt, wt, preferred_element_type=jnp.float32)
            acc = p if acc is None else acc + p
            t += 1
    acc = acc + b_ref[...]
    o_ref[0] = jnp.maximum(acc, 0.0).astype(o_ref.dtype)


def conv_affine_relu_nhwc(x_nhwc, w_hwio, scale, shift, *,
                          cout_tile=256, m_cap=1024, tap_path_min_cin=256):
    """relu(conv2d_valid(x, w) * scale + shift); NHWC in / NHWC bf16 out."""
    n, h, w, cin = x_nhwc.shape
    ksh, ksw, wcin, cout = w_hwio.shape
    assert wcin == cin
    ho, wo = h - ksh + 1, w - ksw + 1
    assert ho > 0 and wo > 0

    cout_pad = _round_up(cout, _LANE)
    tn = cout_tile if cout_pad % cout_tile == 0 else _LANE   # lane-dense tiles
    num_j = cout_pad // tn
    k = ksh * ksw * cin

    # Fold batch elements into M so the MXU rows fill and weights stream fewer times.
    nb = _pick_batch_fold(n, ho * wo, m_cap)
    num_b = n // nb
    m = nb * ho * wo

    use_im2col = cin < tap_path_min_cin

    # bf16 operands for the MXU; f32 accumulation in-kernel.
    x_bf = x_nhwc.astype(jnp.bfloat16)
    # Fold the BN scale into the weight columns in f32 (exact), then cast.
    w_flat = (w_hwio.reshape(k, cout).astype(jnp.float32)
              * scale.astype(jnp.float32)[None, :]).astype(jnp.bfloat16)
    w_flat = jnp.pad(w_flat, ((0, 0), (0, cout_pad - cout)))
    b_pad = jnp.pad(shift.astype(jnp.float32),
                    (0, cout_pad - cout)).reshape(1, cout_pad)

    if use_im2col:
        kernel = functools.partial(_conv_im2col_kernel, ksh=ksh, ksw=ksw, ho=ho, wo=wo)
        scratch_shapes = [pltpu.VMEM((m, k), jnp.bfloat16)]
    else:
        kernel = functools.partial(_conv_taps_kernel, ksh=ksh, ksw=ksw, ho=ho, wo=wo)
        scratch_shapes = []

    vmem_est = _estimate_vmem_bytes(nb, h, w, cin, k, m, tn, use_im2col)
    vmem_limit = int(min(max(2 * vmem_est, 32 * 1024 * 1024), 64 * 1024 * 1024))

    cost = pl.CostEstimate(
        flops=2 * n * ho * wo * k * cout_pad,
        transcendentals=0,
        bytes_accessed=int(x_bf.size * 2 + num_b * w_flat.size * 2
                           + num_b * b_pad.size * 4 + n * ho * wo * cout_pad * 2),
    )

    out = pl.pallas_call(
        kernel,
        out_shape=jax.ShapeDtypeStruct((num_b, m, cout_pad), jnp.bfloat16),
        grid_spec=pltpu.PrefetchScalarGridSpec(
            num_scalar_prefetch=0,
            grid=(num_b, num_j),
            in_specs=[
                # x block invariant over j -> DMA'd once per batch-block.
                pl.BlockSpec((nb, h, w, cin), lambda b, j: (b, 0, 0, 0)),
                pl.BlockSpec((k, tn), lambda b, j: (0, j)),
                pl.BlockSpec((1, tn), lambda b, j: (0, j)),
            ],
            out_specs=pl.BlockSpec((1, m, tn), lambda b, j: (b, 0, j)),
            scratch_shapes=scratch_shapes,
        ),
        compiler_params=pltpu.CompilerParams(
            # j is "arbitrary": the patch-slab scratch is reused across Cout tiles.
            dimension_semantics=("parallel", "arbitrary"),
            vmem_limit_bytes=vmem_limit,
        ),
        cost_estimate=cost,
    )(x_bf, w_flat, b_pad)

    out = out.reshape(num_b, nb, ho, wo, cout_pad).reshape(n, ho, wo, cout_pad)
    # TODO(synk): keep the backbone NHWC/bf16 with Cout pre-padded to a multiple
    # of 128 so this slice (and the wrapper transposes below) disappear.
    return out[..., :cout]


def image_encoder_conv_block(x_nchw, weight_oihw, scale, shift, *,
                             padding=1, cout_tile=256, tap_path_min_cin=256):
    """NCHW interface: relu(BN_affine(conv2d(x, w, stride=1, padding=padding)))."""
    x_nhwc = jnp.transpose(x_nchw, (0, 2, 3, 1))
    if padding:
        x_nhwc = jnp.pad(
            x_nhwc, ((0, 0), (padding, padding), (padding, padding), (0, 0)))
    w_hwio = jnp.transpose(weight_oihw, (2, 3, 1, 0))
    out_nhwc = conv_affine_relu_nhwc(
        x_nhwc, w_hwio, scale, shift,
        cout_tile=cout_tile, tap_path_min_cin=tap_path_min_cin)
    return jnp.transpose(out_nhwc, (0, 3, 1, 2))


def _reference(x, weight, scale, shift, padding):
    """Reference with the same bf16 operand quantization (scale folded in f32)."""
    w_folded = (weight.astype(jnp.float32)
                * scale.astype(jnp.float32)[:, None, None, None]).astype(jnp.bfloat16)
    ref = lax.conv_general_dilated(
        x.astype(jnp.bfloat16), w_folded,
        window_strides=(1, 1), padding=((padding, padding), (padding, padding)),
        dimension_numbers=("NCHW", "OIHW", "NCHW"),
        preferred_element_type=jnp.float32)
    return jnp.maximum(ref + shift[None, :, None, None], 0.0)


def _run_case(name, key, *, n, cin, cout, hw, pad, cout_tile=256,
              tap_path_min_cin=256):
    kx, kw_, ks, kb = jax.random.split(key, 4)
    x = jax.random.normal(kx, (n, cin, hw, hw), dtype=jnp.float32)
    fan_in = cin * 9
    weight = jax.random.normal(
        kw_, (cout, cin, 3, 3), dtype=jnp.float32) / math.sqrt(fan_in)
    scale = 1.0 + 0.1 * jax.random.normal(ks, (cout,), dtype=jnp.float32)
    shift = 0.01 * jax.random.normal(kb, (cout,), dtype=jnp.float32)

    out = image_encoder_conv_block(
        x, weight, scale, shift, padding=pad,
        cout_tile=cout_tile, tap_path_min_cin=tap_path_min_cin)
    out = jax.block_until_ready(out)
    assert out.shape == (n, cout, hw, hw), (name, out.shape)

    ref = _reference(x, weight, scale, shift, pad)
    out_f32 = out.astype(jnp.float32)
    max_err = float(jnp.max(jnp.abs(out_f32 - ref)))
    assert jnp.allclose(out_f32, ref, atol=2e-2, rtol=2e-2), (name, max_err)


if __name__ == "__main__":
    root = jax.random.PRNGKey(0)
    k1, k2, k3 = jax.random.split(root, 3)

    # 1) im2col path with multiple Cout tiles (exercises the @pl.when(j==0)
    #    patch-slab reuse across j) + padded Cout (160 -> 256 lanes).
    _run_case("im2col_multi_j", k1, n=2, cin=8, cout=160, hw=14, pad=1,
              cout_tile=128)
    # 2) im2col path, single Cout tile (original small shape).
    _run_case("im2col_small", k2, n=2, cin=8, cout=16, hw=14, pad=1)
    # 3) per-tap matmul path (large-Cin code path, threshold lowered to force it
    #    at small test shapes).
    _run_case("taps_path", k3, n=2, cin=32, cout=32, hw=10, pad=1,
              tap_path_min_cin=32)

    print("KERNEL_OK")
</pallas_src>

<mosaic_0001>
module attributes {stable_mosaic.version = 11 : i64} {
  func.func @_conv_im2col_kernel(%arg0: i32, %arg1: i32, %arg2: memref<2x16x16x8xbf16, #tpu.memory_space<vmem>>, %arg3: memref<72x128xbf16, #tpu.memory_space<vmem>>, %arg4: memref<1x128xf32, #tpu.memory_space<vmem>>, %arg5: memref<1x392x128xbf16, #tpu.memory_space<vmem>>, %arg6: memref<392x72xbf16, #tpu.memory_space<vmem>>) attributes {dimension_semantics = [#tpu.dimension_semantics<parallel>, #tpu.dimension_semantics<arbitrary>], iteration_bounds = array<i64: 1, 2>, scalar_prefetch = 0 : i64, scratch_operands = 1 : i64, tpu.core_type = #tpu.core_type<tc>, window_params = [{transform_indices = @transform_0, window_bounds = array<i64: 2, 16, 16, 8>}, {transform_indices = @transform_1, window_bounds = array<i64: 72, 128>}, {transform_indices = @transform_2, window_bounds = array<i64: 1, 128>}, {transform_indices = @transform_3, window_bounds = array<i64: 1, 392, 128>}]} {
    %c0_i32 = arith.constant 0 : i32
    %0 = arith.cmpi eq, %arg1, %c0_i32 : i32
    %1 = arith.extui %0 : i1 to i32
    %c0_i32_0 = arith.constant 0 : i32
    %2 = arith.cmpi ne, %1, %c0_i32_0 : i32
    scf.if %2 {
      %c0_10 = arith.constant 0 : index
      %c0_11 = arith.constant 0 : index
      %c0_12 = arith.constant 0 : index
      %c0_13 = arith.constant 0 : index
      %15 = vector.load %arg2[%c0_10, %c0_11, %c0_12, %c0_13] : memref<2x16x16x8xbf16, #tpu.memory_space<vmem>>, vector<2x16x16x8xbf16>
      %16 = vector.extract_strided_slice %15 {offsets = [0, 0, 0, 0], sizes = [2, 14, 14, 8], strides = [1, 1, 1, 1]} : vector<2x16x16x8xbf16> to vector<2x14x14x8xbf16>
      %17 = vector.shape_cast %16 : vector<2x14x14x8xbf16> to vector<392x8xbf16>
      %c0_14 = arith.constant 0 : index
      %c0_15 = arith.constant 0 : index
      %18 = vector.load %arg6[%c0_14, %c0_15] : memref<392x72xbf16, #tpu.memory_space<vmem>>, vector<392x8xbf16>
      tpu.vector_store %arg6[%c0_14, %c0_15], %17 {strides = array<i32>} : memref<392x72xbf16, #tpu.memory_space<vmem>>, vector<392x8xbf16>,
      %19 = vector.extract_strided_slice %15 {offsets = [0, 0, 1, 0], sizes = [2, 14, 14, 8], strides = [1, 1, 1, 1]} : vector<2x16x16x8xbf16> to vector<2x14x14x8xbf16>
      %20 = vector.shape_cast %19 : vector<2x14x14x8xbf16> to vector<392x8xbf16>
      %c0_16 = arith.constant 0 : index
      %c8 = arith.constant 8 : index
      %21 = vector.load %arg6[%c0_16, %c8] : memref<392x72xbf16, #tpu.memory_space<vmem>>, vector<392x8xbf16>
      tpu.vector_store %arg6[%c0_16, %c8], %20 {strides = array<i32>} : memref<392x72xbf16, #tpu.memory_space<vmem>>, vector<392x8xbf16>,
      %22 = vector.extract_strided_slice %15 {offsets = [0, 0, 2, 0], sizes = [2, 14, 14, 8], strides = [1, 1, 1, 1]} : vector<2x16x16x8xbf16> to vector<2x14x14x8xbf16>
      %23 = vector.shape_cast %22 : vector<2x14x14x8xbf16> to vector<392x8xbf16>
      %c0_17 = arith.constant 0 : index
      %c16 = arith.constant 16 : index
      %24 = vector.load %arg6[%c0_17, %c16] : memref<392x72xbf16, #tpu.memory_space<vmem>>, vector<392x8xbf16>
      tpu.vector_store %arg6[%c0_17, %c16], %23 {strides = array<i32>} : memref<392x72xbf16, #tpu.memory_space<vmem>>, vector<392x8xbf16>,
      %25 = vector.extract_strided_slice %15 {offsets = [0, 1, 0, 0], sizes = [2, 14, 14, 8], strides = [1, 1, 1, 1]} : vector<2x16x16x8xbf16> to vector<2x14x14x8xbf16>
      %26 = vector.shape_cast %25 : vector<2x14x14x8xbf16> to vector<392x8xbf16>
      %c0_18 = arith.constant 0 : index
      %c24 = arith.constant 24 : index
      %27 = vector.load %arg6[%c0_18, %c24] : memref<392x72xbf16, #tpu.memory_space<vmem>>, vector<392x8xbf16>
      tpu.vector_store %arg6[%c0_18, %c24], %26 {strides = array<i32>} : memref<392x72xbf16, #tpu.memory_space<vmem>>, vector<392x8xbf16>,
      %28 = vector.extract_strided_slice %15 {offsets = [0, 1, 1, 0], sizes = [2, 14, 14, 8], strides = [1, 1, 1, 1]} : vector<2x16x16x8xbf16> to vector<2x14x14x8xbf16>
      %29 = vector.shape_cast %28 : vector<2x14x14x8xbf16> to vector<392x8xbf16>
      %c0_19 = arith.constant 0 : index
      %c32 = arith.constant 32 : index
      %30 = vector.load %arg6[%c0_19, %c32] : memref<392x72xbf16, #tpu.memory_space<vmem>>, vector<392x8xbf16>
      tpu.vector_store %arg6[%c0_19, %c32], %29 {strides = array<i32>} : memref<392x72xbf16, #tpu.memory_space<vmem>>, vector<392x8xbf16>,
      %31 = vector.extract_strided_slice %15 {offsets = [0, 1, 2, 0], sizes = [2, 14, 14, 8], strides = [1, 1, 1, 1]} : vector<2x16x16x8xbf16> to vector<2x14x14x8xbf16>
      %32 = vector.shape_cast %31 : vector<2x14x14x8xbf16> to vector<392x8xbf16>
      %c0_20 = arith.constant 0 : index
      %c40 = arith.constant 40 : index
      %33 = vector.load %arg6[%c0_20, %c40] : memref<392x72xbf16, #tpu.memory_space<vmem>>, vector<392x8xbf16>
      tpu.vector_store %arg6[%c0_20, %c40], %32 {strides = array<i32>} : memref<392x72xbf16, #tpu.memory_space<vmem>>, vector<392x8xbf16>,
      %34 = vector.extract_strided_slice %15 {offsets = [0, 2, 0, 0], sizes = [2, 14, 14, 8], strides = [1, 1, 1, 1]} : vector<2x16x16x8xbf16> to vector<2x14x14x8xbf16>
      %35 = vector.shape_cast %34 : vector<2x14x14x8xbf16> to vector<392x8xbf16>
      %c0_21 = arith.constant 0 : index
      %c48 = arith.constant 48 : index
      %36 = vector.load %arg6[%c0_21, %c48] : memref<392x72xbf16, #tpu.memory_space<vmem>>, vector<392x8xbf16>
      tpu.vector_store %arg6[%c0_21, %c48], %35 {strides = array<i32>} : memref<392x72xbf16, #tpu.memory_space<vmem>>, vector<392x8xbf16>,
      %37 = vector.extract_strided_slice %15 {offsets = [0, 2, 1, 0], sizes = [2, 14, 14, 8], strides = [1, 1, 1, 1]} : vector<2x16x16x8xbf16> to vector<2x14x14x8xbf16>
      %38 = vector.shape_cast %37 : vector<2x14x14x8xbf16> to vector<392x8xbf16>
      %c0_22 = arith.constant 0 : index
      %c56 = arith.constant 56 : index
      %39 = vector.load %arg6[%c0_22, %c56] : memref<392x72xbf16, #tpu.memory_space<vmem>>, vector<392x8xbf16>
      tpu.vector_store %arg6[%c0_22, %c56], %38 {strides = array<i32>} : memref<392x72xbf16, #tpu.memory_space<vmem>>, vector<392x8xbf16>,
      %40 = vector.extract_strided_slice %15 {offsets = [0, 2, 2, 0], sizes = [2, 14, 14, 8], strides = [1, 1, 1, 1]} : vector<2x16x16x8xbf16> to vector<2x14x14x8xbf16>
      %41 = vector.shape_cast %40 : vector<2x14x14x8xbf16> to vector<392x8xbf16>
      %c0_23 = arith.constant 0 : index
      %c64 = arith.constant 64 : index
      %42 = vector.load %arg6[%c0_23, %c64] : memref<392x72xbf16, #tpu.memory_space<vmem>>, vector<392x8xbf16>
      tpu.vector_store %arg6[%c0_23, %c64], %41 {strides = array<i32>} : memref<392x72xbf16, #tpu.memory_space<vmem>>, vector<392x8xbf16>,
    } else {
    }
    %c0 = arith.constant 0 : index
    %c0_1 = arith.constant 0 : index
    %3 = vector.load %arg6[%c0, %c0_1] : memref<392x72xbf16, #tpu.memory_space<vmem>>, vector<392x72xbf16>
    %c0_2 = arith.constant 0 : index
    %c0_3 = arith.constant 0 : index
    %4 = vector.load %arg3[%c0_2, %c0_3] : memref<72x128xbf16, #tpu.memory_space<vmem>>, vector<72x128xbf16>
    %cst = arith.constant dense<0.000000e+00> : vector<392x128xf32>
    %5 = tpu.matmul %3, %4, %cst {dimension_numbers = #tpu.dot_dimension_numbers<[1], [0], [0], [1], [0, 0, 1, 1], [], []>} : vector<392x72xbf16>, vector<72x128xbf16>, vector<392x128xf32> -> vector<392x128xf32>
    %c0_4 = arith.constant 0 : index
    %c0_5 = arith.constant 0 : index
    %6 = vector.load %arg4[%c0_4, %c0_5] : memref<1x128xf32, #tpu.memory_space<vmem>>, vector<1x128xf32>
    %7 = vector.broadcast %6 : vector<1x128xf32> to vector<392x128xf32>
    %8 = arith.addf %5, %7 : vector<392x128xf32>
    %cst_6 = arith.constant 0.000000e+00 : f32
    %9 = vector.broadcast %cst_6 : f32 to vector<392x128xf32>
    %10 = arith.maximumf %8, %9 : vector<392x128xf32>
    %11 = arith.truncf %10 : vector<392x128xf32> to vector<392x128xbf16>
    %c0_7 = arith.constant 0 : index
    %c0_8 = arith.constant 0 : index
    %c0_9 = arith.constant 0 : index
    %12 = vector.load %arg5[%c0_7, %c0_8, %c0_9] : memref<1x392x128xbf16, #tpu.memory_space<vmem>>, vector<1x392x128xbf16>
    %13 = vector.shape_cast %12 : vector<1x392x128xbf16> to vector<392x128xbf16>
    %14 = vector.shape_cast %11 : vector<392x128xbf16> to vector<1x392x128xbf16>
    tpu.vector_store %arg5[%c0_7, %c0_8, %c0_9], %14 {strides = array<i32>} : memref<1x392x128xbf16, #tpu.memory_space<vmem>>, vector<1x392x128xbf16>,
    return
  }
  func.func @transform_0(%arg0: i32, %arg1: i32) -> (i32, i32, i32, i32) {
    %c0_i32 = arith.constant 0 : i32
    %c0_i32_0 = arith.constant 0 : i32
    %c0_i32_1 = arith.constant 0 : i32
    %c0_i32_2 = arith.constant 0 : i32
    return %arg0, %c0_i32, %c0_i32_0, %c0_i32_1 : i32, i32, i32, i32
  }
  func.func @transform_1(%arg0: i32, %arg1: i32) -> (i32, i32) {
    %c0_i32 = arith.constant 0 : i32
    %c0_i32_0 = arith.constant 0 : i32
    return %c0_i32, %arg1 : i32, i32
  }
  func.func @transform_2(%arg0: i32, %arg1: i32) -> (i32, i32) {
    %c0_i32 = arith.constant 0 : i32
    %c0_i32_0 = arith.constant 0 : i32
    return %c0_i32, %arg1 : i32, i32
  }
  func.func @transform_3(%arg0: i32, %arg1: i32) -> (i32, i32, i32) {
    %c0_i32 = arith.constant 0 : i32
    %c0_i32_0 = arith.constant 0 : i32
    return %arg0, %c0_i32, %arg1 : i32, i32, i32
  }
}

</mosaic_0001>

<bundles_post_ra>
// kernel: tpu_custom_call.1
= control target key start
LH: loop header
LB: loop body
LE: loop exit
PB: predicated region body
PF: predicated region fallthrough
CT: control target
= control target key end

     0   :  { %8 = vsyncpa [#allocation5], 0  ;;  %s21516_s0 = inlined_call_operand.vmem [shape: bf16[2,16,16,8], index: 0, kind: input, shape index: {}]   ;;  %s21517_s1 = inlined_call_operand.vmem [shape: bf16[72,256], index: 1, kind: input, shape index: {}]   ;;  %s21518_s2 = inlined_call_operand.vmem [shape: f32[1,256], index: 2, kind: input, shape index: {}]   ;;  %s21519_s3 = inlined_call_operand.hbm [shape: bf16[1,392,256], index: 3, kind: output, shape index: {}]  }
   0x1   :  { %10 = vsyncpa [#allocation5 + $0x1], 0  ;;  %s14484_s12 = smov 0   ;;  %s14486_s13 = smov 0  }
   0x2   :  { %s14488_s14 = smov 0   ;;  %s14490_s15 = smov 0  }
   0x3   :  { %s14492_s16 = smov 0   ;;  %s14494_s17 = smov 0  }
   0x4 LB: > { %s13489_s18 = sadd.s32 4294967295, %s14446_s17   ;;  %s13490_s19 = sadd.s32 4294967294, %s14446_s17   ;;  %s14446_s17 = sphi %s14494_s17, %s16_s17   ;;  %s14442_s16 = sphi %s14492_s16, %s23943_s16   ;;  %s14438_s15 = sphi %s14490_s15, %s23942_s15   ;;  %s14434_s14 = sphi %s14488_s14, %s23941_s14   ;;  %s14430_s13 = sphi %s14486_s13, %s23940_s13   ;;  %s14426_s12 = sphi %s14484_s12, %s23939_s12  }
   0x5   : > { %s25_s20 = sadd.s32 1, %s14442_s16  ;;  %s61_s21 = sadd.s32 1, %s14434_s14 }
   0x6   : > { %p26_p0 = scmp.ge.s32.totalorder %s25_s20, 2  ;;  %p68_p1 = scmp.ne.s32.totalorder %s14434_s14, %s14430_s13 }
   0x7   : > { %p69_p2 = scmp.eq.s32.totalorder %s14446_s17, 0  ;;  %p126_p3 = scmp.eq.s32.totalorder %s13489_s18, 1 }
   0x8   : > { %s23945_s20 = smov (%p26_p0, %s25_s20), 0  ;;  %p131_p6 = scmp.ne.s32.totalorder %s14430_s13, %s14426_s12 }
   0x9   : > { %p70_p4 = por %p69_p2, %p68_p1  ;;  %p14523_p5 = por %p126_p3, %p68_p1 }
   0xa   : > { %s58_s23 = ssub.s32 %s14442_s16, %s23945_s20  ;;  %p132_p8 = scmp.eq.s32.totalorder %s13490_s19, 1 }
   0xb   : > { %p59_p7 = scmp.eq.s32.totalorder %s58_s23, 0  ;;  %p13493_p10 = scmp.ge.s32.totalorder %s14446_s17, 2 }
   0xc   : > { %p14534_p9 = por %p132_p8, %p131_p6 }
   0xd   : > { %s14532_s24 = scalar_select %p59_p7, %s14434_s14, %s61_s21  }
   0xe   : > { %158 = sbr.rel (%p13493_p10) target bundleno = 31 (0x1f), region = 20 }
  0x15   : > { %161 = sbr.rel (!%p70_p4) target bundleno = 31 (0x1f), region = 24  ;;  %s163_s26 = sand.u32 (%p70_p4), 1, %s14434_s14  }
  0x16   : > { %s13494_s27 = sshll.u32 (%p70_p4), %s14442_s16, 2  ;;  %s14265_s28 = smul.u32 (%p70_p4), 36, %s163_s26 }
  0x17   : > { %s167_s4 = scalar_lea.vmem (%p70_p4), %s21517_s1, %s13494_s27 }
  0x18   : > { %v183_v0 = vld [vmem:[%s167_s4] sm:$0xf] (%p70_p4)  ;;  %v185_v1 = vld [vmem:[%s167_s4 + $0x8] sm:$0xf] (%p70_p4)  ;;  %v187_v2 = vld [vmem:[%s167_s4 + $0x10] sm:$0xf] (%p70_p4) }
  0x19   : > { %v189_v3 = vld [vmem:[%s167_s4 + $0x18] sm:$0xf] (%p70_p4)  ;;  %v191_v4 = vld [vmem:[%s167_s4 + $0x20] sm:$0xf] (%p70_p4)  ;;  %s165_s5 = scalar_lea.vmem (%p70_p4), [#allocation3], %s14265_s28 }
  0x1a   : > { %184 = vst [vmem:[%s165_s5] sm:$0xf] (%p70_p4), %v183_v0  ;;  %186 = vst [vmem:[%s165_s5 + $0x4] sm:$0xf] (%p70_p4), %v185_v1  ;;  %v193_v5 = vld [vmem:[%s167_s4 + $0x28] sm:$0xf] (%p70_p4) }
  0x1b   : > { %188 = vst [vmem:[%s165_s5 + $0x8] sm:$0xf] (%p70_p4), %v187_v2  ;;  %190 = vst [vmem:[%s165_s5 + $0xc] sm:$0xf] (%p70_p4), %v189_v3  ;;  %v195_v6 = vld [vmem:[%s167_s4 + $0x30] sm:$0xf] (%p70_p4) }
  0x1c   : > { %192 = vst [vmem:[%s165_s5 + $0x10] sm:$0xf] %v191_v4  ;;  %v197_v7 = vld [vmem:[%s167_s4 + $0x38] sm:$0xf]  ;;  %194 = vst [vmem:[%s165_s5 + $0x14] sm:$0xf] %v193_v5 }
  0x1d   : > { %196 = vst [vmem:[%s165_s5 + $0x18] sm:$0xf] %v195_v6  ;;  %198 = vst [vmem:[%s165_s5 + $0x1c] sm:$0xf] %v197_v7  ;;  %v199_v8 = vld [vmem:[%s167_s4 + $0x40] sm:$0xf] }
  0x1e   : > { %200 = vst [vmem:[%s165_s5 + $0x20] sm:$0xf] %v199_v8 }
  0x1f PF: > { %p13495_p11 = scmp.ge.s32.totalorder %s14446_s17, 1  ;;  %p246_p12 = scmp.lt.s32.totalorder %s14446_s17, 3 }
  0x21   : > { %p247_p13 = pnand %p13495_p11, %p246_p12 }
  0x22   : > { %s14549_s6 = sand.u32 (!%p247_p13), 1, %s14430_s13   ;;  %p292_p0 = scmp.lt.s32.totalorder (!%p247_p13), %s14438_s15, 1 }
  0x23   : > { %250 = sbr.rel (%p247_p13) target bundleno = 1577 (0x629), region = 69  ;;  %p13496_p1 = scmp.ne.s32.totalorder (!%p247_p13), %s14438_s15, 0 }
  0x24   : > { %s14266_s7 = smul.u32 (!%p247_p13), 36, %s14549_s6 }
  0x25   : > { %s14267_s8 = smul.u32 (!%p247_p13), 196, %s14549_s6 }
  0x26   : > { %s14561_s19 = scalar_lea.vmem (!%p247_p13), [#allocation3], %s14266_s7 }
  0x27   : > { %s14563_s21 = scalar_lea.vmem (!%p247_p13), [#allocation4], %s14267_s8 }
  0x2a   : > { %s14555_s9 = scalar_select %p292_p0, %s14438_s15, 1 }
  0x2b   : > { %299 = sbr.rel (%p13496_p1) target bundleno = 1224 (0x4c8), region = 77 }
  0x2c   : > { %s294_s18 = scalar_lea.vmem %s21518_s2, %s14555_s9 }
  0x32   : > { %v13499_v9 = vld.sshfl [vmem:[%s21516_s0 + $0x8] sm:$0x33 pattern:$0x75316420]  ;;  %v431_v10 = vlaneseq  ;;  %v14448_v12 = vmov 1966171168  }
  0x33   : > { %v13500_v11 = vld.sshfl [vmem:[%s21516_s0 + $0xc] sm:$0x33 pattern:$0x75316420]  ;;  %v429_v13 = vunpack.c.l.s4 %v14448_v12  ;;  %v474_v14 = vcombine.high %v13499_v9, %v13499_v9  ;;  %v14449_v17 = vmov 1935823168  }
  0x34   : > { %v432_v15 = vshrl.u32 %v431_v10, 7  ;;  %v498_v16 = vcombine.high %v13500_v11, %v13500_v11  ;;  %v1739_v18 = vunpack.c.l.s4 %v14449_v17  ;;  %vm3039_vm0 = vsmask.f32 256  ;;  %s14450_s10 = smov 8   ;;  %s14451_s27 = smov 16  }
  0x35   : > { %v430_v19 = vunpack.c.0.s8 %v429_v13  ;;  %vm3040_vm1 = vsmask.f32 1284  ;;  %vm3042_vm2 = vsmask.f32 2312  ;;  %vm3044_vm3 = vsmask.f32 3340 }
  0x36   : > { %v1740_v20 = vunpack.c.0.s8 %v1739_v18  ;;  %vm3041_vm4 = vmor %vm3039_vm0, %vm3040_vm1  ;;  %vm3046_vm5 = vsmask.f32 4368  ;;  %vm3048_vm6 = vsmask.f32 5396  ;;  %vm3050_vm8 = vsmask.f32 6424 }
  0x37   : > { %v14572_v21 = vsub.s32 %v430_v19, %v432_v15  ;;  %vm3043_vm7 = vmor %vm3041_vm4, %vm3042_vm2  ;;  %v13497_v22 = vld.sshfl [vmem:[%s21516_s0] sm:$0x33 pattern:$0x75316420]  ;;  %vm3052_vm10 = vsmask.f32 7452 }
  0x38   : > { %v14577_v23 = vsub.s32 %v1740_v20, %v432_v15  ;;  %vm3045_vm9 = vmor %vm3043_vm7, %vm3044_vm3  ;;  %v14582_v24 = vld.sshfl [vmem:[%s21516_s0 + $0x4] sm:$0x33 pattern:$0x75316420]  ;;  %v427_v25 = vcombine.high %v13497_v22, %v13497_v22  ;;  %v22412_v38 = vmov 0  ;;  %vm2961_vm15 = vcmask 60416  }
  0x39   : > { %22404 = vst [vmem:[#allocation7_spill] sm:$0xff] %v14572_v21  ;;  %v14585_v26 = vrot.slane %v13499_v9, %v14572_v21  ;;  %v14588_v27 = vrot.slane %v474_v14, %v14572_v21  ;;  %v14591_v28 = vrot.slane %v13500_v11, %v14572_v21  ;;  %v14594_v29 = vrot.slane %v498_v16, %v14572_v21  ;;  %vm3047_vm11 = vmor %vm3045_vm9, %vm3046_vm5  ;;  %v13501_v3 = vld.sshfl [vmem:[%s21516_s0 + $0x10] sm:$0x33 pattern:$0x75316420]  ;;  %s14453_s23 = smov 32  }
  0x3a   : > { %vm3049_vm12 = vmor %vm3047_vm11, %vm3048_vm6  ;;  %v14599_v30 = vrot.slane %v13497_v22, %v14572_v21  ;;  %v14602_v31 = vrot.slane %v427_v25, %v14572_v21  ;;  %v451_v32 = vcombine.high %v14582_v24, %v14582_v24  ;;  %v14608_v33 = vrot.slane %v14582_v24, %v14572_v21  ;;  %s14454_s26 = smov 40   ;;  %s14456_s11 = smov 56  }
  0x3b   : > { %22405 = vst [vmem:[#allocation8_spill] sm:$0xff] %v14585_v26  ;;  %22406 = vst [vmem:[#allocation9_spill] sm:$0xff] %v14591_v28  ;;  %v14612_v34 = vcombine.high %v14585_v26, %v14585_v26  ;;  %v14616_v35 = vcombine.high %v14588_v27, %v14588_v27  ;;  %v14620_v36 = vcombine.high %v14591_v28, %v14591_v28  ;;  %v3112_v39 = vshrl.u32 %v14585_v26, 16 }
  0x3c   : > { %22407 = vst [vmem:[#allocation10_spill] sm:$0xff] %v14594_v29  ;;  %22408 = vst [vmem:[#allocation11_spill] sm:$0xff] %v14599_v30  ;;  %v14624_v37 = vcombine.high %v14594_v29, %v14594_v29  ;;  %v3117_v40 = vshll.u32 %v14588_v27, 16  ;;  %v3120_v41 = vshrl.u32 %v14588_v27, 16  ;;  %v3141_v42 = vshll.u32 %v14591_v28, 16 }
  0x3d   : > { %22409 = vst [vmem:[#allocation12_spill] sm:$0xff] %v14612_v34  ;;  %22410 = vst [vmem:[#allocation13_spill] sm:$0xff] %v14620_v36  ;;  %v3125_v43 = vshll.u32 %v14612_v34, 16  ;;  %v3128_v44 = vshrl.u32 %v14612_v34, 16  ;;  %v3133_v45 = vshll.u32 %v14616_v35, 16  ;;  %v3136_v46 = vshrl.u32 %v14616_v35, 16 }
  0x3e   : > { %22411 = vst [vmem:[#allocation14_spill] sm:$0xff] %v14624_v37  ;;  %vm3051_vm13 = vmor %vm3049_vm12, %vm3050_vm8  ;;  %v3144_v48 = vshrl.u32 %v14591_v28, 16  ;;  %v3149_v49 = vshll.u32 %v14594_v29, 16  ;;  %v3160_v50 = vshrl.u32 %v14620_v36, 16  ;;  %v3165_v54 = vshll.u32 %v14624_v37, 16 }
  0x3f   : > { %vm14628_vm14 = vmor %vm3051_vm13, %vm3052_vm10  ;;  %v14661_v58 = vcombine.high %v14599_v30, %v14599_v30  ;;  %v14670_v61 = vcombine.high %v14602_v31, %v14602_v31  ;;  %v3055_v62 = vshrl.u32 %v14599_v30, 16  ;;  %v3060_v2 = vshll.u32 %v14602_v31, 16 }
  0x40   : > { %v22413_v38 = vsel %vm14628_vm14, 4294967295, %v22412_v38  ;;  %v14642_v47 = vsel %vm14628_vm14, %v3112_v39, %v3117_v40  ;;  %v3127_v51 = vsel %vm14628_vm14, %v3120_v41, %v3125_v43  ;;  %v3135_v52 = vsel %vm14628_vm14, %v3128_v44, %v3133_v45 }
  0x41   : > { %22414 = vst [vmem:[#allocation15_spill] sm:$0xff] %v22413_v38  ;;  %v3143_v53 = vsel %vm14628_vm14, %v3136_v46, %v3141_v42  ;;  %v14656_v55 = vsel %vm14628_vm14, %v3144_v48, %v3149_v49  ;;  %v8351_v57 = vcombine.low %v14642_v47, %v3135_v52  ;;  %v14665_v59 = vsel %vm14628_vm14, %v3160_v50, %v3165_v54 }
  0x42   : > { %22415 = vst [vmem:[#allocation16_spill] sm:$0xff] %v14656_v55  ;;  %v4698_v56 = vcombine.low %v3127_v51, %v3143_v53  ;;  %22416 = vst [vmem:[#allocation17_spill] sm:$0xff] %v14665_v59  ;;  %v4699_v60 = vcombine.low %v3135_v52, %v14656_v55  ;;  %v3063_v5 = vshrl.u32 %v14602_v31, 16  ;;  %v3068_v6 = vshll.u32 %v14661_v58, 16 }
  0x43   : > { %v14677_v0 = vrot.slane %v8351_v57, %v14577_v23  ;;  %v3071_v7 = vshrl.u32 %v14661_v58, 16  ;;  %v3062_v9 = vsel %vm14628_vm14, %v3055_v62, %v3060_v2  ;;  %v3076_v10 = vshll.u32 %v14670_v61, 16 }
  0x44   : > { %v14674_v63 = vrot.slane %v4698_v56, %v14577_v23  ;;  %v4713_v4 = vrot.slane %v4699_v60, %v14577_v23  ;;  %v3079_v11 = vshrl.u32 %v14670_v61, 16  ;;  %v3070_v13 = vsel %vm14628_vm14, %v3063_v5, %v3068_v6  ;;  %v13502_v56 = vld.sshfl [vmem:[%s21516_s0 + $0x14] sm:$0x33 pattern:$0x75316420] }
  0x45   : > { %22418 = vst [vmem:[#allocation19_spill] sm:$0xff] %v14677_v0  ;;  %v3084_v14 = vshll.u32 %v14608_v33, 16  ;;  %v521_v15 = vcombine.high %v13501_v3, %v13501_v3  ;;  %v3078_v16 = vsel %vm14628_vm14, %v3071_v7, %v3076_v10  ;;  %v14702_v17 = vrot.slane %v13501_v3, %v14572_v21  ;;  %v13503_v7 = vld.sshfl [vmem:[%s21516_s0 + $0x18] sm:$0x33 pattern:$0x75316420] }
  0x46   : > { %22417 = vst [vmem:[#allocation18_spill] sm:$0xff] %v14674_v63  ;;  %v4714_v12 = vcombine.low %v14674_v63, %v4713_v4  ;;  %v3152_v18 = vshrl.u32 %v14594_v29, 16  ;;  %v3157_v19 = vshll.u32 %v14620_v36, 16  ;;  %v4650_v25 = vcombine.low %v3062_v9, %v3078_v16 }
  0x47   : > { %22419 = vst [vmem:[#allocation20_spill] sm:$0xff] %v14702_v17  ;;  %v3086_v22 = vsel %vm14628_vm14, %v3079_v11, %v3084_v14  ;;  %v14710_v39 = vrot.slane %v521_v15, %v14572_v21  ;;  %v14714_v41 = vcombine.high %v14702_v17, %v14702_v17  ;;  %v3169_v43 = vshrl.u32 %v14702_v17, 16 }
  0x48   : > { %v4721_v20 = vrot.slane %v4714_v12, %v14577_v23  ;;  %v4651_v40 = vcombine.low %v3070_v13, %v3086_v22  ;;  %v3159_v42 = vsel %vm14628_vm14, %v3152_v18, %v3157_v19  ;;  %v4658_v44 = vrot.slane %v4650_v25, %v14577_v23 }
  0x49   : > { %22420 = vst [vmem:[#allocation21_spill] sm:$0xff] %v14710_v39  ;;  %22421 = vst [vmem:[#allocation22_spill] sm:$0xff] %v14714_v41  ;;  %v3174_v45 = vshll.u32 %v14710_v39, 16  ;;  %v3177_v46 = vshrl.u32 %v14710_v39, 16  ;;  %v14727_v48 = vrot.slane %v451_v32, %v14572_v21  ;;  %v3182_v50 = vshll.u32 %v14714_v41, 16 }
  0x4a   : > { %5830 = vrot.lane.b32.xlu1 %v4721_v20, %s14450_s10  ;;  %v4665_v49 = vrot.slane %v4651_v40, %v14577_v23  ;;  %v14733_v51 = vcombine.high %v14608_v33, %v14608_v33  ;;  %v3087_v52 = vshrl.u32 %v14608_v33, 16  ;;  %v545_v12 = vcombine.high %v13502_v56, %v13502_v56 }
  0x4b   : > { %v14738_v53 = vsel %vm14628_vm14, %v3169_v43, %v3174_v45  ;;  %v14742_v54 = vcombine.high %v14727_v48, %v14727_v48  ;;  %v3092_v24 = vshll.u32 %v14727_v48, 16  ;;  %v3095_v32 = vshrl.u32 %v14727_v48, 16 }
  0x4c   : > { %22422 = vst [vmem:[#allocation23_spill] sm:$0xff] %v14738_v53  ;;  %v4666_v57 = vcombine.low %v4658_v44, %v4665_v49  ;;  %v14751_v60 = vsel %vm14628_vm14, %v3177_v46, %v3182_v50  ;;  %v4722_v62 = vcombine.low %v3159_v42, %v14738_v53  ;;  %v3100_v2 = vshll.u32 %v14733_v51, 16 }
  0x4d   : > { %22423 = vst [vmem:[#allocation24_spill] sm:$0xff] %v14751_v60  ;;  %v4723_v3 = vcombine.low %v14665_v59, %v14751_v60  ;;  %v3094_v4 = vsel %vm14628_vm14, %v3087_v52, %v3092_v24  ;;  %v3103_v5 = vshrl.u32 %v14733_v51, 16  ;;  %v3108_v6 = vshll.u32 %v14742_v54, 16 }
  0x4e   : > { %v4673_v9 = vrot.slane %v4666_v57, %v14577_v23  ;;  %v14766_v10 = vrot.slane %v4722_v62, %v14577_v23  ;;  %v3102_v11 = vsel %vm14628_vm14, %v3095_v32, %v3100_v2  ;;  %v14775_v16 = vrot.slane %v13502_v56, %v14572_v21 }
  0x4f   : > { %v4737_v13 = vrot.slane %v4723_v3, %v14577_v23  ;;  %v3110_v14 = vsel %vm14628_vm14, %v3103_v5, %v3108_v6  ;;  %v4675_v15 = vcombine.low %v3102_v11, %v14642_v47  ;;  %v14779_v19 = vrot.slane %v545_v12, %v14572_v21 }
  0x50   : > { %22424 = vst [vmem:[#allocation25_spill] sm:$0xff] %v14766_v10  ;;  %5826 = vrot.lane.b32.xlu0 %v4673_v9, %s14450_s10  ;;  %v4674_v18 = vcombine.low %v3094_v4, %v3110_v14  ;;  %v568_v20 = vcombine.high %v13503_v7, %v13503_v7  ;;  %v14782_v22 = vrot.slane %v13503_v7, %v14572_v21  ;;  %v3185_v24 = vshrl.u32 %v14714_v41, 16 }
  0x51   : > { %22425 = vst [vmem:[#allocation26_spill] sm:$0xff] %v14779_v19  ;;  %v4738_v25 = vcombine.low %v14766_v10, %v4737_v13  ;;  %v4689_v40 = vrot.slane %v4675_v15, %v14577_v23  ;;  %v14788_v47 = vcombine.high %v14775_v16, %v14775_v16  ;;  %v14792_v42 = vcombine.high %v14710_v39, %v14710_v39 }
  0x52   : > { %22426 = vst [vmem:[#allocation27_spill] sm:$0xff] %v14782_v22  ;;  %v4682_v43 = vrot.slane %v4674_v18, %v14577_v23  ;;  %v14796_v44 = vrot.slane %v568_v20, %v14572_v21  ;;  %v14800_v45 = vcombine.high %v14782_v22, %v14782_v22  ;;  %v14804_v46 = vcombine.high %v14779_v19, %v14779_v19 }
  0x53   : > { %22427 = vst [vmem:[#allocation28_spill] sm:$0xff] %v14792_v42  ;;  %v4745_v49 = vrot.slane %v4738_v25, %v14577_v23  ;;  %v3217_v50 = vshrl.u32 %v14788_v47, 16  ;;  %v3226_v52 = vshrl.u32 %v14782_v22, 16  ;;  %v3190_v5 = vshll.u32 %v14792_v42, 16 }
  0x54   : > { %22428 = vst [vmem:[#allocation29_spill] sm:$0xff] %v14800_v45  ;;  %22429 = vst [vmem:[#allocation30_spill] sm:$0xff] %v14804_v46  ;;  %v4690_v32 = vcombine.low %v4682_v43, %v4689_v40  ;;  %v14812_v56 = vcombine.high %v14796_v44, %v14796_v44  ;;  %v3222_v57 = vshll.u32 %v14804_v46, 16  ;;  %v3231_v62 = vshll.u32 %v14796_v44, 16 }
  0x55   : > { %5832 = vrot.lane.b32.xlu1 %v4745_v49, %s14450_s10  ;;  %v3234_v2 = vshrl.u32 %v14796_v44, 16  ;;  %v3239_v3 = vshll.u32 %v14800_v45, 16  ;;  %v3242_v4 = vshrl.u32 %v14800_v45, 16  ;;  %v14837_v13 = vsel %vm14628_vm14, %v3185_v24, %v3190_v5 }
  0x56   : > { %v4697_v6 = vrot.slane %v4690_v32, %v14577_v23  ;;  %v14824_v7 = vsel %vm14628_vm14, %v3217_v50, %v3222_v57  ;;  %v14828_v9 = vsel %vm14628_vm14, %v3226_v52, %v3231_v62  ;;  %v3247_v11 = vshll.u32 %v14812_v56, 16  ;;  %22433 = vst [vmem:[#allocation34_spill] sm:$0xff] %v14837_v13  ;;  %v13505_v24 = vld.sshfl [vmem:[%s21516_s0 + $0x20] sm:$0x33 pattern:$0x75316420] }
  0x57   : > { %22430 = vst [vmem:[#allocation31_spill] sm:$0xff] %v14824_v7  ;;  %22431 = vst [vmem:[#allocation32_spill] sm:$0xff] %v14828_v9  ;;  %v14833_v12 = vsel %vm14628_vm14, %v3234_v2, %v3239_v3  ;;  %v3193_v14 = vshrl.u32 %v14792_v42, 16  ;;  %v3198_v15 = vshll.u32 %v14775_v16, 16  ;;  %v3201_v25 = vshrl.u32 %v14775_v16, 16 }
  0x58   : > { %22432 = vst [vmem:[#allocation33_spill] sm:$0xff] %v14833_v12  ;;  %5828 = vrot.lane.b32.xlu0 %v4697_v6, %s14450_s10  ;;  %v14844_v18 = vsel %vm14628_vm14, %v3242_v4, %v3247_v11  ;;  %v4770_v20 = vcombine.low %v14824_v7, %v14833_v12  ;;  %v3206_v40 = vshll.u32 %v14779_v19, 16  ;;  %v3209_v50 = vshrl.u32 %v14779_v19, 16 }
  0x59   : > { %22434 = vst [vmem:[#allocation35_spill] sm:$0xff] %v14844_v18  ;;  %v4771_v43 = vcombine.low %v14828_v9, %v14844_v18  ;;  %v14854_v49 = vsel %vm14628_vm14, %v3193_v14, %v3198_v15  ;;  %v3214_v52 = vshll.u32 %v14788_v47, 16  ;;  %v13506_v3 = vld.sshfl [vmem:[%s21516_s0 + $0x24] sm:$0x33 pattern:$0x75316420] }
  0x5a   : > { %22435 = vst [vmem:[#allocation36_spill] sm:$0xff] %v14854_v49  ;;  %v14862_v32 = vrot.slane %v4770_v20, %v14577_v23  ;;  %v14866_v57 = vsel %vm14628_vm14, %v3201_v25, %v3206_v40  ;;  %v615_v20 = vcombine.high %v13505_v24, %v13505_v24  ;;  %v14889_v25 = vrot.slane %v13505_v24, %v14572_v21  ;;  %v13504_v40 = vld.sshfl [vmem:[%s21516_s0 + $0x1c] sm:$0x33 pattern:$0x75316420] }
  0x5b   : > { %22437 = vst [vmem:[#allocation38_spill] sm:$0xff] %v14866_v57  ;;  %v4785_v4 = vrot.slane %v4771_v43, %v14577_v23  ;;  %v14878_v5 = vsel %vm14628_vm14, %v3209_v50, %v3214_v52  ;;  %v4746_v6 = vcombine.low %v14837_v13, %v14866_v57  ;;  %v639_v52 = vcombine.high %v13506_v3, %v13506_v3 }
  0x5c   : > { %22436 = vst [vmem:[#allocation37_spill] sm:$0xff] %v14862_v32  ;;  %22438 = vst [vmem:[#allocation39_spill] sm:$0xff] %v14878_v5  ;;  %v4747_v14 = vcombine.low %v14854_v49, %v14878_v5  ;;  %v14899_v11 = vrot.slane %v13506_v3, %v14572_v21  ;;  %v14903_v8 = vrot.slane %v615_v20, %v14572_v21  ;;  %v3283_v15 = vshrl.u32 %v14889_v25, 16 }
  0x5d   : > { %22439 = vst [vmem:[#allocation40_spill] sm:$0xff] %v14889_v25  ;;  %v4786_v43 = vcombine.low %v14862_v32, %v4785_v4  ;;  %v14896_v50 = vrot.slane %v4746_v6, %v14577_v23  ;;  %v14907_v24 = vcombine.high %v14889_v25, %v14889_v25  ;;  %v14912_v6 = vrot.slane %v639_v52, %v14572_v21 }
  0x5e   : > { %v4761_v2 = vrot.slane %v4747_v14, %v14577_v23  ;;  %22441 = vst [vmem:[#allocation42_spill] sm:$0xff] %v14903_v8  ;;  %v3312_v62 = vshll.u32 %v14899_v11, 16  ;;  %v592_v3 = vcombine.high %v13504_v40, %v13504_v40  ;;  %v14918_v14 = vcombine.high %v14903_v8, %v14903_v8 }
  0x5f   : > { %22440 = vst [vmem:[#allocation41_spill] sm:$0xff] %v14896_v50  ;;  %v4793_v4 = vrot.slane %v4786_v43, %v14577_v23  ;;  %22442 = vst [vmem:[#allocation43_spill] sm:$0xff] %v14912_v6  ;;  %v3288_v20 = vshll.u32 %v14903_v8, 16  ;;  %v3291_v46 = vshrl.u32 %v14903_v8, 16  ;;  %v3296_v43 = vshll.u32 %v14907_v24, 16 }
  0x60   : > { %v4762_v1 = vcombine.low %v14896_v50, %v4761_v2  ;;  %22443 = vst [vmem:[#allocation44_spill] sm:$0xff] %v14918_v14  ;;  %v3299_v52 = vshrl.u32 %v14907_v24, 16  ;;  %v14926_v7 = vrot.slane %v13504_v40, %v14572_v21  ;;  %v14929_v57 = vrot.slane %v592_v3, %v14572_v21 }
  0x61   : > { %5836 = vrot.lane.b32.xlu1 %v4793_v4, %s14450_s10  ;;  %v14934_v13 = vsel %vm14628_vm14, %v3283_v15, %v3288_v20  ;;  %v3304_v53 = vshll.u32 %v14918_v14, 16  ;;  %v3307_v4 = vshrl.u32 %v14918_v14, 16  ;;  %v14940_v37 = vsel %vm14628_vm14, %v3291_v46, %v3296_v43 }
  0x62   : > { %22444 = vst [vmem:[#allocation45_spill] sm:$0xff] %v14926_v7  ;;  %22445 = vst [vmem:[#allocation46_spill] sm:$0xff] %v14929_v57  ;;  %v4769_v2 = vrot.slane %v4762_v1, %v14577_v23  ;;  %v14944_v40 = vcombine.high %v14926_v7, %v14926_v7  ;;  %v14948_v3 = vcombine.high %v14929_v57, %v14929_v57  ;;  %v3250_v1 = vshrl.u32 %v14812_v56, 16 }
  0x63   : > { %22446 = vst [vmem:[#allocation47_spill] sm:$0xff] %v14934_v13  ;;  %22447 = vst [vmem:[#allocation48_spill] sm:$0xff] %v14940_v37  ;;  %v14954_v15 = vsel %vm14628_vm14, %v3299_v52, %v3304_v53  ;;  %v14958_v46 = vsel %vm14628_vm14, %v3307_v4, %v3312_v62  ;;  %v3255_v20 = vshll.u32 %v14926_v7, 16  ;;  %v3258_v43 = vshrl.u32 %v14926_v7, 16 }
  0x64   : > { %22448 = vst [vmem:[#allocation49_spill] sm:$0xff] %v14944_v40  ;;  %5834 = vrot.lane.b32.xlu0 %v4769_v2, %s14450_s10  ;;  %22449 = vst [vmem:[#allocation50_spill] sm:$0xff] %v14954_v15  ;;  %v4818_v32 = vcombine.low %v14934_v13, %v14954_v15  ;;  %v4819_v50 = vcombine.low %v14940_v37, %v14958_v46  ;;  %v3263_v2 = vshll.u32 %v14929_v57, 16  ;;  %v3266_v63 = vshrl.u32 %v14929_v57, 16 }
  0x65   : > { %22450 = vst [vmem:[#allocation51_spill] sm:$0xff] %v14958_v46  ;;  %v13507_v53 = vld.sshfl [vmem:[%s21516_s0 + $0x28] sm:$0x33 pattern:$0x75316420]  ;;  %v14973_v62 = vsel %vm14628_vm14, %v3250_v1, %v3255_v20  ;;  %v3271_v52 = vshll.u32 %v14944_v40, 16 }
  0x66   : > { %22451 = vst [vmem:[#allocation52_spill] sm:$0xff] %v14973_v62  ;;  %v3274_v4 = vshrl.u32 %v14944_v40, 16  ;;  %v3279_v0 = vshll.u32 %v14948_v3, 16  ;;  %v14979_v9 = vrot.slane %v4818_v32, %v14577_v23  ;;  %v4833_v5 = vrot.slane %v4819_v50, %v14577_v23 }
  0x67   : > { %v14984_v10 = vsel %vm14628_vm14, %v3258_v43, %v3263_v2  ;;  %v13508_v1 = vld.sshfl [vmem:[%s21516_s0 + $0x2c] sm:$0x33 pattern:$0x75316420]  ;;  %v14993_v20 = vsel %vm14628_vm14, %v3266_v63, %v3271_v52  ;;  %v662_v43 = vcombine.high %v13507_v53, %v13507_v53  ;;  %v15042_v63 = vcombine.high %v14899_v11, %v14899_v11 }
  0x68   : > { %22452 = vst [vmem:[#allocation53_spill] sm:$0xff] %v14979_v9  ;;  %22453 = vst [vmem:[#allocation54_spill] sm:$0xff] %v14984_v10  ;;  %v14997_v32 = vsel %vm14628_vm14, %v3274_v4, %v3279_v0  ;;  %v4834_v2 = vcombine.low %v14979_v9, %v4833_v5  ;;  %v4794_v49 = vcombine.low %v14973_v62, %v14993_v20  ;;  %vm5973_vm0 = vcmask 126016  }
  0x69   : > { %22454 = vst [vmem:[#allocation55_spill] sm:$0xff] %v14993_v20  ;;  %22455 = vst [vmem:[#allocation56_spill] sm:$0xff] %v14997_v32  ;;  %v4795_v12 = vcombine.low %v14984_v10, %v14997_v32  ;;  %v15011_v0 = vrot.slane %v13507_v53, %v14572_v21  ;;  %v15014_v4 = vrot.slane %v662_v43, %v14572_v21  ;;  %v3315_v32 = vshrl.u32 %v14899_v11, 16 }
  0x6a   : > { %v686_v50 = vcombine.high %v13508_v1, %v13508_v1  ;;  %v4841_v5 = vrot.slane %v4834_v2, %v14577_v23  ;;  %v15018_v62 = vrot.slane %v4794_v49, %v14577_v23  ;;  %v15022_v10 = vrot.slane %v13508_v1, %v14572_v21  ;;  %22462 = vst [vmem:[#allocation63_spill] sm:$0xff] %v15042_v63 }
  0x6b   : > { %22456 = vst [vmem:[#allocation57_spill] sm:$0xff] %v15011_v0  ;;  %v4809_v9 = vrot.slane %v4795_v12, %v14577_v23  ;;  %v15026_v52 = vcombine.high %v15011_v0, %v15011_v0  ;;  %v15030_v53 = vcombine.high %v15014_v4, %v15014_v4  ;;  %v3348_v2 = vshrl.u32 %v15014_v4, 16 }
  0x6c   : > { %22457 = vst [vmem:[#allocation58_spill] sm:$0xff] %v15018_v62  ;;  %22458 = vst [vmem:[#allocation59_spill] sm:$0xff] %v15022_v10  ;;  %v15033_v43 = vrot.slane %v686_v50, %v14572_v21  ;;  %5840 = vrot.lane.b32.xlu1 %v4841_v5, %s14450_s10  ;;  %v3369_v49 = vshll.u32 %v15022_v10, 16  ;;  %v3372_v1 = vshrl.u32 %v15022_v10, 16  ;;  %v3340_v41 = vshrl.u32 %v15011_v0, 16 }
  0x6d   : > { %22459 = vst [vmem:[#allocation60_spill] sm:$0xff] %v15026_v52  ;;  %22460 = vst [vmem:[#allocation61_spill] sm:$0xff] %v15030_v53  ;;  %v4810_v12 = vcombine.low %v15018_v62, %v4809_v9  ;;  %v3353_v13 = vshll.u32 %v15026_v52, 16  ;;  %v3356_v20 = vshrl.u32 %v15026_v52, 16  ;;  %v3361_v50 = vshll.u32 %v15030_v53, 16 }
  0x6e   : > { %22461 = vst [vmem:[#allocation62_spill] sm:$0xff] %v15033_v43  ;;  %v3364_v37 = vshrl.u32 %v15030_v53, 16  ;;  %v3377_v9 = vshll.u32 %v15033_v43, 16  ;;  %v15052_v62 = vcombine.high %v14912_v6, %v14912_v6  ;;  %vm7066_vm1 = vcmask 191616  }
  0x6f   : > { %v4817_v5 = vrot.slane %v4810_v12, %v14577_v23  ;;  %v15057_v18 = vsel %vm14628_vm14, %v3348_v2, %v3353_v13  ;;  %v15061_v60 = vsel %vm14628_vm14, %v3356_v20, %v3361_v50  ;;  %v3320_v12 = vshll.u32 %v14912_v6, 16 }
  0x70   : > { %22463 = vst [vmem:[#allocation64_spill] sm:$0xff] %v15057_v18  ;;  %22464 = vst [vmem:[#allocation65_spill] sm:$0xff] %v15061_v60  ;;  %v15065_v59 = vsel %vm14628_vm14, %v3364_v37, %v3369_v49  ;;  %v15071_v55 = vsel %vm14628_vm14, %v3372_v1, %v3377_v9  ;;  %v3323_v2 = vshrl.u32 %v14912_v6, 16  ;;  %v3328_v20 = vshll.u32 %v15042_v63, 16 }
  0x71   : > { %22465 = vst [vmem:[#allocation66_spill] sm:$0xff] %v15065_v59  ;;  %5838 = vrot.lane.b32.xlu0 %v4817_v5, %s14450_s10  ;;  %22466 = vst [vmem:[#allocation67_spill] sm:$0xff] %v15071_v55  ;;  %v4866_v13 = vcombine.low %v15057_v18, %v15065_v59  ;;  %v4867_v50 = vcombine.low %v15061_v60, %v15071_v55  ;;  %v15081_v37 = vsel %vm14628_vm14, %v3315_v32, %v3320_v12  ;;  %v13509_v1 = vld.sshfl [vmem:[%s21516_s0 + $0x30] sm:$0x33 pattern:$0x75316420] }
  0x72   : > { %22467 = vst [vmem:[#allocation68_spill] sm:$0xff] %v15081_v37  ;;  %v3331_v49 = vshrl.u32 %v15042_v63, 16  ;;  %v3336_v5 = vshll.u32 %v15052_v62, 16  ;;  %v15093_v25 = vsel %vm14628_vm14, %v3323_v2, %v3328_v20  ;;  %v3345_v32 = vshll.u32 %v15014_v4, 16 }
  0x73   : > { %v15089_v9 = vrot.slane %v4866_v13, %v14577_v23  ;;  %22469 = vst [vmem:[#allocation70_spill] sm:$0xff] %v15093_v25  ;;  %v4881_v12 = vrot.slane %v4867_v50, %v14577_v23  ;;  %v13510_v2 = vld.sshfl [vmem:[%s21516_s0 + $0x34] sm:$0x33 pattern:$0x75316420]  ;;  %v15123_v46 = vrot.slane %v13509_v1, %v14572_v21  ;;  %v15162_v60 = vcombine.high %v15033_v43, %v15033_v43 }
  0x74   : > { %v15100_v45 = vsel %vm14628_vm14, %v3331_v49, %v3336_v5  ;;  %v15111_v20 = vsel %vm14628_vm14, %v3340_v41, %v3345_v32  ;;  %v709_v5 = vcombine.high %v13509_v1, %v13509_v1  ;;  %v15132_v49 = vrot.slane %v13510_v2, %v14572_v21 }
  0x75   : > { %22468 = vst [vmem:[#allocation69_spill] sm:$0xff] %v15089_v9  ;;  %22470 = vst [vmem:[#allocation71_spill] sm:$0xff] %v15100_v45  ;;  %v4842_v50 = vcombine.low %v15081_v37, %v15100_v45  ;;  %v4882_v26 = vcombine.low %v15089_v9, %v4881_v12  ;;  %v4843_v13 = vcombine.low %v15093_v25, %v15111_v20  ;;  %vm8185_vm2 = vcmask 257216  }
  0x76   : > { %22471 = vst [vmem:[#allocation72_spill] sm:$0xff] %v15111_v20  ;;  %22472 = vst [vmem:[#allocation73_spill] sm:$0xff] %v15123_v46  ;;  %v15129_v32 = vrot.slane %v709_v5, %v14572_v21  ;;  %v733_v37 = vcombine.high %v13510_v2, %v13510_v2  ;;  %v15138_v15 = vcombine.high %v15123_v46, %v15123_v46  ;;  %v3429_v9 = vshrl.u32 %v15132_v49, 16 }
  0x77   : > { %v15126_v41 = vrot.slane %v4842_v50, %v14577_v23  ;;  %22475 = vst [vmem:[#allocation76_spill] sm:$0xff] %v15132_v49  ;;  %v4889_v12 = vrot.slane %v4882_v26, %v14577_v23  ;;  %v4857_v18 = vrot.slane %v4843_v13, %v14577_v23  ;;  %v15142_v1 = vcombine.high %v15022_v10, %v15022_v10 }
  0x78   : > { %22474 = vst [vmem:[#allocation75_spill] sm:$0xff] %v15129_v32  ;;  %22476 = vst [vmem:[#allocation77_spill] sm:$0xff] %v15138_v15  ;;  %v15146_v50 = vcombine.high %v15129_v32, %v15129_v32  ;;  %v15149_v5 = vrot.slane %v733_v37, %v14572_v21  ;;  %v15153_v26 = vcombine.high %v15132_v49, %v15132_v49  ;;  %v3426_v13 = vshll.u32 %v15132_v49, 16 }
  0x79   : > { %22473 = vst [vmem:[#allocation74_spill] sm:$0xff] %v15126_v41  ;;  %22477 = vst [vmem:[#allocation78_spill] sm:$0xff] %v15142_v1  ;;  %5844 = vrot.lane.b32.xlu1 %v4889_v12, %s14450_s10  ;;  %v4858_v2 = vcombine.low %v15126_v41, %v4857_v18  ;;  %v3413_v45 = vshrl.u32 %v15138_v15, 16  ;;  %v3380_v41 = vshrl.u32 %v15033_v43, 16  ;;  %v3385_v49 = vshll.u32 %v15142_v1, 16 }
  0x7a   : > { %22478 = vst [vmem:[#allocation79_spill] sm:$0xff] %v15146_v50  ;;  %22479 = vst [vmem:[#allocation80_spill] sm:$0xff] %v15149_v5  ;;  %v3418_v37 = vshll.u32 %v15146_v50, 16  ;;  %v3421_v20 = vshrl.u32 %v15146_v50, 16  ;;  %v3434_v25 = vshll.u32 %v15149_v5, 16  ;;  %v3437_v0 = vshrl.u32 %v15149_v5, 16 }
  0x7b   : > { %22480 = vst [vmem:[#allocation81_spill] sm:$0xff] %v15153_v26  ;;  %22481 = vst [vmem:[#allocation82_spill] sm:$0xff] %v15162_v60  ;;  %v4865_v12 = vrot.slane %v4858_v2, %v14577_v23  ;;  %v3442_v18 = vshll.u32 %v15153_v26, 16  ;;  %v3388_v2 = vshrl.u32 %v15142_v1, 16  ;;  %v3445_v55 = vshrl.u32 %v15153_v26, 16 }
  0x7c   : > { %v15174_v53 = vsel %vm14628_vm14, %v3413_v45, %v3418_v37  ;;  %v15178_v52 = vsel %vm14628_vm14, %v3421_v20, %v3426_v13  ;;  %v15182_v50 = vsel %vm14628_vm14, %v3429_v9, %v3434_v25  ;;  %v13511_v43 = vld.sshfl [vmem:[%s21516_s0 + $0x38] sm:$0x33 pattern:$0x75316420]  ;;  %v15197_v13 = vsel %vm14628_vm14, %v3380_v41, %v3385_v49 }
  0x7d   : > { %22482 = vst [vmem:[#allocation83_spill] sm:$0xff] %v15174_v53  ;;  %22483 = vst [vmem:[#allocation84_spill] sm:$0xff] %v15178_v52  ;;  %5842 = vrot.lane.b32.xlu0 %v4865_v12, %s14450_s10  ;;  %v15191_v45 = vsel %vm14628_vm14, %v3437_v0, %v3442_v18  ;;  %v4914_v20 = vcombine.low %v15174_v53, %v15182_v50  ;;  %v3393_v25 = vshll.u32 %v15162_v60, 16  ;;  %v3397_v12 = vshrl.u32 %v15123_v46, 16 }
  0x7e   : > { %22484 = vst [vmem:[#allocation85_spill] sm:$0xff] %v15182_v50  ;;  %22485 = vst [vmem:[#allocation86_spill] sm:$0xff] %v15191_v45  ;;  %v13512_v9 = vld.sshfl [vmem:[%s21516_s0 + $0x3c] sm:$0x33 pattern:$0x75316420]  ;;  %v4915_v37 = vcombine.low %v15178_v52, %v15191_v45 }
  0x7f   : > { %22486 = vst [vmem:[#allocation87_spill] sm:$0xff] %v15197_v13  ;;  %v3402_v0 = vshll.u32 %v15129_v32, 16  ;;  %v3405_v18 = vshrl.u32 %v15129_v32, 16  ;;  %v15209_v1 = vrot.slane %v4914_v20, %v14577_v23  ;;  %v15213_v49 = vsel %vm14628_vm14, %v3388_v2, %v3393_v25 }
  0x80   : > { %22488 = vst [vmem:[#allocation89_spill] sm:$0xff] %v15213_v49  ;;  %v3410_v41 = vshll.u32 %v15138_v15, 16  ;;  %v4929_v10 = vrot.slane %v4915_v37, %v14577_v23  ;;  %v756_v20 = vcombine.high %v13511_v43, %v13511_v43  ;;  %v780_v60 = vcombine.high %v13512_v9, %v13512_v9 }
  0x81   : > { %22487 = vst [vmem:[#allocation88_spill] sm:$0xff] %v15209_v1  ;;  %v15221_v46 = vsel %vm14628_vm14, %v3397_v12, %v3402_v0  ;;  %vm9322_vm3 = vcmask 322816   ;;  %vm9903_vm4 = vcmask 388416   ;;  %vm10782_vm5 = vcmask 454016  }
  0x82   : > { %22489 = vst [vmem:[#allocation90_spill] sm:$0xff] %v15221_v46  ;;  %v15227_v30 = vsel %vm14628_vm14, %v3405_v18, %v3410_v41  ;;  %v4890_v2 = vcombine.low %v15197_v13, %v15221_v46  ;;  %v4930_v37 = vcombine.low %v15209_v1, %v4929_v10  ;;  %v15239_v32 = vrot.slane %v756_v20, %v14572_v21 }
  0x83   : > { %22490 = vst [vmem:[#allocation91_spill] sm:$0xff] %v15227_v30  ;;  %v4891_v12 = vcombine.low %v15213_v49, %v15227_v30  ;;  %v15245_v41 = vrot.slane %v13512_v9, %v14572_v21  ;;  %v15248_v25 = vrot.slane %v780_v60, %v14572_v21  ;;  %v15251_v10 = vrot.slane %v13511_v43, %v14572_v21 }
  0x84   : > { %22491 = vst [vmem:[#allocation92_spill] sm:$0xff] %v15239_v32  ;;  %v15242_v18 = vrot.slane %v4890_v2, %v14577_v23  ;;  %v4937_v53 = vrot.slane %v4930_v37, %v14577_v23  ;;  %v15257_v20 = vcombine.high %v15239_v32, %v15239_v32  ;;  %v15261_v2 = vcombine.high %v15149_v5, %v15149_v5 }
  0x85   : > { %22493 = vst [vmem:[#allocation94_spill] sm:$0xff] %v15245_v41  ;;  %22494 = vst [vmem:[#allocation95_spill] sm:$0xff] %v15248_v25  ;;  %v4905_v46 = vrot.slane %v4891_v12, %v14577_v23  ;;  %v15265_v9 = vcombine.high %v15245_v41, %v15245_v41  ;;  %v15269_v60 = vcombine.high %v15248_v25, %v15248_v25  ;;  %v3483_v43 = vshll.u32 %v15245_v41, 16 }
  0x86   : > { %22492 = vst [vmem:[#allocation93_spill] sm:$0xff] %v15242_v18  ;;  %22495 = vst [vmem:[#allocation96_spill] sm:$0xff] %v15251_v10  ;;  %v3486_v37 = vshrl.u32 %v15245_v41, 16  ;;  %5848 = vrot.lane.b32.xlu1 %v4937_v53, %s14450_s10  ;;  %v3478_v0 = vshrl.u32 %v15257_v20, 16  ;;  %v3491_v13 = vshll.u32 %v15248_v25, 16  ;;  %v3494_v59 = vshrl.u32 %v15248_v25, 16 }
  0x87   : > { %22496 = vst [vmem:[#allocation97_spill] sm:$0xff] %v15257_v20  ;;  %22497 = vst [vmem:[#allocation98_spill] sm:$0xff] %v15261_v2  ;;  %v4906_v12 = vcombine.low %v15242_v18, %v4905_v46  ;;  %v3499_v1 = vshll.u32 %v15265_v9, 16  ;;  %v3502_v52 = vshrl.u32 %v15265_v9, 16  ;;  %v3507_v30 = vshll.u32 %v15269_v60, 16 }
  0x88   : > { %22498 = vst [vmem:[#allocation99_spill] sm:$0xff] %v15265_v9  ;;  %22499 = vst [vmem:[#allocation100_spill] sm:$0xff] %v15269_v60  ;;  %v15283_v49 = vcombine.high %v15251_v10, %v15251_v10  ;;  %v15288_v46 = vsel %vm14628_vm14, %v3478_v0, %v3483_v43  ;;  %v15292_v18 = vsel %vm14628_vm14, %v3486_v37, %v3491_v13  ;;  %v3454_v60 = vshrl.u32 %v15251_v10, 16 }
  0x89   : > { %v4913_v53 = vrot.slane %v4906_v12, %v14577_v23  ;;  %22501 = vst [vmem:[#allocation102_spill] sm:$0xff] %v15288_v46  ;;  %22502 = vst [vmem:[#allocation103_spill] sm:$0xff] %v15292_v18  ;;  %v15297_v15 = vsel %vm14628_vm14, %v3494_v59, %v3499_v1  ;;  %v15301_v25 = vsel %vm14628_vm14, %v3502_v52, %v3507_v30  ;;  %v3450_v12 = vshll.u32 %v15261_v2, 16 }
  0x8a   : > { %22500 = vst [vmem:[#allocation101_spill] sm:$0xff] %v15283_v49  ;;  %22503 = vst [vmem:[#allocation104_spill] sm:$0xff] %v15297_v15  ;;  %v4962_v13 = vcombine.low %v15288_v46, %v15297_v15  ;;  %v4963_v0 = vcombine.low %v15292_v18, %v15301_v25  ;;  %v3459_v43 = vshll.u32 %v15239_v32, 16  ;;  %v3462_v59 = vshrl.u32 %v15239_v32, 16 }
  0x8b   : > { %22504 = vst [vmem:[#allocation105_spill] sm:$0xff] %v15301_v25  ;;  %5846 = vrot.lane.b32.xlu0 %v4913_v53, %s14450_s10  ;;  %v13514_v30 = vld.sshfl [vmem:[%s21516_s0 + $0x44] sm:$0x33 pattern:$0x75316420]  ;;  %v15317_v52 = vsel %vm14628_vm14, %v3445_v55, %v3450_v12  ;;  %v3467_v1 = vshll.u32 %v15283_v49, 16 }
  0x8c   : > { %22505 = vst [vmem:[#allocation106_spill] sm:$0xff] %v15317_v52  ;;  %v3470_v37 = vshrl.u32 %v15283_v49, 16  ;;  %v3475_v53 = vshll.u32 %v15257_v20, 16  ;;  %v15323_v2 = vrot.slane %v4962_v13, %v14577_v23  ;;  %v4977_v41 = vrot.slane %v4963_v0, %v14577_v23 }
  0x8d   : > { %v15328_v9 = vsel %vm14628_vm14, %v3454_v60, %v3459_v43  ;;  %v13515_v55 = vld.sshfl [vmem:[%s21516_s0 + $0x48] sm:$0x33 pattern:$0x75316420]  ;;  %v15337_v12 = vsel %vm14628_vm14, %v3462_v59, %v3467_v1  ;;  %v827_v60 = vcombine.high %v13514_v30, %v13514_v30  ;;  %vm11919_vm6 = vcmask 519616  }
  0x8e   : > { %22506 = vst [vmem:[#allocation107_spill] sm:$0xff] %v15323_v2  ;;  %22507 = vst [vmem:[#allocation108_spill] sm:$0xff] %v15328_v9  ;;  %v15341_v13 = vsel %vm14628_vm14, %v3470_v37, %v3475_v53  ;;  %v4978_v43 = vcombine.low %v15323_v2, %v4977_v41  ;;  %v4938_v32 = vcombine.low %v15317_v52, %v15337_v12  ;;  %v13516_v46 = vld.sshfl [vmem:[%s21516_s0 + $0x4c] sm:$0x33 pattern:$0x75316420] }
  0x8f   : > { %22508 = vst [vmem:[#allocation109_spill] sm:$0xff] %v15337_v12  ;;  %22509 = vst [vmem:[#allocation110_spill] sm:$0xff] %v15341_v13  ;;  %v4939_v50 = vcombine.low %v15328_v9, %v15341_v13  ;;  %v15355_v37 = vrot.slane %v13514_v30, %v14572_v21  ;;  %v15358_v53 = vrot.slane %v827_v60, %v14572_v21  ;;  %vm12500_vm7 = vcmask 585216  }
  0x90   : > { %v850_v0 = vcombine.high %v13515_v55, %v13515_v55  ;;  %v4985_v41 = vrot.slane %v4978_v43, %v14577_v23  ;;  %v15362_v52 = vrot.slane %v4938_v32, %v14577_v23  ;;  %v15366_v9 = vrot.slane %v13515_v55, %v14572_v21  ;;  %v13513_v32 = vld.sshfl [vmem:[%s21516_s0 + $0x40] sm:$0x33 pattern:$0x75316420] }
  0x91   : > { %22510 = vst [vmem:[#allocation111_spill] sm:$0xff] %v15355_v37  ;;  %22511 = vst [vmem:[#allocation112_spill] sm:$0xff] %v15358_v53  ;;  %v4953_v2 = vrot.slane %v4939_v50, %v14577_v23  ;;  %v15370_v1 = vcombine.high %v15355_v37, %v15355_v37  ;;  %v15377_v60 = vcombine.high %v15358_v53, %v15358_v53  ;;  %v3543_v43 = vshrl.u32 %v15355_v37, 16 }
  0x92   : > { %22512 = vst [vmem:[#allocation113_spill] sm:$0xff] %v15362_v52  ;;  %22513 = vst [vmem:[#allocation114_spill] sm:$0xff] %v15366_v9  ;;  %v15373_v30 = vrot.slane %v850_v0, %v14572_v21  ;;  %5852 = vrot.lane.b32.xlu1 %v4985_v41, %s14450_s10  ;;  %v3548_v55 = vshll.u32 %v15358_v53, 16  ;;  %v3551_v59 = vshrl.u32 %v15358_v53, 16  ;;  %v3568_v0 = vshrl.u32 %v15366_v9, 16 }
  0x93   : > { %22514 = vst [vmem:[#allocation115_spill] sm:$0xff] %v15370_v1  ;;  %22516 = vst [vmem:[#allocation117_spill] sm:$0xff] %v15377_v60  ;;  %v4954_v50 = vcombine.low %v15362_v52, %v4953_v2  ;;  %v3556_v12 = vshll.u32 %v15370_v1, 16  ;;  %v3559_v18 = vshrl.u32 %v15370_v1, 16  ;;  %v3564_v13 = vshll.u32 %v15377_v60, 16 }
  0x94   : > { %22515 = vst [vmem:[#allocation116_spill] sm:$0xff] %v15373_v30  ;;  %v3573_v41 = vshll.u32 %v15373_v30, 16  ;;  %v15398_v52 = vsel %vm14628_vm14, %v3543_v43, %v3548_v55  ;;  %v803_v45 = vcombine.high %v13513_v32, %v13513_v32  ;;  %v15401_v49 = vrot.slane %v13513_v32, %v14572_v21  ;;  %v13517_v53 = vld.sshfl [vmem:[%s21516_s0 + $0x50] sm:$0x33 pattern:$0x75316420] }
  0x95   : > { %v4961_v2 = vrot.slane %v4954_v50, %v14577_v23  ;;  %22517 = vst [vmem:[#allocation118_spill] sm:$0xff] %v15398_v52  ;;  %v15408_v1 = vsel %vm14628_vm14, %v3551_v59, %v3556_v12  ;;  %v15412_v60 = vsel %vm14628_vm14, %v3559_v18, %v3564_v13  ;;  %v3540_v50 = vshll.u32 %v15355_v37, 16 }
  0x96   : > { %22518 = vst [vmem:[#allocation119_spill] sm:$0xff] %v15401_v49  ;;  %22519 = vst [vmem:[#allocation120_spill] sm:$0xff] %v15408_v1  ;;  %v15416_v43 = vsel %vm14628_vm14, %v3568_v0, %v3573_v41  ;;  %v5010_v32 = vcombine.low %v15398_v52, %v15412_v60  ;;  %v15425_v12 = vrot.slane %v803_v45, %v14572_v21  ;;  %v3511_v13 = vshrl.u32 %v15401_v49, 16 }
  0x97   : > { %22520 = vst [vmem:[#allocation121_spill] sm:$0xff] %v15412_v60  ;;  %22521 = vst [vmem:[#allocation122_spill] sm:$0xff] %v15416_v43  ;;  %5850 = vrot.lane.b32.xlu0 %v4961_v2, %s14450_s10  ;;  %v5011_v55 = vcombine.low %v15408_v1, %v15416_v43  ;;  %v15429_v18 = vcombine.high %v15401_v49, %v15401_v49  ;;  %v874_v59 = vcombine.high %v13516_v46, %v13516_v46 }
  0x98   : > { %22522 = vst [vmem:[#allocation123_spill] sm:$0xff] %v15425_v12  ;;  %v15433_v0 = vrot.slane %v13516_v46, %v14572_v21  ;;  %v897_v41 = vcombine.high %v13517_v53, %v13517_v53  ;;  %v15436_v2 = vrot.slane %v5010_v32, %v14577_v23  ;;  %v15441_v45 = vcombine.high %v15425_v12, %v15425_v12 }
  0x99   : > { %22523 = vst [vmem:[#allocation124_spill] sm:$0xff] %v15429_v18  ;;  %v5025_v37 = vrot.slane %v5011_v55, %v14577_v23  ;;  %v3516_v20 = vshll.u32 %v15425_v12, 16  ;;  %v3519_v10 = vshrl.u32 %v15425_v12, 16  ;;  %v3524_v49 = vshll.u32 %v15429_v18, 16 }
  0x9a   : > { %22524 = vst [vmem:[#allocation125_spill] sm:$0xff] %v15433_v0  ;;  %22525 = vst [vmem:[#allocation126_spill] sm:$0xff] %v15436_v2  ;;  %v3527_v26 = vshrl.u32 %v15429_v18, 16  ;;  %v15448_v46 = vrot.slane %v874_v59, %v14572_v21  ;;  %v3532_v5 = vshll.u32 %v15441_v45, 16  ;;  %v3535_v63 = vshrl.u32 %v15441_v45, 16 }
  0x9b   : > { %22526 = vst [vmem:[#allocation127_spill] sm:$0xff] %v15441_v45  ;;  %v5026_v32 = vcombine.low %v15436_v2, %v5025_v37  ;;  %v15453_v55 = vsel %vm14628_vm14, %v3511_v13, %v3516_v20  ;;  %v15459_v12 = vsel %vm14628_vm14, %v3519_v10, %v3524_v49  ;;  %v15465_v59 = vcombine.high %v15433_v0, %v15433_v0 }
  0x9c   : > { %22527 = vst [vmem:[#allocation128_spill] sm:$0xff] %v15448_v46  ;;  %22528 = vst [vmem:[#allocation129_spill] sm:$0xff] %v15453_v55  ;;  %v15468_v37 = vrot.slane %v13517_v53, %v14572_v21  ;;  %v15473_v13 = vsel %vm14628_vm14, %v3527_v26, %v3532_v5  ;;  %v15477_v49 = vsel %vm14628_vm14, %v3535_v63, %v3540_v50  ;;  %v3608_v10 = vshrl.u32 %v15448_v46, 16 }
  0x9d   : > { %22529 = vst [vmem:[#allocation130_spill] sm:$0xff] %v15459_v12  ;;  %22530 = vst [vmem:[#allocation131_spill] sm:$0xff] %v15465_v59  ;;  %v5033_v20 = vrot.slane %v5026_v32, %v14577_v23  ;;  %v4986_v18 = vcombine.low %v15453_v55, %v15473_v13  ;;  %v4987_v53 = vcombine.low %v15459_v12, %v15477_v49 }
  0x9e   : > { %22531 = vst [vmem:[#allocation132_spill] sm:$0xff] %v15468_v37  ;;  %22532 = vst [vmem:[#allocation133_spill] sm:$0xff] %v15473_v13  ;;  %v15491_v63 = vrot.slane %v897_v41, %v14572_v21  ;;  %v15495_v26 = vcombine.high %v15468_v37, %v15468_v37  ;;  %v15499_v50 = vcombine.high %v15448_v46, %v15448_v46  ;;  %v3616_v41 = vshrl.u32 %v15465_v59, 16 }
  0x9f   : > { %22533 = vst [vmem:[#allocation134_spill] sm:$0xff] %v15477_v49  ;;  %5856 = vrot.lane.b32.xlu1 %v5033_v20, %s14450_s10  ;;  %v15503_v32 = vrot.slane %v4986_v18, %v14577_v23  ;;  %v5001_v5 = vrot.slane %v4987_v53, %v14577_v23  ;;  %v3613_v20 = vshll.u32 %v15465_v59, 16  ;;  %v3625_v13 = vshrl.u32 %v15468_v37, 16 }
  0xa0   : > { %22534 = vst [vmem:[#allocation135_spill] sm:$0xff] %v15491_v63  ;;  %22535 = vst [vmem:[#allocation136_spill] sm:$0xff] %v15495_v26  ;;  %v3621_v52 = vshll.u32 %v15499_v50, 16  ;;  %v3630_v55 = vshll.u32 %v15491_v63, 16  ;;  %v3633_v15 = vshrl.u32 %v15491_v63, 16  ;;  %v3638_v53 = vshll.u32 %v15495_v26, 16 }
  0xa1   : > { %22536 = vst [vmem:[#allocation137_spill] sm:$0xff] %v15499_v50  ;;  %22537 = vst [vmem:[#allocation138_spill] sm:$0xff] %v15503_v32  ;;  %v5002_v2 = vcombine.low %v15503_v32, %v5001_v5  ;;  %v15515_v18 = vsel %vm14628_vm14, %v3608_v10, %v3613_v20  ;;  %v15520_v1 = vcombine.high %v15366_v9, %v15366_v9  ;;  %v3576_v10 = vshrl.u32 %v15373_v30, 16 }
  0xa2   : > { %22538 = vst [vmem:[#allocation139_spill] sm:$0xff] %v15515_v18  ;;  %v15524_v50 = vsel %vm14628_vm14, %v3616_v41, %v3621_v52  ;;  %v15528_v49 = vsel %vm14628_vm14, %v3625_v13, %v3630_v55  ;;  %v15532_v5 = vcombine.high %v15373_v30, %v15373_v30  ;;  %v15538_v32 = vsel %vm14628_vm14, %v3633_v15, %v3638_v53  ;;  %v13518_v55 = vld.sshfl [vmem:[%s21516_s0 + $0x54] sm:$0x33 pattern:$0x75316420] }
  0xa3   : > { %22539 = vst [vmem:[#allocation140_spill] sm:$0xff] %v15520_v1  ;;  %22540 = vst [vmem:[#allocation141_spill] sm:$0xff] %v15524_v50  ;;  %v5009_v20 = vrot.slane %v5002_v2, %v14577_v23  ;;  %v5058_v52 = vcombine.low %v15515_v18, %v15528_v49  ;;  %v3581_v41 = vshll.u32 %v15520_v1, 16  ;;  %v5059_v13 = vcombine.low %v15524_v50, %v15538_v32 }
  0xa4   : > { %22541 = vst [vmem:[#allocation142_spill] sm:$0xff] %v15528_v49  ;;  %22542 = vst [vmem:[#allocation143_spill] sm:$0xff] %v15532_v5  ;;  %v3584_v12 = vshrl.u32 %v15520_v1, 16  ;;  %v3589_v2 = vshll.u32 %v15532_v5, 16  ;;  %v3592_v25 = vshrl.u32 %v15532_v5, 16  ;;  %v3597_v9 = vshll.u32 %v15433_v0, 16 }
  0xa5   : > { %22543 = vst [vmem:[#allocation144_spill] sm:$0xff] %v15538_v32  ;;  %5854 = vrot.lane.b32.xlu0 %v5009_v20, %s14450_s10  ;;  %v15553_v15 = vrot.slane %v5058_v52, %v14577_v23  ;;  %v15557_v53 = vsel %vm14628_vm14, %v3576_v10, %v3581_v41  ;;  %v3600_v37 = vshrl.u32 %v15433_v0, 16  ;;  %v5073_v59 = vrot.slane %v5059_v13, %v14577_v23  ;;  %v13519_v41 = vld.sshfl [vmem:[%s21516_s0 + $0x58] sm:$0x33 pattern:$0x75316420] }
  0xa6   : > { %22545 = vst [vmem:[#allocation146_spill] sm:$0xff] %v15557_v53  ;;  %v15564_v1 = vsel %vm14628_vm14, %v3584_v12, %v3589_v2  ;;  %v3605_v5 = vshll.u32 %v15448_v46, 16  ;;  %v15571_v52 = vsel %vm14628_vm14, %v3592_v25, %v3597_v9  ;;  %v921_v13 = vcombine.high %v13518_v55, %v13518_v55 }
  0xa7   : > { %22544 = vst [vmem:[#allocation145_spill] sm:$0xff] %v15553_v15  ;;  %22546 = vst [vmem:[#allocation147_spill] sm:$0xff] %v15564_v1  ;;  %v15579_v12 = vrot.slane %v13518_v55, %v14572_v21  ;;  %v5074_v2 = vcombine.low %v15553_v15, %v5073_v59  ;;  %v5034_v25 = vcombine.low %v15557_v53, %v15571_v52 }
  0xa8   : > { %22547 = vst [vmem:[#allocation148_spill] sm:$0xff] %v15571_v52  ;;  %v15584_v20 = vsel %vm14628_vm14, %v3600_v37, %v3605_v5  ;;  %v15595_v55 = vrot.slane %v921_v13, %v14572_v21  ;;  %v944_v53 = vcombine.high %v13519_v41, %v13519_v41  ;;  %v15606_v9 = vrot.slane %v13519_v41, %v14572_v21 }
  0xa9   : > { %22548 = vst [vmem:[#allocation149_spill] sm:$0xff] %v15579_v12  ;;  %22549 = vst [vmem:[#allocation150_spill] sm:$0xff] %v15584_v20  ;;  %v5035_v10 = vcombine.low %v15564_v1, %v15584_v20  ;;  %v15599_v59 = vcombine.high %v15579_v12, %v15579_v12  ;;  %v5081_v37 = vrot.slane %v5074_v2, %v14577_v23 }
  0xaa   : > { %22550 = vst [vmem:[#allocation151_spill] sm:$0xff] %v15595_v55  ;;  %v15603_v5 = vrot.slane %v5034_v25, %v14577_v23  ;;  %22553 = vst [vmem:[#allocation154_spill] sm:$0xff] %v15606_v9  ;;  %v15611_v60 = vcombine.high %v15595_v55, %v15595_v55  ;;  %v15616_v52 = vcombine.high %v15491_v63, %v15491_v63  ;;  %v3641_v25 = vshrl.u32 %v15495_v26, 16 }
  0xab   : > { %22551 = vst [vmem:[#allocation152_spill] sm:$0xff] %v15599_v59  ;;  %v5049_v18 = vrot.slane %v5035_v10, %v14577_v23  ;;  %v3673_v13 = vshrl.u32 %v15599_v59, 16  ;;  %5860 = vrot.lane.b32.xlu1 %v5081_v37, %s14450_s10  ;;  %v15620_v2 = vrot.slane %v944_v53, %v14572_v21  ;;  %v15624_v41 = vcombine.high %v15606_v9, %v15606_v9 }
  0xac   : > { %22552 = vst [vmem:[#allocation153_spill] sm:$0xff] %v15603_v5  ;;  %22554 = vst [vmem:[#allocation155_spill] sm:$0xff] %v15611_v60  ;;  %v3682_v10 = vshrl.u32 %v15606_v9, 16  ;;  %v3678_v50 = vshll.u32 %v15611_v60, 16  ;;  %v3646_v20 = vshll.u32 %v15616_v52, 16  ;;  %v3649_v1 = vshrl.u32 %v15616_v52, 16 }
  0xad   : > { %22555 = vst [vmem:[#allocation156_spill] sm:$0xff] %v15616_v52  ;;  %22556 = vst [vmem:[#allocation157_spill] sm:$0xff] %v15620_v2  ;;  %v5050_v15 = vcombine.low %v15603_v5, %v5049_v18  ;;  %v15634_v53 = vcombine.high %v15620_v2, %v15620_v2  ;;  %v3687_v37 = vshll.u32 %v15620_v2, 16  ;;  %v3690_v43 = vshrl.u32 %v15620_v2, 16 }
  0xae   : > { %22557 = vst [vmem:[#allocation158_spill] sm:$0xff] %v15624_v41  ;;  %v3695_v9 = vshll.u32 %v15624_v41, 16  ;;  %v15642_v18 = vsel %vm14628_vm14, %v3673_v13, %v3678_v50  ;;  %v3698_v60 = vshrl.u32 %v15624_v41, 16  ;;  %v15647_v5 = vsel %vm14628_vm14, %v3641_v25, %v3646_v20 }
  0xaf   : > { %22558 = vst [vmem:[#allocation159_spill] sm:$0xff] %v15634_v53  ;;  %v5057_v26 = vrot.slane %v5050_v15, %v14577_v23  ;;  %22559 = vst [vmem:[#allocation160_spill] sm:$0xff] %v15642_v18  ;;  %v15651_v52 = vsel %vm14628_vm14, %v3682_v10, %v3687_v37  ;;  %v3703_v15 = vshll.u32 %v15634_v53, 16  ;;  %v3654_v63 = vshll.u32 %v15579_v12, 16 }
  0xb0   : > { %22560 = vst [vmem:[#allocation161_spill] sm:$0xff] %v15647_v5  ;;  %22561 = vst [vmem:[#allocation162_spill] sm:$0xff] %v15651_v52  ;;  %v15655_v2 = vsel %vm14628_vm14, %v3690_v43, %v3695_v9  ;;  %v13521_v50 = vld.sshfl [vmem:[%s21516_s0 + $0x60] sm:$0x33 pattern:$0x75316420] }
  0xb1   : > { %22562 = vst [vmem:[#allocation163_spill] sm:$0xff] %v15655_v2  ;;  %5858 = vrot.lane.b32.xlu0 %v5057_v26, %s14450_s10  ;;  %v5106_v20 = vcombine.low %v15642_v18, %v15655_v2  ;;  %v3657_v13 = vshrl.u32 %v15579_v12, 16  ;;  %v3662_v10 = vshll.u32 %v15595_v55, 16  ;;  %v3665_v43 = vshrl.u32 %v15595_v55, 16 }
  0xb2   : > { %v15670_v9 = vsel %vm14628_vm14, %v3698_v60, %v3703_v15  ;;  %v15674_v25 = vsel %vm14628_vm14, %v3649_v1, %v3654_v63  ;;  %v3670_v37 = vshll.u32 %v15599_v59, 16  ;;  %v13522_v1 = vld.sshfl [vmem:[%s21516_s0 + $0x64] sm:$0x33 pattern:$0x75316420]  ;;  %v991_v26 = vcombine.high %v13521_v50, %v13521_v50 }
  0xb3   : > { %22563 = vst [vmem:[#allocation164_spill] sm:$0xff] %v15670_v9  ;;  %22564 = vst [vmem:[#allocation165_spill] sm:$0xff] %v15674_v25  ;;  %v5107_v41 = vcombine.low %v15651_v52, %v15670_v9  ;;  %v15682_v12 = vrot.slane %v5106_v20, %v14577_v23  ;;  %v15686_v55 = vsel %vm14628_vm14, %v3657_v13, %v3662_v10 }
  0xb4   : > { %22566 = vst [vmem:[#allocation167_spill] sm:$0xff] %v15686_v55  ;;  %v15695_v63 = vsel %vm14628_vm14, %v3665_v43, %v3670_v37  ;;  %v5082_v15 = vcombine.low %v15647_v5, %v15686_v55  ;;  %v15707_v49 = vrot.slane %v13521_v50, %v14572_v21  ;;  %v15713_v37 = vrot.slane %v991_v26, %v14572_v21 }
  0xb5   : > { %22565 = vst [vmem:[#allocation166_spill] sm:$0xff] %v15682_v12  ;;  %22567 = vst [vmem:[#allocation168_spill] sm:$0xff] %v15695_v63  ;;  %v5121_v13 = vrot.slane %v5107_v41, %v14577_v23  ;;  %v5083_v10 = vcombine.low %v15674_v25, %v15695_v63  ;;  %v1015_v5 = vcombine.high %v13522_v1, %v13522_v1 }
  0xb6   : > { %22568 = vst [vmem:[#allocation169_spill] sm:$0xff] %v15707_v49  ;;  %v15710_v43 = vrot.slane %v5082_v15, %v14577_v23  ;;  %22570 = vst [vmem:[#allocation171_spill] sm:$0xff] %v15713_v37  ;;  %v15716_v20 = vrot.slane %v13522_v1, %v14572_v21  ;;  %v15722_v60 = vcombine.high %v15707_v49, %v15707_v49  ;;  %v3739_v50 = vshrl.u32 %v15707_v49, 16 }
  0xb7   : > { %v5122_v41 = vcombine.low %v15682_v12, %v5121_v13  ;;  %v5097_v18 = vrot.slane %v5083_v10, %v14577_v23  ;;  %v15727_v15 = vcombine.high %v15713_v37, %v15713_v37  ;;  %v15730_v26 = vrot.slane %v1015_v5, %v14572_v21  ;;  %v13520_v13 = vld.sshfl [vmem:[%s21516_s0 + $0x5c] sm:$0x33 pattern:$0x75316420] }
  0xb8   : > { %22569 = vst [vmem:[#allocation170_spill] sm:$0xff] %v15710_v43  ;;  %22571 = vst [vmem:[#allocation172_spill] sm:$0xff] %v15716_v20  ;;  %v3744_v1 = vshll.u32 %v15713_v37, 16  ;;  %v3747_v55 = vshrl.u32 %v15713_v37, 16  ;;  %v3752_v52 = vshll.u32 %v15722_v60, 16  ;;  %v3755_v63 = vshrl.u32 %v15722_v60, 16 }
  0xb9   : > { %22572 = vst [vmem:[#allocation173_spill] sm:$0xff] %v15722_v60  ;;  %22573 = vst [vmem:[#allocation174_spill] sm:$0xff] %v15727_v15  ;;  %v5129_v10 = vrot.slane %v5122_v41, %v14577_v23  ;;  %v5098_v12 = vcombine.low %v15710_v43, %v5097_v18  ;;  %v13523_v5 = vld.sshfl [vmem:[%s21516_s0 + $0x68] sm:$0x33 pattern:$0x75316420]  ;;  %v968_v60 = vcombine.high %v13520_v13, %v13520_v13 }
  0xba   : > { %22574 = vst [vmem:[#allocation175_spill] sm:$0xff] %v15730_v26  ;;  %v15746_v25 = vsel %vm14628_vm14, %v3739_v50, %v3744_v1  ;;  %v3760_v32 = vshll.u32 %v15727_v15, 16  ;;  %v3763_v49 = vshrl.u32 %v15727_v15, 16  ;;  %v3768_v41 = vshll.u32 %v15716_v20, 16 }
  0xbb   : > { %22575 = vst [vmem:[#allocation176_spill] sm:$0xff] %v15746_v25  ;;  %5864 = vrot.lane.b32.xlu1 %v5129_v10, %s14450_s10  ;;  %v5105_v18 = vrot.slane %v5098_v12, %v14577_v23  ;;  %v15755_v43 = vsel %vm14628_vm14, %v3747_v55, %v3752_v52  ;;  %v15758_v37 = vrot.slane %v13520_v13, %v14572_v21  ;;  %v3706_v10 = vshrl.u32 %v15634_v53, 16 }
  0xbc   : > { %22576 = vst [vmem:[#allocation177_spill] sm:$0xff] %v15755_v43  ;;  %v15762_v50 = vsel %vm14628_vm14, %v3755_v63, %v3760_v32  ;;  %v15766_v1 = vsel %vm14628_vm14, %v3763_v49, %v3768_v41  ;;  %v1038_v15 = vcombine.high %v13523_v5, %v13523_v5  ;;  %v15775_v55 = vrot.slane %v968_v60, %v14572_v21 }
  0xbd   : > { %22577 = vst [vmem:[#allocation178_spill] sm:$0xff] %v15758_v37  ;;  %22578 = vst [vmem:[#allocation179_spill] sm:$0xff] %v15762_v50  ;;  %5862 = vrot.lane.b32.xlu0 %v5105_v18, %s14450_s10  ;;  %v5154_v52 = vcombine.low %v15746_v25, %v15762_v50  ;;  %v5155_v12 = vcombine.low %v15755_v43, %v15766_v1  ;;  %v15779_v32 = vcombine.high %v15758_v37, %v15758_v37 }
  0xbe   : > { %22579 = vst [vmem:[#allocation180_spill] sm:$0xff] %v15766_v1  ;;  %22580 = vst [vmem:[#allocation181_spill] sm:$0xff] %v15775_v55  ;;  %v3711_v49 = vshll.u32 %v15758_v37, 16  ;;  %v3714_v63 = vshrl.u32 %v15758_v37, 16  ;;  %v15784_v13 = vrot.slane %v13523_v5, %v14572_v21  ;;  %v15787_v41 = vrot.slane %v1038_v15, %v14572_v21 }
  0xbf   : > { %22581 = vst [vmem:[#allocation182_spill] sm:$0xff] %v15779_v32  ;;  %v15790_v18 = vrot.slane %v5154_v52, %v14577_v23  ;;  %v5169_v60 = vrot.slane %v5155_v12, %v14577_v23  ;;  %v15795_v53 = vcombine.high %v15775_v55, %v15775_v55  ;;  %v3719_v59 = vshll.u32 %v15775_v55, 16 }
  0xc0   : > { %22582 = vst [vmem:[#allocation183_spill] sm:$0xff] %v15784_v13  ;;  %22583 = vst [vmem:[#allocation184_spill] sm:$0xff] %v15787_v41  ;;  %v15800_v37 = vsel %vm14628_vm14, %v3706_v10, %v3711_v49  ;;  %v3722_v5 = vshrl.u32 %v15775_v55, 16  ;;  %v3727_v15 = vshll.u32 %v15779_v32, 16  ;;  %v3730_v46 = vshrl.u32 %v15779_v32, 16 }
  0xc1   : > { %22584 = vst [vmem:[#allocation185_spill] sm:$0xff] %v15790_v18  ;;  %22585 = vst [vmem:[#allocation186_spill] sm:$0xff] %v15795_v53  ;;  %v5170_v52 = vcombine.low %v15790_v18, %v5169_v60  ;;  %v15808_v12 = vsel %vm14628_vm14, %v3714_v63, %v3719_v59  ;;  %v3735_v0 = vshll.u32 %v15795_v53, 16  ;;  %v15824_v59 = vcombine.high %v15784_v13, %v15784_v13 }
  0xc2   : > { %22586 = vst [vmem:[#allocation187_spill] sm:$0xff] %v15800_v37  ;;  %22587 = vst [vmem:[#allocation188_spill] sm:$0xff] %v15808_v12  ;;  %v13524_v10 = vld.sshfl [vmem:[%s21516_s0 + $0x6c] sm:$0x33 pattern:$0x75316420]  ;;  %v15818_v49 = vsel %vm14628_vm14, %v3722_v5, %v3727_v15  ;;  %v15828_v63 = vcombine.high %v15787_v41, %v15787_v41 }
  0xc3   : > { %22588 = vst [vmem:[#allocation189_spill] sm:$0xff] %v15818_v49  ;;  %22589 = vst [vmem:[#allocation190_spill] sm:$0xff] %v15824_v59  ;;  %v5177_v30 = vrot.slane %v5170_v52, %v14577_v23  ;;  %v15833_v2 = vsel %vm14628_vm14, %v3730_v46, %v3735_v0  ;;  %v5130_v5 = vcombine.low %v15800_v37, %v15818_v49  ;;  %v3804_v46 = vshrl.u32 %v15787_v41, 16 }
  0xc4   : > { %22590 = vst [vmem:[#allocation191_spill] sm:$0xff] %v15828_v63  ;;  %22591 = vst [vmem:[#allocation192_spill] sm:$0xff] %v15833_v2  ;;  %v5131_v60 = vcombine.low %v15808_v12, %v15833_v2  ;;  %v1062_v9 = vcombine.high %v13524_v10, %v13524_v10  ;;  %v15844_v55 = vrot.slane %v13524_v10, %v14572_v21  ;;  %v3809_v52 = vshll.u32 %v15824_v59, 16 }
  0xc5   : > { %5868 = vrot.lane.b32.xlu1 %v5177_v30, %s14450_s10  ;;  %v15848_v0 = vrot.slane %v5130_v5, %v14577_v23  ;;  %v3812_v15 = vshrl.u32 %v15824_v59, 16  ;;  %v3817_v30 = vshll.u32 %v15828_v63, 16  ;;  %v3820_v18 = vshrl.u32 %v15828_v63, 16 }
  0xc6   : > { %22592 = vst [vmem:[#allocation193_spill] sm:$0xff] %v15844_v55  ;;  %v5145_v25 = vrot.slane %v5131_v60, %v14577_v23  ;;  %v15855_v49 = vrot.slane %v1062_v9, %v14572_v21  ;;  %v15859_v10 = vcombine.high %v15844_v55, %v15844_v55  ;;  %v15864_v5 = vsel %vm14628_vm14, %v3804_v46, %v3809_v52 }
  0xc7   : > { %22593 = vst [vmem:[#allocation194_spill] sm:$0xff] %v15848_v0  ;;  %22596 = vst [vmem:[#allocation197_spill] sm:$0xff] %v15864_v5  ;;  %v3825_v37 = vshll.u32 %v15844_v55, 16  ;;  %v3828_v43 = vshrl.u32 %v15844_v55, 16  ;;  %v15872_v9 = vsel %vm14628_vm14, %v3812_v15, %v3817_v30  ;;  %v15883_v63 = vcombine.high %v15716_v20, %v15716_v20 }
  0xc8   : > { %22594 = vst [vmem:[#allocation195_spill] sm:$0xff] %v15855_v49  ;;  %22595 = vst [vmem:[#allocation196_spill] sm:$0xff] %v15859_v10  ;;  %v5146_v60 = vcombine.low %v15848_v0, %v5145_v25  ;;  %v3833_v2 = vshll.u32 %v15855_v49, 16  ;;  %v3836_v12 = vshrl.u32 %v15855_v49, 16  ;;  %v3841_v52 = vshll.u32 %v15859_v10, 16 }
  0xc9   : > { %22597 = vst [vmem:[#allocation198_spill] sm:$0xff] %v15872_v9  ;;  %v15878_v46 = vsel %vm14628_vm14, %v3820_v18, %v3825_v37  ;;  %22599 = vst [vmem:[#allocation200_spill] sm:$0xff] %v15883_v63  ;;  %v15887_v25 = vcombine.high %v15730_v26, %v15730_v26  ;;  %v3771_v18 = vshrl.u32 %v15716_v20, 16  ;;  %v3776_v59 = vshll.u32 %v15730_v26, 16 }
  0xca   : > { %22598 = vst [vmem:[#allocation199_spill] sm:$0xff] %v15878_v46  ;;  %v5153_v15 = vrot.slane %v5146_v60, %v14577_v23  ;;  %v15892_v30 = vsel %vm14628_vm14, %v3828_v43, %v3833_v2  ;;  %v5202_v37 = vcombine.low %v15864_v5, %v15878_v46  ;;  %v3779_v55 = vshrl.u32 %v15730_v26, 16  ;;  %v13525_v60 = vld.sshfl [vmem:[%s21516_s0 + $0x80] sm:$0x33 pattern:$0x75316420] }
  0xcb   : > { %22600 = vst [vmem:[#allocation201_spill] sm:$0xff] %v15887_v25  ;;  %22601 = vst [vmem:[#allocation202_spill] sm:$0xff] %v15892_v30  ;;  %v5203_v0 = vcombine.low %v15872_v9, %v15892_v30  ;;  %v15907_v2 = vsel %vm14628_vm14, %v3836_v12, %v3841_v52  ;;  %v3784_v46 = vshll.u32 %v15883_v63, 16  ;;  %v3787_v20 = vshrl.u32 %v15883_v63, 16 }
  0xcc   : > { %5866 = vrot.lane.b32.xlu0 %v5153_v15, %s14450_s10  ;;  %22602 = vst [vmem:[#allocation203_spill] sm:$0xff] %v15907_v2  ;;  %v15910_v43 = vrot.slane %v5202_v37, %v14577_v23  ;;  %v15917_v26 = vsel %vm14628_vm14, %v3771_v18, %v3776_v59  ;;  %v3792_v32 = vshll.u32 %v15887_v25, 16  ;;  %v3796_v15 = vshrl.u32 %v15784_v13, 16 }
  0xcd   : > { %v5217_v53 = vrot.slane %v5203_v0, %v14577_v23  ;;  %22604 = vst [vmem:[#allocation205_spill] sm:$0xff] %v15917_v26  ;;  %v15923_v12 = vsel %vm14628_vm14, %v3779_v55, %v3784_v46  ;;  %v3801_v52 = vshll.u32 %v15787_v41, 16  ;;  %v1085_v63 = vcombine.high %v13525_v60, %v13525_v60  ;;  %v13526_v55 = vld.sshfl [vmem:[%s21516_s0 + $0x84] sm:$0x33 pattern:$0x75316420] }
  0xce   : > { %22603 = vst [vmem:[#allocation204_spill] sm:$0xff] %v15910_v43  ;;  %22605 = vst [vmem:[#allocation206_spill] sm:$0xff] %v15923_v12  ;;  %v15931_v59 = vsel %vm14628_vm14, %v3787_v20, %v3792_v32  ;;  %v15939_v46 = vrot.slane %v13525_v60, %v14572_v21 }
  0xcf   : > { %v5218_v0 = vcombine.low %v15910_v43, %v5217_v53  ;;  %22606 = vst [vmem:[#allocation207_spill] sm:$0xff] %v15931_v59  ;;  %v15943_v37 = vsel %vm14628_vm14, %v3796_v15, %v3801_v52  ;;  %v5178_v53 = vcombine.low %v15917_v26, %v15931_v59  ;;  %v15950_v32 = vrot.slane %v1085_v63, %v14572_v21 }
  0xd0   : > { %22607 = vst [vmem:[#allocation208_spill] sm:$0xff] %v15939_v46  ;;  %22608 = vst [vmem:[#allocation209_spill] sm:$0xff] %v15943_v37  ;;  %v5179_v50 = vcombine.low %v15923_v12, %v15943_v37  ;;  %v15959_v15 = vcombine.high %v15939_v46, %v15939_v46  ;;  %v1109_v63 = vcombine.high %v13526_v55, %v13526_v55 }
  0xd1   : > { %22609 = vst [vmem:[#allocation210_spill] sm:$0xff] %v15950_v32  ;;  %v5225_v18 = vrot.slane %v5218_v0, %v14577_v23  ;;  %v15962_v52 = vrot.slane %v5178_v53, %v14577_v23  ;;  %v15966_v20 = vcombine.high %v15950_v32, %v15950_v32  ;;  %v15969_v0 = vrot.slane %v13526_v55, %v14572_v21 }
  0xd2   : > { %22610 = vst [vmem:[#allocation211_spill] sm:$0xff] %v15959_v15  ;;  %v5193_v5 = vrot.slane %v5179_v50, %v14577_v23  ;;  %v3869_v60 = vshrl.u32 %v15959_v15, 16  ;;  %v15976_v59 = vcombine.high %v15855_v49, %v15855_v49  ;;  %v3844_v53 = vshrl.u32 %v15859_v10, 16 }
  0xd3   : > { %22611 = vst [vmem:[#allocation212_spill] sm:$0xff] %v15962_v52  ;;  %22612 = vst [vmem:[#allocation213_spill] sm:$0xff] %v15966_v20  ;;  %5872 = vrot.lane.b32.xlu1 %v5225_v18, %s14450_s10  ;;  %v15980_v26 = vrot.slane %v1109_v63, %v14572_v21  ;;  %v15984_v43 = vcombine.high %v15969_v0, %v15969_v0  ;;  %v3874_v55 = vshll.u32 %v15966_v20, 16  ;;  %v3877_v18 = vshrl.u32 %v15966_v20, 16 }
  0xd4   : > { %22613 = vst [vmem:[#allocation214_spill] sm:$0xff] %v15969_v0  ;;  %22614 = vst [vmem:[#allocation215_spill] sm:$0xff] %v15976_v59  ;;  %v5194_v50 = vcombine.low %v15962_v52, %v5193_v5  ;;  %v3882_v9 = vshll.u32 %v15969_v0, 16  ;;  %v3885_v37 = vshrl.u32 %v15969_v0, 16  ;;  %v3849_v12 = vshll.u32 %v15976_v59, 16 }
  0xd5   : > { %22615 = vst [vmem:[#allocation216_spill] sm:$0xff] %v15980_v26  ;;  %22616 = vst [vmem:[#allocation217_spill] sm:$0xff] %v15984_v43  ;;  %v13527_v63 = vld.sshfl [vmem:[%s21516_s0 + $0x88] sm:$0x33 pattern:$0x75316420]  ;;  %v3876_v1 = vsel %vm14628_vm14, %v3869_v60, %v3874_v55 }
  0xd6   : > { %v3890_v13 = vshll.u32 %v15980_v26, 16  ;;  %v3893_v10 = vshrl.u32 %v15980_v26, 16  ;;  %v3898_v20 = vshll.u32 %v15984_v43, 16  ;;  %v5201_v5 = vrot.slane %v5194_v50, %v14577_v23 }
  0xd7   : > { %v3884_v52 = vsel %vm14628_vm14, %v3877_v18, %v3882_v9  ;;  %v16005_v59 = vsel %vm14628_vm14, %v3844_v53, %v3849_v12  ;;  %v3853_v0 = vshrl.u32 %v15939_v46, 16  ;;  %v13528_v60 = vld.sshfl [vmem:[%s21516_s0 + $0x8c] sm:$0x33 pattern:$0x75316420]  ;;  %v3858_v50 = vshll.u32 %v15950_v32, 16 }
  0xd8   : > { %22617 = vst [vmem:[#allocation218_spill] sm:$0xff] %v16005_v59  ;;  %v3892_v55 = vsel %vm14628_vm14, %v3885_v37, %v3890_v13  ;;  %v3900_v49 = vsel %vm14628_vm14, %v3893_v10, %v3898_v20  ;;  %v3861_v9 = vshrl.u32 %v15950_v32, 16  ;;  %5870 = vrot.lane.b32.xlu0 %v5201_v5, %s14450_s10  ;;  %v3866_v18 = vshll.u32 %v15959_v15, 16 }
  0xd9   : > { %v5250_v12 = vcombine.low %v3876_v1, %v3892_v55  ;;  %v5251_v53 = vcombine.low %v3884_v52, %v3900_v49  ;;  %v3860_v41 = vsel %vm14628_vm14, %v3853_v0, %v3858_v50  ;;  %v1132_v13 = vcombine.high %v13527_v63, %v13527_v63 }
  0xda   : > { %v1156_v37 = vcombine.high %v13528_v60, %v13528_v60  ;;  %v16024_v10 = vrot.slane %v13528_v60, %v14572_v21  ;;  %v3868_v1 = vsel %vm14628_vm14, %v3861_v9, %v3866_v18  ;;  %v5226_v49 = vcombine.low %v15907_v2, %v3860_v41 }
  0xdb   : > { %v5258_v20 = vrot.slane %v5250_v12, %v14577_v23  ;;  %v5265_v32 = vrot.slane %v5251_v53, %v14577_v23  ;;  %v5227_v52 = vcombine.low %v16005_v59, %v3868_v1  ;;  %v16033_v5 = vrot.slane %v1132_v13, %v14572_v21 }
  0xdc   : > { %22618 = vst [vmem:[#allocation219_spill] sm:$0xff] %v16024_v10  ;;  %v16036_v0 = vrot.slane %v1156_v37, %v14572_v21  ;;  %v5234_v60 = vrot.slane %v5226_v49, %v14577_v23  ;;  %v16041_v50 = vcombine.high %v16024_v10, %v16024_v10  ;;  %v3939_v53 = vshll.u32 %v16024_v10, 16 }
  0xdd   : > { %22619 = vst [vmem:[#allocation220_spill] sm:$0xff] %v16033_v5  ;;  %v5266_v55 = vcombine.low %v5258_v20, %v5265_v32  ;;  %v5241_v12 = vrot.slane %v5227_v52, %v14577_v23  ;;  %v16046_v41 = vcombine.high %v16033_v5, %v16033_v5  ;;  %v3942_v18 = vshrl.u32 %v16024_v10, 16 }
  0xde   : > { %22620 = vst [vmem:[#allocation221_spill] sm:$0xff] %v16036_v0  ;;  %22621 = vst [vmem:[#allocation222_spill] sm:$0xff] %v16041_v50  ;;  %v16050_v9 = vcombine.high %v16036_v0, %v16036_v0  ;;  %v3947_v20 = vshll.u32 %v16036_v0, 16  ;;  %v3950_v1 = vshrl.u32 %v16036_v0, 16  ;;  %v3955_v49 = vshll.u32 %v16041_v50, 16 }
  0xdf   : > { %22622 = vst [vmem:[#allocation223_spill] sm:$0xff] %v16046_v41  ;;  %v5273_v32 = vrot.slane %v5266_v55, %v14577_v23  ;;  %v5242_v13 = vcombine.low %v5234_v60, %v5241_v12  ;;  %v3934_v37 = vshrl.u32 %v16046_v41, 16  ;;  %v3958_v52 = vshrl.u32 %v16041_v50, 16 }
  0xe0   : > { %22623 = vst [vmem:[#allocation224_spill] sm:$0xff] %v16050_v9  ;;  %v3963_v46 = vshll.u32 %v16050_v9, 16  ;;  %v16067_v60 = vsel %vm14628_vm14, %v3942_v18, %v3947_v20  ;;  %v3957_v12 = vsel %vm14628_vm14, %v3950_v1, %v3955_v49  ;;  %v16076_v30 = vrot.slane %v13527_v63, %v14572_v21  ;;  %v13529_v20 = vld.sshfl [vmem:[%s21516_s0 + $0x90] sm:$0x33 pattern:$0x75316420] }
  0xe1   : > { %5876 = vrot.lane.b32.xlu1 %v5273_v32, %s14450_s10  ;;  %v5249_v59 = vrot.slane %v5242_v13, %v14577_v23  ;;  %v3941_v55 = vsel %vm14628_vm14, %v3934_v37, %v3939_v53  ;;  %22624 = vst [vmem:[#allocation225_spill] sm:$0xff] %v16067_v60  ;;  %v3025_v13 = vcombine.high %v15980_v26, %v15980_v26  ;;  %v3901_v37 = vshrl.u32 %v15984_v43, 16 }
  0xe2   : > { %v16073_v32 = vsel %vm14628_vm14, %v3958_v52, %v3963_v46  ;;  %22626 = vst [vmem:[#allocation227_spill] sm:$0xff] %v16076_v30  ;;  %v5298_v53 = vcombine.low %v3941_v55, %v3957_v12  ;;  %v16089_v46 = vcombine.high %v16076_v30, %v16076_v30  ;;  %v3910_v1 = vshrl.u32 %v16076_v30, 16  ;;  %v13530_v12 = vld.sshfl [vmem:[%s21516_s0 + $0x94] sm:$0x33 pattern:$0x75316420] }
  0xe3   : > { %22625 = vst [vmem:[#allocation226_spill] sm:$0xff] %v16073_v32  ;;  %5874 = vrot.lane.b32.xlu0 %v5249_v59, %s14450_s10  ;;  %v5299_v18 = vcombine.low %v16067_v60, %v16073_v32  ;;  %v3906_v63 = vshll.u32 %v3025_v13, 16  ;;  %v3915_v52 = vshll.u32 %v16033_v5, 16  ;;  %v3918_v55 = vshrl.u32 %v16033_v5, 16 }
  0xe4   : > { %22627 = vst [vmem:[#allocation228_spill] sm:$0xff] %v16089_v46  ;;  %v16093_v49 = vrot.slane %v5298_v53, %v14577_v23  ;;  %v3923_v13 = vshll.u32 %v16089_v46, 16  ;;  %v3926_v2 = vshrl.u32 %v16089_v46, 16  ;;  %v3931_v53 = vshll.u32 %v16046_v41, 16 }
  0xe5   : > { %v5313_v59 = vrot.slane %v5299_v18, %v14577_v23  ;;  %v3908_v32 = vsel %vm14628_vm14, %v3901_v37, %v3906_v63  ;;  %v1179_v15 = vcombine.high %v13529_v20, %v13529_v20  ;;  %v16107_v18 = vrot.slane %v13529_v20, %v14572_v21 }
  0xe6   : > { %22628 = vst [vmem:[#allocation229_spill] sm:$0xff] %v16093_v49  ;;  %v16112_v9 = vsel %vm14628_vm14, %v3910_v1, %v3915_v52  ;;  %v16116_v10 = vsel %vm14628_vm14, %v3918_v55, %v3923_v13  ;;  %v16120_v37 = vsel %vm14628_vm14, %v3926_v2, %v3931_v53  ;;  %v1203_v63 = vcombine.high %v13530_v12, %v13530_v12  ;;  %v13531_v52 = vld.sshfl [vmem:[%s21516_s0 + $0x98] sm:$0x33 pattern:$0x75316420] }
  0xe7   : > { %22629 = vst [vmem:[#allocation230_spill] sm:$0xff] %v16107_v18  ;;  %v5314_v0 = vcombine.low %v16093_v49, %v5313_v59  ;;  %22630 = vst [vmem:[#allocation231_spill] sm:$0xff] %v16112_v9  ;;  %v16123_v46 = vrot.slane %v13530_v12, %v14572_v21  ;;  %v5274_v59 = vcombine.low %v3908_v32, %v16116_v10 }
  0xe8   : > { %22631 = vst [vmem:[#allocation232_spill] sm:$0xff] %v16116_v10  ;;  %22632 = vst [vmem:[#allocation233_spill] sm:$0xff] %v16120_v37  ;;  %v5275_v1 = vcombine.low %v16112_v9, %v16120_v37  ;;  %v16135_v2 = vrot.slane %v1203_v63, %v14572_v21  ;;  %v16145_v13 = vrot.slane %v1179_v15, %v14572_v21 }
  0xe9   : > { %22633 = vst [vmem:[#allocation234_spill] sm:$0xff] %v16123_v46  ;;  %v5321_v20 = vrot.slane %v5314_v0, %v14577_v23  ;;  %v5282_v12 = vrot.slane %v5274_v59, %v14577_v23  ;;  %v16142_v32 = vcombine.high %v16123_v46, %v16123_v46  ;;  %v16149_v53 = vcombine.high %v16107_v18, %v16107_v18 }
  0xea   : > { %22634 = vst [vmem:[#allocation235_spill] sm:$0xff] %v16135_v2  ;;  %v5289_v0 = vrot.slane %v5275_v1, %v14577_v23  ;;  %22636 = vst [vmem:[#allocation237_spill] sm:$0xff] %v16145_v13  ;;  %v1226_v55 = vcombine.high %v13531_v52, %v13531_v52  ;;  %v16152_v49 = vrot.slane %v13531_v52, %v14572_v21  ;;  %v3999_v59 = vshrl.u32 %v16123_v46, 16 }
  0xeb   : > { %5880 = vrot.lane.b32.xlu1 %v5321_v20, %s14450_s10  ;;  %22635 = vst [vmem:[#allocation236_spill] sm:$0xff] %v16142_v32  ;;  %22637 = vst [vmem:[#allocation238_spill] sm:$0xff] %v16149_v53  ;;  %v16156_v20 = vcombine.high %v16135_v2, %v16135_v2  ;;  %v4004_v15 = vshll.u32 %v16135_v2, 16  ;;  %v4007_v60 = vshrl.u32 %v16135_v2, 16  ;;  %v3975_v37 = vshrl.u32 %v16145_v13, 16 }
  0xec   : > { %v5290_v63 = vcombine.low %v5282_v12, %v5289_v0  ;;  %22638 = vst [vmem:[#allocation239_spill] sm:$0xff] %v16152_v49  ;;  %v16160_v1 = vrot.slane %v1226_v55, %v14572_v21  ;;  %v4012_v52 = vshll.u32 %v16142_v32, 16  ;;  %v3980_v0 = vshll.u32 %v16149_v53, 16 }
  0xed   : > { %22639 = vst [vmem:[#allocation240_spill] sm:$0xff] %v16156_v20  ;;  %v16170_v10 = vsel %vm14628_vm14, %v3999_v59, %v4004_v15  ;;  %v4015_v9 = vshrl.u32 %v16142_v32, 16  ;;  %v4020_v55 = vshll.u32 %v16156_v20, 16  ;;  %v16183_v5 = vcombine.high %v16145_v13, %v16145_v13 }
  0xee   : > { %22640 = vst [vmem:[#allocation241_spill] sm:$0xff] %v16160_v1  ;;  %v5297_v12 = vrot.slane %v5290_v63, %v14577_v23  ;;  %22641 = vst [vmem:[#allocation242_spill] sm:$0xff] %v16170_v10  ;;  %v16177_v2 = vsel %vm14628_vm14, %v4007_v60, %v4012_v52  ;;  %v4024_v63 = vshrl.u32 %v16152_v49, 16  ;;  %v4029_v50 = vshll.u32 %v16160_v1, 16 }
  0xef   : > { %22642 = vst [vmem:[#allocation243_spill] sm:$0xff] %v16177_v2  ;;  %22643 = vst [vmem:[#allocation244_spill] sm:$0xff] %v16183_v5  ;;  %v13532_v59 = vld.sshfl [vmem:[%s21516_s0 + $0x9c] sm:$0x33 pattern:$0x75316420]  ;;  %v16190_v15 = vsel %vm14628_vm14, %v4015_v9, %v4020_v55  ;;  %v16205_v9 = vsel %vm14628_vm14, %v3975_v37, %v3980_v0 }
  0xf0   : > { %5878 = vrot.lane.b32.xlu0 %v5297_v12, %s14450_s10  ;;  %22644 = vst [vmem:[#allocation245_spill] sm:$0xff] %v16190_v15  ;;  %v3967_v12 = vshrl.u32 %v16107_v18, 16  ;;  %v3972_v60 = vshll.u32 %v16145_v13, 16  ;;  %v3983_v52 = vshrl.u32 %v16149_v53, 16  ;;  %v16197_v32 = vsel %vm14628_vm14, %v4024_v63, %v4029_v50  ;;  %22646 = vst [vmem:[#allocation247_spill] sm:$0xff] %v16205_v9 }
  0xf1   : > { %22645 = vst [vmem:[#allocation246_spill] sm:$0xff] %v16197_v32  ;;  %v5346_v20 = vcombine.low %v16170_v10, %v16190_v15  ;;  %v3988_v41 = vshll.u32 %v16183_v5, 16  ;;  %v3991_v30 = vshrl.u32 %v16183_v5, 16  ;;  %v5347_v55 = vcombine.low %v16177_v2, %v16197_v32 }
  0xf2   : > { %v16211_v18 = vsel %vm14628_vm14, %v3967_v12, %v3972_v60  ;;  %v3996_v50 = vshll.u32 %v16123_v46, 16  ;;  %v1250_v13 = vcombine.high %v13532_v59, %v13532_v59  ;;  %v13533_v60 = vld.sshfl [vmem:[%s21516_s0 + $0xa0] sm:$0x33 pattern:$0x75316420] }
  0xf3   : > { %22647 = vst [vmem:[#allocation248_spill] sm:$0xff] %v16211_v18  ;;  %v16215_v63 = vrot.slane %v5346_v20, %v14577_v23  ;;  %v16219_v53 = vsel %vm14628_vm14, %v3983_v52, %v3988_v41  ;;  %v5361_v37 = vrot.slane %v5347_v55, %v14577_v23 }
  0xf4   : > { %22649 = vst [vmem:[#allocation250_spill] sm:$0xff] %v16219_v53  ;;  %v16224_v0 = vsel %vm14628_vm14, %v3991_v30, %v3996_v50  ;;  %v5322_v12 = vcombine.low %v16211_v18, %v16219_v53  ;;  %v16242_v50 = vrot.slane %v13532_v59, %v14572_v21  ;;  %v16246_v46 = vrot.slane %v1250_v13, %v14572_v21 }
  0xf5   : > { %22648 = vst [vmem:[#allocation249_spill] sm:$0xff] %v16215_v63  ;;  %22650 = vst [vmem:[#allocation251_spill] sm:$0xff] %v16224_v0  ;;  %v5323_v20 = vcombine.low %v16205_v9, %v16224_v0  ;;  %v5362_v55 = vcombine.low %v16215_v63, %v5361_v37  ;;  %v1273_v9 = vcombine.high %v13533_v60, %v13533_v60  ;;  %v4032_v0 = vshrl.u32 %v16160_v1, 16 }
  0xf6   : > { %v16239_v30 = vrot.slane %v5322_v12, %v14577_v23  ;;  %22652 = vst [vmem:[#allocation253_spill] sm:$0xff] %v16242_v50  ;;  %22653 = vst [vmem:[#allocation254_spill] sm:$0xff] %v16246_v46  ;;  %v16251_v41 = vcombine.high %v16242_v50, %v16242_v50  ;;  %v16254_v37 = vrot.slane %v13533_v60, %v14572_v21  ;;  %v4064_v60 = vshrl.u32 %v16246_v46, 16 }
  0xf7   : > { %v5337_v18 = vrot.slane %v5323_v20, %v14577_v23  ;;  %v5369_v5 = vrot.slane %v5362_v55, %v14577_v23  ;;  %v16258_v59 = vrot.slane %v1273_v9, %v14572_v21  ;;  %v16262_v20 = vcombine.high %v16246_v46, %v16246_v46 }
  0xf8   : > { %22651 = vst [vmem:[#allocation252_spill] sm:$0xff] %v16239_v30  ;;  %22654 = vst [vmem:[#allocation255_spill] sm:$0xff] %v16251_v41  ;;  %v16266_v13 = vcombine.high %v16152_v49, %v16152_v49  ;;  %v16271_v55 = vcombine.high %v16254_v37, %v16254_v37  ;;  %v4072_v52 = vshrl.u32 %v16251_v41, 16  ;;  %v4081_v53 = vshrl.u32 %v16254_v37, 16 }
  0xf9   : > { %22655 = vst [vmem:[#allocation256_spill] sm:$0xff] %v16254_v37  ;;  %v5338_v12 = vcombine.low %v16239_v30, %v5337_v18  ;;  %22656 = vst [vmem:[#allocation257_spill] sm:$0xff] %v16258_v59  ;;  %5884 = vrot.lane.b32.xlu1 %v5369_v5, %s14450_s10  ;;  %v4069_v18 = vshll.u32 %v16251_v41, 16  ;;  %v4077_v10 = vshll.u32 %v16262_v20, 16  ;;  %v4086_v5 = vshll.u32 %v16258_v59, 16 }
  0xfa   : > { %22657 = vst [vmem:[#allocation258_spill] sm:$0xff] %v16262_v20  ;;  %22658 = vst [vmem:[#allocation259_spill] sm:$0xff] %v16266_v13  ;;  %v4089_v30 = vshrl.u32 %v16258_v59, 16  ;;  %v4094_v2 = vshll.u32 %v16271_v55, 16  ;;  %v16293_v20 = vcombine.high %v16160_v1, %v16160_v1 }
  0xfb   : > { %22659 = vst [vmem:[#allocation260_spill] sm:$0xff] %v16271_v55  ;;  %v5345_v9 = vrot.slane %v5338_v12, %v14577_v23  ;;  %v16281_v63 = vsel %vm14628_vm14, %v4064_v60, %v4069_v18  ;;  %v16289_v12 = vsel %vm14628_vm14, %v4072_v52, %v4077_v10  ;;  %v4037_v60 = vshll.u32 %v16266_v13, 16  ;;  %v13534_v52 = vld.sshfl [vmem:[%s21516_s0 + $0xa4] sm:$0x33 pattern:$0x75316420] }
  0xfc   : > { %22660 = vst [vmem:[#allocation261_spill] sm:$0xff] %v16281_v63  ;;  %22661 = vst [vmem:[#allocation262_spill] sm:$0xff] %v16289_v12  ;;  %v16299_v18 = vsel %vm14628_vm14, %v4081_v53, %v4086_v5  ;;  %v16303_v49 = vsel %vm14628_vm14, %v4089_v30, %v4094_v2  ;;  %v4053_v10 = vshll.u32 %v16242_v50, 16  ;;  %v4045_v2 = vshll.u32 %v16293_v20, 16 }
  0xfd   : > { %5882 = vrot.lane.b32.xlu0 %v5345_v9, %s14450_s10  ;;  %22662 = vst [vmem:[#allocation263_spill] sm:$0xff] %v16293_v20  ;;  %22663 = vst [vmem:[#allocation264_spill] sm:$0xff] %v16299_v18  ;;  %v4040_v9 = vshrl.u32 %v16266_v13, 16  ;;  %v5394_v37 = vcombine.low %v16281_v63, %v16299_v18  ;;  %v5395_v41 = vcombine.low %v16289_v12, %v16303_v49  ;;  %v4048_v30 = vshrl.u32 %v16293_v20, 16 }
  0xfe   : > { %22664 = vst [vmem:[#allocation265_spill] sm:$0xff] %v16303_v49  ;;  %v16316_v53 = vsel %vm14628_vm14, %v4032_v0, %v4037_v60  ;;  %v4056_v5 = vshrl.u32 %v16242_v50, 16  ;;  %v4061_v13 = vshll.u32 %v16246_v46, 16  ;;  %v1297_v20 = vcombine.high %v13534_v52, %v13534_v52 }
  0xff   : > { %22665 = vst [vmem:[#allocation266_spill] sm:$0xff] %v16316_v53  ;;  %v16325_v43 = vrot.slane %v5394_v37, %v14577_v23  ;;  %v5409_v26 = vrot.slane %v5395_v41, %v14577_v23  ;;  %v16330_v0 = vsel %vm14628_vm14, %v4040_v9, %v4045_v2  ;;  %v13535_v60 = vld.sshfl [vmem:[%s21516_s0 + $0xa8] sm:$0x33 pattern:$0x75316420]  ;;  %v16337_v46 = vsel %vm14628_vm14, %v4048_v30, %v4053_v10 }
 0x100   : > { %22667 = vst [vmem:[#allocation268_spill] sm:$0xff] %v16330_v0  ;;  %22668 = vst [vmem:[#allocation269_spill] sm:$0xff] %v16337_v46  ;;  %v16341_v1 = vsel %vm14628_vm14, %v4056_v5, %v4061_v13  ;;  %v16346_v37 = vrot.slane %v13534_v52, %v14572_v21  ;;  %v5370_v2 = vcombine.low %v16316_v53, %v16337_v46 }
 0x101   : > { %22666 = vst [vmem:[#allocation267_spill] sm:$0xff] %v16325_v43  ;;  %22669 = vst [vmem:[#allocation270_spill] sm:$0xff] %v16341_v1  ;;  %v5410_v9 = vcombine.low %v16325_v43, %v5409_v26  ;;  %v5371_v15 = vcombine.low %v16330_v0, %v16341_v1  ;;  %v16358_v30 = vrot.slane %v1297_v20, %v14572_v21 }
 0x102   : > { %22670 = vst [vmem:[#allocation271_spill] sm:$0xff] %v16346_v37  ;;  %v16362_v52 = vcombine.high %v16346_v37, %v16346_v37  ;;  %v1320_v26 = vcombine.high %v13535_v60, %v13535_v60  ;;  %v16366_v41 = vrot.slane %v5370_v2, %v14577_v23  ;;  %v16370_v10 = vrot.slane %v13535_v60, %v14572_v21 }
 0x103   : > { %22671 = vst [vmem:[#allocation272_spill] sm:$0xff] %v16358_v30  ;;  %v5417_v5 = vrot.slane %v5410_v9, %v14577_v23  ;;  %v5385_v53 = vrot.slane %v5371_v15, %v14577_v23  ;;  %v16377_v20 = vcombine.high %v16358_v30, %v16358_v30  ;;  %v16382_v9 = vcombine.high %v16258_v59, %v16258_v59 }
 0x104   : > { %22672 = vst [vmem:[#allocation273_spill] sm:$0xff] %v16362_v52  ;;  %22673 = vst [vmem:[#allocation274_spill] sm:$0xff] %v16366_v41  ;;  %v16373_v13 = vrot.slane %v1320_v26, %v14572_v21  ;;  %v4129_v63 = vshrl.u32 %v16362_v52, 16  ;;  %v16388_v60 = vcombine.high %v16370_v10, %v16370_v10  ;;  %v4138_v2 = vshrl.u32 %v16370_v10, 16 }
 0x105   : > { %22674 = vst [vmem:[#allocation275_spill] sm:$0xff] %v16370_v10  ;;  %22676 = vst [vmem:[#allocation277_spill] sm:$0xff] %v16377_v20  ;;  %5888 = vrot.lane.b32.xlu1 %v5417_v5, %s14450_s10  ;;  %v5386_v15 = vcombine.low %v16366_v41, %v5385_v53  ;;  %v4097_v26 = vshrl.u32 %v16271_v55, 16  ;;  %v4134_v43 = vshll.u32 %v16377_v20, 16  ;;  %v4102_v0 = vshll.u32 %v16382_v9, 16 }
 0x106   : > { %22675 = vst [vmem:[#allocation276_spill] sm:$0xff] %v16373_v13  ;;  %22677 = vst [vmem:[#allocation278_spill] sm:$0xff] %v16382_v9  ;;  %v16394_v46 = vcombine.high %v16373_v13, %v16373_v13  ;;  %v4143_v12 = vshll.u32 %v16373_v13, 16  ;;  %v4146_v5 = vshrl.u32 %v16373_v13, 16  ;;  %v4151_v41 = vshll.u32 %v16388_v60, 16 }
 0x107   : > { %22678 = vst [vmem:[#allocation279_spill] sm:$0xff] %v16388_v60  ;;  %v5393_v53 = vrot.slane %v5386_v15, %v14577_v23  ;;  %v4154_v1 = vshrl.u32 %v16388_v60, 16  ;;  %v16405_v32 = vsel %vm14628_vm14, %v4129_v63, %v4134_v43  ;;  %v4105_v13 = vshrl.u32 %v16382_v9, 16 }
 0x108   : > { %22679 = vst [vmem:[#allocation280_spill] sm:$0xff] %v16394_v46  ;;  %22680 = vst [vmem:[#allocation281_spill] sm:$0xff] %v16405_v32  ;;  %v16409_v55 = vsel %vm14628_vm14, %v4138_v2, %v4143_v12  ;;  %v4159_v20 = vshll.u32 %v16394_v46, 16  ;;  %v16416_v15 = vsel %vm14628_vm14, %v4146_v5, %v4151_v41  ;;  %v16420_v60 = vsel %vm14628_vm14, %v4097_v26, %v4102_v0 }
 0x109   : > { %22681 = vst [vmem:[#allocation282_spill] sm:$0xff] %v16409_v55  ;;  %5886 = vrot.lane.b32.xlu0 %v5393_v53, %s14450_s10  ;;  %22682 = vst [vmem:[#allocation283_spill] sm:$0xff] %v16416_v15  ;;  %v4110_v43 = vshll.u32 %v16346_v37, 16  ;;  %v4113_v63 = vshrl.u32 %v16346_v37, 16  ;;  %v5442_v41 = vcombine.low %v16405_v32, %v16416_v15  ;;  %v4118_v5 = vshll.u32 %v16358_v30, 16 }
 0x10a   : > { %22683 = vst [vmem:[#allocation284_spill] sm:$0xff] %v16420_v60  ;;  %v13537_v12 = vld.sshfl [vmem:[%s21516_s0 + $0xb0] sm:$0x33 pattern:$0x75316420]  ;;  %v16429_v2 = vsel %vm14628_vm14, %v4154_v1, %v4159_v20  ;;  %v4121_v0 = vshrl.u32 %v16358_v30, 16 }
 0x10b   : > { %22684 = vst [vmem:[#allocation285_spill] sm:$0xff] %v16429_v2  ;;  %v5443_v26 = vcombine.low %v16409_v55, %v16429_v2  ;;  %v16439_v53 = vsel %vm14628_vm14, %v4105_v13, %v4110_v43  ;;  %v4126_v10 = vshll.u32 %v16362_v52, 16  ;;  %v16445_v20 = vrot.slane %v5442_v41, %v14577_v23  ;;  %v13538_v13 = vld.sshfl [vmem:[%s21516_s0 + $0xb4] sm:$0x33 pattern:$0x75316420] }
 0x10c   : > { %22685 = vst [vmem:[#allocation286_spill] sm:$0xff] %v16439_v53  ;;  %v16449_v37 = vsel %vm14628_vm14, %v4113_v63, %v4118_v5  ;;  %v1367_v43 = vcombine.high %v13537_v12, %v13537_v12  ;;  %v16470_v18 = vrot.slane %v13537_v12, %v14572_v21  ;;  %v16480_v63 = vrot.slane %v13538_v13, %v14572_v21 }
 0x10d   : > { %22686 = vst [vmem:[#allocation287_spill] sm:$0xff] %v16445_v20  ;;  %22687 = vst [vmem:[#allocation288_spill] sm:$0xff] %v16449_v37  ;;  %v5457_v52 = vrot.slane %v5443_v26, %v14577_v23  ;;  %v16459_v1 = vsel %vm14628_vm14, %v4121_v0, %v4126_v10  ;;  %v5418_v41 = vcombine.low %v16420_v60, %v16449_v37 }
 0x10e   : > { %22688 = vst [vmem:[#allocation289_spill] sm:$0xff] %v16459_v1  ;;  %v5419_v5 = vcombine.low %v16439_v53, %v16459_v1  ;;  %22689 = vst [vmem:[#allocation290_spill] sm:$0xff] %v16470_v18  ;;  %v16473_v26 = vrot.slane %v1367_v43, %v14572_v21  ;;  %v1391_v60 = vcombine.high %v13538_v13, %v13538_v13  ;;  %v4195_v43 = vshrl.u32 %v16470_v18, 16 }
 0x10f   : > { %v5458_v10 = vcombine.low %v16445_v20, %v5457_v52  ;;  %v16477_v0 = vrot.slane %v5418_v41, %v14577_v23  ;;  %22692 = vst [vmem:[#allocation293_spill] sm:$0xff] %v16480_v63  ;;  %v16485_v9 = vcombine.high %v16470_v18, %v16470_v18  ;;  %v13536_v52 = vld.sshfl [vmem:[%s21516_s0 + $0xac] sm:$0x33 pattern:$0x75316420]  ;;  %v4224_v49 = vshll.u32 %v16480_v63, 16 }
 0x110   : > { %22690 = vst [vmem:[#allocation291_spill] sm:$0xff] %v16473_v26  ;;  %v5433_v32 = vrot.slane %v5419_v5, %v14577_v23  ;;  %v16489_v12 = vcombine.high %v16473_v26, %v16473_v26  ;;  %v16497_v13 = vrot.slane %v1391_v60, %v14572_v21  ;;  %v4200_v5 = vshll.u32 %v16473_v26, 16 }
 0x111   : > { %22691 = vst [vmem:[#allocation292_spill] sm:$0xff] %v16477_v0  ;;  %22693 = vst [vmem:[#allocation294_spill] sm:$0xff] %v16485_v9  ;;  %v5465_v41 = vrot.slane %v5458_v10, %v14577_v23  ;;  %v4203_v37 = vshrl.u32 %v16473_v26, 16  ;;  %v4208_v55 = vshll.u32 %v16485_v9, 16  ;;  %v4211_v1 = vshrl.u32 %v16485_v9, 16 }
 0x112   : > { %22694 = vst [vmem:[#allocation295_spill] sm:$0xff] %v16489_v12  ;;  %22695 = vst [vmem:[#allocation296_spill] sm:$0xff] %v16497_v13  ;;  %v5434_v20 = vcombine.low %v16477_v0, %v5433_v32  ;;  %v4216_v53 = vshll.u32 %v16489_v12, 16  ;;  %v16508_v10 = vsel %vm14628_vm14, %v4195_v43, %v4200_v5  ;;  %v4219_v60 = vshrl.u32 %v16489_v12, 16 }
 0x113   : > { %5892 = vrot.lane.b32.xlu1 %v5465_v41, %s14450_s10  ;;  %22696 = vst [vmem:[#allocation297_spill] sm:$0xff] %v16508_v10  ;;  %v1344_v18 = vcombine.high %v13536_v52, %v13536_v52  ;;  %v16515_v32 = vsel %vm14628_vm14, %v4203_v37, %v4208_v55  ;;  %v16522_v41 = vrot.slane %v13536_v52, %v14572_v21  ;;  %v4162_v55 = vshrl.u32 %v16394_v46, 16 }
 0x114   : > { %v5441_v26 = vrot.slane %v5434_v20, %v14577_v23  ;;  %22697 = vst [vmem:[#allocation298_spill] sm:$0xff] %v16515_v32  ;;  %v16519_v0 = vsel %vm14628_vm14, %v4211_v1, %v4216_v53  ;;  %v16526_v43 = vsel %vm14628_vm14, %v4219_v60, %v4224_v49 }
 0x115   : > { %22698 = vst [vmem:[#allocation299_spill] sm:$0xff] %v16519_v0  ;;  %22699 = vst [vmem:[#allocation300_spill] sm:$0xff] %v16522_v41  ;;  %v5490_v5 = vcombine.low %v16508_v10, %v16519_v0  ;;  %v16531_v20 = vrot.slane %v1344_v18, %v14572_v21  ;;  %v5491_v37 = vcombine.low %v16515_v32, %v16526_v43  ;;  %v4167_v49 = vshll.u32 %v16522_v41, 16 }
 0x116   : > { %22700 = vst [vmem:[#allocation301_spill] sm:$0xff] %v16526_v43  ;;  %5890 = vrot.lane.b32.xlu0 %v5441_v26, %s14450_s10  ;;  %v16539_v53 = vcombine.high %v16522_v41, %v16522_v41  ;;  %v4170_v1 = vshrl.u32 %v16522_v41, 16  ;;  %v13539_v18 = vld.sshfl [vmem:[%s21516_s0 + $0xb8] sm:$0x33 pattern:$0x75316420] }
 0x117   : > { %22701 = vst [vmem:[#allocation302_spill] sm:$0xff] %v16531_v20  ;;  %v16547_v52 = vrot.slane %v5490_v5, %v14577_v23  ;;  %v16551_v26 = vcombine.high %v16531_v20, %v16531_v20  ;;  %v4175_v60 = vshll.u32 %v16531_v20, 16  ;;  %v4178_v9 = vshrl.u32 %v16531_v20, 16 }
 0x118   : > { %22702 = vst [vmem:[#allocation303_spill] sm:$0xff] %v16539_v53  ;;  %v5505_v12 = vrot.slane %v5491_v37, %v14577_v23  ;;  %v16558_v41 = vsel %vm14628_vm14, %v4162_v55, %v4167_v49  ;;  %v4183_v46 = vshll.u32 %v16539_v53, 16  ;;  %v4186_v30 = vshrl.u32 %v16539_v53, 16 }
 0x119   : > { %22703 = vst [vmem:[#allocation304_spill] sm:$0xff] %v16547_v52  ;;  %22704 = vst [vmem:[#allocation305_spill] sm:$0xff] %v16551_v26  ;;  %v16564_v5 = vsel %vm14628_vm14, %v4170_v1, %v4175_v60  ;;  %v4191_v59 = vshll.u32 %v16551_v26, 16  ;;  %v1414_v20 = vcombine.high %v13539_v18, %v13539_v18  ;;  %v16580_v60 = vrot.slane %v13539_v18, %v14572_v21 }
 0x11a   : > { %22705 = vst [vmem:[#allocation306_spill] sm:$0xff] %v16558_v41  ;;  %22706 = vst [vmem:[#allocation307_spill] sm:$0xff] %v16564_v5  ;;  %v5506_v37 = vcombine.low %v16547_v52, %v5505_v12  ;;  %v16572_v55 = vsel %vm14628_vm14, %v4178_v9, %v4183_v46  ;;  %v13540_v1 = vld.sshfl [vmem:[%s21516_s0 + $0xbc] sm:$0x33 pattern:$0x75316420] }
 0x11b   : > { %22707 = vst [vmem:[#allocation308_spill] sm:$0xff] %v16572_v55  ;;  %22708 = vst [vmem:[#allocation309_spill] sm:$0xff] %v16580_v60  ;;  %v16584_v50 = vsel %vm14628_vm14, %v4186_v30, %v4191_v59  ;;  %v5466_v12 = vcombine.low %v16558_v41, %v16572_v55  ;;  %v16591_v9 = vrot.slane %v1414_v20, %v14572_v21 }
 0x11c   : > { %22709 = vst [vmem:[#allocation310_spill] sm:$0xff] %v16584_v50  ;;  %v5513_v49 = vrot.slane %v5506_v37, %v14577_v23  ;;  %v5467_v15 = vcombine.low %v16564_v5, %v16584_v50  ;;  %v16600_v59 = vcombine.high %v16580_v60, %v16580_v60  ;;  %v1438_v20 = vcombine.high %v13540_v1, %v13540_v1 }
 0x11d   : > { %22710 = vst [vmem:[#allocation311_spill] sm:$0xff] %v16591_v9  ;;  %v16603_v30 = vrot.slane %v5466_v12, %v14577_v23  ;;  %v16607_v46 = vcombine.high %v16591_v9, %v16591_v9  ;;  %v16610_v37 = vrot.slane %v13540_v1, %v14572_v21  ;;  %v4260_v18 = vshrl.u32 %v16591_v9, 16 }
 0x11e   : > { %22711 = vst [vmem:[#allocation312_spill] sm:$0xff] %v16600_v59  ;;  %5896 = vrot.lane.b32.xlu1 %v5513_v49, %s14450_s10  ;;  %v5481_v10 = vrot.slane %v5467_v15, %v14577_v23  ;;  %v4265_v55 = vshll.u32 %v16600_v59, 16  ;;  %v4268_v41 = vshrl.u32 %v16600_v59, 16  ;;  %v16618_v12 = vrot.slane %v1438_v20, %v14572_v21 }
 0x11f   : > { %22712 = vst [vmem:[#allocation313_spill] sm:$0xff] %v16603_v30  ;;  %22713 = vst [vmem:[#allocation314_spill] sm:$0xff] %v16607_v46  ;;  %v4273_v52 = vshll.u32 %v16607_v46, 16  ;;  %v4276_v32 = vshrl.u32 %v16607_v46, 16  ;;  %v4281_v1 = vshll.u32 %v16610_v37, 16  ;;  %v4284_v49 = vshrl.u32 %v16610_v37, 16 }
 0x120   : > { %22714 = vst [vmem:[#allocation315_spill] sm:$0xff] %v16610_v37  ;;  %22715 = vst [vmem:[#allocation316_spill] sm:$0xff] %v16618_v12  ;;  %v5482_v50 = vcombine.low %v16603_v30, %v5481_v10  ;;  %v16626_v15 = vsel %vm14628_vm14, %v4260_v18, %v4265_v55  ;;  %v16631_v5 = vcombine.high %v16480_v63, %v16480_v63  ;;  %v4289_v10 = vshll.u32 %v16618_v12, 16 }
 0x121   : > { %22716 = vst [vmem:[#allocation317_spill] sm:$0xff] %v16626_v15  ;;  %v16635_v20 = vsel %vm14628_vm14, %v4268_v41, %v4273_v52  ;;  %v16639_v2 = vsel %vm14628_vm14, %v4276_v32, %v4281_v1  ;;  %v16644_v55 = vcombine.high %v16497_v13, %v16497_v13  ;;  %v4227_v46 = vshrl.u32 %v16480_v63, 16  ;;  %v13541_v32 = vld.sshfl [vmem:[%s21516_s0 + $0xc0] sm:$0x33 pattern:$0x75316420] }
 0x122   : > { %22717 = vst [vmem:[#allocation318_spill] sm:$0xff] %v16631_v5  ;;  %22718 = vst [vmem:[#allocation319_spill] sm:$0xff] %v16635_v20  ;;  %v5489_v18 = vrot.slane %v5482_v50, %v14577_v23  ;;  %v5538_v30 = vcombine.low %v16626_v15, %v16639_v2  ;;  %v4232_v41 = vshll.u32 %v16497_v13, 16  ;;  %v16656_v52 = vsel %vm14628_vm14, %v4284_v49, %v4289_v10 }
 0x123   : > { %22719 = vst [vmem:[#allocation320_spill] sm:$0xff] %v16639_v2  ;;  %22720 = vst [vmem:[#allocation321_spill] sm:$0xff] %v16644_v55  ;;  %v4235_v1 = vshrl.u32 %v16497_v13, 16  ;;  %v4240_v59 = vshll.u32 %v16631_v5, 16  ;;  %v4243_v50 = vshrl.u32 %v16631_v5, 16  ;;  %v5539_v63 = vcombine.low %v16635_v20, %v16656_v52 }
 0x124   : > { %22721 = vst [vmem:[#allocation322_spill] sm:$0xff] %v16656_v52  ;;  %5894 = vrot.lane.b32.xlu0 %v5489_v18, %s14450_s10  ;;  %v16665_v26 = vrot.slane %v5538_v30, %v14577_v23  ;;  %v16669_v53 = vsel %vm14628_vm14, %v4227_v46, %v4232_v41  ;;  %v4248_v49 = vshll.u32 %v16644_v55, 16  ;;  %v4252_v5 = vshrl.u32 %v16580_v60, 16 }
 0x125   : > { %22723 = vst [vmem:[#allocation324_spill] sm:$0xff] %v16669_v53  ;;  %v16674_v10 = vsel %vm14628_vm14, %v4235_v1, %v4240_v59  ;;  %v4257_v18 = vshll.u32 %v16591_v9, 16  ;;  %v5553_v30 = vrot.slane %v5539_v63, %v14577_v23  ;;  %v13542_v59 = vld.sshfl [vmem:[%s21516_s0 + $0xc4] sm:$0x33 pattern:$0x75316420]  ;;  %v1461_v41 = vcombine.high %v13541_v32, %v13541_v32 }
 0x126   : > { %22722 = vst [vmem:[#allocation323_spill] sm:$0xff] %v16665_v26  ;;  %22724 = vst [vmem:[#allocation325_spill] sm:$0xff] %v16674_v10  ;;  %v16683_v25 = vsel %vm14628_vm14, %v4243_v50, %v4248_v49  ;;  %v16699_v50 = vrot.slane %v13541_v32, %v14572_v21  ;;  %v1485_v32 = vcombine.high %v13542_v59, %v13542_v59 }
 0x127   : > { %22725 = vst [vmem:[#allocation326_spill] sm:$0xff] %v16683_v25  ;;  %v16692_v1 = vsel %vm14628_vm14, %v4252_v5, %v4257_v18  ;;  %v5514_v13 = vcombine.low %v16669_v53, %v16683_v25  ;;  %v5554_v49 = vcombine.low %v16665_v26, %v5553_v30  ;;  %v16707_v5 = vrot.slane %v1461_v41, %v14572_v21 }
 0x128   : > { %22726 = vst [vmem:[#allocation327_spill] sm:$0xff] %v16692_v1  ;;  %22727 = vst [vmem:[#allocation328_spill] sm:$0xff] %v16699_v50  ;;  %v5515_v46 = vcombine.low %v16674_v10, %v16692_v1  ;;  %v16714_v63 = vcombine.high %v16699_v50, %v16699_v50  ;;  %v16717_v15 = vrot.slane %v13542_v59, %v14572_v21 }
 0x129   : > { %22728 = vst [vmem:[#allocation329_spill] sm:$0xff] %v16707_v5  ;;  %v16710_v18 = vrot.slane %v5514_v13, %v14577_v23  ;;  %v5561_v30 = vrot.slane %v5554_v49, %v14577_v23  ;;  %v16723_v0 = vcombine.high %v16707_v5, %v16707_v5  ;;  %v16727_v13 = vcombine.high %v16610_v37, %v16610_v37 }
 0x12a   : > { %22730 = vst [vmem:[#allocation331_spill] sm:$0xff] %v16714_v63  ;;  %22731 = vst [vmem:[#allocation332_spill] sm:$0xff] %v16717_v15  ;;  %v5529_v25 = vrot.slane %v5515_v46, %v14577_v23  ;;  %v16730_v41 = vrot.slane %v1485_v32, %v14572_v21  ;;  %v16734_v53 = vcombine.high %v16717_v15, %v16717_v15  ;;  %v4325_v59 = vshrl.u32 %v16714_v63, 16 }
 0x12b   : > { %22729 = vst [vmem:[#allocation330_spill] sm:$0xff] %v16710_v18  ;;  %22732 = vst [vmem:[#allocation333_spill] sm:$0xff] %v16723_v0  ;;  %v4338_v49 = vshll.u32 %v16717_v15, 16  ;;  %5900 = vrot.lane.b32.xlu1 %v5561_v30, %s14450_s10  ;;  %v4330_v26 = vshll.u32 %v16723_v0, 16  ;;  %v4333_v20 = vshrl.u32 %v16723_v0, 16  ;;  %v4341_v1 = vshrl.u32 %v16717_v15, 16 }
 0x12c   : > { %22733 = vst [vmem:[#allocation334_spill] sm:$0xff] %v16727_v13  ;;  %22734 = vst [vmem:[#allocation335_spill] sm:$0xff] %v16730_v41  ;;  %v5530_v46 = vcombine.low %v16710_v18, %v5529_v25  ;;  %v4346_v32 = vshll.u32 %v16730_v41, 16  ;;  %v4349_v10 = vshrl.u32 %v16730_v41, 16  ;;  %v4354_v43 = vshll.u32 %v16734_v53, 16 }
 0x12d   : > { %22735 = vst [vmem:[#allocation336_spill] sm:$0xff] %v16734_v53  ;;  %v16748_v60 = vcombine.high %v16618_v12, %v16618_v12  ;;  %v16753_v25 = vsel %vm14628_vm14, %v4325_v59, %v4330_v26  ;;  %v16757_v18 = vsel %vm14628_vm14, %v4333_v20, %v4338_v49  ;;  %v4292_v15 = vshrl.u32 %v16618_v12, 16 }
 0x12e   : > { %v5537_v30 = vrot.slane %v5530_v46, %v14577_v23  ;;  %22737 = vst [vmem:[#allocation338_spill] sm:$0xff] %v16753_v25  ;;  %22738 = vst [vmem:[#allocation339_spill] sm:$0xff] %v16757_v18  ;;  %v16762_v0 = vsel %vm14628_vm14, %v4341_v1, %v4346_v32  ;;  %v16766_v37 = vsel %vm14628_vm14, %v4349_v10, %v4354_v43  ;;  %v4297_v46 = vshll.u32 %v16727_v13, 16 }
 0x12f   : > { %22736 = vst [vmem:[#allocation337_spill] sm:$0xff] %v16748_v60  ;;  %22739 = vst [vmem:[#allocation340_spill] sm:$0xff] %v16762_v0  ;;  %v4300_v9 = vshrl.u32 %v16727_v13, 16  ;;  %v5586_v26 = vcombine.low %v16753_v25, %v16762_v0  ;;  %v5587_v20 = vcombine.low %v16757_v18, %v16766_v37  ;;  %v4305_v59 = vshll.u32 %v16748_v60, 16 }
 0x130   : > { %22740 = vst [vmem:[#allocation341_spill] sm:$0xff] %v16766_v37  ;;  %5898 = vrot.lane.b32.xlu0 %v5537_v30, %s14450_s10  ;;  %v4309_v1 = vshrl.u32 %v16699_v50, 16  ;;  %v13543_v43 = vld.sshfl [vmem:[%s21516_s0 + $0xc8] sm:$0x33 pattern:$0x75316420]  ;;  %v16782_v10 = vsel %vm14628_vm14, %v4292_v15, %v4297_v46 }
 0x131   : > { %22741 = vst [vmem:[#allocation342_spill] sm:$0xff] %v16782_v10  ;;  %v4314_v49 = vshll.u32 %v16707_v5, 16  ;;  %v4317_v32 = vshrl.u32 %v16707_v5, 16  ;;  %v4322_v30 = vshll.u32 %v16714_v63, 16  ;;  %v16788_v13 = vrot.slane %v5586_v26, %v14577_v23 }
 0x132   : > { %v5601_v60 = vrot.slane %v5587_v20, %v14577_v23  ;;  %v16793_v50 = vsel %vm14628_vm14, %v4300_v9, %v4305_v59  ;;  %v13544_v15 = vld.sshfl [vmem:[%s21516_s0 + $0xcc] sm:$0x33 pattern:$0x75316420]  ;;  %v1508_v9 = vcombine.high %v13543_v43, %v13543_v43 }
 0x133   : > { %22742 = vst [vmem:[#allocation343_spill] sm:$0xff] %v16788_v13  ;;  %22743 = vst [vmem:[#allocation344_spill] sm:$0xff] %v16793_v50  ;;  %v16802_v46 = vsel %vm14628_vm14, %v4309_v1, %v4314_v49  ;;  %v16806_v26 = vsel %vm14628_vm14, %v4317_v32, %v4322_v30  ;;  %v1532_v30 = vcombine.high %v13544_v15, %v13544_v15 }
 0x134   : > { %22744 = vst [vmem:[#allocation345_spill] sm:$0xff] %v16802_v46  ;;  %22745 = vst [vmem:[#allocation346_spill] sm:$0xff] %v16806_v26  ;;  %v5602_v59 = vcombine.low %v16788_v13, %v5601_v60  ;;  %v5562_v12 = vcombine.low %v16782_v10, %v16802_v46  ;;  %v5563_v2 = vcombine.low %v16793_v50, %v16806_v26  ;;  %v4357_v26 = vshrl.u32 %v16734_v53, 16 }
 0x135   : > { %v16820_v32 = vrot.slane %v1508_v9, %v14572_v21  ;;  %v16823_v20 = vrot.slane %v13544_v15, %v14572_v21  ;;  %v16831_v50 = vrot.slane %v13543_v43, %v14572_v21  ;;  %v16838_v9 = vrot.slane %v1532_v30, %v14572_v21 }
 0x136   : > { %v5609_v60 = vrot.slane %v5602_v59, %v14577_v23  ;;  %v16827_v10 = vrot.slane %v5562_v12, %v14577_v23  ;;  %v5577_v13 = vrot.slane %v5563_v2, %v14577_v23  ;;  %v16854_v30 = vcombine.high %v16730_v41, %v16730_v41 }
 0x137   : > { %22746 = vst [vmem:[#allocation347_spill] sm:$0xff] %v16820_v32  ;;  %22747 = vst [vmem:[#allocation348_spill] sm:$0xff] %v16823_v20  ;;  %v16835_v49 = vcombine.high %v16820_v32, %v16820_v32  ;;  %v16842_v15 = vcombine.high %v16823_v20, %v16823_v20  ;;  %v4395_v59 = vshll.u32 %v16823_v20, 16  ;;  %v4398_v12 = vshrl.u32 %v16823_v20, 16 }
 0x138   : > { %22748 = vst [vmem:[#allocation349_spill] sm:$0xff] %v16827_v10  ;;  %22749 = vst [vmem:[#allocation350_spill] sm:$0xff] %v16831_v50  ;;  %5904 = vrot.lane.b32.xlu1 %v5609_v60, %s14450_s10  ;;  %v5578_v2 = vcombine.low %v16827_v10, %v5577_v13  ;;  %v16850_v43 = vcombine.high %v16831_v50, %v16831_v50  ;;  %v16858_v1 = vcombine.high %v16838_v9, %v16838_v9 }
 0x139   : > { %22750 = vst [vmem:[#allocation351_spill] sm:$0xff] %v16835_v49  ;;  %22751 = vst [vmem:[#allocation352_spill] sm:$0xff] %v16838_v9  ;;  %v4390_v25 = vshrl.u32 %v16835_v49, 16  ;;  %v4403_v60 = vshll.u32 %v16838_v9, 16  ;;  %v4406_v13 = vshrl.u32 %v16838_v9, 16  ;;  %v4411_v10 = vshll.u32 %v16842_v15, 16 }
 0x13a   : > { %22752 = vst [vmem:[#allocation353_spill] sm:$0xff] %v16842_v15  ;;  %22753 = vst [vmem:[#allocation354_spill] sm:$0xff] %v16850_v43  ;;  %v5585_v46 = vrot.slane %v5578_v2, %v14577_v23  ;;  %v4414_v18 = vshrl.u32 %v16842_v15, 16  ;;  %v4419_v20 = vshll.u32 %v16858_v1, 16  ;;  %v4362_v9 = vshll.u32 %v16854_v30, 16 }
 0x13b   : > { %22754 = vst [vmem:[#allocation355_spill] sm:$0xff] %v16854_v30  ;;  %22755 = vst [vmem:[#allocation356_spill] sm:$0xff] %v16858_v1  ;;  %v16869_v52 = vsel %vm14628_vm14, %v4390_v25, %v4395_v59  ;;  %v16873_v63 = vsel %vm14628_vm14, %v4398_v12, %v4403_v60  ;;  %v16880_v2 = vsel %vm14628_vm14, %v4406_v13, %v4411_v10  ;;  %v4366_v15 = vshrl.u32 %v16831_v50, 16 }
 0x13c   : > { %22756 = vst [vmem:[#allocation357_spill] sm:$0xff] %v16869_v52  ;;  %22757 = vst [vmem:[#allocation358_spill] sm:$0xff] %v16873_v63  ;;  %5902 = vrot.lane.b32.xlu0 %v5585_v46, %s14450_s10  ;;  %v4371_v53 = vshll.u32 %v16820_v32, 16  ;;  %v4374_v25 = vshrl.u32 %v16820_v32, 16  ;;  %v16887_v59 = vsel %vm14628_vm14, %v4414_v18, %v4419_v20  ;;  %v5634_v12 = vcombine.low %v16869_v52, %v16880_v2 }
 0x13d   : > { %22758 = vst [vmem:[#allocation359_spill] sm:$0xff] %v16880_v2  ;;  %22759 = vst [vmem:[#allocation360_spill] sm:$0xff] %v16887_v59  ;;  %v16893_v46 = vsel %vm14628_vm14, %v4357_v26, %v4362_v9  ;;  %v4379_v10 = vshll.u32 %v16850_v43, 16  ;;  %v5635_v60 = vcombine.low %v16873_v63, %v16887_v59  ;;  %v4382_v30 = vshrl.u32 %v16850_v43, 16 }
 0x13e   : > { %22760 = vst [vmem:[#allocation361_spill] sm:$0xff] %v16893_v46  ;;  %v16900_v13 = vsel %vm14628_vm14, %v4366_v15, %v4371_v53  ;;  %v4387_v18 = vshll.u32 %v16835_v49, 16  ;;  %v13546_v20 = vld.sshfl [vmem:[%s21516_s0 + $0xd4] sm:$0x33 pattern:$0x75316420]  ;;  %v16908_v26 = vrot.slane %v5634_v12, %v14577_v23 }
 0x13f   : > { %22761 = vst [vmem:[#allocation362_spill] sm:$0xff] %v16900_v13  ;;  %v16912_v9 = vsel %vm14628_vm14, %v4374_v25, %v4379_v10  ;;  %v13547_v15 = vld.sshfl [vmem:[%s21516_s0 + $0xd8] sm:$0x33 pattern:$0x75316420]  ;;  %v5649_v43 = vrot.slane %v5635_v60, %v14577_v23  ;;  %v1579_v0 = vcombine.high %v13546_v20, %v13546_v20  ;;  %v16935_v37 = vrot.slane %v13546_v20, %v14572_v21 }
 0x140   : > { %22762 = vst [vmem:[#allocation363_spill] sm:$0xff] %v16908_v26  ;;  %22763 = vst [vmem:[#allocation364_spill] sm:$0xff] %v16912_v9  ;;  %v16924_v12 = vsel %vm14628_vm14, %v4382_v30, %v4387_v18  ;;  %v5610_v25 = vcombine.low %v16893_v46, %v16912_v9  ;;  %v13545_v30 = vld.sshfl [vmem:[%s21516_s0 + $0xd0] sm:$0x33 pattern:$0x75316420]  ;;  %v1602_v10 = vcombine.high %v13547_v15, %v13547_v15 }
 0x141   : > { %22764 = vst [vmem:[#allocation365_spill] sm:$0xff] %v16924_v12  ;;  %v5611_v1 = vcombine.low %v16900_v13, %v16924_v12  ;;  %22765 = vst [vmem:[#allocation366_spill] sm:$0xff] %v16935_v37  ;;  %v5650_v60 = vcombine.low %v16908_v26, %v5649_v43  ;;  %v16945_v52 = vrot.slane %v13547_v15, %v14572_v21  ;;  %v4455_v46 = vshrl.u32 %v16935_v37, 16 }
 0x142   : > { %v16942_v18 = vrot.slane %v5610_v25, %v14577_v23  ;;  %v16949_v53 = vrot.slane %v1579_v0, %v14572_v21  ;;  %v16953_v20 = vcombine.high %v16935_v37, %v16935_v37  ;;  %v16958_v25 = vrot.slane %v1602_v10, %v14572_v21 }
 0x143   : > { %22767 = vst [vmem:[#allocation368_spill] sm:$0xff] %v16945_v52  ;;  %v5625_v9 = vrot.slane %v5611_v1, %v14577_v23  ;;  %v5657_v43 = vrot.slane %v5650_v60, %v14577_v23  ;;  %v4480_v26 = vshrl.u32 %v16945_v52, 16  ;;  %v1555_v15 = vcombine.high %v13545_v30, %v13545_v30 }
 0x144   : > { %22766 = vst [vmem:[#allocation367_spill] sm:$0xff] %v16942_v18  ;;  %22768 = vst [vmem:[#allocation369_spill] sm:$0xff] %v16949_v53  ;;  %v16964_v0 = vcombine.high %v16949_v53, %v16949_v53  ;;  %v4460_v1 = vshll.u32 %v16949_v53, 16  ;;  %v4463_v12 = vshrl.u32 %v16949_v53, 16  ;;  %v4468_v60 = vshll.u32 %v16953_v20, 16 }
 0x145   : > { %22769 = vst [vmem:[#allocation370_spill] sm:$0xff] %v16953_v20  ;;  %22770 = vst [vmem:[#allocation371_spill] sm:$0xff] %v16958_v25  ;;  %v5626_v63 = vcombine.low %v16942_v18, %v5625_v9  ;;  %5908 = vrot.lane.b32.xlu1 %v5657_v43, %s14450_s10  ;;  %v4471_v10 = vshrl.u32 %v16953_v20, 16  ;;  %v4485_v13 = vshll.u32 %v16958_v25, 16  ;;  %v16973_v32 = vrot.slane %v13545_v30, %v14572_v21 }
 0x146   : > { %22771 = vst [vmem:[#allocation372_spill] sm:$0xff] %v16964_v0  ;;  %v16978_v18 = vsel %vm14628_vm14, %v4455_v46, %v4460_v1  ;;  %v4476_v49 = vshll.u32 %v16964_v0, 16  ;;  %v16982_v53 = vrot.slane %v1555_v15, %v14572_v21  ;;  %v16986_v43 = vsel %vm14628_vm14, %v4463_v12, %v4468_v60 }
 0x147   : > { %22772 = vst [vmem:[#allocation373_spill] sm:$0xff] %v16973_v32  ;;  %v5633_v9 = vrot.slane %v5626_v63, %v14577_v23  ;;  %22773 = vst [vmem:[#allocation374_spill] sm:$0xff] %v16978_v18  ;;  %v16990_v20 = vsel %vm14628_vm14, %v4480_v26, %v4485_v13  ;;  %v16994_v63 = vcombine.high %v16973_v32, %v16973_v32  ;;  %v4423_v46 = vshrl.u32 %v16973_v32, 16 }
 0x148   : > { %22774 = vst [vmem:[#allocation375_spill] sm:$0xff] %v16982_v53  ;;  %22775 = vst [vmem:[#allocation376_spill] sm:$0xff] %v16986_v43  ;;  %v17000_v30 = vsel %vm14628_vm14, %v4471_v10, %v4476_v49  ;;  %v5683_v12 = vcombine.low %v16986_v43, %v16990_v20  ;;  %v17006_v15 = vcombine.high %v16982_v53, %v16982_v53  ;;  %v4428_v13 = vshll.u32 %v16982_v53, 16 }
 0x149   : > { %22776 = vst [vmem:[#allocation377_spill] sm:$0xff] %v16990_v20  ;;  %22777 = vst [vmem:[#allocation378_spill] sm:$0xff] %v16994_v63  ;;  %5906 = vrot.lane.b32.xlu0 %v5633_v9, %s14450_s10  ;;  %v13548_v26 = vld.sshfl [vmem:[%s21516_s0 + $0xdc] sm:$0x33 pattern:$0x75316420]  ;;  %v5682_v1 = vcombine.low %v16978_v18, %v17000_v30 }
 0x14a   : > { %22778 = vst [vmem:[#allocation379_spill] sm:$0xff] %v17000_v30  ;;  %22779 = vst [vmem:[#allocation380_spill] sm:$0xff] %v17006_v15  ;;  %v4431_v60 = vshrl.u32 %v16982_v53, 16  ;;  %v4436_v49 = vshll.u32 %v16994_v63, 16  ;;  %v4439_v10 = vshrl.u32 %v16994_v63, 16  ;;  %v5697_v9 = vrot.slane %v5683_v12, %v14577_v23 }
 0x14b   : > { %v17020_v32 = vsel %vm14628_vm14, %v4423_v46, %v4428_v13  ;;  %v4444_v0 = vshll.u32 %v17006_v15, 16  ;;  %v4447_v50 = vshrl.u32 %v17006_v15, 16  ;;  %v17025_v41 = vrot.slane %v5682_v1, %v14577_v23  ;;  %v13549_v1 = vld.sshfl [vmem:[%s21516_s0 + $0xe0] sm:$0x33 pattern:$0x75316420] }
 0x14c   : > { %22780 = vst [vmem:[#allocation381_spill] sm:$0xff] %v17020_v32  ;;  %v17029_v53 = vsel %vm14628_vm14, %v4431_v60, %v4436_v49  ;;  %v4452_v5 = vshll.u32 %v16935_v37, 16  ;;  %v1626_v63 = vcombine.high %v13548_v26, %v13548_v26  ;;  %v17044_v60 = vrot.slane %v13548_v26, %v14572_v21 }
 0x14d   : > { %22781 = vst [vmem:[#allocation382_spill] sm:$0xff] %v17025_v41  ;;  %22782 = vst [vmem:[#allocation383_spill] sm:$0xff] %v17029_v53  ;;  %v17036_v46 = vsel %vm14628_vm14, %v4439_v10, %v4444_v0  ;;  %v5698_v49 = vcombine.low %v17025_v41, %v5697_v9  ;;  %v17071_v10 = vrot.slane %v13549_v1, %v14572_v21 }
 0x14e   : > { %22783 = vst [vmem:[#allocation384_spill] sm:$0xff] %v17036_v46  ;;  %22784 = vst [vmem:[#allocation385_spill] sm:$0xff] %v17044_v60  ;;  %v17049_v12 = vsel %vm14628_vm14, %v4447_v50, %v4452_v5  ;;  %v5658_v0 = vcombine.low %v17020_v32, %v17036_v46  ;;  %v17060_v26 = vrot.slane %v1626_v63, %v14572_v21 }
 0x14f   : > { %22785 = vst [vmem:[#allocation386_spill] sm:$0xff] %v17049_v12  ;;  %v5659_v13 = vcombine.low %v17029_v53, %v17049_v12  ;;  %v17064_v9 = vcombine.high %v17044_v60, %v17044_v60  ;;  %v5705_v50 = vrot.slane %v5698_v49, %v14577_v23  ;;  %v1649_v32 = vcombine.high %v13549_v1, %v13549_v1 }
 0x150   : > { %22786 = vst [vmem:[#allocation387_spill] sm:$0xff] %v17060_v26  ;;  %v17068_v5 = vrot.slane %v5658_v0, %v14577_v23  ;;  %22789 = vst [vmem:[#allocation390_spill] sm:$0xff] %v17071_v10  ;;  %v17076_v2 = vcombine.high %v17060_v26, %v17060_v26  ;;  %v4520_v63 = vshrl.u32 %v17060_v26, 16  ;;  %v17086_v0 = vcombine.high %v17071_v10, %v17071_v10 }
 0x151   : > { %22787 = vst [vmem:[#allocation388_spill] sm:$0xff] %v17064_v9  ;;  %v5673_v18 = vrot.slane %v5659_v13, %v14577_v23  ;;  %v4525_v46 = vshll.u32 %v17064_v9, 16  ;;  %5912 = vrot.lane.b32.xlu1 %v5705_v50, %s14450_s10  ;;  %v17082_v49 = vrot.slane %v1649_v32, %v14572_v21  ;;  %v4528_v1 = vshrl.u32 %v17064_v9, 16 }
 0x152   : > { %22788 = vst [vmem:[#allocation389_spill] sm:$0xff] %v17068_v5  ;;  %22790 = vst [vmem:[#allocation391_spill] sm:$0xff] %v17076_v2  ;;  %v4537_v13 = vshrl.u32 %v17071_v10, 16  ;;  %v4533_v12 = vshll.u32 %v17076_v2, 16  ;;  %v17098_v32 = vcombine.high %v16945_v52, %v16945_v52  ;;  %v4550_v59 = vshll.u32 %v17086_v0, 16 }
 0x153   : > { %22791 = vst [vmem:[#allocation392_spill] sm:$0xff] %v17082_v49  ;;  %22792 = vst [vmem:[#allocation393_spill] sm:$0xff] %v17086_v0  ;;  %v5674_v41 = vcombine.low %v17068_v5, %v5673_v18  ;;  %v17093_v43 = vsel %vm14628_vm14, %v4520_v63, %v4525_v46  ;;  %v4542_v50 = vshll.u32 %v17082_v49, 16  ;;  %v4545_v53 = vshrl.u32 %v17082_v49, 16 }
 0x154   : > { %22793 = vst [vmem:[#allocation394_spill] sm:$0xff] %v17093_v43  ;;  %22794 = vst [vmem:[#allocation395_spill] sm:$0xff] %v17098_v32  ;;  %v17105_v10 = vcombine.high %v16958_v25, %v16958_v25  ;;  %v17110_v46 = vsel %vm14628_vm14, %v4528_v1, %v4533_v12  ;;  %v4488_v63 = vshrl.u32 %v16958_v25, 16  ;;  %v4493_v2 = vshll.u32 %v17098_v32, 16 }
 0x155   : > { %v5681_v18 = vrot.slane %v5674_v41, %v14577_v23  ;;  %22796 = vst [vmem:[#allocation397_spill] sm:$0xff] %v17110_v46  ;;  %v17116_v5 = vsel %vm14628_vm14, %v4537_v13, %v4542_v50  ;;  %v17120_v52 = vsel %vm14628_vm14, %v4545_v53, %v4550_v59  ;;  %v4496_v9 = vshrl.u32 %v17098_v32, 16  ;;  %v13550_v59 = vld.sshfl [vmem:[%s21516_s0 + $0xe4] sm:$0x33 pattern:$0x75316420] }
 0x156   : > { %22795 = vst [vmem:[#allocation396_spill] sm:$0xff] %v17105_v10  ;;  %22797 = vst [vmem:[#allocation398_spill] sm:$0xff] %v17116_v5  ;;  %v4501_v41 = vshll.u32 %v17105_v10, 16  ;;  %v5730_v12 = vcombine.low %v17093_v43, %v17116_v5  ;;  %v5731_v1 = vcombine.low %v17110_v46, %v17120_v52  ;;  %v17131_v13 = vsel %vm14628_vm14, %v4488_v63, %v4493_v2  ;;  %v17166_v63 = vpop.permute.xlu0 %5826 }
 0x157   : > { %22798 = vst [vmem:[#allocation399_spill] sm:$0xff] %v17120_v52  ;;  %5910 = vrot.lane.b32.xlu0 %v5681_v18, %s14450_s10  ;;  %22799 = vst [vmem:[#allocation400_spill] sm:$0xff] %v17131_v13  ;;  %v4504_v50 = vshrl.u32 %v17105_v10, 16  ;;  %v4509_v18 = vshll.u32 %v17044_v60, 16  ;;  %v4512_v32 = vshrl.u32 %v17044_v60, 16  ;;  %v4517_v25 = vshll.u32 %v17060_v26, 16 }
 0x158   : > { %v17139_v53 = vsel %vm14628_vm14, %v4496_v9, %v4501_v41  ;;  %v17145_v37 = vrot.slane %v5730_v12, %v14577_v23  ;;  %v5745_v2 = vrot.slane %v5731_v1, %v14577_v23  ;;  %v13551_v9 = vld.sshfl [vmem:[%s21516_s0 + $0xe8] sm:$0x33 pattern:$0x75316420]  ;;  %v1673_v26 = vcombine.high %v13550_v59, %v13550_v59 }
 0x159   : > { %22800 = vst [vmem:[#allocation401_spill] sm:$0xff] %v17139_v53  ;;  %v17157_v41 = vsel %vm14628_vm14, %v4504_v50, %v4509_v18  ;;  %v17161_v12 = vsel %vm14628_vm14, %v4512_v32, %v4517_v25  ;;  %v17164_v1 = vrot.slane %v13550_v59, %v14572_v21  ;;  %v17175_v18 = vpop.permute.xlu1 %5830  ;;  %v17192_v46 = vrot.slane %v13551_v9, %v14572_v21 }
 0x15a   : > { %22801 = vst [vmem:[#allocation402_spill] sm:$0xff] %v17145_v37  ;;  %22802 = vst [vmem:[#allocation403_spill] sm:$0xff] %v17157_v41  ;;  %v5746_v10 = vcombine.low %v17145_v37, %v5745_v2  ;;  %v5706_v30 = vcombine.low %v17131_v13, %v17157_v41  ;;  %v5707_v20 = vcombine.low %v17139_v53, %v17161_v12 }
 0x15b   : > { %22803 = vst [vmem:[#allocation404_spill] sm:$0xff] %v17161_v12  ;;  %22804 = vst [vmem:[#allocation405_spill] sm:$0xff] %v17164_v1  ;;  %v17180_v32 = vrot.slane %v1673_v26, %v14572_v21  ;;  %v17184_v59 = vcombine.high %v17164_v1, %v17164_v1  ;;  %v1696_v2 = vcombine.high %v13551_v9, %v13551_v9  ;;  %v4594_v9 = vshrl.u32 %v17192_v46, 16 }
 0x15c   : > { %v5753_v13 = vrot.slane %v5746_v10, %v14577_v23  ;;  %v17188_v37 = vrot.slane %v5706_v30, %v14577_v23  ;;  %v5721_v50 = vrot.slane %v5707_v20, %v14577_v23  ;;  %22807 = vst [vmem:[#allocation408_spill] sm:$0xff] %v17192_v46  ;;  %v17204_v10 = vcombine.high %v17082_v49, %v17082_v49  ;;  %v17221_v49 = vpop.permute.xlu0 %5828 }
 0x15d   : > { %22805 = vst [vmem:[#allocation406_spill] sm:$0xff] %v17180_v32  ;;  %v17195_v25 = vrot.slane %v1696_v2, %v14572_v21  ;;  %v17199_v26 = vcombine.high %v17180_v32, %v17180_v32  ;;  %v4585_v43 = vshrl.u32 %v17184_v59, 16  ;;  %v17210_v30 = vcombine.high %v17192_v46, %v17192_v46  ;;  %22812 = vst [vmem:[#allocation413_spill] sm:$0xff] %v17221_v49  ;;  %v17227_v60 = vpop.permute.xlu1 %5832 }
 0x15e   : > { %22806 = vst [vmem:[#allocation407_spill] sm:$0xff] %v17188_v37  ;;  %22810 = vst [vmem:[#allocation411_spill] sm:$0xff] %v17204_v10  ;;  %5916 = vrot.lane.b32.xlu1 %v5753_v13, %s14450_s10  ;;  %v5722_v20 = vcombine.low %v17188_v37, %v5721_v50  ;;  %v4553_v2 = vshrl.u32 %v17086_v0, 16  ;;  %v4558_v0 = vshll.u32 %v17204_v10, 16 }
 0x15f   : > { %22808 = vst [vmem:[#allocation409_spill] sm:$0xff] %v17195_v25  ;;  %22809 = vst [vmem:[#allocation410_spill] sm:$0xff] %v17199_v26  ;;  %v17216_v41 = vcombine.high %v17195_v25, %v17195_v25  ;;  %v4590_v12 = vshll.u32 %v17199_v26, 16  ;;  %v4599_v53 = vshll.u32 %v17195_v25, 16  ;;  %v4602_v13 = vshrl.u32 %v17195_v25, 16 }
 0x160   : > { %22811 = vst [vmem:[#allocation412_spill] sm:$0xff] %v17210_v30  ;;  %v5729_v50 = vrot.slane %v5722_v20, %v14577_v23  ;;  %v4607_v37 = vshll.u32 %v17210_v30, 16  ;;  %v4610_v46 = vshrl.u32 %v17210_v30, 16  ;;  %v4561_v20 = vshrl.u32 %v17204_v10, 16  ;;  %v17279_v45 = vpop.permute.xlu0 %5834 }
 0x161   : > { %v17231_v15 = vsel %vm14628_vm14, %v4585_v43, %v4590_v12  ;;  %v17235_v26 = vsel %vm14628_vm14, %v4594_v9, %v4599_v53  ;;  %v4615_v25 = vshll.u32 %v17216_v41, 16  ;;  %v17246_v55 = vsel %vm14628_vm14, %v4553_v2, %v4558_v0  ;;  %v13552_v53 = vld.sshfl [vmem:[%s21516_s0 + $0xec] sm:$0x33 pattern:$0x75316420] }
 0x162   : > { %22813 = vst [vmem:[#allocation414_spill] sm:$0xff] %v17231_v15  ;;  %22814 = vst [vmem:[#allocation415_spill] sm:$0xff] %v17235_v26  ;;  %5914 = vrot.lane.b32.xlu0 %v5729_v50, %s14450_s10  ;;  %v17242_v30 = vsel %vm14628_vm14, %v4602_v13, %v4607_v37  ;;  %v4566_v43 = vshll.u32 %v17164_v1, 16  ;;  %v4569_v12 = vshrl.u32 %v17164_v1, 16  ;;  %v4574_v13 = vshll.u32 %v17180_v32, 16 }
 0x163   : > { %22815 = vst [vmem:[#allocation416_spill] sm:$0xff] %v17242_v30  ;;  %22816 = vst [vmem:[#allocation417_spill] sm:$0xff] %v17246_v55  ;;  %v17255_v9 = vsel %vm14628_vm14, %v4610_v46, %v4615_v25  ;;  %v5778_v37 = vcombine.low %v17231_v15, %v17242_v30  ;;  %v4577_v0 = vshrl.u32 %v17180_v32, 16  ;;  %v4582_v1 = vshll.u32 %v17184_v59, 16 }
 0x164   : > { %22817 = vst [vmem:[#allocation418_spill] sm:$0xff] %v17255_v9  ;;  %v5779_v2 = vcombine.low %v17235_v26, %v17255_v9  ;;  %v17265_v50 = vsel %vm14628_vm14, %v4561_v20, %v4566_v43  ;;  %v17275_v10 = vsel %vm14628_vm14, %v4569_v12, %v4574_v13  ;;  %v1720_v49 = vcombine.high %v13552_v53, %v13552_v53  ;;  %v17290_v12 = vpop.permute.xlu1 %5836 }
 0x165   : > { %22818 = vst [vmem:[#allocation419_spill] sm:$0xff] %v17265_v50  ;;  %v17271_v25 = vrot.slane %v5778_v37, %v14577_v23  ;;  %22820 = vst [vmem:[#allocation421_spill] sm:$0xff] %v17275_v10  ;;  %v17284_v43 = vsel %vm14628_vm14, %v4577_v0, %v4582_v1  ;;  %v5754_v37 = vcombine.low %v17246_v55, %v17275_v10  ;;  %v4618_v46 = vshrl.u32 %v17216_v41, 16 }
 0x166   : > { %v5793_v20 = vrot.slane %v5779_v2, %v14577_v23  ;;  %22821 = vst [vmem:[#allocation422_spill] sm:$0xff] %v17284_v43  ;;  %v5755_v13 = vcombine.low %v17265_v50, %v17284_v43  ;;  %v17297_v2 = vrot.slane %v13552_v53, %v14572_v21  ;;  %v17300_v1 = vrot.slane %v1720_v49, %v14572_v21  ;;  %v17328_v50 = vpop.permute.xlu0 %5838 }
 0x167   : > { %22819 = vst [vmem:[#allocation420_spill] sm:$0xff] %v17271_v25  ;;  %v17304_v55 = vrot.slane %v5754_v37, %v14577_v23 }
 0x168   : > { %22822 = vst [vmem:[#allocation423_spill] sm:$0xff] %v17297_v2  ;;  %22823 = vst [vmem:[#allocation424_spill] sm:$0xff] %v17300_v1  ;;  %v5794_v0 = vcombine.low %v17271_v25, %v5793_v20  ;;  %v5769_v15 = vrot.slane %v5755_v13, %v14577_v23  ;;  %v17310_v10 = vcombine.high %v17297_v2, %v17297_v2  ;;  %v4623_v49 = vshll.u32 %v17297_v2, 16  ;;  %v17336_v21 = vpop.permute.xlu1 %5840 }
 0x169   : > { %22824 = vst [vmem:[#allocation425_spill] sm:$0xff] %v17304_v55  ;;  %v17314_v53 = vcombine.high %v17300_v1, %v17300_v1  ;;  %v4626_v20 = vshrl.u32 %v17297_v2, 16  ;;  %v4631_v37 = vshll.u32 %v17300_v1, 16  ;;  %v4634_v5 = vshrl.u32 %v17300_v1, 16 }
 0x16a   : > { %22825 = vst [vmem:[#allocation426_spill] sm:$0xff] %v17310_v10  ;;  %v5801_v32 = vrot.slane %v5794_v0, %v14577_v23  ;;  %v5770_v13 = vcombine.low %v17304_v55, %v5769_v15  ;;  %v17324_v25 = vsel %vm14628_vm14, %v4618_v46, %v4623_v49  ;;  %v4639_v26 = vshll.u32 %v17310_v10, 16 }
 0x16b   : > { %22826 = vst [vmem:[#allocation427_spill] sm:$0xff] %v17324_v25  ;;  %v4642_v43 = vshrl.u32 %v17310_v10, 16  ;;  %v17333_v0 = vsel %vm14628_vm14, %v4626_v20, %v4631_v37  ;;  %v4647_v52 = vshll.u32 %v17314_v53, 16  ;;  %v1809_v55 = vcombine.low %v14620_v36, %v14710_v39  ;;  %v22842_v39 = vld [vmem:[#allocation60_spill] sm:$0xff]  ;;  %v22847_v36 = vld [vmem:[#allocation78_spill] sm:$0xff] }
 0x16c   : > { %5920 = vrot.lane.b32.xlu1 %v5801_v32, %s14450_s10  ;;  %22827 = vst [vmem:[#allocation428_spill] sm:$0xff] %v17333_v0  ;;  %v5777_v15 = vrot.slane %v5770_v13, %v14577_v23  ;;  %v17341_v46 = vsel %vm14628_vm14, %v4634_v5, %v4639_v26  ;;  %v1737_v5 = vcombine.low %v14602_v31, %v14670_v61 }
 0x16d   : > { %22828 = vst [vmem:[#allocation429_spill] sm:$0xff] %v17341_v46  ;;  %v17349_v20 = vsel %vm14628_vm14, %v4642_v43, %v4647_v52  ;;  %v5802_v37 = vcombine.low %v17324_v25, %v17341_v46  ;;  %v6023_v32 = vcombine.low %v14661_v58, %v14608_v33  ;;  %v6039_v52 = vcombine.low %v14727_v48, %v14742_v54  ;;  %v17371_v25 = vpop.permute.xlu0 %5842 }
 0x16e   : > { %22829 = vst [vmem:[#allocation430_spill] sm:$0xff] %v17349_v20  ;;  %5918 = vrot.lane.b32.xlu0 %v5777_v15, %s14450_s10  ;;  %v5803_v13 = vcombine.low %v17333_v0, %v17349_v20  ;;  %v17367_v49 = vrot.slane %v1737_v5, %v14577_v23  ;;  %v6040_v15 = vcombine.low %v14733_v51, %v14588_v27 }
 0x16f   : > { %v17359_v26 = vrot.slane %v5802_v37, %v14577_v23  ;;  %v6030_v31 = vrot.slane %v6023_v32, %v14577_v23  ;;  %v6047_v61 = vrot.slane %v6039_v52, %v14577_v23  ;;  %v17375_v37 = vpop.permute.xlu1 %5844  ;;  %v6063_v46 = vcombine.low %v14616_v35, %v14594_v29 }
 0x170   : > { %v5817_v43 = vrot.slane %v5803_v13, %v14577_v23  ;;  %v6054_v54 = vrot.slane %v6040_v15, %v14577_v23  ;;  %v1785_v13 = vcombine.low %v14612_v34, %v14591_v28  ;;  %v13749_v32 = vcombine.high %v14594_v29, %v14702_v17  ;;  %v22846_v28 = vld [vmem:[#allocation75_spill] sm:$0xff] }
 0x171   : > { %22830 = vst [vmem:[#allocation431_spill] sm:$0xff] %v17359_v26  ;;  %v6031_v5 = vcombine.low %v17367_v49, %v6030_v31  ;;  %v1833_v15 = vcombine.low %v14792_v42, %v14779_v19  ;;  %v17397_v9 = vrot.slane %v1809_v55, %v14577_v23 }
 0x172   : > { %v5818_v30 = vcombine.low %v17359_v26, %v5817_v43  ;;  %v6055_v0 = vcombine.low %v6047_v61, %v6054_v54  ;;  %v17390_v43 = vrot.slane %v1785_v13, %v14577_v23  ;;  %v6070_v26 = vrot.slane %v6063_v46, %v14577_v23 }
 0x173   : > { %v6038_v31 = vrot.slane %v6031_v5, %v14577_v23  ;;  %22831 = vst [vmem:[#allocation432_spill] sm:$0xff] %v17397_v9  ;;  %v6086_v20 = vrot.slane %v13749_v32, %v14577_v23  ;;  %v17403_v61 = vrot.slane %v1833_v15, %v14577_v23  ;;  %v6095_v54 = vcombine.low %v14775_v16, %v14788_v47  ;;  %v17409_v5 = vpop.permute.xlu0 %5846 }
 0x174   : > { %v5825_v52 = vrot.slane %v5818_v30, %v14577_v23  ;;  %v6062_v30 = vrot.slane %v6055_v0, %v14577_v23  ;;  %v13750_v13 = vcombine.high %v14779_v19, %v14782_v22  ;;  %v6071_v55 = vcombine.low %v17390_v43, %v6070_v26 }
 0x175   : > { %6919 = vrot.lane.b32.xlu1 %v6038_v31, %s14451_s27  ;;  %v6087_v46 = vcombine.low %v17397_v9, %v6086_v20  ;;  %v6112_v0 = vcombine.low %v14796_v44, %v14812_v56  ;;  %v1881_v32 = vcombine.low %v14926_v7, %v14944_v40  ;;  %v17421_v15 = vrot.slane %v6095_v54, %v14577_v23 }
 0x176   : > { %5922 = vrot.lane.b32.xlu0 %v5825_v52, %s14450_s10  ;;  %v17418_v52 = vpop.permute.xlu1 %5848  ;;  %v17424_v38 = vrot.slane %v13750_v13, %v14577_v23  ;;  %v6135_v31 = vcombine.low %v14929_v57, %v14948_v3  ;;  %v1905_v20 = vcombine.low %v14903_v8, %v14918_v14  ;;  %v6078_v26 = vrot.slane %v6071_v55, %v14577_v23  ;;  %s14452_s10 = smov 24  }
 0x177   : > { %22832 = vst [vmem:[#allocation433_spill] sm:$0xff] %v17421_v15  ;;  %v6094_v19 = vrot.slane %v6087_v46, %v14577_v23  ;;  %v17433_v40 = vrot.slane %v6112_v0, %v14577_v23  ;;  %v17436_v7 = vrot.slane %v1881_v32, %v14577_v23  ;;  %v6103_v54 = vcombine.low %v17403_v61, %v17421_v15  ;;  %v17459_v14 = vpop.permute.xlu0 %5850 }
 0x178   : > { %22833 = vst [vmem:[#allocation434_spill] sm:$0xff] %v17424_v38  ;;  %v6142_v3 = vrot.slane %v6135_v31, %v14577_v23  ;;  %v17443_v13 = vrot.slane %v1905_v20, %v14577_v23  ;;  %v6151_v55 = vcombine.low %v14907_v24, %v14899_v11  ;;  %v6167_v0 = vcombine.low %v14912_v6, %v15052_v62 }
 0x179   : > { %22834 = vst [vmem:[#allocation435_spill] sm:$0xff] %v17433_v40  ;;  %6923 = vrot.lane.b32.xlu1 %v6078_v26, %s14451_s27  ;;  %v6127_v46 = vcombine.low %v17424_v38, %v17433_v40  ;;  %v6110_v31 = vrot.slane %v6103_v54, %v14577_v23  ;;  %v1784_v38 = vcombine.low %v14588_v27, %v14616_v35 }
 0x17a   : > { %6921 = vrot.lane.b32.xlu0 %v6062_v30, %s14451_s27  ;;  %22835 = vst [vmem:[#allocation436_spill] sm:$0xff] %v17443_v13  ;;  %v22836_v30 = vld [vmem:[#allocation63_spill] sm:$0xff]  ;;  %v6143_v20 = vcombine.low %v17436_v7, %v6142_v3  ;;  %v17457_v15 = vrot.slane %v6151_v55, %v14577_v23  ;;  %v17463_v40 = vrot.slane %v6167_v0, %v14577_v23  ;;  %v17470_v54 = vpop.permute.xlu1 %5852 }
 0x17b   : > { %v6168_v32 = vcombine.low %v22836_v30, %v15014_v4  ;;  %v6134_v26 = vrot.slane %v6127_v46, %v14577_v23  ;;  %v22840_v46 = vld [vmem:[#allocation11_spill] sm:$0xff]  ;;  %v17484_v35 = vrot.slane %v1784_v38, %v14577_v23 }
 0x17c   : > { %22837 = vst [vmem:[#allocation63_spill] sm:$0xff] %v17457_v15  ;;  %22838 = vst [vmem:[#allocation437_spill] sm:$0xff] %v17463_v40  ;;  %v6150_v3 = vrot.slane %v6143_v20, %v14577_v23  ;;  %v6159_v55 = vcombine.low %v17443_v13, %v17457_v15  ;;  %v1736_v8 = vcombine.low %v22840_v46, %v14661_v58  ;;  %v22841_v0 = vld [vmem:[#allocation59_spill] sm:$0xff] }
 0x17d   : > { %v17466_v62 = vrot.slane %v6168_v32, %v14577_v23  ;;  %v1953_v42 = vcombine.low %v22842_v39, %v22841_v0  ;;  %6927 = vrot.lane.b32.xlu1 %v6110_v31, %s14451_s27  ;;  %22843 = vst [vmem:[#allocation11_spill] sm:$0xff] %v17484_v35  ;;  %v22845_v32 = vld [vmem:[#allocation61_spill] sm:$0xff]  ;;  %v1977_v15 = vcombine.low %v22847_v36, %v22846_v28  ;;  %v17513_v36 = vpop.permute.xlu0 %5854  ;;  %v22857_v39 = vld [vmem:[#allocation76_spill] sm:$0xff] }
 0x17e   : > { %6925 = vrot.lane.b32.xlu0 %v6094_v19, %s14451_s27  ;;  %v22844_v19 = vld [vmem:[#allocation62_spill] sm:$0xff]  ;;  %v6166_v34 = vrot.slane %v6159_v55, %v14577_v23  ;;  %v1744_v58 = vrot.slane %v1736_v8, %v14577_v23  ;;  %v22848_v31 = vld [vmem:[#allocation73_spill] sm:$0xff]  ;;  %v1800_v38 = vcombine.low %v17484_v35, %v17390_v43  ;;  %v1808_v55 = vcombine.low %v14594_v29, %v14702_v17  ;;  %v17525_v17 = vpop.permute.xlu1 %5856  ;;  %v22875_v35 = vld [vmem:[#allocation124_spill] sm:$0xff] }
 0x17f   : > { %22839 = vst [vmem:[#allocation438_spill] sm:$0xff] %v17466_v62  ;;  %v6183_v27 = vcombine.low %v17463_v40, %v17466_v62  ;;  %v6191_v20 = vcombine.low %v22845_v32, %v22844_v19  ;;  %v17493_v46 = vrot.slane %v1953_v42, %v14577_v23  ;;  %v13751_v0 = vcombine.high %v22844_v19, %v22848_v31 }
 0x180   : > { %v17504_v28 = vrot.slane %v1977_v15, %v14577_v23  ;;  %v1752_v8 = vcombine.low %v1744_v58, %v17367_v49  ;;  %v17517_v43 = vrot.slane %v1800_v38, %v14577_v23 }
 0x181   : > { %v6190_v62 = vrot.slane %v6183_v27, %v14577_v23  ;;  %v17501_v40 = vrot.slane %v6191_v20, %v14577_v23  ;;  %v6214_v42 = vrot.slane %v13751_v0, %v14577_v23  ;;  %v1760_v27 = vcombine.low %v14608_v33, %v14733_v51  ;;  %6931 = vrot.lane.b32.xlu1 %v6150_v3, %s14451_s27  ;;  %v22853_v0 = vld [vmem:[#allocation80_spill] sm:$0xff]  ;;  %v22854_v20 = vld [vmem:[#allocation79_spill] sm:$0xff] }
 0x182   : > { %22850 = vst [vmem:[#allocation439_spill] sm:$0xff] %v17504_v28  ;;  %6929 = vrot.lane.b32.xlu0 %v6134_v26, %s14451_s27  ;;  %22851 = vst [vmem:[#allocation440_spill] sm:$0xff] %v17517_v43  ;;  %v22852_v26 = vld [vmem:[#allocation8_spill] sm:$0xff]  ;;  %v2001_v58 = vcombine.low %v22854_v20, %v22853_v0  ;;  %v1759_v33 = vrot.slane %v1752_v8, %v14577_v23  ;;  %v17530_v3 = vrot.slane %v1808_v55, %v14577_v23  ;;  %v22856_v20 = vld [vmem:[#allocation81_spill] sm:$0xff] }
 0x183   : > { %22849 = vst [vmem:[#allocation61_spill] sm:$0xff] %v17501_v40  ;;  %v6199_v15 = vcombine.low %v17493_v46, %v17501_v40  ;;  %v1761_v49 = vcombine.low %v14727_v48, %v22852_v26  ;;  %v6215_v51 = vcombine.low %v17504_v28, %v6214_v42  ;;  %v1768_v38 = vrot.slane %v1760_v27, %v14577_v23  ;;  %v22858_v27 = vld [vmem:[#allocation96_spill] sm:$0xff] }
 0x184   : > { %22855 = vst [vmem:[#allocation441_spill] sm:$0xff] %v17530_v3  ;;  %2964 = vst.msk [vmem:[#allocation2 + $0x8] sm:$0xf] %vm2961_vm15, %v17517_v43  ;;  %v17538_v29 = vrot.slane %v2001_v58, %v14577_v23  ;;  %v6223_v8 = vcombine.low %v22857_v39, %v22856_v20  ;;  %v1824_v55 = vcombine.low %v17530_v3, %v17397_v9  ;;  %v22860_v58 = vld [vmem:[#allocation92_spill] sm:$0xff] }
 0x185   : > { %v6206_v40 = vrot.slane %v6199_v15, %v14577_v23  ;;  %v1775_v48 = vrot.slane %v1761_v49, %v14577_v23  ;;  %5976 = vst.msk [vmem:[#allocation2 + $0x8] sm:$0xf] %vm5973_vm0, %v17175_v18  ;;  %v6222_v42 = vrot.slane %v6215_v51, %v14577_v23  ;;  %v13752_v15 = vcombine.high %v22853_v0, %v22858_v27  ;;  %v22859_v49 = vld [vmem:[#allocation97_spill] sm:$0xff] }
 0x186   : > { %6933 = vrot.lane.b32.xlu0 %v6166_v34, %s14451_s27  ;;  %2962 = vst.msk [vmem:[#allocation2] sm:$0xf] %vm2961_vm15, %v1759_v33  ;;  %v6240_v43 = vcombine.low %v22860_v58, %v22859_v49  ;;  %6935 = vrot.lane.b32.xlu1 %v6190_v62, %s14451_s27  ;;  %v17557_v18 = vrot.slane %v6223_v8, %v14577_v23  ;;  %v22862_v51 = vld [vmem:[#allocation29_spill] sm:$0xff] }
 0x187   : > { %5974 = vst.msk [vmem:[#allocation2] sm:$0xf] %vm5973_vm0, %v17166_v63  ;;  %v1776_v34 = vcombine.low %v1768_v38, %v1775_v48  ;;  %v1856_v33 = vcombine.low %v14788_v47, %v14796_v44  ;;  %v1857_v9 = vcombine.low %v14782_v22, %v22862_v51  ;;  %v1831_v0 = vrot.slane %v1824_v55, %v14577_v23  ;;  %v22865_v63 = vld [vmem:[#allocation22_spill] sm:$0xff]  ;;  %v17572_v48 = vpop.permute.xlu0 %5858  ;;  %v22870_v51 = vld [vmem:[#allocation100_spill] sm:$0xff] }
 0x188   : > { %22861 = vst [vmem:[#allocation81_spill] sm:$0xff] %v17557_v18  ;;  %v17565_v3 = vrot.slane %v13752_v15, %v14577_v23  ;;  %v17568_v62 = vrot.slane %v6240_v43, %v14577_v23  ;;  %v1832_v38 = vcombine.low %v22865_v63, %v14775_v16  ;;  %v6231_v47 = vcombine.low %v17538_v29, %v17557_v18  ;;  %v17581_v15 = vpop.permute.xlu1 %5860  ;;  %v22869_v63 = vld [vmem:[#allocation94_spill] sm:$0xff] }
 0x189   : > { %v1783_v8 = vrot.slane %v1776_v34, %v14577_v23  ;;  %v17578_v44 = vrot.slane %v1856_v33, %v14577_v23  ;;  %v1871_v55 = vrot.slane %v1857_v9, %v14577_v23  ;;  %2965 = vst.msk [vmem:[#allocation2 + $0xc] sm:$0xf] %vm2961_vm15, %v1831_v0  ;;  %v22868_v34 = vld [vmem:[#allocation99_spill] sm:$0xff] }
 0x18a   : > { %22863 = vst [vmem:[#allocation76_spill] sm:$0xff] %v17565_v3  ;;  %22864 = vst [vmem:[#allocation96_spill] sm:$0xff] %v17568_v62  ;;  %6937 = vrot.lane.b32.xlu0 %v6206_v40, %s14451_s27  ;;  %v6255_v16 = vcombine.low %v17565_v3, %v17568_v62  ;;  %v17588_v43 = vrot.slane %v1832_v38, %v14577_v23  ;;  %v2049_v18 = vcombine.low %v22869_v63, %v22868_v34  ;;  %v22871_v33 = vld [vmem:[#allocation95_spill] sm:$0xff]  ;;  %v22876_v63 = vld [vmem:[#allocation413_spill] sm:$0xff] }
 0x18b   : > { %22866 = vst [vmem:[#allocation97_spill] sm:$0xff] %v17578_v44  ;;  %v6263_v22 = vcombine.low %v22871_v33, %v22870_v51  ;;  %6939 = vrot.lane.b32.xlu1 %v6222_v42, %s14451_s27  ;;  %5977 = vst.msk [vmem:[#allocation2 + $0xc] sm:$0xf] %vm5973_vm0, %v17227_v60  ;;  %v6238_v40 = vrot.slane %v6231_v47, %v14577_v23  ;;  %v1872_v9 = vcombine.low %v17578_v44, %v1871_v55  ;;  %v22872_v0 = vld [vmem:[#allocation127_spill] sm:$0xff]  ;;  %v17631_v44 = vpop.permute.xlu0 %5862 }
 0x18c   : > { %22867 = vst [vmem:[#allocation92_spill] sm:$0xff] %v17588_v43  ;;  %2963 = vst.msk [vmem:[#allocation2 + $0x4] sm:$0xf] %vm2961_vm15, %v1783_v8  ;;  %v22873_v38 = vld [vmem:[#allocation123_spill] sm:$0xff]  ;;  %v6262_v42 = vrot.slane %v6255_v16, %v14577_v23  ;;  %v1848_v60 = vcombine.low %v17588_v43, %v17403_v61  ;;  %v17610_v51 = vrot.slane %v2049_v18, %v14577_v23  ;;  %v22881_v16 = vld [vmem:[#allocation117_spill] sm:$0xff]  ;;  %v17644_v43 = vpop.permute.xlu1 %5864 }
 0x18d   : > { %v2073_v62 = vcombine.low %v22873_v38, %v22872_v0  ;;  %v22874_v3 = vld [vmem:[#allocation111_spill] sm:$0xff]  ;;  %5975 = vst.msk [vmem:[#allocation2 + $0x4] sm:$0xf] %vm5973_vm0, %v22876_v63  ;;  %v6270_v8 = vrot.slane %v6263_v22, %v14577_v23  ;;  %v1879_v47 = vrot.slane %v1872_v9, %v14577_v23  ;;  %v22879_v63 = vld [vmem:[#allocation40_spill] sm:$0xff]  ;;  %v1880_v22 = vcombine.low %v14812_v56, %v14929_v57 }
 0x18e   : > { %v6279_v34 = vcombine.low %v22875_v35, %v22874_v3  ;;  %v1904_v38 = vcombine.low %v22879_v63, %v14907_v24  ;;  %6941 = vrot.lane.b32.xlu0 %v6238_v40, %s14451_s27  ;;  %v17624_v61 = vrot.slane %v1848_v60, %v14577_v23  ;;  %v22882_v9 = vld [vmem:[#allocation112_spill] sm:$0xff]  ;;  %v22885_v60 = vld [vmem:[#allocation115_spill] sm:$0xff]  ;;  %v22886_v63 = vld [vmem:[#allocation125_spill] sm:$0xff] }
 0x18f   : > { %v17615_v55 = vrot.slane %v2073_v62, %v14577_v23  ;;  %v6271_v18 = vcombine.low %v17610_v51, %v6270_v8  ;;  %v6295_v62 = vcombine.low %v22882_v9, %v22881_v16  ;;  %6943 = vrot.lane.b32.xlu1 %v6262_v42, %s14451_s27  ;;  %2967 = vst.msk [vmem:[#allocation2 + $0x14] sm:$0xf] %vm2961_vm15, %v1879_v47  ;;  %v22884_v40 = vld [vmem:[#allocation116_spill] sm:$0xff] }
 0x190   : > { %v17618_v0 = vrot.slane %v6279_v34, %v14577_v23  ;;  %22880 = vst [vmem:[#allocation124_spill] sm:$0xff] %v17624_v61  ;;  %v17638_v34 = vrot.slane %v1904_v38, %v14577_v23  ;;  %v6296_v8 = vcombine.low %v22885_v60, %v22884_v40  ;;  %v22887_v56 = vld [vmem:[#allocation140_spill] sm:$0xff]  ;;  %5979 = vst.msk [vmem:[#allocation2 + $0x14] sm:$0xf] %vm5973_vm0, %v17290_v12 }
 0x191   : > { %22877 = vst [vmem:[#allocation100_spill] sm:$0xff] %v17615_v55  ;;  %v2121_v57 = vcombine.low %v22887_v56, %v22886_v63  ;;  %2966 = vst.msk [vmem:[#allocation2 + $0x10] sm:$0xf] %vm2961_vm15, %v17624_v61  ;;  %v6278_v42 = vrot.slane %v6271_v18, %v14577_v23  ;;  %v17652_v47 = vrot.slane %v1880_v22, %v14577_v23  ;;  %v22890_v16 = vld [vmem:[#allocation128_spill] sm:$0xff]  ;;  %v22896_v56 = vld [vmem:[#allocation131_spill] sm:$0xff] }
 0x192   : > { %22878 = vst [vmem:[#allocation111_spill] sm:$0xff] %v17618_v0  ;;  %v6287_v24 = vcombine.low %v17615_v55, %v17618_v0  ;;  %22883 = vst [vmem:[#allocation413_spill] sm:$0xff] %v17638_v34  ;;  %v17655_v38 = vrot.slane %v6295_v62, %v14577_v23  ;;  %v22891_v0 = vld [vmem:[#allocation143_spill] sm:$0xff]  ;;  %v1920_v12 = vcombine.low %v17638_v34, %v17443_v13 }
 0x193   : > { %22888 = vst [vmem:[#allocation117_spill] sm:$0xff] %v17652_v47  ;;  %v6319_v26 = vcombine.low %v22891_v0, %v22890_v16  ;;  %5978 = vst.msk [vmem:[#allocation2 + $0x10] sm:$0xf] %vm5973_vm0, %v17279_v45  ;;  %v17665_v61 = vrot.slane %v6296_v8, %v14577_v23  ;;  %v17668_v18 = vrot.slane %v2121_v57, %v14577_v23  ;;  %6945 = vrot.lane.b32.xlu0 %v6278_v42, %s14451_s27  ;;  %v22894_v42 = vld [vmem:[#allocation57_spill] sm:$0xff] }
 0x194   : > { %22889 = vst [vmem:[#allocation116_spill] sm:$0xff] %v17655_v38  ;;  %v6294_v63 = vrot.slane %v6287_v24, %v14577_v23  ;;  %v1896_v22 = vcombine.low %v17652_v47, %v17436_v7  ;;  %v1952_v45 = vcombine.low %v15014_v4, %v22845_v32  ;;  %v1928_v24 = vcombine.low %v14899_v11, %v22836_v30  ;;  %v22895_v7 = vld [vmem:[#allocation135_spill] sm:$0xff]  ;;  %v17699_v32 = vpop.permute.xlu0 %5866 }
 0x195   : > { %22892 = vst [vmem:[#allocation115_spill] sm:$0xff] %v17665_v61  ;;  %v17674_v62 = vrot.slane %v6319_v26, %v14577_v23  ;;  %v1927_v8 = vrot.slane %v1920_v12, %v14577_v23  ;;  %v6311_v57 = vcombine.low %v17655_v38, %v17665_v61  ;;  %v1929_v13 = vcombine.low %v14912_v6, %v22894_v42  ;;  %v22901_v61 = vld [vmem:[#allocation132_spill] sm:$0xff]  ;;  %v17709_v38 = vpop.permute.xlu1 %5868 }
 0x196   : > { %6947 = vrot.lane.b32.xlu1 %v6294_v63, %s14451_s27  ;;  %v2145_v26 = vcombine.low %v22896_v56, %v22895_v7  ;;  %v17689_v34 = vrot.slane %v1896_v22, %v14577_v23  ;;  %v17694_v11 = vrot.slane %v1952_v45, %v14577_v23  ;;  %v17697_v30 = vrot.slane %v1928_v24, %v14577_v23  ;;  %v22905_v7 = vld [vmem:[#allocation149_spill] sm:$0xff] }
 0x197   : > { %22893 = vst [vmem:[#allocation143_spill] sm:$0xff] %v17674_v62  ;;  %v6327_v4 = vcombine.low %v17668_v18, %v17674_v62  ;;  %2969 = vst.msk [vmem:[#allocation2 + $0x1c] sm:$0xf] %vm2961_vm15, %v1927_v8  ;;  %v6318_v63 = vrot.slane %v6311_v57, %v14577_v23  ;;  %v1943_v12 = vrot.slane %v1929_v13, %v14577_v23  ;;  %v22902_v13 = vld [vmem:[#allocation151_spill] sm:$0xff]  ;;  %v22903_v8 = vld [vmem:[#allocation156_spill] sm:$0xff] }
 0x198   : > { %22897 = vst [vmem:[#allocation442_spill] sm:$0xff] %v17689_v34  ;;  %22898 = vst [vmem:[#allocation443_spill] sm:$0xff] %v17694_v11  ;;  %v17705_v22 = vrot.slane %v2145_v26, %v14577_v23  ;;  %v13753_v62 = vcombine.high %v22890_v16, %v22901_v61  ;;  %v1968_v24 = vcombine.low %v17694_v11, %v17493_v46  ;;  %v22904_v26 = vld [vmem:[#allocation152_spill] sm:$0xff] }
 0x199   : > { %22899 = vst [vmem:[#allocation444_spill] sm:$0xff] %v17697_v30  ;;  %5981 = vst.msk [vmem:[#allocation2 + $0x1c] sm:$0xf] %vm5973_vm0, %v17336_v21  ;;  %v6334_v45 = vrot.slane %v6327_v4, %v14577_v23  ;;  %v2169_v57 = vcombine.low %v22903_v8, %v22902_v13  ;;  %v6351_v56 = vcombine.low %v22905_v7, %v22904_v26  ;;  %6949 = vrot.lane.b32.xlu0 %v6318_v63, %s14451_s27  ;;  %v22906_v4 = vld [vmem:[#allocation77_spill] sm:$0xff]  ;;  %v22909_v63 = vld [vmem:[#allocation154_spill] sm:$0xff]  ;;  %v17774_v47 = vpop.permute.xlu1 %5872 }
 0x19a   : > { %22900 = vst [vmem:[#allocation445_spill] sm:$0xff] %v17705_v22  ;;  %2968 = vst.msk [vmem:[#allocation2 + $0x18] sm:$0xf] %vm2961_vm15, %v17689_v34  ;;  %v1944_v21 = vcombine.low %v17697_v30, %v1943_v12  ;;  %v6342_v34 = vrot.slane %v13753_v62, %v14577_v23  ;;  %v2000_v42 = vcombine.low %v22906_v4, %v22857_v39  ;;  %v22918_v30 = vld [vmem:[#allocation181_spill] sm:$0xff] }
 0x19b   : > { %5980 = vst.msk [vmem:[#allocation2 + $0x18] sm:$0xf] %vm5973_vm0, %v17328_v50  ;;  %v1976_v46 = vcombine.low %v22844_v19, %v22848_v31  ;;  %6951 = vrot.lane.b32.xlu1 %v6334_v45, %s14451_s27  ;;  %v17733_v8 = vrot.slane %v1968_v24, %v14577_v23  ;;  %v17736_v11 = vrot.slane %v2169_v57, %v14577_v23  ;;  %v22912_v24 = vld [vmem:[#allocation159_spill] sm:$0xff]  ;;  %v22913_v57 = vld [vmem:[#allocation157_spill] sm:$0xff] }
 0x19c   : > { %v17739_v50 = vrot.slane %v6351_v56, %v14577_v23  ;;  %v13754_v62 = vcombine.high %v22902_v13, %v22909_v63  ;;  %v1951_v12 = vrot.slane %v1944_v21, %v14577_v23  ;;  %v6343_v39 = vcombine.low %v17705_v22, %v6342_v34  ;;  %v22915_v21 = vld [vmem:[#allocation182_spill] sm:$0xff] }
 0x19d   : > { %22907 = vst [vmem:[#allocation152_spill] sm:$0xff] %v17733_v8  ;;  %v17746_v31 = vrot.slane %v2000_v42, %v14577_v23  ;;  %v17749_v45 = vrot.slane %v1976_v46, %v14577_v23  ;;  %2971 = vst.msk [vmem:[#allocation2 + $0x24] sm:$0xf] %vm2961_vm15, %v17733_v8  ;;  %v6368_v4 = vcombine.low %v22913_v57, %v22912_v24  ;;  %v22916_v34 = vld [vmem:[#allocation178_spill] sm:$0xff]  ;;  %v17762_v42 = vpop.permute.xlu0 %5870 }
 0x19e   : > { %22908 = vst [vmem:[#allocation149_spill] sm:$0xff] %v17739_v50  ;;  %v6359_v56 = vcombine.low %v17736_v11, %v17739_v50  ;;  %v17758_v19 = vrot.slane %v13754_v62, %v14577_v23  ;;  %v2217_v13 = vcombine.low %v22916_v34, %v22915_v21  ;;  %5983 = vst.msk [vmem:[#allocation2 + $0x24] sm:$0xf] %vm5973_vm0, %v17375_v37  ;;  %v22917_v62 = vld [vmem:[#allocation186_spill] sm:$0xff]  ;;  %v22933_v34 = vld [vmem:[#allocation200_spill] sm:$0xff] }
 0x19f   : > { %22910 = vst [vmem:[#allocation446_spill] sm:$0xff] %v17746_v31  ;;  %22911 = vst [vmem:[#allocation447_spill] sm:$0xff] %v17749_v45  ;;  %v6350_v46 = vrot.slane %v6343_v39, %v14577_v23  ;;  %v2016_v50 = vcombine.low %v17746_v31, %v17538_v29  ;;  %v1992_v8 = vcombine.low %v17749_v45, %v17504_v28  ;;  %v17838_v31 = vpop.permute.xlu1 %5876  ;;  %v22940_v45 = vld [vmem:[#allocation190_spill] sm:$0xff] }
 0x1a0   : > { %22914 = vst [vmem:[#allocation159_spill] sm:$0xff] %v17758_v19  ;;  %2970 = vst.msk [vmem:[#allocation2 + $0x20] sm:$0xf] %vm2961_vm15, %v1951_v12  ;;  %v6391_v6 = vcombine.low %v22918_v30, %v22917_v62  ;;  %v6366_v37 = vrot.slane %v6359_v56, %v14577_v23  ;;  %v17780_v12 = vrot.slane %v6368_v4, %v14577_v23 }
 0x1a1   : > { %5982 = vst.msk [vmem:[#allocation2 + $0x20] sm:$0xf] %vm5973_vm0, %v17371_v25  ;;  %v17783_v39 = vrot.slane %v2217_v13, %v14577_v23  ;;  %v2048_v29 = vcombine.low %v22859_v49, %v22871_v33  ;;  %6953 = vrot.lane.b32.xlu0 %v6350_v46, %s14451_s27  ;;  %v17789_v62 = vrot.slane %v2016_v50, %v14577_v23  ;;  %v22922_v49 = vld [vmem:[#allocation101_spill] sm:$0xff]  ;;  %v22923_v50 = vld [vmem:[#allocation174_spill] sm:$0xff]  ;;  %v22924_v33 = vld [vmem:[#allocation171_spill] sm:$0xff] }
 0x1a2   : > { %22919 = vst [vmem:[#allocation157_spill] sm:$0xff] %v17780_v12  ;;  %v1999_v28 = vrot.slane %v1992_v8, %v14577_v23  ;;  %v6398_v25 = vrot.slane %v6391_v6, %v14577_v23  ;;  %v2024_v56 = vcombine.low %v22856_v20, %v22860_v58  ;;  %6955 = vrot.lane.b32.xlu1 %v6366_v37, %s14451_s27  ;;  %v22926_v58 = vld [vmem:[#allocation172_spill] sm:$0xff]  ;;  %v22927_v8 = vld [vmem:[#allocation173_spill] sm:$0xff] }
 0x1a3   : > { %22920 = vst [vmem:[#allocation186_spill] sm:$0xff] %v17789_v62  ;;  %v6383_v13 = vcombine.low %v17758_v19, %v17780_v12  ;;  %v17799_v4 = vrot.slane %v2048_v29, %v14577_v23  ;;  %v2025_v46 = vcombine.low %v22858_v27, %v22922_v49  ;;  %v2241_v21 = vcombine.low %v22924_v33, %v22923_v50  ;;  %v22928_v29 = vld [vmem:[#allocation201_spill] sm:$0xff]  ;;  %v22929_v12 = vld [vmem:[#allocation175_spill] sm:$0xff]  ;;  %v17827_v50 = vpop.permute.xlu0 %5874 }
 0x1a4   : > { %2973 = vst.msk [vmem:[#allocation2 + $0x2c] sm:$0xf] %vm2961_vm15, %v17789_v62  ;;  %2972 = vst.msk [vmem:[#allocation2 + $0x28] sm:$0xf] %vm2961_vm15, %v1999_v28  ;;  %v6399_v6 = vcombine.low %v17783_v39, %v6398_v25  ;;  %v17810_v20 = vrot.slane %v2024_v56, %v14577_v23  ;;  %v6407_v37 = vcombine.low %v22927_v8, %v22926_v58  ;;  %v22939_v49 = vld [vmem:[#allocation193_spill] sm:$0xff] }
 0x1a5   : > { %22921 = vst [vmem:[#allocation448_spill] sm:$0xff] %v17799_v4  ;;  %v6423_v19 = vcombine.low %v22929_v12, %v22928_v29  ;;  %5985 = vst.msk [vmem:[#allocation2 + $0x2c] sm:$0xf] %vm5973_vm0, %v17418_v52  ;;  %v6390_v62 = vrot.slane %v6383_v13, %v14577_v23  ;;  %v2064_v28 = vcombine.low %v17799_v4, %v17610_v51  ;;  %v22932_v52 = vld [vmem:[#allocation184_spill] sm:$0xff] }
 0x1a6   : > { %22925 = vst [vmem:[#allocation449_spill] sm:$0xff] %v17810_v20  ;;  %5984 = vst.msk [vmem:[#allocation2 + $0x28] sm:$0xf] %vm5973_vm0, %v17409_v5  ;;  %v2039_v25 = vrot.slane %v2025_v46, %v14577_v23  ;;  %v17825_v56 = vrot.slane %v2241_v21, %v14577_v23  ;;  %v6406_v29 = vrot.slane %v6399_v6, %v14577_v23  ;;  %v22936_v6 = vld [vmem:[#allocation114_spill] sm:$0xff] }
 0x1a7   : > { %v17831_v33 = vrot.slane %v6407_v37, %v14577_v23  ;;  %v6424_v5 = vcombine.low %v22933_v34, %v22932_v52  ;;  %v17836_v13 = vrot.slane %v6423_v19, %v14577_v23  ;;  %6957 = vrot.lane.b32.xlu0 %v6390_v62, %s14451_s27  ;;  %v17842_v51 = vrot.slane %v2064_v28, %v14577_v23  ;;  %v22938_v62 = vld [vmem:[#allocation119_spill] sm:$0xff] }
 0x1a8   : > { %22930 = vst [vmem:[#allocation172_spill] sm:$0xff] %v17825_v56  ;;  %v2040_v21 = vcombine.low %v17810_v20, %v2039_v25  ;;  %v2096_v46 = vcombine.low %v22874_v3, %v22885_v60  ;;  %v2097_v37 = vcombine.low %v22882_v9, %v22936_v6  ;;  %6959 = vrot.lane.b32.xlu1 %v6406_v29, %s14451_s27  ;;  %v22943_v6 = vld [vmem:[#allocation191_spill] sm:$0xff] }
 0x1a9   : > { %22931 = vst [vmem:[#allocation173_spill] sm:$0xff] %v17831_v33  ;;  %22934 = vst [vmem:[#allocation201_spill] sm:$0xff] %v17836_v13  ;;  %v6415_v19 = vcombine.low %v17825_v56, %v17831_v33  ;;  %v17853_v4 = vrot.slane %v6424_v5, %v14577_v23  ;;  %v2072_v28 = vcombine.low %v22938_v62, %v22875_v35  ;;  %v22942_v33 = vld [vmem:[#allocation195_spill] sm:$0xff] }
 0x1aa   : > { %22935 = vst [vmem:[#allocation184_spill] sm:$0xff] %v17842_v51  ;;  %v2289_v25 = vcombine.low %v22940_v45, %v22939_v49  ;;  %2975 = vst.msk [vmem:[#allocation2 + $0x34] sm:$0xf] %vm2961_vm15, %v17842_v51  ;;  %v2047_v3 = vrot.slane %v2040_v21, %v14577_v23  ;;  %v17863_v60 = vrot.slane %v2096_v46, %v14577_v23  ;;  %v22946_v49 = vld [vmem:[#allocation210_spill] sm:$0xff] }
 0x1ab   : > { %22937 = vst [vmem:[#allocation200_spill] sm:$0xff] %v17853_v4  ;;  %v2111_v29 = vrot.slane %v2097_v37, %v14577_v23  ;;  %v6447_v5 = vcombine.low %v22943_v6, %v22942_v33  ;;  %5987 = vst.msk [vmem:[#allocation2 + $0x34] sm:$0xf] %vm5973_vm0, %v17470_v54  ;;  %v6422_v35 = vrot.slane %v6415_v19, %v14577_v23  ;;  %v22947_v54 = vld [vmem:[#allocation196_spill] sm:$0xff] }
 0x1ac   : > { %22941 = vst [vmem:[#allocation450_spill] sm:$0xff] %v17863_v60  ;;  %v6439_v62 = vcombine.low %v17836_v13, %v17853_v4  ;;  %v17874_v51 = vrot.slane %v2072_v28, %v14577_v23  ;;  %v17877_v21 = vrot.slane %v2289_v25, %v14577_v23  ;;  %2974 = vst.msk [vmem:[#allocation2 + $0x30] sm:$0xf] %vm2961_vm15, %v2047_v3  ;;  %v22948_v19 = vld [vmem:[#allocation208_spill] sm:$0xff]  ;;  %v17888_v4 = vpop.permute.xlu0 %5878 }
 0x1ad   : > { %v2112_v46 = vcombine.low %v17863_v60, %v2111_v29  ;;  %v17882_v37 = vrot.slane %v6447_v5, %v14577_v23  ;;  %v2313_v45 = vcombine.low %v22947_v54, %v22946_v49  ;;  %v13755_v9 = vcombine.high %v22942_v33, %v22948_v19  ;;  %5986 = vst.msk [vmem:[#allocation2 + $0x30] sm:$0xf] %vm5973_vm0, %v17459_v14  ;;  %v17900_v29 = vpop.permute.xlu1 %5880  ;;  %v22955_v54 = vld [vmem:[#allocation227_spill] sm:$0xff] }
 0x1ae   : > { %22944 = vst [vmem:[#allocation191_spill] sm:$0xff] %v17874_v51  ;;  %6961 = vrot.lane.b32.xlu0 %v6422_v35, %s14451_s27  ;;  %v6446_v28 = vrot.slane %v6439_v62, %v14577_v23  ;;  %v2088_v25 = vcombine.low %v17874_v51, %v17615_v55  ;;  %v2144_v3 = vcombine.low %v22890_v16, %v22901_v61  ;;  %v22954_v16 = vld [vmem:[#allocation214_spill] sm:$0xff]  ;;  %v22966_v51 = vld [vmem:[#allocation244_spill] sm:$0xff] }
 0x1af   : > { %22945 = vst [vmem:[#allocation451_spill] sm:$0xff] %v17882_v37  ;;  %v2120_v49 = vcombine.low %v22884_v40, %v22891_v0  ;;  %v2119_v5 = vrot.slane %v2112_v46, %v14577_v23  ;;  %v6455_v14 = vcombine.low %v17877_v21, %v17882_v37  ;;  %v17906_v35 = vrot.slane %v2313_v45, %v14577_v23  ;;  %v22951_v40 = vld [vmem:[#allocation216_spill] sm:$0xff]  ;;  %v22952_v46 = vld [vmem:[#allocation213_spill] sm:$0xff] }
 0x1b0   : > { %v6470_v62 = vrot.slane %v13755_v9, %v14577_v23  ;;  %6963 = vrot.lane.b32.xlu1 %v6446_v28, %s14451_s27  ;;  %v2095_v13 = vrot.slane %v2088_v25, %v14577_v23  ;;  %v17912_v61 = vrot.slane %v2144_v3, %v14577_v23  ;;  %v2337_v55 = vcombine.low %v22952_v46, %v22951_v40  ;;  %v22953_v9 = vld [vmem:[#allocation217_spill] sm:$0xff] }
 0x1b1   : > { %v17915_v0 = vrot.slane %v2120_v49, %v14577_v23  ;;  %2977 = vst.msk [vmem:[#allocation2 + $0x3c] sm:$0xf] %vm2961_vm15, %v2119_v5  ;;  %v6462_v45 = vrot.slane %v6455_v14, %v14577_v23  ;;  %v6479_v28 = vcombine.low %v22954_v16, %v22953_v9  ;;  %v13756_v25 = vcombine.high %v22951_v40, %v22955_v54  ;;  %v22956_v14 = vld [vmem:[#allocation223_spill] sm:$0xff] }
 0x1b2   : > { %22949 = vst [vmem:[#allocation210_spill] sm:$0xff] %v17912_v61  ;;  %v6471_v37 = vcombine.low %v17906_v35, %v6470_v62  ;;  %5989 = vst.msk [vmem:[#allocation2 + $0x3c] sm:$0xf] %vm5973_vm0, %v17525_v17  ;;  %v2160_v3 = vcombine.low %v17912_v61, %v17705_v22  ;;  %v17934_v5 = vrot.slane %v2337_v55, %v14577_v23  ;;  %v22957_v62 = vld [vmem:[#allocation220_spill] sm:$0xff]  ;;  %v17946_v22 = vpop.permute.xlu0 %5882 }
 0x1b3   : > { %22950 = vst [vmem:[#allocation208_spill] sm:$0xff] %v17915_v0  ;;  %2976 = vst.msk [vmem:[#allocation2 + $0x38] sm:$0xf] %vm2961_vm15, %v2095_v13  ;;  %v2136_v49 = vcombine.low %v17915_v0, %v17668_v18  ;;  %v6496_v46 = vcombine.low %v22957_v62, %v22956_v14  ;;  %6965 = vrot.lane.b32.xlu0 %v6462_v45, %s14451_s27  ;;  %v6486_v13 = vrot.slane %v6479_v28, %v14577_v23  ;;  %v22959_v0 = vld [vmem:[#allocation158_spill] sm:$0xff] }
 0x1b4   : > { %5988 = vst.msk [vmem:[#allocation2 + $0x38] sm:$0xf] %vm5973_vm0, %v17513_v36  ;;  %v6478_v17 = vrot.slane %v6471_v37, %v14577_v23  ;;  %v6503_v40 = vrot.slane %v13756_v25, %v14577_v23  ;;  %v2192_v18 = vcombine.low %v22904_v26, %v22913_v57  ;;  %v2167_v55 = vrot.slane %v2160_v3, %v14577_v23  ;;  %v17955_v37 = vpop.permute.xlu1 %5884  ;;  %v22961_v57 = vld [vmem:[#allocation136_spill] sm:$0xff]  ;;  %v22962_v3 = vld [vmem:[#allocation222_spill] sm:$0xff] }
 0x1b5   : > { %v17950_v61 = vrot.slane %v2136_v49, %v14577_v23  ;;  %v6510_v36 = vrot.slane %v6496_v46, %v14577_v23  ;;  %v2193_v45 = vcombine.low %v22909_v63, %v22959_v0  ;;  %v6487_v28 = vcombine.low %v17934_v5, %v6486_v13  ;;  %v22963_v49 = vld [vmem:[#allocation219_spill] sm:$0xff]  ;;  %v22965_v63 = vld [vmem:[#allocation221_spill] sm:$0xff] }
 0x1b6   : > { %6967 = vrot.lane.b32.xlu1 %v6478_v17, %s14451_s27  ;;  %v17960_v26 = vrot.slane %v2192_v18, %v14577_v23  ;;  %v2168_v25 = vcombine.low %v22961_v57, %v22905_v7  ;;  %v2385_v60 = vcombine.low %v22963_v49, %v22962_v3  ;;  %2979 = vst.msk [vmem:[#allocation2 + $0x44] sm:$0xf] %vm2961_vm15, %v2167_v55  ;;  %v22964_v17 = vld [vmem:[#allocation224_spill] sm:$0xff]  ;;  %v22967_v18 = vld [vmem:[#allocation237_spill] sm:$0xff]  ;;  %v22975_v3 = vld [vmem:[#allocation235_spill] sm:$0xff] }
 0x1b7   : > { %22958 = vst [vmem:[#allocation216_spill] sm:$0xff] %v17950_v61  ;;  %2978 = vst.msk [vmem:[#allocation2 + $0x40] sm:$0xf] %vm2961_vm15, %v17950_v61  ;;  %v6511_v46 = vcombine.low %v6503_v40, %v6510_v36  ;;  %v2207_v0 = vrot.slane %v2193_v45, %v14577_v23  ;;  %v6519_v13 = vcombine.low %v22965_v63, %v22964_v17  ;;  %v22969_v36 = vld [vmem:[#allocation234_spill] sm:$0xff] }
 0x1b8   : > { %22960 = vst [vmem:[#allocation213_spill] sm:$0xff] %v17960_v26  ;;  %v2409_v20 = vcombine.low %v22967_v18, %v22966_v51  ;;  %5991 = vst.msk [vmem:[#allocation2 + $0x44] sm:$0xf] %vm5973_vm0, %v17581_v15  ;;  %v6494_v7 = vrot.slane %v6487_v28, %v14577_v23  ;;  %v17980_v55 = vrot.slane %v2168_v25, %v14577_v23  ;;  %v22970_v45 = vld [vmem:[#allocation238_spill] sm:$0xff]  ;;  %v22973_v28 = vld [vmem:[#allocation169_spill] sm:$0xff] }
 0x1b9   : > { %5990 = vst.msk [vmem:[#allocation2 + $0x40] sm:$0xf] %vm5973_vm0, %v17572_v48  ;;  %v17983_v40 = vrot.slane %v2385_v60, %v14577_v23  ;;  %v6535_v17 = vcombine.low %v22970_v45, %v22969_v36  ;;  %v6518_v57 = vrot.slane %v6511_v46, %v14577_v23  ;;  %v2208_v61 = vcombine.low %v17960_v26, %v2207_v0  ;;  %v18003_v0 = vpop.permute.xlu0 %5886  ;;  %v22976_v18 = vld [vmem:[#allocation241_spill] sm:$0xff]  ;;  %v18012_v26 = vpop.permute.xlu1 %5888 }
 0x1ba   : > { %22968 = vst [vmem:[#allocation217_spill] sm:$0xff] %v17980_v55  ;;  %v6526_v15 = vrot.slane %v6519_v13, %v14577_v23  ;;  %v17991_v51 = vrot.slane %v2409_v20, %v14577_v23  ;;  %6969 = vrot.lane.b32.xlu0 %v6494_v7, %s14451_s27  ;;  %v2184_v48 = vcombine.low %v17980_v55, %v17736_v11  ;;  %v22974_v7 = vld [vmem:[#allocation240_spill] sm:$0xff] }
 0x1bb   : > { %v17997_v60 = vrot.slane %v6535_v17, %v14577_v23  ;;  %v2240_v25 = vcombine.low %v22973_v28, %v22927_v8  ;;  %v2216_v46 = vcombine.low %v22912_v24, %v22918_v30  ;;  %6971 = vrot.lane.b32.xlu1 %v6518_v57, %s14451_s27  ;;  %v2215_v20 = vrot.slane %v2208_v61, %v14577_v23  ;;  %v22977_v17 = vld [vmem:[#allocation236_spill] sm:$0xff]  ;;  %v22984_v28 = vld [vmem:[#allocation259_spill] sm:$0xff] }
 0x1bc   : > { %22971 = vst [vmem:[#allocation214_spill] sm:$0xff] %v17991_v51  ;;  %v6527_v13 = vcombine.low %v17983_v40, %v6526_v15  ;;  %v6551_v11 = vcombine.low %v22975_v3, %v22974_v7  ;;  %v6552_v49 = vcombine.low %v22977_v17, %v22976_v18  ;;  %v18015_v8 = vrot.slane %v2184_v48, %v14577_v23  ;;  %v22983_v48 = vld [vmem:[#allocation253_spill] sm:$0xff] }
 0x1bd   : > { %22972 = vst [vmem:[#allocation223_spill] sm:$0xff] %v17997_v60  ;;  %v6543_v24 = vcombine.low %v17991_v51, %v17997_v60  ;;  %v18020_v57 = vrot.slane %v2240_v25, %v14577_v23  ;;  %v18023_v61 = vrot.slane %v2216_v46, %v14577_v23  ;;  %2981 = vst.msk [vmem:[#allocation2 + $0x4c] sm:$0xf] %vm2961_vm15, %v2215_v20 }
 0x1be   : > { %22978 = vst [vmem:[#allocation224_spill] sm:$0xff] %v18015_v8  ;;  %v6534_v15 = vrot.slane %v6527_v13, %v14577_v23  ;;  %v18028_v7 = vrot.slane %v6551_v11, %v14577_v23  ;;  %v18031_v30 = vrot.slane %v6552_v49, %v14577_v23  ;;  %v2457_v55 = vcombine.low %v22984_v28, %v22983_v48  ;;  %v22985_v13 = vld [vmem:[#allocation254_spill] sm:$0xff]  ;;  %v22986_v49 = vld [vmem:[#allocation263_spill] sm:$0xff] }
 0x1bf   : > { %22979 = vst [vmem:[#allocation234_spill] sm:$0xff] %v18020_v57  ;;  %22980 = vst [vmem:[#allocation238_spill] sm:$0xff] %v18023_v61  ;;  %v6550_v25 = vrot.slane %v6543_v24, %v14577_v23  ;;  %v2256_v46 = vcombine.low %v18020_v57, %v17825_v56  ;;  %v2232_v20 = vcombine.low %v18023_v61, %v17783_v39  ;;  %v22996_v48 = vld [vmem:[#allocation278_spill] sm:$0xff] }
 0x1c0   : > { %22981 = vst [vmem:[#allocation240_spill] sm:$0xff] %v18028_v7  ;;  %22982 = vst [vmem:[#allocation241_spill] sm:$0xff] %v18031_v30  ;;  %v6575_v11 = vcombine.low %v22986_v49, %v22985_v13  ;;  %6973 = vrot.lane.b32.xlu0 %v6534_v15, %s14451_s27  ;;  %v18052_v60 = vrot.slane %v2457_v55, %v14577_v23  ;;  %v2288_v24 = vcombine.low %v22932_v52, %v22943_v6 }
 0x1c1   : > { %5993 = vst.msk [vmem:[#allocation2 + $0x4c] sm:$0xf] %vm5973_vm0, %v17644_v43  ;;  %v6567_v43 = vcombine.low %v18028_v7, %v18031_v30  ;;  %v2264_v39 = vcombine.low %v22926_v58, %v22933_v34  ;;  %6975 = vrot.lane.b32.xlu1 %v6550_v25, %s14451_s27  ;;  %v22989_v30 = vld [vmem:[#allocation183_spill] sm:$0xff]  ;;  %v18068_v7 = vpop.permute.xlu0 %5890  ;;  %v22992_v58 = vld [vmem:[#allocation257_spill] sm:$0xff] }
 0x1c2   : > { %2980 = vst.msk [vmem:[#allocation2 + $0x48] sm:$0xf] %vm2961_vm15, %v18015_v8  ;;  %v2263_v8 = vrot.slane %v2256_v46, %v14577_v23  ;;  %v18064_v15 = vrot.slane %v6575_v11, %v14577_v23  ;;  %v2265_v55 = vcombine.low %v22929_v12, %v22989_v30  ;;  %v18072_v6 = vrot.slane %v2288_v24, %v14577_v23  ;;  %v22993_v25 = vld [vmem:[#allocation255_spill] sm:$0xff]  ;;  %v22994_v24 = vld [vmem:[#allocation256_spill] sm:$0xff] }
 0x1c3   : > { %5992 = vst.msk [vmem:[#allocation2 + $0x48] sm:$0xf] %vm5973_vm0, %v17631_v44  ;;  %v18061_v44 = vrot.slane %v2232_v20, %v14577_v23  ;;  %v6574_v52 = vrot.slane %v6567_v43, %v14577_v23  ;;  %v18075_v34 = vrot.slane %v2264_v39, %v14577_v23  ;;  %v2481_v46 = vcombine.low %v22993_v25, %v22992_v58  ;;  %v18079_v20 = vpop.permute.xlu1 %5892  ;;  %v22995_v39 = vld [vmem:[#allocation272_spill] sm:$0xff]  ;;  %v23000_v25 = vld [vmem:[#allocation211_spill] sm:$0xff] }
 0x1c4   : > { %22988 = vst [vmem:[#allocation263_spill] sm:$0xff] %v18064_v15  ;;  %22990 = vst [vmem:[#allocation452_spill] sm:$0xff] %v18072_v6  ;;  %v6583_v11 = vcombine.low %v18052_v60, %v18064_v15  ;;  %v2279_v43 = vrot.slane %v2265_v55, %v14577_v23  ;;  %v13757_v56 = vcombine.high %v22985_v13, %v22994_v24  ;;  %v22998_v55 = vld [vmem:[#allocation273_spill] sm:$0xff] }
 0x1c5   : > { %22987 = vst [vmem:[#allocation236_spill] sm:$0xff] %v18061_v44  ;;  %22991 = vst [vmem:[#allocation453_spill] sm:$0xff] %v18075_v34  ;;  %v2505_v28 = vcombine.low %v22996_v48, %v22995_v39  ;;  %6977 = vrot.lane.b32.xlu0 %v6574_v52, %s14451_s27  ;;  %v18099_v15 = vrot.slane %v2481_v46, %v14577_v23  ;;  %v2336_v48 = vcombine.low %v23000_v25, %v22954_v16  ;;  %v18127_v61 = vpop.permute.xlu0 %5894 }
 0x1c6   : > { %2983 = vst.msk [vmem:[#allocation2 + $0x54] sm:$0xf] %vm2961_vm15, %v2263_v8  ;;  %2982 = vst.msk [vmem:[#allocation2 + $0x50] sm:$0xf] %vm2961_vm15, %v18061_v44  ;;  %v2304_v8 = vcombine.low %v18072_v6, %v17877_v21  ;;  %v22999_v44 = vld [vmem:[#allocation271_spill] sm:$0xff]  ;;  %v6590_v57 = vrot.slane %v6583_v11, %v14577_v23  ;;  %v2312_v16 = vcombine.low %v22942_v33, %v22948_v19 }
 0x1c7   : > { %5995 = vst.msk [vmem:[#allocation2 + $0x54] sm:$0xf] %vm5973_vm0, %v17709_v38  ;;  %5994 = vst.msk [vmem:[#allocation2 + $0x50] sm:$0xf] %vm5973_vm0, %v17699_v32  ;;  %v6607_v58 = vcombine.low %v22999_v44, %v22998_v55  ;;  %v2280_v38 = vcombine.low %v18075_v34, %v2279_v43  ;;  %v6598_v32 = vrot.slane %v13757_v56, %v14577_v23  ;;  %v23003_v11 = vld [vmem:[#allocation275_spill] sm:$0xff]  ;;  %v23004_v43 = vld [vmem:[#allocation280_spill] sm:$0xff]  ;;  %v18137_v33 = vpop.permute.xlu1 %5896 }
 0x1c8   : > { %22997 = vst [vmem:[#allocation454_spill] sm:$0xff] %v18099_v15  ;;  %v18109_v52 = vrot.slane %v2505_v28, %v14577_v23  ;;  %v18112_v21 = vrot.slane %v2304_v8, %v14577_v23  ;;  %v2344_v6 = vrot.slane %v2336_v48, %v14577_v23  ;;  %6979 = vrot.lane.b32.xlu1 %v6590_v57, %s14451_s27  ;;  %v23005_v8 = vld [vmem:[#allocation276_spill] sm:$0xff] }
 0x1c9   : > { %v18115_v46 = vrot.slane %v6607_v58, %v14577_v23  ;;  %v2287_v25 = vrot.slane %v2280_v38, %v14577_v23  ;;  %v6599_v56 = vcombine.low %v18099_v15, %v6598_v32  ;;  %v13758_v28 = vcombine.high %v22995_v39, %v23003_v11  ;;  %v23006_v58 = vld [vmem:[#allocation303_spill] sm:$0xff]  ;;  %v23007_v38 = vld [vmem:[#allocation300_spill] sm:$0xff] }
 0x1ca   : > { %23001 = vst [vmem:[#allocation273_spill] sm:$0xff] %v18112_v21  ;;  %v6624_v34 = vcombine.low %v23005_v8, %v23004_v43  ;;  %2985 = vst.msk [vmem:[#allocation2 + $0x5c] sm:$0xf] %vm2961_vm15, %v18112_v21  ;;  %v2352_v57 = vcombine.low %v2344_v6, %v17934_v5  ;;  %v2320_v48 = vrot.slane %v2312_v16, %v14577_v23  ;;  %v23010_v5 = vld [vmem:[#allocation305_spill] sm:$0xff]  ;;  %v23011_v6 = vld [vmem:[#allocation302_spill] sm:$0xff] }
 0x1cb   : > { %23002 = vst [vmem:[#allocation271_spill] sm:$0xff] %v18115_v46  ;;  %v6615_v19 = vcombine.low %v18109_v52, %v18115_v46  ;;  %v2553_v32 = vcombine.low %v23007_v38, %v23006_v58  ;;  %5997 = vst.msk [vmem:[#allocation2 + $0x5c] sm:$0xf] %vm5973_vm0, %v17774_v47  ;;  %v6606_v39 = vrot.slane %v6599_v56, %v14577_v23  ;;  %v18196_v38 = vpop.permute.xlu1 %5900 }
 0x1cc   : > { %2984 = vst.msk [vmem:[#allocation2 + $0x58] sm:$0xf] %vm2961_vm15, %v2287_v25  ;;  %v18144_v21 = vrot.slane %v13758_v28, %v14577_v23  ;;  %v18147_v46 = vrot.slane %v6624_v34, %v14577_v23  ;;  %v6647_v16 = vcombine.low %v23011_v6, %v23010_v5  ;;  %v2359_v47 = vrot.slane %v2352_v57, %v14577_v23  ;;  %v23013_v57 = vld [vmem:[#allocation295_spill] sm:$0xff] }
 0x1cd   : > { %5996 = vst.msk [vmem:[#allocation2 + $0x58] sm:$0xf] %vm5973_vm0, %v17762_v42  ;;  %v6622_v58 = vrot.slane %v6615_v19, %v14577_v23  ;;  %v2328_v25 = vcombine.low %v2320_v48, %v17906_v35  ;;  %v18157_v56 = vrot.slane %v2553_v32, %v14577_v23  ;;  %6981 = vrot.lane.b32.xlu0 %v6606_v39, %s14451_s27  ;;  %v23012_v19 = vld [vmem:[#allocation228_spill] sm:$0xff]  ;;  %v23014_v48 = vld [vmem:[#allocation291_spill] sm:$0xff] }
 0x1ce   : > { %23008 = vst [vmem:[#allocation211_spill] sm:$0xff] %v18144_v21  ;;  %23009 = vst [vmem:[#allocation275_spill] sm:$0xff] %v18147_v46  ;;  %v6639_v34 = vcombine.low %v18144_v21, %v18147_v46  ;;  %v6654_v28 = vrot.slane %v6647_v16, %v14577_v23  ;;  %v2384_v5 = vcombine.low %v22956_v14, %v22965_v63  ;;  %v23015_v46 = vld [vmem:[#allocation293_spill] sm:$0xff]  ;;  %v23016_v16 = vld [vmem:[#allocation294_spill] sm:$0xff] }
 0x1cf   : > { %v2360_v42 = vcombine.low %v22953_v9, %v22957_v62  ;;  %6983 = vrot.lane.b32.xlu1 %v6622_v58, %s14451_s27  ;;  %2987 = vst.msk [vmem:[#allocation2 + $0x64] sm:$0xf] %vm2961_vm15, %v2359_v47  ;;  %v2335_v35 = vrot.slane %v2328_v25, %v14577_v23  ;;  %v2361_v39 = vcombine.low %v22955_v54, %v23012_v19  ;;  %v18184_v25 = vpop.permute.xlu0 %5898 }
 0x1d0   : > { %v2577_v32 = vcombine.low %v23014_v48, %v23013_v57  ;;  %v6663_v21 = vcombine.low %v23016_v16, %v23015_v46  ;;  %5999 = vst.msk [vmem:[#allocation2 + $0x64] sm:$0xf] %vm5973_vm0, %v17838_v31  ;;  %v6646_v9 = vrot.slane %v6639_v34, %v14577_v23  ;;  %v6655_v14 = vcombine.low %v18157_v56, %v6654_v28  ;;  %v23020_v34 = vld [vmem:[#allocation321_spill] sm:$0xff]  ;;  %v23021_v48 = vld [vmem:[#allocation296_spill] sm:$0xff] }
 0x1d1   : > { %v18181_v58 = vrot.slane %v2384_v5, %v14577_v23  ;;  %v2368_v47 = vrot.slane %v2360_v42, %v14577_v23  ;;  %2986 = vst.msk [vmem:[#allocation2 + $0x60] sm:$0xf] %vm2961_vm15, %v2335_v35  ;;  %v2375_v63 = vrot.slane %v2361_v39, %v14577_v23  ;;  %v6679_v28 = vcombine.low %v23021_v48, %v23020_v34  ;;  %v23022_v35 = vld [vmem:[#allocation311_spill] sm:$0xff]  ;;  %v23023_v39 = vld [vmem:[#allocation318_spill] sm:$0xff] }
 0x1d2   : > { %v18189_v57 = vrot.slane %v2577_v32, %v14577_v23  ;;  %v18192_v31 = vrot.slane %v6663_v21, %v14577_v23  ;;  %5998 = vst.msk [vmem:[#allocation2 + $0x60] sm:$0xf] %vm5973_vm0, %v17827_v50  ;;  %6985 = vrot.lane.b32.xlu0 %v6646_v9, %s14451_s27  ;;  %v6662_v5 = vrot.slane %v6655_v14, %v14577_v23  ;;  %v23025_v50 = vld [vmem:[#allocation239_spill] sm:$0xff] }
 0x1d3   : > { %23017 = vst [vmem:[#allocation280_spill] sm:$0xff] %v18181_v58  ;;  %v2400_v42 = vcombine.low %v18181_v58, %v17983_v40  ;;  %v6680_v32 = vcombine.low %v23023_v39, %v23022_v35  ;;  %v2432_v21 = vcombine.low %v22969_v36, %v22977_v17  ;;  %v2376_v19 = vcombine.low %v2368_v47, %v2375_v63  ;;  %v23029_v63 = vld [vmem:[#allocation230_spill] sm:$0xff]  ;;  %v23030_v58 = vld [vmem:[#allocation315_spill] sm:$0xff]  ;;  %v18243_v54 = vpop.permute.xlu0 %5902 }
 0x1d4   : > { %23018 = vst [vmem:[#allocation276_spill] sm:$0xff] %v18189_v57  ;;  %23019 = vst [vmem:[#allocation305_spill] sm:$0xff] %v18192_v31  ;;  %v6671_v34 = vcombine.low %v18189_v57, %v18192_v31  ;;  %v18211_v62 = vrot.slane %v6679_v28, %v14577_v23  ;;  %v2433_v9 = vcombine.low %v22975_v3, %v23025_v50  ;;  %6987 = vrot.lane.b32.xlu1 %v6662_v5, %s14451_s27  ;;  %v23031_v5 = vld [vmem:[#allocation312_spill] sm:$0xff]  ;;  %v23036_v3 = vld [vmem:[#allocation334_spill] sm:$0xff] }
 0x1d5   : > { %v18217_v40 = vrot.slane %v2400_v42, %v14577_v23  ;;  %v18220_v14 = vrot.slane %v6680_v32, %v14577_v23  ;;  %v18223_v36 = vrot.slane %v2432_v21, %v14577_v23  ;;  %v2408_v17 = vcombine.low %v23029_v63, %v22970_v45  ;;  %v23033_v21 = vld [vmem:[#allocation316_spill] sm:$0xff]  ;;  %v23034_v45 = vld [vmem:[#allocation314_spill] sm:$0xff] }
 0x1d6   : > { %23024 = vst [vmem:[#allocation293_spill] sm:$0xff] %v18211_v62  ;;  %v2383_v47 = vrot.slane %v2376_v19, %v14577_v23  ;;  %v6678_v28 = vrot.slane %v6671_v34, %v14577_v23  ;;  %v2447_v31 = vrot.slane %v2433_v9, %v14577_v23  ;;  %v2625_v50 = vcombine.low %v23031_v5, %v23030_v58  ;;  %v23035_v19 = vld [vmem:[#allocation329_spill] sm:$0xff] }
 0x1d7   : > { %23026 = vst [vmem:[#allocation294_spill] sm:$0xff] %v18217_v40  ;;  %23027 = vst [vmem:[#allocation321_spill] sm:$0xff] %v18220_v14  ;;  %v6695_v42 = vcombine.low %v18211_v62, %v18220_v14  ;;  %v18237_v32 = vrot.slane %v2408_v17, %v14577_v23  ;;  %v6703_v63 = vcombine.low %v23034_v45, %v23033_v21  ;;  %v23037_v14 = vld [vmem:[#allocation328_spill] sm:$0xff] }
 0x1d8   : > { %23028 = vst [vmem:[#allocation311_spill] sm:$0xff] %v18223_v36  ;;  %2989 = vst.msk [vmem:[#allocation2 + $0x6c] sm:$0xf] %vm2961_vm15, %v18217_v40  ;;  %v2649_v34 = vcombine.low %v23036_v3, %v23035_v19  ;;  %6989 = vrot.lane.b32.xlu0 %v6678_v28, %s14451_s27  ;;  %v2448_v9 = vcombine.low %v18223_v36, %v2447_v31  ;;  %v18251_v17 = vrot.slane %v2625_v50, %v14577_v23  ;;  %v18257_v19 = vpop.permute.xlu1 %5904  ;;  %v23043_v3 = vld [vmem:[#allocation336_spill] sm:$0xff] }
 0x1d9   : > { %23032 = vst [vmem:[#allocation318_spill] sm:$0xff] %v18237_v32  ;;  %6001 = vst.msk [vmem:[#allocation2 + $0x6c] sm:$0xf] %vm5973_vm0, %v17900_v29  ;;  %v13759_v62 = vcombine.high %v23033_v21, %v23037_v14  ;;  %v2480_v40 = vcombine.low %v22985_v13, %v22994_v24  ;;  %v6702_v29 = vrot.slane %v6695_v42, %v14577_v23  ;;  %v23057_v36 = vld [vmem:[#allocation356_spill] sm:$0xff] }
 0x1da   : > { %2988 = vst.msk [vmem:[#allocation2 + $0x68] sm:$0xf] %vm2961_vm15, %v2383_v47  ;;  %v2424_v47 = vcombine.low %v18237_v32, %v17991_v51  ;;  %v18265_v31 = vrot.slane %v6703_v63, %v14577_v23  ;;  %v18268_v50 = vrot.slane %v2649_v34, %v14577_v23  ;;  %v2455_v28 = vrot.slane %v2448_v9, %v14577_v23  ;;  %v23041_v51 = vld [vmem:[#allocation335_spill] sm:$0xff]  ;;  %v23042_v34 = vld [vmem:[#allocation333_spill] sm:$0xff]  ;;  %v23044_v9 = vld [vmem:[#allocation332_spill] sm:$0xff] }
 0x1db   : > { %6000 = vst.msk [vmem:[#allocation2 + $0x68] sm:$0xf] %vm5973_vm0, %v17888_v4  ;;  %v6726_v24 = vrot.slane %v13759_v62, %v14577_v23  ;;  %v18273_v13 = vrot.slane %v2480_v40, %v14577_v23  ;;  %v2456_v4 = vcombine.low %v22976_v18, %v22986_v49  ;;  %6991 = vrot.lane.b32.xlu1 %v6702_v29, %s14451_s27  ;;  %v23046_v40 = vld [vmem:[#allocation350_spill] sm:$0xff]  ;;  %v23058_v32 = vld [vmem:[#allocation352_spill] sm:$0xff] }
 0x1dc   : > { %23038 = vst [vmem:[#allocation314_spill] sm:$0xff] %v18265_v31  ;;  %23039 = vst [vmem:[#allocation455_spill] sm:$0xff] %v18268_v50  ;;  %v2431_v42 = vrot.slane %v2424_v47, %v14577_v23  ;;  %v6711_v63 = vcombine.low %v18251_v17, %v18265_v31  ;;  %v2673_v58 = vcombine.low %v23042_v34, %v23041_v51  ;;  %v23048_v31 = vld [vmem:[#allocation351_spill] sm:$0xff]  ;;  %v18306_v34 = vpop.permute.xlu0 %5906 }
 0x1dd   : > { %23040 = vst [vmem:[#allocation456_spill] sm:$0xff] %v18273_v13  ;;  %v6735_v5 = vcombine.low %v23044_v9, %v23043_v3  ;;  %2991 = vst.msk [vmem:[#allocation2 + $0x74] sm:$0xf] %vm2961_vm15, %v2455_v28  ;;  %v6727_v62 = vcombine.low %v18268_v50, %v6726_v24  ;;  %v2496_v18 = vcombine.low %v18273_v13, %v18099_v15  ;;  %v23049_v15 = vld [vmem:[#allocation347_spill] sm:$0xff] }
 0x1de   : > { %v18290_v49 = vrot.slane %v2456_v4, %v14577_v23  ;;  %v13760_v29 = vcombine.high %v23041_v51, %v23046_v40  ;;  %6003 = vst.msk [vmem:[#allocation2 + $0x74] sm:$0xf] %vm5973_vm0, %v17955_v37  ;;  %v6718_v47 = vrot.slane %v6711_v63, %v14577_v23  ;;  %v18299_v28 = vrot.slane %v2673_v58, %v14577_v23 }
 0x1df   : > { %2990 = vst.msk [vmem:[#allocation2 + $0x70] sm:$0xf] %vm2961_vm15, %v2431_v42  ;;  %v18302_v24 = vrot.slane %v6735_v5, %v14577_v23  ;;  %v6752_v4 = vcombine.low %v23049_v15, %v23048_v31  ;;  %v6734_v37 = vrot.slane %v6727_v62, %v14577_v23  ;;  %v2503_v42 = vrot.slane %v2496_v18, %v14577_v23  ;;  %v18317_v5 = vpop.permute.xlu1 %5908  ;;  %v23052_v62 = vld [vmem:[#allocation279_spill] sm:$0xff] }
 0x1e0   : > { %23045 = vst [vmem:[#allocation336_spill] sm:$0xff] %v18290_v49  ;;  %6002 = vst.msk [vmem:[#allocation2 + $0x70] sm:$0xf] %vm5973_vm0, %v17946_v22  ;;  %v2472_v63 = vcombine.low %v18290_v49, %v18052_v60  ;;  %v18315_v58 = vrot.slane %v13760_v29, %v14577_v23  ;;  %6993 = vrot.lane.b32.xlu0 %v6718_v47, %s14451_s27  ;;  %v2528_v22 = vcombine.low %v22998_v55, %v23005_v8  ;;  %v23054_v29 = vld [vmem:[#allocation260_spill] sm:$0xff] }
 0x1e1   : > { %23047 = vst [vmem:[#allocation332_spill] sm:$0xff] %v18302_v24  ;;  %v6743_v51 = vcombine.low %v18299_v28, %v18302_v24  ;;  %v18323_v13 = vrot.slane %v6752_v4, %v14577_v23  ;;  %v2529_v18 = vcombine.low %v23003_v11, %v23052_v62  ;;  %6995 = vrot.lane.b32.xlu1 %v6734_v37, %s14451_s27  ;;  %2993 = vst.msk [vmem:[#allocation2 + $0x7c] sm:$0xf] %vm2961_vm15, %v2503_v42  ;;  %v23055_v24 = vld [vmem:[#allocation353_spill] sm:$0xff]  ;;  %v23056_v49 = vld [vmem:[#allocation348_spill] sm:$0xff] }
 0x1e2   : > { %23050 = vst [vmem:[#allocation350_spill] sm:$0xff] %v18315_v58  ;;  %v18332_v60 = vrot.slane %v2472_v63, %v14577_v23  ;;  %v2504_v47 = vcombine.low %v23054_v29, %v22999_v44  ;;  %v2721_v4 = vcombine.low %v23056_v49, %v23055_v24  ;;  %v6775_v30 = vcombine.low %v23058_v32, %v23057_v36  ;;  %v23061_v63 = vld [vmem:[#allocation375_spill] sm:$0xff]  ;;  %v18369_v24 = vpop.permute.xlu0 %5910  ;;  %v23073_v49 = vld [vmem:[#allocation370_spill] sm:$0xff] }
 0x1e3   : > { %23051 = vst [vmem:[#allocation351_spill] sm:$0xff] %v18323_v13  ;;  %6005 = vst.msk [vmem:[#allocation2 + $0x7c] sm:$0xf] %vm5973_vm0, %v18012_v26  ;;  %v6750_v55 = vrot.slane %v6743_v51, %v14577_v23  ;;  %v6767_v8 = vcombine.low %v18315_v58, %v18323_v13  ;;  %v18346_v37 = vrot.slane %v2528_v22, %v14577_v23  ;;  %v23060_v51 = vld [vmem:[#allocation380_spill] sm:$0xff]  ;;  %v23062_v13 = vld [vmem:[#allocation366_spill] sm:$0xff] }
 0x1e4   : > { %23053 = vst [vmem:[#allocation347_spill] sm:$0xff] %v18332_v60  ;;  %v2543_v42 = vrot.slane %v2529_v18, %v14577_v23  ;;  %2992 = vst.msk [vmem:[#allocation2 + $0x78] sm:$0xf] %vm2961_vm15, %v18332_v60  ;;  %v18352_v44 = vrot.slane %v2504_v47, %v14577_v23  ;;  %v18355_v36 = vrot.slane %v2721_v4, %v14577_v23  ;;  %v23063_v47 = vld [vmem:[#allocation378_spill] sm:$0xff] }
 0x1e5   : > { %23059 = vst [vmem:[#allocation279_spill] sm:$0xff] %v18346_v37  ;;  %v6782_v26 = vrot.slane %v6775_v30, %v14577_v23  ;;  %v2745_v29 = vcombine.low %v23061_v63, %v23060_v51  ;;  %6004 = vst.msk [vmem:[#allocation2 + $0x78] sm:$0xf] %vm5973_vm0, %v18003_v0  ;;  %6997 = vrot.lane.b32.xlu0 %v6750_v55, %s14451_s27  ;;  %v6774_v22 = vrot.slane %v6767_v8, %v14577_v23  ;;  %v23064_v4 = vld [vmem:[#allocation290_spill] sm:$0xff]  ;;  %v18379_v8 = vpop.permute.xlu1 %5912 }
 0x1e6   : > { %v2544_v18 = vcombine.low %v18346_v37, %v2543_v42  ;;  %v6791_v58 = vcombine.low %v23063_v47, %v23062_v13  ;;  %v2576_v60 = vcombine.low %v23064_v4, %v23016_v16  ;;  %v2520_v30 = vcombine.low %v18352_v44, %v18109_v52  ;;  %v23068_v52 = vld [vmem:[#allocation372_spill] sm:$0xff]  ;;  %v23076_v37 = vld [vmem:[#allocation395_spill] sm:$0xff] }
 0x1e7   : > { %v6783_v51 = vcombine.low %v18355_v36, %v6782_v26  ;;  %v18375_v0 = vrot.slane %v2745_v29, %v14577_v23  ;;  %v2552_v55 = vcombine.low %v23004_v43, %v23011_v6  ;;  %6999 = vrot.lane.b32.xlu1 %v6774_v22, %s14451_s27  ;;  %v23069_v26 = vld [vmem:[#allocation369_spill] sm:$0xff]  ;;  %v23072_v22 = vld [vmem:[#allocation371_spill] sm:$0xff] }
 0x1e8   : > { %v2551_v42 = vrot.slane %v2544_v18, %v14577_v23  ;;  %v18384_v16 = vrot.slane %v6791_v58, %v14577_v23  ;;  %v18387_v4 = vrot.slane %v2576_v60, %v14577_v23  ;;  %v6807_v63 = vcombine.low %v23069_v26, %v23068_v52 }
 0x1e9   : > { %23065 = vst [vmem:[#allocation356_spill] sm:$0xff] %v18375_v0  ;;  %v18392_v29 = vrot.slane %v2520_v30, %v14577_v23  ;;  %v6790_v43 = vrot.slane %v6783_v51, %v14577_v23  ;;  %v18396_v6 = vrot.slane %v2552_v55, %v14577_v23  ;;  %v6808_v18 = vcombine.low %v23073_v49, %v23072_v22  ;;  %v23075_v30 = vld [vmem:[#allocation385_spill] sm:$0xff] }
 0x1ea   : > { %23066 = vst [vmem:[#allocation366_spill] sm:$0xff] %v18384_v16  ;;  %23067 = vst [vmem:[#allocation378_spill] sm:$0xff] %v18387_v4  ;;  %v6799_v58 = vcombine.low %v18375_v0, %v18384_v16  ;;  %v2592_v60 = vcombine.low %v18387_v4, %v18189_v57  ;;  %v18406_v52 = vrot.slane %v6807_v63, %v14577_v23  ;;  %v23078_v16 = vld [vmem:[#allocation387_spill] sm:$0xff]  ;;  %v23079_v63 = vld [vmem:[#allocation396_spill] sm:$0xff] }
 0x1eb   : > { %23070 = vst [vmem:[#allocation372_spill] sm:$0xff] %v18392_v29  ;;  %23071 = vst [vmem:[#allocation457_spill] sm:$0xff] %v18396_v6  ;;  %v2793_v51 = vcombine.low %v23076_v37, %v23075_v30  ;;  %7001 = vrot.lane.b32.xlu0 %v6790_v43, %s14451_s27  ;;  %v2568_v55 = vcombine.low %v18396_v6, %v18157_v56  ;;  %v6831_v57 = vcombine.low %v23079_v63, %v23078_v16  ;;  %v23088_v4 = vld [vmem:[#allocation411_spill] sm:$0xff] }
 0x1ec   : > { %2995 = vst.msk [vmem:[#allocation2 + $0x84] sm:$0xf] %vm2961_vm15, %v2551_v42  ;;  %23074 = vst [vmem:[#allocation371_spill] sm:$0xff] %v18406_v52  ;;  %v18418_v42 = vrot.slane %v6808_v18, %v14577_v23  ;;  %v2624_v30 = vcombine.low %v23022_v35, %v23034_v45  ;;  %v2600_v56 = vcombine.low %v23015_v46, %v23023_v39  ;;  %v18433_v18 = vpop.permute.xlu0 %5914  ;;  %v23083_v46 = vld [vmem:[#allocation309_spill] sm:$0xff] }
 0x1ed   : > { %6007 = vst.msk [vmem:[#allocation2 + $0x84] sm:$0xf] %vm5973_vm0, %v18079_v20  ;;  %v6806_v20 = vrot.slane %v6799_v58, %v14577_v23  ;;  %v18429_v43 = vrot.slane %v2793_v51, %v14577_v23  ;;  %v18436_v37 = vrot.slane %v2568_v55, %v14577_v23  ;;  %v18446_v58 = vpop.permute.xlu1 %5916  ;;  %v2601_v39 = vcombine.low %v23021_v48, %v23083_v46  ;;  %v23084_v51 = vld [vmem:[#allocation392_spill] sm:$0xff] }
 0x1ee   : > { %2994 = vst.msk [vmem:[#allocation2 + $0x80] sm:$0xf] %vm2961_vm15, %v18392_v29  ;;  %23077 = vst [vmem:[#allocation370_spill] sm:$0xff] %v18418_v42  ;;  %v2599_v29 = vrot.slane %v2592_v60, %v14577_v23  ;;  %v6823_v35 = vcombine.low %v18406_v52, %v18418_v42  ;;  %v18444_v45 = vrot.slane %v2624_v30, %v14577_v23  ;;  %v23085_v55 = vld [vmem:[#allocation388_spill] sm:$0xff] }
 0x1ef   : > { %6006 = vst.msk [vmem:[#allocation2 + $0x80] sm:$0xf] %vm5973_vm0, %v18068_v7  ;;  %23080 = vst [vmem:[#allocation396_spill] sm:$0xff] %v18436_v37  ;;  %v18441_v7 = vrot.slane %v6831_v57, %v14577_v23  ;;  %7003 = vrot.lane.b32.xlu1 %v6806_v20, %s14451_s27  ;;  %v18453_v60 = vrot.slane %v2600_v56, %v14577_v23  ;;  %v2817_v42 = vcombine.low %v23085_v55, %v23084_v51  ;;  %v23086_v57 = vld [vmem:[#allocation390_spill] sm:$0xff] }
 0x1f0   : > { %23082 = vst [vmem:[#allocation459_spill] sm:$0xff] %v18444_v45  ;;  %2997 = vst.msk [vmem:[#allocation2 + $0x8c] sm:$0xf] %vm2961_vm15, %v2599_v29  ;;  %v13761_v52 = vcombine.high %v23078_v16, %v23086_v57  ;;  %v6830_v29 = vrot.slane %v6823_v35, %v14577_v23  ;;  %v2640_v20 = vcombine.low %v18444_v45, %v18251_v17  ;;  %v23087_v56 = vld [vmem:[#allocation406_spill] sm:$0xff]  ;;  %v23090_v35 = vld [vmem:[#allocation405_spill] sm:$0xff] }
 0x1f1   : > { %23081 = vst [vmem:[#allocation458_spill] sm:$0xff] %v18441_v7  ;;  %6009 = vst.msk [vmem:[#allocation2 + $0x8c] sm:$0xf] %vm5973_vm0, %v18137_v33  ;;  %v6839_v30 = vcombine.low %v18429_v43, %v18441_v7  ;;  %v2841_v51 = vcombine.low %v23088_v4, %v23087_v56  ;;  %v2615_v55 = vrot.slane %v2601_v39, %v14577_v23 }
 0x1f2   : > { %2996 = vst.msk [vmem:[#allocation2 + $0x88] sm:$0xf] %vm2961_vm15, %v18436_v37  ;;  %v18474_v33 = vrot.slane %v2817_v42, %v14577_v23  ;;  %v6854_v37 = vrot.slane %v13761_v52, %v14577_v23  ;;  %v6863_v6 = vcombine.low %v23090_v35, %v17184_v59  ;;  %7005 = vrot.lane.b32.xlu0 %v6830_v29, %s14451_s27 }
 0x1f3   : > { %6008 = vst.msk [vmem:[#allocation2 + $0x88] sm:$0xf] %vm5973_vm0, %v18127_v61  ;;  %v6846_v17 = vrot.slane %v6839_v30, %v14577_v23  ;;  %v18482_v7 = vrot.slane %v2640_v20, %v14577_v23  ;;  %v18485_v4 = vrot.slane %v2841_v51, %v14577_v23  ;;  %v23092_v61 = vld [vmem:[#allocation331_spill] sm:$0xff]  ;;  %v2616_v42 = vcombine.low %v18453_v60, %v2615_v55  ;;  %v18496_v30 = vpop.permute.xlu0 %5918 }
 0x1f4   : > { %23089 = vst [vmem:[#allocation460_spill] sm:$0xff] %v18474_v33  ;;  %v2672_v39 = vcombine.low %v23092_v61, %v23044_v9  ;;  %v6855_v52 = vcombine.low %v18474_v33, %v6854_v37  ;;  %v18492_v45 = vrot.slane %v6863_v6, %v14577_v23  ;;  %v2648_v29 = vcombine.low %v23033_v21, %v23037_v14  ;;  %v23094_v9 = vld [vmem:[#allocation408_spill] sm:$0xff]  ;;  %v23095_v37 = vld [vmem:[#allocation409_spill] sm:$0xff]  ;;  %v18510_v14 = vpop.permute.xlu1 %5920 }
 0x1f5   : > { %23091 = vst [vmem:[#allocation405_spill] sm:$0xff] %v18482_v7  ;;  %7007 = vrot.lane.b32.xlu1 %v6846_v17, %s14451_s27  ;;  %2999 = vst.msk [vmem:[#allocation2 + $0x94] sm:$0xf] %vm2961_vm15, %v18482_v7  ;;  %v13762_v55 = vcombine.high %v23087_v56, %v23094_v9  ;;  %v6880_v6 = vcombine.low %v23095_v37, %v17216_v41  ;;  %v2889_v20 = vcombine.low %v17297_v2, %v17310_v10 }
 0x1f6   : > { %23093 = vst [vmem:[#allocation461_spill] sm:$0xff] %v18492_v45  ;;  %v18502_v51 = vrot.slane %v2672_v39, %v14577_v23  ;;  %6011 = vst.msk [vmem:[#allocation2 + $0x94] sm:$0xf] %vm5973_vm0, %v18196_v38  ;;  %v2623_v17 = vrot.slane %v2616_v42, %v14577_v23  ;;  %v6862_v61 = vrot.slane %v6855_v52, %v14577_v23 }
 0x1f7   : > { %v6871_v39 = vcombine.low %v18485_v4, %v18492_v45  ;;  %v18519_v7 = vrot.slane %v2648_v29, %v14577_v23  ;;  %v18524_v10 = vrot.slane %v13762_v55, %v14577_v23  ;;  %v18527_v2 = vrot.slane %v6880_v6, %v14577_v23 }
 0x1f8   : > { %v2688_v21 = vcombine.low %v18502_v51, %v18299_v28  ;;  %v18530_v38 = vrot.slane %v2889_v20, %v14577_v23  ;;  %2998 = vst.msk [vmem:[#allocation2 + $0x90] sm:$0xf] %vm2961_vm15, %v2623_v17  ;;  %7009 = vrot.lane.b32.xlu0 %v6862_v61, %s14451_s27  ;;  %v6903_v28 = vcombine.low %v17300_v1, %v17314_v53  ;;  %v23099_v20 = vld [vmem:[#allocation354_spill] sm:$0xff] }
 0x1f9   : > { %23096 = vst [vmem:[#allocation408_spill] sm:$0xff] %v18524_v10  ;;  %23097 = vst [vmem:[#allocation409_spill] sm:$0xff] %v18527_v2  ;;  %v6878_v42 = vrot.slane %v6871_v39, %v14577_v23  ;;  %v2664_v52 = vcombine.low %v18519_v7, %v18268_v50  ;;  %v2720_v29 = vcombine.low %v23048_v31, %v23058_v32  ;;  %v23101_v39 = vld [vmem:[#allocation8_spill] sm:$0xff]  ;;  %v18560_v32 = vpop.permute.xlu0 %5922 }
 0x1fa   : > { %6010 = vst.msk [vmem:[#allocation2 + $0x90] sm:$0xf] %vm5973_vm0, %v18184_v25  ;;  %v18544_v55 = vrot.slane %v2688_v21, %v14577_v23  ;;  %v6895_v61 = vcombine.low %v18524_v10, %v18527_v2  ;;  %v2696_v6 = vcombine.low %v23043_v3, %v23049_v15  ;;  %v2697_v17 = vcombine.low %v23046_v40, %v23099_v20  ;;  %v23100_v21 = vld [vmem:[#allocation12_spill] sm:$0xff] }
 0x1fb   : > { %7011 = vrot.lane.b32.xlu1 %v6878_v42, %s14451_s27  ;;  %v2671_v53 = vrot.slane %v2664_v52, %v14577_v23  ;;  %v6910_v31 = vrot.slane %v6903_v28, %v14577_v23  ;;  %v18556_v25 = vrot.slane %v2720_v29, %v14577_v23  ;;  %v7214_v45 = vcombine.low %v23101_v39, %v23100_v21  ;;  %v23103_v52 = vld [vmem:[#allocation13_spill] sm:$0xff]  ;;  %v18571_v29 = vpop.permute.xlu1 %6919 }
 0x1fc   : > { %23098 = vst [vmem:[#allocation462_spill] sm:$0xff] %v18544_v55  ;;  %3001 = vst.msk [vmem:[#allocation2 + $0x9c] sm:$0xf] %vm2961_vm15, %v18544_v55  ;;  %v6902_v3 = vrot.slane %v6895_v61, %v14577_v23  ;;  %v18566_v15 = vrot.slane %v2696_v6, %v14577_v23  ;;  %v2711_v42 = vrot.slane %v2697_v17, %v14577_v23  ;;  %v23104_v28 = vld [vmem:[#allocation9_spill] sm:$0xff] }
 0x1fd   : > { %v7230_v2 = vcombine.low %v23104_v28, %v23103_v52  ;;  %6013 = vst.msk [vmem:[#allocation2 + $0x9c] sm:$0xf] %vm5973_vm0, %v18257_v19  ;;  %v6911_v21 = vcombine.low %v18530_v38, %v6910_v31  ;;  %v2736_v61 = vcombine.low %v18556_v25, %v18355_v36  ;;  %v7221_v6 = vrot.slane %v7214_v45, %v14577_v23  ;;  %v23106_v52 = vld [vmem:[#allocation373_spill] sm:$0xff] }
 0x1fe   : > { %23102 = vst [vmem:[#allocation354_spill] sm:$0xff] %v18566_v15  ;;  %3000 = vst.msk [vmem:[#allocation2 + $0x98] sm:$0xf] %vm2961_vm15, %v2671_v53  ;;  %v2768_v17 = vcombine.low %v23062_v13, %v23073_v49  ;;  %7013 = vrot.lane.b32.xlu0 %v6902_v3, %s14451_s27  ;;  %v2712_v39 = vcombine.low %v18566_v15, %v2711_v42  ;;  %v23105_v53 = vld [vmem:[#allocation368_spill] sm:$0xff]  ;;  %v2744_v36 = vcombine.low %v23106_v52, %v23063_v47  ;;  %v23108_v13 = vld [vmem:[#allocation11_spill] sm:$0xff]  ;;  %v18599_v3 = vpop.permute.xlu0 %6921 }
 0x1ff   : > { %6012 = vst.msk [vmem:[#allocation2 + $0x98] sm:$0xf] %vm5973_vm0, %v18243_v54  ;;  %v7237_v19 = vrot.slane %v7230_v2, %v14577_v23  ;;  %v2769_v31 = vcombine.low %v23069_v26, %v23105_v53  ;;  %v6918_v45 = vrot.slane %v6911_v21, %v14577_v23  ;;  %v18593_v28 = vrot.slane %v2736_v61, %v14577_v23  ;;  %v23109_v42 = vld [vmem:[#allocation441_spill] sm:$0xff]  ;;  %v18607_v21 = vpop.permute.xlu1 %6923  ;;  %v23113_v52 = vld [vmem:[#allocation26_spill] sm:$0xff] }
 0x200   : > { %v7222_v49 = vcombine.low %v7221_v6, %v23108_v13  ;;  %v18597_v54 = vrot.slane %v2768_v17, %v14577_v23  ;;  %v2719_v2 = vrot.slane %v2712_v39, %v14577_v23  ;;  %v18605_v47 = vrot.slane %v2744_v36, %v14577_v23  ;;  %v23110_v6 = vld [vmem:[#allocation28_spill] sm:$0xff]  ;;  %v23111_v17 = vld [vmem:[#allocation21_spill] sm:$0xff]  ;;  %v23112_v39 = vld [vmem:[#allocation27_spill] sm:$0xff]  ;;  %7067 = vst.msk [vmem:[#allocation2] sm:$0xf] %vm7066_vm1, %v18571_v29 }
 0x201   : > { %23107 = vst [vmem:[#allocation12_spill] sm:$0xff] %v18593_v28  ;;  %v7238_v10 = vcombine.low %v7237_v19, %v23109_v42  ;;  %v2783_v55 = vrot.slane %v2769_v31, %v14577_v23  ;;  %7015 = vrot.lane.b32.xlu1 %v6918_v45, %s14451_s27  ;;  %3003 = vst.msk [vmem:[#allocation2 + $0xa4] sm:$0xf] %vm2961_vm15, %v18593_v28  ;;  %v7246_v13 = vcombine.low %v23111_v17, %v23110_v6  ;;  %v23117_v6 = vld [vmem:[#allocation29_spill] sm:$0xff]  ;;  %v23138_v29 = vld [vmem:[#allocation78_spill] sm:$0xff]  ;;  %s14455_s27 = smov 48  }
 0x202   : > { %v7229_v61 = vrot.slane %v7222_v49, %v14577_v23  ;;  %v7262_v19 = vcombine.low %v23113_v52, %v23112_v39  ;;  %v2816_v31 = vcombine.low %v23078_v16, %v23086_v57  ;;  %6015 = vst.msk [vmem:[#allocation2 + $0xa4] sm:$0xf] %vm5973_vm0, %v18317_v5  ;;  %v2760_v49 = vcombine.low %v18605_v47, %v18375_v0  ;;  %v6926_v39 = vpop.permute.xlu0 %6925  ;;  %v23122_v28 = vld [vmem:[#allocation97_spill] sm:$0xff]  ;;  %v23215_v0 = vld [vmem:[#allocation228_spill] sm:$0xff] }
 0x203   : > { %3002 = vst.msk [vmem:[#allocation2 + $0xa0] sm:$0xf] %vm2961_vm15, %v2719_v2  ;;  %v7245_v36 = vrot.slane %v7238_v10, %v14577_v23  ;;  %v2784_v45 = vcombine.low %v18597_v54, %v2783_v55  ;;  %v2792_v42 = vcombine.low %v23072_v22, %v23079_v63  ;;  %v18632_v5 = vrot.slane %v7246_v13, %v14577_v23  ;;  %v23116_v55 = vld [vmem:[#allocation45_spill] sm:$0xff]  ;;  %v6928_v57 = vpop.permute.xlu1 %6927 }
 0x204   : > { %6014 = vst.msk [vmem:[#allocation2 + $0xa0] sm:$0xf] %vm5973_vm0, %v18306_v34  ;;  %8038 = vrot.lane.b32.xlu0 %v7229_v61, %s14452_s10  ;;  %v18635_v2 = vrot.slane %v7262_v19, %v14577_v23  ;;  %v18638_v10 = vrot.slane %v2816_v31, %v14577_v23  ;;  %v7278_v17 = vcombine.low %v23117_v6, %v23116_v55  ;;  %v23119_v61 = vld [vmem:[#allocation42_spill] sm:$0xff]  ;;  %v23120_v13 = vld [vmem:[#allocation49_spill] sm:$0xff]  ;;  %v23121_v19 = vld [vmem:[#allocation92_spill] sm:$0xff] }
 0x205   : > { %23114 = vst [vmem:[#allocation8_spill] sm:$0xff] %v18632_v5  ;;  %v2791_v22 = vrot.slane %v2784_v45, %v14577_v23  ;;  %v2767_v34 = vrot.slane %v2760_v49, %v14577_v23  ;;  %v18645_v63 = vrot.slane %v2792_v42, %v14577_v23  ;;  %v7294_v52 = vcombine.low %v23120_v13, %v23119_v61  ;;  %v23125_v61 = vld [vmem:[#allocation412_spill] sm:$0xff] }
 0x206   : > { %23115 = vst [vmem:[#allocation13_spill] sm:$0xff] %v18635_v2  ;;  %8040 = vrot.lane.b32.xlu1 %v7245_v36, %s14452_s10  ;;  %v7254_v31 = vcombine.low %v18632_v5, %v23121_v19  ;;  %v7270_v55 = vcombine.low %v18635_v2, %v23122_v28  ;;  %v2832_v45 = vcombine.low %v18638_v10, %v18474_v33  ;;  %v23129_v19 = vld [vmem:[#allocation413_spill] sm:$0xff]  ;;  %7068 = vst.msk [vmem:[#allocation2 + $0x4] sm:$0xf] %vm7066_vm1, %v18599_v3  ;;  %v23139_v3 = vld [vmem:[#allocation59_spill] sm:$0xff] }
 0x207   : > { %23118 = vst [vmem:[#allocation9_spill] sm:$0xff] %v18645_v63  ;;  %v18657_v49 = vrot.slane %v7278_v17, %v14577_v23  ;;  %3005 = vst.msk [vmem:[#allocation2 + $0xac] sm:$0xf] %vm2961_vm15, %v2791_v22  ;;  %v2808_v42 = vcombine.low %v18645_v63, %v18429_v43  ;;  %v18664_v36 = vrot.slane %v7294_v52, %v14577_v23  ;;  %v23127_v22 = vld [vmem:[#allocation117_spill] sm:$0xff] }
 0x208   : > { %3004 = vst.msk [vmem:[#allocation2 + $0xa8] sm:$0xf] %vm2961_vm15, %v2767_v34  ;;  %v2864_v6 = vcombine.low %v17184_v59, %v23095_v37  ;;  %v2865_v13 = vcombine.low %v23094_v9, %v23125_v61  ;;  %v18675_v17 = vrot.slane %v7254_v31, %v14577_v23  ;;  %v7277_v43 = vrot.slane %v7270_v55, %v14577_v23  ;;  %v6930_v59 = vpop.permute.xlu0 %6929  ;;  %v6932_v31 = vpop.permute.xlu1 %6931 }
 0x209   : > { %23123 = vst [vmem:[#allocation11_spill] sm:$0xff] %v18657_v49  ;;  %23124 = vst [vmem:[#allocation441_spill] sm:$0xff] %v18664_v36  ;;  %v2839_v52 = vrot.slane %v2832_v45, %v14577_v23  ;;  %v7286_v34 = vcombine.low %v18657_v49, %v23127_v22  ;;  %v18682_v37 = vrot.slane %v2808_v42, %v14577_v23  ;;  %v23132_v45 = vld [vmem:[#allocation393_spill] sm:$0xff]  ;;  %v23133_v22 = vld [vmem:[#allocation43_spill] sm:$0xff] }
 0x20a   : > { %6017 = vst.msk [vmem:[#allocation2 + $0xac] sm:$0xf] %vm5973_vm0, %v18379_v8  ;;  %6016 = vst.msk [vmem:[#allocation2 + $0xa8] sm:$0xf] %vm5973_vm0, %v18369_v24  ;;  %v7302_v8 = vcombine.low %v18664_v36, %v23129_v19  ;;  %v18687_v2 = vrot.slane %v2864_v6, %v14577_v23  ;;  %v2879_v24 = vrot.slane %v2865_v13, %v14577_v23  ;;  %8042 = vrot.lane.b32.xlu0 %v18675_v17, %s14452_s10  ;;  %v23134_v19 = vld [vmem:[#allocation44_spill] sm:$0xff]  ;;  %v23204_v36 = vld [vmem:[#allocation193_spill] sm:$0xff] }
 0x20b   : > { %23126 = vst [vmem:[#allocation28_spill] sm:$0xff] %v18675_v17  ;;  %23128 = vst [vmem:[#allocation21_spill] sm:$0xff] %v18682_v37  ;;  %8044 = vrot.lane.b32.xlu1 %v7277_v43, %s14452_s10  ;;  %v18695_v55 = vrot.slane %v7286_v34, %v14577_v23  ;;  %v2840_v42 = vcombine.low %v23132_v45, %v23090_v35  ;;  %v7310_v6 = vcombine.low %v23134_v19, %v23133_v22  ;;  %v23136_v34 = vld [vmem:[#allocation57_spill] sm:$0xff]  ;;  %v23161_v22 = vld [vmem:[#allocation127_spill] sm:$0xff] }
 0x20c   : > { %23130 = vst [vmem:[#allocation27_spill] sm:$0xff] %v18687_v2  ;;  %3007 = vst.msk [vmem:[#allocation2 + $0xb4] sm:$0xf] %vm2961_vm15, %v2839_v52  ;;  %v7309_v13 = vrot.slane %v7302_v8, %v14577_v23  ;;  %v2880_v43 = vcombine.low %v18687_v2, %v2879_v24  ;;  %v23135_v52 = vld [vmem:[#allocation60_spill] sm:$0xff]  ;;  %v2888_v35 = vcombine.low %v17216_v41, %v17300_v1  ;;  %v23140_v8 = vld [vmem:[#allocation79_spill] sm:$0xff] }
 0x20d   : > { %23131 = vst [vmem:[#allocation45_spill] sm:$0xff] %v18695_v55  ;;  %6019 = vst.msk [vmem:[#allocation2 + $0xb4] sm:$0xf] %vm5973_vm0, %v18446_v58  ;;  %v7326_v17 = vcombine.low %v23136_v34, %v23135_v52  ;;  %v18724_v41 = vrot.slane %v2840_v42, %v14577_v23  ;;  %v18727_v58 = vrot.slane %v7310_v6, %v14577_v23  ;;  %v23143_v42 = vld [vmem:[#allocation80_spill] sm:$0xff]  ;;  %v6936_v6 = vpop.permute.xlu1 %6935 }
 0x20e   : > { %3006 = vst.msk [vmem:[#allocation2 + $0xb0] sm:$0xf] %vm2961_vm15, %v18682_v37  ;;  %v7374_v19 = vcombine.low %v23143_v42, %v22858_v27  ;;  %8046 = vrot.lane.b32.xlu0 %v18695_v55, %s14452_s10  ;;  %v23144_v52 = vld [vmem:[#allocation444_spill] sm:$0xff]  ;;  %v23146_v27 = vld [vmem:[#allocation443_spill] sm:$0xff] }
 0x20f   : > { %7069 = vst.msk [vmem:[#allocation2 + $0x8] sm:$0xf] %vm7066_vm1, %v18607_v21  ;;  %7070 = vst.msk [vmem:[#allocation2 + $0xc] sm:$0xf] %vm7066_vm1, %v6926_v39  ;;  %v7342_v21 = vcombine.low %v23139_v3, %v23138_v29  ;;  %v23141_v39 = vld [vmem:[#allocation75_spill] sm:$0xff]  ;;  %8048 = vrot.lane.b32.xlu1 %v7309_v13, %s14452_s10 }
 0x210   : > { %7071 = vst.msk [vmem:[#allocation2 + $0x10] sm:$0xf] %vm7066_vm1, %v6928_v57  ;;  %7072 = vst.msk [vmem:[#allocation2 + $0x14] sm:$0xf] %vm7066_vm1, %v6930_v59  ;;  %v7358_v24 = vcombine.low %v23141_v39, %v23140_v8  ;;  %v6934_v57 = vpop.permute.xlu0 %6933  ;;  %v2887_v59 = vrot.slane %v2880_v43, %v14577_v23  ;;  %v2856_v43 = vcombine.low %v18724_v41, %v18485_v4  ;;  %v23151_v39 = vld [vmem:[#allocation447_spill] sm:$0xff] }
 0x211   : > { %7073 = vst.msk [vmem:[#allocation2 + $0x18] sm:$0xf] %vm7066_vm1, %v6932_v31  ;;  %23137 = vst [vmem:[#allocation29_spill] sm:$0xff] %v18727_v58  ;;  %v18735_v31 = vrot.slane %v7326_v17, %v14577_v23  ;;  %v7318_v17 = vcombine.low %v18727_v58, %v23144_v52  ;;  %v18763_v4 = vrot.slane %v7374_v19, %v14577_v23 }
 0x212   : > { %6018 = vst.msk [vmem:[#allocation2 + $0xb0] sm:$0xf] %vm5973_vm0, %v18433_v18  ;;  %v18738_v18 = vrot.slane %v2888_v35, %v14577_v23  ;;  %v18751_v35 = vrot.slane %v7342_v21, %v14577_v23  ;;  %v18760_v13 = vrot.slane %v7358_v24, %v14577_v23  ;;  %v18768_v21 = vrot.slane %v2856_v43, %v14577_v23  ;;  %v23156_v43 = vld [vmem:[#allocation449_spill] sm:$0xff] }
 0x213   : > { %23142 = vst [vmem:[#allocation42_spill] sm:$0xff] %v18735_v31  ;;  %7074 = vst.msk [vmem:[#allocation2 + $0x1c] sm:$0xf] %vm7066_vm1, %v6934_v57  ;;  %v7334_v29 = vcombine.low %v18735_v31, %v23146_v27  ;;  %v18771_v8 = vrot.slane %v7318_v17, %v14577_v23  ;;  %v23155_v27 = vld [vmem:[#allocation446_spill] sm:$0xff]  ;;  %v7382_v42 = vcombine.low %v18763_v4, %v23156_v43  ;;  %v6940_v17 = vpop.permute.xlu1 %6939 }
 0x214   : > { %23145 = vst [vmem:[#allocation49_spill] sm:$0xff] %v18751_v35  ;;  %7075 = vst.msk [vmem:[#allocation2 + $0x20] sm:$0xf] %vm7066_vm1, %v6936_v6  ;;  %v2904_v3 = vcombine.low %v18738_v18, %v18530_v38  ;;  %v7350_v57 = vcombine.low %v18751_v35, %v23151_v39  ;;  %v23153_v38 = vld [vmem:[#allocation101_spill] sm:$0xff]  ;;  %v6938_v24 = vpop.permute.xlu0 %6937  ;;  %v23158_v39 = vld [vmem:[#allocation123_spill] sm:$0xff] }
 0x215   : > { %3009 = vst.msk [vmem:[#allocation2 + $0xbc] sm:$0xf] %vm2961_vm15, %v2887_v59  ;;  %23147 = vst [vmem:[#allocation92_spill] sm:$0xff] %v18760_v13  ;;  %v23152_v59 = vld [vmem:[#allocation94_spill] sm:$0xff]  ;;  %v7341_v55 = vrot.slane %v7334_v29, %v14577_v23  ;;  %8050 = vrot.lane.b32.xlu0 %v18771_v8, %s14452_s10  ;;  %v23184_v35 = vld [vmem:[#allocation171_spill] sm:$0xff] }
 0x216   : > { %23148 = vst [vmem:[#allocation97_spill] sm:$0xff] %v18763_v4  ;;  %6021 = vst.msk [vmem:[#allocation2 + $0xbc] sm:$0xf] %vm5973_vm0, %v18510_v14  ;;  %v7390_v6 = vcombine.low %v23153_v38, %v23152_v59  ;;  %v18779_v19 = vrot.slane %v2904_v3, %v14577_v23  ;;  %v7366_v14 = vcombine.low %v18760_v13, %v23155_v27  ;;  %v23159_v59 = vld [vmem:[#allocation99_spill] sm:$0xff]  ;;  %v23160_v38 = vld [vmem:[#allocation112_spill] sm:$0xff] }
 0x217   : > { %23149 = vst [vmem:[#allocation412_spill] sm:$0xff] %v18768_v21  ;;  %23150 = vst [vmem:[#allocation117_spill] sm:$0xff] %v18771_v8  ;;  %v7357_v29 = vrot.slane %v7350_v57, %v14577_v23  ;;  %v7406_v27 = vcombine.low %v23159_v59, %v23158_v39  ;;  %v7422_v34 = vcombine.low %v23161_v22, %v23160_v38  ;;  %8052 = vrot.lane.b32.xlu1 %v7341_v55, %s14452_s10  ;;  %v23165_v39 = vld [vmem:[#allocation131_spill] sm:$0xff]  ;;  %v23166_v59 = vld [vmem:[#allocation125_spill] sm:$0xff] }
 0x218   : > { %23154 = vst [vmem:[#allocation413_spill] sm:$0xff] %v18779_v19  ;;  %7076 = vst.msk [vmem:[#allocation2 + $0x24] sm:$0xf] %vm7066_vm1, %v6938_v24  ;;  %v18792_v3 = vrot.slane %v7390_v6, %v14577_v23  ;;  %v18805_v57 = vrot.slane %v7366_v14, %v14577_v23  ;;  %v23163_v6 = vld [vmem:[#allocation140_spill] sm:$0xff]  ;;  %v23164_v24 = vld [vmem:[#allocation114_spill] sm:$0xff]  ;;  %v7454_v45 = vcombine.low %v23166_v59, %v23165_v39  ;;  %v6942_v14 = vpop.permute.xlu0 %6941 }
 0x219   : > { %3008 = vst.msk [vmem:[#allocation2 + $0xb8] sm:$0xf] %vm2961_vm15, %v18768_v21  ;;  %3010 = vst.msk [vmem:[#allocation2 + $0xc0] sm:$0xf] %vm2961_vm15, %v18779_v19  ;;  %v7438_v8 = vcombine.low %v23164_v24, %v23163_v6  ;;  %v23167_v22 = vld [vmem:[#allocation448_spill] sm:$0xff]  ;;  %v18816_v55 = vrot.slane %v7406_v27, %v14577_v23  ;;  %v23171_v4 = vld [vmem:[#allocation135_spill] sm:$0xff]  ;;  %v6944_v6 = vpop.permute.xlu1 %6943  ;;  %8054 = vrot.lane.b32.xlu0 %v7357_v29, %s14452_s10 }
 0x21a   : > { %23157 = vst [vmem:[#allocation44_spill] sm:$0xff] %v18792_v3  ;;  %7077 = vst.msk [vmem:[#allocation2 + $0x28] sm:$0xf] %vm7066_vm1, %v6940_v17  ;;  %v18819_v17 = vrot.slane %v7422_v34, %v14577_v23  ;;  %v23170_v38 = vld [vmem:[#allocation156_spill] sm:$0xff]  ;;  %v23172_v39 = vld [vmem:[#allocation191_spill] sm:$0xff]  ;;  %v18832_v34 = vrot.slane %v7454_v45, %v14577_v23 }
 0x21b   : > { %6020 = vst.msk [vmem:[#allocation2 + $0xb8] sm:$0xf] %vm5973_vm0, %v18496_v30  ;;  %23162 = vst [vmem:[#allocation60_spill] sm:$0xff] %v18805_v57  ;;  %v7398_v30 = vcombine.low %v18792_v3, %v23167_v22  ;;  %v7470_v13 = vcombine.low %v23171_v4, %v23170_v38  ;;  %v7414_v59 = vcombine.low %v18816_v55, %v23172_v39  ;;  %8056 = vrot.lane.b32.xlu1 %v18805_v57, %s14452_s10  ;;  %v23176_v29 = vld [vmem:[#allocation450_spill] sm:$0xff]  ;;  %v23178_v22 = vld [vmem:[#allocation151_spill] sm:$0xff] }
 0x21c   : > { %6022 = vst.msk [vmem:[#allocation2 + $0xc0] sm:$0xf] %vm5973_vm0, %v18560_v32  ;;  %23168 = vst [vmem:[#allocation78_spill] sm:$0xff] %v18816_v55  ;;  %v7389_v32 = vrot.slane %v7382_v42, %v14577_v23  ;;  %v18829_v27 = vrot.slane %v7438_v8, %v14577_v23  ;;  %v7430_v42 = vcombine.low %v18819_v17, %v23176_v29  ;;  %v23177_v38 = vld [vmem:[#allocation154_spill] sm:$0xff]  ;;  %v6946_v39 = vpop.permute.xlu0 %6945  ;;  %v23205_v19 = vld [vmem:[#allocation195_spill] sm:$0xff] }
 0x21d   : > { %23169 = vst [vmem:[#allocation59_spill] sm:$0xff] %v18819_v17  ;;  %7078 = vst.msk [vmem:[#allocation2 + $0x2c] sm:$0xf] %vm7066_vm1, %v6942_v14  ;;  %v18838_v4 = vrot.slane %v7398_v30, %v14577_v23  ;;  %v7486_v14 = vcombine.low %v23178_v22, %v23177_v38  ;;  %v18848_v8 = vrot.slane %v7470_v13, %v14577_v23  ;;  %v23181_v24 = vld [vmem:[#allocation158_spill] sm:$0xff]  ;;  %v6948_v30 = vpop.permute.xlu1 %6947  ;;  %v23182_v22 = vld [vmem:[#allocation208_spill] sm:$0xff] }
 0x21e   : > { %23173 = vst [vmem:[#allocation79_spill] sm:$0xff] %v18829_v27  ;;  %23174 = vst [vmem:[#allocation75_spill] sm:$0xff] %v18832_v34  ;;  %v13763_v45 = vld.sshfl [vmem:[%s21516_s0 + $0x70] sm:$0x33 pattern:$0x75316420]  ;;  %8058 = vrot.lane.b32.xlu0 %v7389_v32, %s14452_s10  ;;  %v7421_v38 = vrot.slane %v7414_v59, %v14577_v23  ;;  %v7446_v55 = vcombine.low %v18829_v27, %v23182_v22 }
 0x21f   : > { %7079 = vst.msk [vmem:[#allocation2 + $0x30] sm:$0xf] %vm7066_vm1, %v6944_v6  ;;  %23175 = vst [vmem:[#allocation444_spill] sm:$0xff] %v18838_v4  ;;  %v23180_v6 = vld [vmem:[#allocation178_spill] sm:$0xff]  ;;  %8060 = vrot.lane.b32.xlu1 %v18838_v4, %s14452_s10  ;;  %v18871_v32 = vrot.slane %v7486_v14, %v14577_v23  ;;  %v7127_v59 = vcombine.high %v13763_v45, %v13763_v45 }
 0x220   : > { %23179 = vst [vmem:[#allocation447_spill] sm:$0xff] %v18848_v8  ;;  %v7502_v57 = vcombine.low %v23181_v24, %v23180_v6  ;;  %7080 = vst.msk [vmem:[#allocation2 + $0x34] sm:$0xf] %vm7066_vm1, %v6946_v39  ;;  %v23183_v3 = vld [vmem:[#allocation210_spill] sm:$0xff]  ;;  %v18868_v39 = vrot.slane %v7430_v42, %v14577_v23  ;;  %v23188_v6 = vld [vmem:[#allocation7_spill] sm:$0xff]  ;;  %v6950_v4 = vpop.permute.xlu0 %6949  ;;  %v7453_v14 = vrot.slane %v7446_v55, %v14577_v23 }
 0x221   : > { %v13764_v17 = vld.sshfl [vmem:[%s21516_s0 + $0x74] sm:$0x33 pattern:$0x75316420]  ;;  %v7462_v13 = vcombine.low %v18832_v34, %v23183_v3  ;;  %v23185_v31 = vld [vmem:[#allocation182_spill] sm:$0xff]  ;;  %23187 = vst [vmem:[#allocation101_spill] sm:$0xff] %v18871_v32  ;;  %v18874_v22 = vrot.slane %v13763_v45, %v23188_v6  ;;  %v18885_v42 = vrot.slane %v7127_v59, %v23188_v6 }
 0x222   : > { %v7518_v24 = vcombine.low %v23185_v31, %v23184_v35  ;;  %7081 = vst.msk [vmem:[#allocation2 + $0x38] sm:$0xf] %vm7066_vm1, %v6948_v30  ;;  %23186 = vst [vmem:[#allocation94_spill] sm:$0xff] %v18868_v39  ;;  %v7151_v27 = vcombine.high %v13764_v17, %v13764_v17  ;;  %v18877_v3 = vrot.slane %v13764_v17, %v23188_v6  ;;  %v23191_v35 = vld [vmem:[#allocation174_spill] sm:$0xff]  ;;  %8062 = vrot.lane.b32.xlu0 %v7421_v38, %s14452_s10  ;;  %v23192_v34 = vld [vmem:[#allocation217_spill] sm:$0xff] }
 0x223   : > { %v18880_v31 = vrot.slane %v7502_v57, %v14577_v23  ;;  %v7534_v30 = vcombine.low %v23191_v35, %v22929_v12  ;;  %v7469_v45 = vrot.slane %v7462_v13, %v14577_v23  ;;  %v7478_v17 = vcombine.low %v18848_v8, %v23192_v34  ;;  %7082 = vst.msk [vmem:[#allocation2 + $0x3c] sm:$0xf] %vm7066_vm1, %v6950_v4  ;;  %v6952_v57 = vpop.permute.xlu1 %6951  ;;  %v23194_v59 = vld [vmem:[#allocation213_spill] sm:$0xff]  ;;  %v23195_v38 = vld [vmem:[#allocation190_spill] sm:$0xff]  ;;  %v23196_v12 = vld [vmem:[#allocation183_spill] sm:$0xff] }
 0x224   : > { %23189 = vst [vmem:[#allocation446_spill] sm:$0xff] %v18877_v3  ;;  %v18893_v58 = vrot.slane %v7518_v24, %v14577_v23  ;;  %8064 = vrot.lane.b32.xlu1 %v18868_v39, %s14452_s10  ;;  %v7494_v35 = vcombine.low %v18871_v32, %v23194_v59  ;;  %v7550_v55 = vcombine.low %v23196_v12, %v23195_v38  ;;  %7083 = vst.msk [vmem:[#allocation2 + $0x40] sm:$0xf] %vm7066_vm1, %v6952_v57  ;;  %v23199_v39 = vld [vmem:[#allocation238_spill] sm:$0xff] }
 0x225   : > { %23190 = vst [vmem:[#allocation123_spill] sm:$0xff] %v18880_v31  ;;  %v18904_v13 = vcombine.high %v18874_v22, %v18874_v22  ;;  %v18908_v34 = vcombine.high %v18885_v42, %v18885_v42  ;;  %v18912_v4 = vrot.slane %v7151_v27, %v23188_v6  ;;  %v18916_v24 = vcombine.high %v18877_v3, %v18877_v3  ;;  %v23202_v8 = vld [vmem:[#allocation234_spill] sm:$0xff]  ;;  %v23203_v27 = vld [vmem:[#allocation196_spill] sm:$0xff] }
 0x226   : > { %23193 = vst [vmem:[#allocation99_spill] sm:$0xff] %v18893_v58  ;;  %v7510_v38 = vcombine.low %v18880_v31, %v23199_v39  ;;  %v18921_v12 = vrot.slane %v7534_v30, %v14577_v23  ;;  %8066 = vrot.lane.b32.xlu0 %v7453_v14, %s14452_s10  ;;  %v18925_v32 = vrot.slane %v7478_v17, %v14577_v23  ;;  %v23208_v31 = vld [vmem:[#allocation453_spill] sm:$0xff] }
 0x227   : > { %23197 = vst [vmem:[#allocation127_spill] sm:$0xff] %v18912_v4  ;;  %23198 = vst [vmem:[#allocation140_spill] sm:$0xff] %v18916_v24  ;;  %v7526_v57 = vcombine.low %v18893_v58, %v23202_v8  ;;  %v7566_v49 = vcombine.low %v23204_v36, %v23203_v27  ;;  %v7567_v5 = vcombine.low %v23205_v19, %v18874_v22  ;;  %v6954_v8 = vpop.permute.xlu0 %6953  ;;  %v6956_v36 = vpop.permute.xlu1 %6955 }
 0x228   : > { %23200 = vst [vmem:[#allocation131_spill] sm:$0xff] %v18921_v12  ;;  %23201 = vst [vmem:[#allocation125_spill] sm:$0xff] %v18925_v32  ;;  %8068 = vrot.lane.b32.xlu1 %v7469_v45, %s14452_s10  ;;  %v7501_v39 = vrot.slane %v7494_v35, %v14577_v23  ;;  %v18936_v30 = vrot.slane %v7550_v55, %v14577_v23  ;;  %v7590_v14 = vcombine.low %v18885_v42, %v18908_v34  ;;  %v23209_v35 = vld [vmem:[#allocation227_spill] sm:$0xff] }
 0x229   : > { %v7591_v17 = vcombine.low %v18904_v13, %v18877_v3  ;;  %7084 = vst.msk [vmem:[#allocation2 + $0x44] sm:$0xf] %vm7066_vm1, %v6954_v8  ;;  %v18944_v58 = vrot.slane %v7510_v38, %v14577_v23  ;;  %v7542_v45 = vcombine.low %v18921_v12, %v23208_v31  ;;  %v7614_v55 = vcombine.low %v18912_v4, %v23209_v35  ;;  %v23211_v38 = vld [vmem:[#allocation220_spill] sm:$0xff] }
 0x22a   : > { %23206 = vst [vmem:[#allocation448_spill] sm:$0xff] %v18936_v30  ;;  %7085 = vst.msk [vmem:[#allocation2 + $0x48] sm:$0xf] %vm7066_vm1, %v6956_v36  ;;  %8070 = vrot.lane.b32.xlu0 %v18925_v32, %s14452_s10  ;;  %v7533_v21 = vrot.slane %v7526_v57, %v14577_v23  ;;  %v18955_v37 = vrot.slane %v7566_v49, %v14577_v23  ;;  %v7581_v8 = vrot.slane %v7567_v5, %v14577_v23  ;;  %v23212_v12 = vld [vmem:[#allocation452_spill] sm:$0xff]  ;;  %v23214_v57 = vld [vmem:[#allocation219_spill] sm:$0xff] }
 0x22b   : > { %23207 = vst [vmem:[#allocation156_spill] sm:$0xff] %v18944_v58  ;;  %v7615_v1 = vcombine.low %v18916_v24, %v23211_v38  ;;  %v7558_v33 = vcombine.low %v18936_v30, %v23212_v12  ;;  %v18964_v36 = vrot.slane %v7590_v14, %v14577_v23  ;;  %v18967_v32 = vrot.slane %v7591_v17, %v14577_v23  ;;  %v6958_v16 = vpop.permute.xlu0 %6957  ;;  %v6960_v38 = vpop.permute.xlu1 %6959  ;;  %v23217_v12 = vld [vmem:[#allocation237_spill] sm:$0xff]  ;;  %v23218_v30 = vld [vmem:[#allocation222_spill] sm:$0xff] }
 0x22c   : > { %23210 = vst [vmem:[#allocation135_spill] sm:$0xff] %v18955_v37  ;;  %8072 = vrot.lane.b32.xlu1 %v7501_v39, %s14452_s10  ;;  %v7638_v49 = vcombine.low %v23215_v0, %v23214_v57  ;;  %v18972_v5 = vrot.slane %v7542_v45, %v14577_v23  ;;  %7086 = vst.msk [vmem:[#allocation2 + $0x4c] sm:$0xf] %vm7066_vm1, %v6958_v16  ;;  %v7582_v39 = vcombine.low %v18955_v37, %v7581_v8  ;;  %v23219_v8 = vld [vmem:[#allocation235_spill] sm:$0xff] }
 0x22d   : > { %23213 = vst [vmem:[#allocation191_spill] sm:$0xff] %v18964_v36  ;;  %v7622_v14 = vrot.slane %v7614_v55, %v14577_v23  ;;  %v18980_v17 = vrot.slane %v7615_v1, %v14577_v23  ;;  %v7654_v0 = vcombine.low %v23218_v30, %v23217_v12  ;;  %7087 = vst.msk [vmem:[#allocation2 + $0x50] sm:$0xf] %vm7066_vm1, %v6960_v38  ;;  %v23221_v38 = vld [vmem:[#allocation259_spill] sm:$0xff] }
 0x22e   : > { %23216 = vst [vmem:[#allocation450_spill] sm:$0xff] %v18972_v5  ;;  %8074 = vrot.lane.b32.xlu0 %v18944_v58, %s14452_s10  ;;  %v7565_v16 = vrot.slane %v7558_v33, %v14577_v23  ;;  %v7606_v45 = vcombine.low %v18964_v36, %v18967_v32  ;;  %v7645_v57 = vrot.slane %v7638_v49, %v14577_v23  ;;  %v23220_v58 = vld [vmem:[#allocation244_spill] sm:$0xff]  ;;  %v23222_v33 = vld [vmem:[#allocation239_spill] sm:$0xff]  ;;  %v23227_v36 = vld [vmem:[#allocation253_spill] sm:$0xff] }
 0x22f   : > { %v7670_v55 = vcombine.low %v23220_v58, %v23219_v8  ;;  %v6962_v37 = vpop.permute.xlu0 %6961  ;;  %v7589_v1 = vrot.slane %v7582_v39, %v14577_v23  ;;  %v7630_v30 = vcombine.low %v7622_v14, %v18980_v17  ;;  %v7686_v12 = vcombine.low %v23222_v33, %v23221_v38  ;;  %v23224_v58 = vld [vmem:[#allocation280_spill] sm:$0xff]  ;;  %v23226_v39 = vld [vmem:[#allocation255_spill] sm:$0xff]  ;;  %v6964_v50 = vpop.permute.xlu1 %6963  ;;  %v23230_v38 = vld [vmem:[#allocation278_spill] sm:$0xff] }
 0x230   : > { %8076 = vrot.lane.b32.xlu1 %v7533_v21, %s14452_s10  ;;  %v7661_v21 = vrot.slane %v7654_v0, %v14577_v23  ;;  %7088 = vst.msk [vmem:[#allocation2 + $0x54] sm:$0xf] %vm7066_vm1, %v6962_v37  ;;  %v19002_v49 = vrot.slane %v7606_v45, %v14577_v23  ;;  %v7646_v8 = vcombine.low %v7645_v57, %v23224_v58  ;;  %7089 = vst.msk [vmem:[#allocation2 + $0x58] sm:$0xf] %vm7066_vm1, %v6964_v50  ;;  %v23228_v0 = vld [vmem:[#allocation318_spill] sm:$0xff]  ;;  %v23231_v57 = vld [vmem:[#allocation257_spill] sm:$0xff] }
 0x231   : > { %v7702_v14 = vcombine.low %v23227_v36, %v23226_v39  ;;  %v7637_v37 = vrot.slane %v7630_v30, %v14577_v23  ;;  %v19015_v45 = vrot.slane %v7686_v12, %v14577_v23  ;;  %v7718_v58 = vcombine.low %v23231_v57, %v23230_v38  ;;  %v23232_v39 = vld [vmem:[#allocation311_spill] sm:$0xff]  ;;  %v23234_v30 = vld [vmem:[#allocation272_spill] sm:$0xff] }
 0x232   : > { %8078 = vrot.lane.b32.xlu0 %v18972_v5, %s14452_s10  ;;  %23223 = vst [vmem:[#allocation154_spill] sm:$0xff] %v19002_v49  ;;  %v19006_v5 = vrot.slane %v7670_v55, %v14577_v23  ;;  %v7653_v36 = vrot.slane %v7646_v8, %v14577_v23  ;;  %v23235_v38 = vld [vmem:[#allocation336_spill] sm:$0xff] }
 0x233   : > { %23229 = vst [vmem:[#allocation158_spill] sm:$0xff] %v19015_v45  ;;  %v6966_v55 = vpop.permute.xlu0 %6965  ;;  %v6968_v12 = vpop.permute.xlu1 %6967  ;;  %v7694_v8 = vcombine.low %v19015_v45, %v23235_v38  ;;  %v19036_v57 = vrot.slane %v7718_v58, %v14577_v23 }
 0x234   : > { %8080 = vrot.lane.b32.xlu1 %v7565_v16, %s14452_s10  ;;  %23225 = vst [vmem:[#allocation178_spill] sm:$0xff] %v19006_v5  ;;  %v7662_v16 = vcombine.low %v7661_v21, %v23228_v0  ;;  %v7678_v50 = vcombine.low %v19006_v5, %v23232_v39  ;;  %v7734_v21 = vcombine.low %v23234_v30, %v23003_v11  ;;  %7090 = vst.msk [vmem:[#allocation2 + $0x5c] sm:$0xf] %vm7066_vm1, %v6966_v55  ;;  %v23239_v55 = vld [vmem:[#allocation456_spill] sm:$0xff]  ;;  %v23242_v30 = vld [vmem:[#allocation303_spill] sm:$0xff] }
 0x235   : > { %7091 = vst.msk [vmem:[#allocation2 + $0x60] sm:$0xf] %vm7066_vm1, %v6968_v12  ;;  %23236 = vst [vmem:[#allocation171_spill] sm:$0xff] %v19036_v57 }
 0x236   : > { %8082 = vrot.lane.b32.xlu0 %v7589_v1, %s14452_s10  ;;  %v19025_v1 = vrot.slane %v7702_v14, %v14577_v23  ;;  %v7669_v0 = vrot.slane %v7662_v16, %v14577_v23  ;;  %v23237_v14 = vld [vmem:[#allocation300_spill] sm:$0xff]  ;;  %v19042_v11 = vrot.slane %v7678_v50, %v14577_v23  ;;  %v23241_v16 = vld [vmem:[#allocation291_spill] sm:$0xff] }
 0x237   : > { %v7766_v38 = vcombine.low %v23242_v30, %v23241_v16  ;;  %v6970_v33 = vpop.permute.xlu0 %6969  ;;  %v6972_v58 = vpop.permute.xlu1 %6971  ;;  %v23245_v30 = vld [vmem:[#allocation279_spill] sm:$0xff] }
 0x238   : > { %8084 = vrot.lane.b32.xlu1 %v19002_v49, %s14452_s10  ;;  %23233 = vst [vmem:[#allocation210_spill] sm:$0xff] %v19025_v1  ;;  %v7750_v49 = vcombine.low %v23052_v62, %v23237_v14  ;;  %23238 = vst [vmem:[#allocation182_spill] sm:$0xff] %v19042_v11  ;;  %v7710_v12 = vcombine.low %v19025_v1, %v23239_v55  ;;  %v7701_v62 = vrot.slane %v7694_v8, %v14577_v23  ;;  %v23396_v1 = vld [vmem:[#allocation206_spill] sm:$0xff] }
 0x239   : > { %7092 = vst.msk [vmem:[#allocation2 + $0x64] sm:$0xf] %vm7066_vm1, %v6970_v33  ;;  %7093 = vst.msk [vmem:[#allocation2 + $0x68] sm:$0xf] %vm7066_vm1, %v6972_v58  ;;  %v19068_v8 = vrot.slane %v7766_v38, %v14577_v23  ;;  %v23249_v58 = vld [vmem:[#allocation457_spill] sm:$0xff]  ;;  %v23251_v38 = vld [vmem:[#allocation334_spill] sm:$0xff] }
 0x23a   : > { %8086 = vrot.lane.b32.xlu0 %v7637_v37, %s14452_s10  ;;  %v19047_v37 = vrot.slane %v7734_v21, %v14577_v23  ;;  %v19057_v50 = vrot.slane %v7750_v49, %v14577_v23  ;;  %v23244_v21 = vld [vmem:[#allocation295_spill] sm:$0xff]  ;;  %v7717_v33 = vrot.slane %v7710_v12, %v14577_v23 }
 0x23b   : > { %v7782_v14 = vcombine.low %v23244_v21, %v23021_v48  ;;  %23246 = vst [vmem:[#allocation217_spill] sm:$0xff] %v19068_v8  ;;  %v6974_v55 = vpop.permute.xlu0 %6973  ;;  %v6976_v48 = vpop.permute.xlu1 %6975 }
 0x23c   : > { %8088 = vrot.lane.b32.xlu1 %v7653_v36, %s14452_s10  ;;  %23240 = vst [vmem:[#allocation7_spill] sm:$0xff] %v19047_v37  ;;  %v7726_v36 = vcombine.low %v19036_v57, %v18352_v44  ;;  %23243 = vst [vmem:[#allocation174_spill] sm:$0xff] %v19057_v50  ;;  %v23247_v44 = vld [vmem:[#allocation312_spill] sm:$0xff]  ;;  %v7758_v21 = vcombine.low %v19057_v50, %v23249_v58  ;;  %v23256_v58 = vld [vmem:[#allocation329_spill] sm:$0xff] }
 0x23d   : > { %v7798_v49 = vcombine.low %v23083_v46, %v23247_v44  ;;  %v19079_v12 = vrot.slane %v7782_v14, %v14577_v23  ;;  %7094 = vst.msk [vmem:[#allocation2 + $0x6c] sm:$0xf] %vm7066_vm1, %v6974_v55  ;;  %7095 = vst.msk [vmem:[#allocation2 + $0x70] sm:$0xf] %vm7066_vm1, %v6976_v48  ;;  %v23255_v14 = vld [vmem:[#allocation333_spill] sm:$0xff]  ;;  %v19096_v55 = vcombine.high %v18912_v4, %v18912_v4  ;;  %v23260_v48 = vld [vmem:[#allocation335_spill] sm:$0xff] }
 0x23e   : > { %8090 = vrot.lane.b32.xlu0 %v7669_v0, %s14452_s10  ;;  %v7742_v0 = vcombine.low %v19047_v37, %v23245_v30  ;;  %v19074_v16 = vrot.slane %v7726_v36, %v14577_v23  ;;  %v7830_v50 = vcombine.low %v23256_v58, %v23255_v14  ;;  %v23261_v14 = vld [vmem:[#allocation459_spill] sm:$0xff]  ;;  %v23395_v57 = vld [vmem:[#allocation180_spill] sm:$0xff] }
 0x23f   : > { %23250 = vst [vmem:[#allocation238_spill] sm:$0xff] %v19079_v12  ;;  %v19089_v46 = vrot.slane %v7798_v49, %v14577_v23  ;;  %23257 = vst [vmem:[#allocation196_spill] sm:$0xff] %v19096_v55  ;;  %v23397_v45 = vcombine.low %v23395_v57, %v23396_v1 }
 0x240   : > { %8092 = vrot.lane.b32.xlu1 %v19042_v11, %s14452_s10  ;;  %23248 = vst [vmem:[#allocation190_spill] sm:$0xff] %v19074_v16  ;;  %v23252_v11 = vld [vmem:[#allocation315_spill] sm:$0xff]  ;;  %v7749_v44 = vrot.slane %v7742_v0, %v14577_v23  ;;  %v7790_v0 = vcombine.low %v19079_v12, %v18453_v60 }
 0x241   : > { %v7814_v37 = vcombine.low %v23252_v11, %v23251_v38  ;;  %23254 = vst [vmem:[#allocation234_spill] sm:$0xff] %v19089_v46  ;;  %v6978_v11 = vpop.permute.xlu0 %6977  ;;  %v7846_v38 = vcombine.low %v23260_v48, %v23046_v40  ;;  %v7806_v58 = vcombine.low %v19089_v46, %v23261_v14  ;;  %v8286_v40 = vshrl.u32 %v18916_v24, 16  ;;  %v23265_v48 = vld [vmem:[#allocation353_spill] sm:$0xff] }
 0x242   : > { %8094 = vrot.lane.b32.xlu0 %v7701_v62, %s14452_s10  ;;  %v23253_v62 = vld [vmem:[#allocation378_spill] sm:$0xff]  ;;  %7096 = vst.msk [vmem:[#allocation2 + $0x74] sm:$0xf] %vm7066_vm1, %v6978_v11  ;;  %v8283_v11 = vshll.u32 %v18916_v24, 16  ;;  %v19531_v5 = vrot.slane %v23397_v45, %v14577_v23 }
 0x243   : > { %v7774_v36 = vcombine.low %v19068_v8, %v23253_v62  ;;  %v19106_v49 = vrot.slane %v7814_v37, %v14577_v23  ;;  %v8278_v37 = vshrl.u32 %v18912_v4, 16  ;;  %v6980_v8 = vpop.permute.xlu1 %6979 }
 0x244   : > { %8096 = vrot.lane.b32.xlu1 %v7717_v33, %s14452_s10  ;;  %v19101_v33 = vrot.slane %v7758_v21, %v14577_v23  ;;  %v19116_v21 = vrot.slane %v7830_v50, %v14577_v23  ;;  %7097 = vst.msk [vmem:[#allocation2 + $0x78] sm:$0xf] %vm7066_vm1, %v6980_v8  ;;  %v19130_v50 = vrot.slane %v7790_v0, %v14577_v23 }
 0x245   : > { %23259 = vst [vmem:[#allocation195_spill] sm:$0xff] %v19106_v49  ;;  %v7781_v62 = vrot.slane %v7774_v36, %v14577_v23  ;;  %v23264_v36 = vld [vmem:[#allocation375_spill] sm:$0xff]  ;;  %v7813_v8 = vrot.slane %v7806_v58, %v14577_v23 }
 0x246   : > { %8098 = vrot.lane.b32.xlu0 %v19074_v16, %s14452_s10  ;;  %23258 = vst [vmem:[#allocation193_spill] sm:$0xff] %v19101_v33  ;;  %23262 = vst [vmem:[#allocation453_spill] sm:$0xff] %v19116_v21  ;;  %v23263_v16 = vld [vmem:[#allocation348_spill] sm:$0xff]  ;;  %v7878_v14 = vcombine.low %v23265_v48, %v23264_v36  ;;  %v7838_v48 = vcombine.low %v19116_v21, %v18502_v51 }
 0x247   : > { %v7862_v12 = vcombine.low %v23099_v20, %v23263_v16  ;;  %23266 = vst [vmem:[#allocation227_spill] sm:$0xff] %v19130_v50  ;;  %v7822_v20 = vcombine.low %v19106_v49, %v18519_v7  ;;  %v19135_v16 = vrot.slane %v7846_v38, %v14577_v23  ;;  %v23269_v36 = vld [vmem:[#allocation380_spill] sm:$0xff]  ;;  %v19151_v49 = vsel %vm14628_vm14, %v8278_v37, %v8283_v11 }
 0x248   : > { %8100 = vrot.lane.b32.xlu1 %v7749_v44, %s14452_s10  ;;  %v8291_v44 = vshll.u32 %v19096_v55, 16  ;;  %v13765_v55 = vld.sshfl [vmem:[%s21516_s0 + $0xf0] sm:$0x33 pattern:$0x75316420]  ;;  %v7894_v7 = vcombine.low %v23269_v36, %v23069_v26  ;;  %23271 = vst [vmem:[#allocation228_spill] sm:$0xff] %v19151_v49  ;;  %v19159_v51 = vrot.slane %v7878_v14, %v14577_v23  ;;  %v19176_v36 = vrot.slane %v7838_v48, %v14577_v23 }
 0x249   : > { %23267 = vst [vmem:[#allocation220_spill] sm:$0xff] %v19135_v16  ;;  %v19145_v0 = vrot.slane %v7862_v12, %v14577_v23  ;;  %v23274_v12 = vld [vmem:[#allocation395_spill] sm:$0xff]  ;;  %v7174_v21 = vcombine.high %v13765_v55, %v13765_v55  ;;  %v7829_v37 = vrot.slane %v7822_v20, %v14577_v23  ;;  %v7854_v11 = vcombine.low %v19135_v16, %v18566_v15 }
 0x24a   : > { %8102 = vrot.lane.b32.xlu0 %v19101_v33, %s14452_s10  ;;  %v6982_v33 = vpop.permute.xlu0 %6981  ;;  %v19155_v46 = vsel %vm14628_vm14, %v8286_v40, %v8291_v44  ;;  %23273 = vst [vmem:[#allocation244_spill] sm:$0xff] %v19159_v51  ;;  %v7910_v58 = vcombine.low %v23105_v53, %v23274_v12  ;;  %v23275_v40 = vld [vmem:[#allocation388_spill] sm:$0xff]  ;;  %v19172_v14 = vrot.slane %v13765_v55, %v23188_v6  ;;  %23277 = vst [vmem:[#allocation259_spill] sm:$0xff] %v19176_v36  ;;  %v23281_v53 = vld [vmem:[#allocation231_spill] sm:$0xff] }
 0x24b   : > { %23268 = vst [vmem:[#allocation219_spill] sm:$0xff] %v19145_v0  ;;  %23272 = vst [vmem:[#allocation222_spill] sm:$0xff] %v19155_v46  ;;  %v7870_v12 = vcombine.low %v19145_v0, %v18556_v25  ;;  %v19181_v20 = vrot.slane %v7894_v7, %v14577_v23  ;;  %v8751_v48 = vcombine.low %v19151_v49, %v23281_v53 }
 0x24c   : > { %8104 = vrot.lane.b32.xlu1 %v7781_v62, %s14452_s10  ;;  %7098 = vst.msk [vmem:[#allocation2 + $0x7c] sm:$0xf] %vm7066_vm1, %v6982_v33  ;;  %v6984_v62 = vpop.permute.xlu1 %6983  ;;  %v23276_v33 = vld [vmem:[#allocation385_spill] sm:$0xff]  ;;  %v7886_v7 = vcombine.low %v19159_v51, %v18605_v47  ;;  %v19198_v0 = vrot.slane %v7910_v58, %v14577_v23 }
 0x24d   : > { %7099 = vst.msk [vmem:[#allocation2 + $0x80] sm:$0xf] %vm7066_vm1, %v6984_v62  ;;  %v7926_v44 = vcombine.low %v23276_v33, %v23275_v40  ;;  %23278 = vst [vmem:[#allocation280_spill] sm:$0xff] %v19181_v20  ;;  %v23279_v40 = vld [vmem:[#allocation411_spill] sm:$0xff]  ;;  %v23280_v33 = vld [vmem:[#allocation392_spill] sm:$0xff]  ;;  %v19218_v47 = vrot.slane %v7870_v12, %v14577_v23  ;;  %v7902_v58 = vcombine.low %v19181_v20, %v18597_v54 }
 0x24e   : > { %8106 = vrot.lane.b32.xlu0 %v19130_v50, %s14452_s10  ;;  %v13766_v62 = vld.sshfl [vmem:[%s21516_s0 + $0xf4] sm:$0x33 pattern:$0x75316420]  ;;  %v6986_v26 = vpop.permute.xlu0 %6985  ;;  %v7942_v55 = vcombine.low %v23280_v33, %v23279_v40  ;;  %v23282_v50 = vld [vmem:[#allocation232_spill] sm:$0xff]  ;;  %23283 = vst [vmem:[#allocation255_spill] sm:$0xff] %v19198_v0  ;;  %v7861_v40 = vrot.slane %v7854_v11, %v14577_v23  ;;  %v7918_v12 = vcombine.low %v19198_v0, %v18645_v63 }
 0x24f   : > { %v8752_v25 = vcombine.low %v19155_v46, %v23282_v50  ;;  %7100 = vst.msk [vmem:[#allocation2 + $0x84] sm:$0xf] %vm7066_vm1, %v6986_v26  ;;  %v7198_v53 = vcombine.high %v13766_v62, %v13766_v62  ;;  %v19209_v50 = vrot.slane %v7174_v21, %v23188_v6  ;;  %v19213_v26 = vcombine.high %v19172_v14, %v19172_v14  ;;  %v23288_v11 = vld [vmem:[#allocation423_spill] sm:$0xff] }
 0x250   : > { %8108 = vrot.lane.b32.xlu1 %v7813_v8, %s14452_s10  ;;  %v7958_v8 = vcombine.low %v23087_v56, %v23094_v9  ;;  %v6988_v33 = vpop.permute.xlu1 %6987  ;;  %v19203_v9 = vrot.slane %v7926_v44, %v14577_v23  ;;  %v19206_v56 = vrot.slane %v13766_v62, %v23188_v6  ;;  %23285 = vst [vmem:[#allocation318_spill] sm:$0xff] %v19218_v47 }
 0x251   : > { %7101 = vst.msk [vmem:[#allocation2 + $0x88] sm:$0xf] %vm7066_vm1, %v6988_v33  ;;  %v7974_v44 = vcombine.low %v23125_v61, %v23288_v11  ;;  %v7893_v62 = vrot.slane %v7886_v7, %v14577_v23  ;;  %v19235_v49 = vrot.slane %v8751_v48, %v14577_v23  ;;  %v19238_v33 = vrot.slane %v8752_v25, %v14577_v23 }
 0x252   : > { %8110 = vrot.lane.b32.xlu0 %v7829_v37, %s14452_s10  ;;  %23284 = vst [vmem:[#allocation253_spill] sm:$0xff] %v19203_v9  ;;  %v19224_v37 = vrot.slane %v7942_v55, %v14577_v23  ;;  %v19227_v21 = vrot.slane %v7958_v8, %v14577_v23  ;;  %v7934_v55 = vcombine.low %v19203_v9, %v18638_v10  ;;  %v23292_v10 = vld [vmem:[#allocation426_spill] sm:$0xff] }
 0x253   : > { %v19246_v61 = vcombine.high %v19209_v50, %v19209_v50  ;;  %v19249_v8 = vrot.slane %v7198_v53, %v23188_v6  ;;  %v19253_v48 = vcombine.high %v19206_v56, %v19206_v56  ;;  %v19258_v25 = vrot.slane %v7902_v58, %v14577_v23 }
 0x254   : > { %8112 = vrot.lane.b32.xlu1 %v19176_v36, %s14452_s10  ;;  %23286 = vst [vmem:[#allocation278_spill] sm:$0xff] %v19224_v37  ;;  %23287 = vst [vmem:[#allocation257_spill] sm:$0xff] %v19227_v21  ;;  %v6990_v36 = vpop.permute.xlu0 %6989  ;;  %v7991_v7 = vcombine.low %v19172_v14, %v19213_v26  ;;  %v6992_v53 = vpop.permute.xlu1 %6991  ;;  %v7950_v11 = vcombine.low %v19224_v37, %v18724_v41  ;;  %v7925_v58 = vrot.slane %v7918_v12, %v14577_v23  ;;  %v23316_v37 = vld [vmem:[#allocation54_spill] sm:$0xff] }
 0x255   : > { %7102 = vst.msk [vmem:[#allocation2 + $0x8c] sm:$0xf] %vm7066_vm1, %v6990_v36  ;;  %23289 = vst [vmem:[#allocation311_spill] sm:$0xff] %v19249_v8  ;;  %v7990_v36 = vcombine.low %v23292_v10, %v19209_v50  ;;  %v8014_v10 = vcombine.low %v19246_v61, %v19249_v8  ;;  %v8015_v63 = vcombine.low %v19206_v56, %v19253_v48 }
 0x256   : > { %8114 = vrot.lane.b32.xlu0 %v7861_v40, %s14452_s10  ;;  %23290 = vst [vmem:[#allocation300_spill] sm:$0xff] %v19253_v48  ;;  %23291 = vst [vmem:[#allocation456_spill] sm:$0xff] %v19258_v25  ;;  %v7966_v41 = vcombine.low %v19227_v21, %v18687_v2  ;;  %v19290_v46 = vrot.slane %v7950_v11, %v14577_v23  ;;  %v23298_v11 = vld [vmem:[#allocation16_spill] sm:$0xff]  ;;  %v23314_v21 = vld [vmem:[#allocation41_spill] sm:$0xff] }
 0x257   : > { %7103 = vst.msk [vmem:[#allocation2 + $0x90] sm:$0xf] %vm7066_vm1, %v6992_v53  ;;  %v7941_v53 = vrot.slane %v7934_v55, %v14577_v23 }
 0x258   : > { %8116 = vrot.lane.b32.xlu1 %v19218_v47, %s14452_s10  ;;  %v19272_v47 = vrot.slane %v7974_v44, %v14577_v23  ;;  %v8005_v44 = vrot.slane %v7991_v7, %v14577_v23  ;;  %v6994_v12 = vpop.permute.xlu0 %6993  ;;  %v6996_v40 = vpop.permute.xlu1 %6995  ;;  %23295 = vst [vmem:[#allocation295_spill] sm:$0xff] %v19290_v46  ;;  %v7973_v7 = vrot.slane %v7966_v41, %v14577_v23 }
 0x259   : > { %7104 = vst.msk [vmem:[#allocation2 + $0x94] sm:$0xf] %vm7066_vm1, %v6994_v12  ;;  %7105 = vst.msk [vmem:[#allocation2 + $0x98] sm:$0xf] %vm7066_vm1, %v6996_v40 }
 0x25a   : > { %8118 = vrot.lane.b32.xlu0 %v7893_v62, %s14452_s10  ;;  %23293 = vst [vmem:[#allocation291_spill] sm:$0xff] %v19272_v47  ;;  %v19284_v62 = vrot.slane %v7990_v36, %v14577_v23  ;;  %v7982_v55 = vcombine.low %v19272_v47, %v18738_v18  ;;  %v19299_v36 = vrot.slane %v8015_v63, %v14577_v23 }
 0x25c   : > { %8120 = vrot.lane.b32.xlu1 %v19258_v25, %s14452_s10  ;;  %23294 = vst [vmem:[#allocation303_spill] sm:$0xff] %v19284_v62  ;;  %v19296_v25 = vrot.slane %v8014_v10, %v14577_v23  ;;  %v6998_v12 = vpop.permute.xlu0 %6997  ;;  %v19308_v18 = vrot.slane %v7982_v55, %v14577_v23  ;;  %v7000_v40 = vpop.permute.xlu1 %6999  ;;  %v23299_v10 = vld [vmem:[#allocation17_spill] sm:$0xff] }
 0x25d   : > { %7106 = vst.msk [vmem:[#allocation2 + $0x9c] sm:$0xf] %vm7066_vm1, %v6998_v12  ;;  %7107 = vst.msk [vmem:[#allocation2 + $0xa0] sm:$0xf] %vm7066_vm1, %v7000_v40  ;;  %v23301_v12 = vld [vmem:[#allocation24_spill] sm:$0xff] }
 0x25e   : > { %8122 = vrot.lane.b32.xlu0 %v7925_v58, %s14452_s10  ;;  %23296 = vst [vmem:[#allocation312_spill] sm:$0xff] %v19296_v25  ;;  %v8006_v58 = vcombine.low %v19284_v62, %v8005_v44  ;;  %23297 = vst [vmem:[#allocation457_spill] sm:$0xff] %v19308_v18  ;;  %v8030_v63 = vcombine.low %v19296_v25, %v19299_v36  ;;  %v23308_v40 = vld [vmem:[#allocation32_spill] sm:$0xff] }
 0x25f   : > { %23398 = vst [vmem:[#allocation17_spill] sm:$0xff] %v19531_v5 }
 0x260   : > { %8124 = vrot.lane.b32.xlu1 %v7941_v53, %s14452_s10  ;;  %v23300_v53 = vcombine.low %v23298_v11, %v23299_v10  ;;  %v8013_v44 = vrot.slane %v8006_v58, %v14577_v23  ;;  %v7002_v47 = vpop.permute.xlu0 %7001  ;;  %v19328_v25 = vrot.slane %v8030_v63, %v14577_v23  ;;  %v23307_v58 = vld [vmem:[#allocation39_spill] sm:$0xff] }
 0x261   : > { %7108 = vst.msk [vmem:[#allocation2 + $0xa4] sm:$0xf] %vm7066_vm1, %v7002_v47  ;;  %v23309_v10 = vcombine.low %v23307_v58, %v23308_v40  ;;  %v23315_v47 = vld [vmem:[#allocation35_spill] sm:$0xff]  ;;  %v7004_v9 = vpop.permute.xlu1 %7003  ;;  %v23319_v58 = vld [vmem:[#allocation37_spill] sm:$0xff] }
 0x262   : > { %8126 = vrot.lane.b32.xlu0 %v19290_v46, %s14452_s10  ;;  %v8374_v41 = vrot.slane %v23300_v53, %v14577_v23  ;;  %v23302_v46 = vld [vmem:[#allocation36_spill] sm:$0xff]  ;;  %23305 = vst [vmem:[#allocation315_spill] sm:$0xff] %v19328_v25  ;;  %7109 = vst.msk [vmem:[#allocation2 + $0xa8] sm:$0xf] %vm7066_vm1, %v7004_v9 }
 0x263   : > { %v23303_v55 = vcombine.low %v23301_v12, %v23302_v46  ;;  %v19336_v53 = vrot.slane %v23309_v10, %v14577_v23  ;;  %v23311_v46 = vld [vmem:[#allocation19_spill] sm:$0xff]  ;;  %v23312_v12 = vld [vmem:[#allocation18_spill] sm:$0xff]  ;;  %v23320_v10 = vld [vmem:[#allocation56_spill] sm:$0xff] }
 0x264   : > { %8128 = vrot.lane.b32.xlu1 %v7973_v7, %s14452_s10  ;;  %v23306_v7 = vld [vmem:[#allocation25_spill] sm:$0xff]  ;;  %v7006_v9 = vpop.permute.xlu0 %7005 }
 0x265   : > { %v19323_v62 = vrot.slane %v23303_v55, %v14577_v23  ;;  %v8375_v11 = vcombine.low %v8374_v41, %v23306_v7  ;;  %23310 = vst [vmem:[#allocation378_spill] sm:$0xff] %v19336_v53  ;;  %v23313_v55 = vcombine.low %v23311_v46, %v23312_v12  ;;  %v23317_v41 = vcombine.low %v23315_v47, %v23316_v37 }
 0x266   : > { %8130 = vrot.lane.b32.xlu0 %v19308_v18, %s14452_s10  ;;  %v8407_v40 = vcombine.low %v19336_v53, %v23319_v58  ;;  %7110 = vst.msk [vmem:[#allocation2 + $0xac] sm:$0xf] %vm7066_vm1, %v7006_v9  ;;  %v23334_v9 = vld [vmem:[#allocation74_spill] sm:$0xff] }
 0x267   : > { %23304 = vst [vmem:[#allocation334_spill] sm:$0xff] %v19323_v62  ;;  %v8366_v18 = vrot.slane %v23313_v55, %v14577_v23  ;;  %v8391_v63 = vcombine.low %v19323_v62, %v23314_v21  ;;  %v19349_v7 = vrot.slane %v23317_v41, %v14577_v23  ;;  %v23321_v21 = vld [vmem:[#allocation48_spill] sm:$0xff]  ;;  %v23324_v55 = vld [vmem:[#allocation58_spill] sm:$0xff] }
 0x268   : > { %8132 = vrot.lane.b32.xlu1 %v8013_v44, %s14452_s10  ;;  %v8382_v44 = vrot.slane %v8375_v11, %v14577_v23  ;;  %v23322_v46 = vcombine.low %v23320_v10, %v23321_v21  ;;  %v23325_v11 = vld [vmem:[#allocation51_spill] sm:$0xff]  ;;  %v23326_v41 = vld [vmem:[#allocation70_spill] sm:$0xff]  ;;  %v7008_v10 = vpop.permute.xlu1 %7007 }
 0x269   : > { %23318 = vst [vmem:[#allocation333_spill] sm:$0xff] %v19349_v7  ;;  %v8398_v37 = vrot.slane %v8391_v63, %v14577_v23  ;;  %v8423_v47 = vcombine.low %v19349_v7, %v23324_v55  ;;  %7111 = vst.msk [vmem:[#allocation2 + $0xb0] sm:$0xf] %vm7066_vm1, %v7008_v10  ;;  %v23329_v63 = vld [vmem:[#allocation53_spill] sm:$0xff] }
 0x26a   : > { %8134 = vrot.lane.b32.xlu0 %v19328_v25, %s14452_s10  ;;  %v19361_v12 = vrot.slane %v23322_v46, %v14577_v23  ;;  %v23327_v25 = vcombine.low %v23325_v11, %v23326_v41  ;;  %v23330_v46 = vld [vmem:[#allocation72_spill] sm:$0xff]  ;;  %v23331_v55 = vld [vmem:[#allocation65_spill] sm:$0xff]  ;;  %v23335_v11 = vld [vmem:[#allocation67_spill] sm:$0xff] }
 0x26b   : > { %v23332_v7 = vcombine.low %v23330_v46, %v23331_v55  ;;  %v23336_v41 = vld [vmem:[#allocation89_spill] sm:$0xff]  ;;  %v23340_v55 = vld [vmem:[#allocation91_spill] sm:$0xff] }
 0x26c   : > { %23323 = vst [vmem:[#allocation329_spill] sm:$0xff] %v19361_v12  ;;  %9175 = vrot.lane.b32.xlu1 %v8366_v18, %s14453_s23  ;;  %v19371_v58 = vrot.slane %v23327_v25, %v14577_v23  ;;  %v8414_v18 = vrot.slane %v8407_v40, %v14577_v23  ;;  %v8439_v21 = vcombine.low %v19361_v12, %v23329_v63  ;;  %v7010_v63 = vpop.permute.xlu0 %7009 }
 0x26d   : > { %v19383_v53 = vrot.slane %v23332_v7, %v14577_v23  ;;  %v8430_v25 = vrot.slane %v8423_v47, %v14577_v23  ;;  %v23337_v40 = vcombine.low %v23335_v11, %v23336_v41  ;;  %7112 = vst.msk [vmem:[#allocation2 + $0xb4] sm:$0xf] %vm7066_vm1, %v7010_v63  ;;  %v7012_v7 = vpop.permute.xlu1 %7011  ;;  %v23344_v41 = vld [vmem:[#allocation93_spill] sm:$0xff] }
 0x26e   : > { %23328 = vst [vmem:[#allocation348_spill] sm:$0xff] %v19371_v58  ;;  %9177 = vrot.lane.b32.xlu0 %v8382_v44, %s14453_s23  ;;  %v8455_v44 = vcombine.low %v19371_v58, %v23334_v9  ;;  %v8446_v46 = vrot.slane %v8439_v21, %v14577_v23  ;;  %v23341_v9 = vld [vmem:[#allocation84_spill] sm:$0xff]  ;;  %7113 = vst.msk [vmem:[#allocation2 + $0xb8] sm:$0xf] %vm7066_vm1, %v7012_v7  ;;  %v23345_v21 = vld [vmem:[#allocation86_spill] sm:$0xff] }
 0x26f   : > { %23333 = vst [vmem:[#allocation375_spill] sm:$0xff] %v19383_v53  ;;  %v19393_v10 = vrot.slane %v23337_v40, %v14577_v23  ;;  %v23342_v58 = vcombine.low %v23340_v55, %v23341_v9  ;;  %v23346_v40 = vld [vmem:[#allocation108_spill] sm:$0xff]  ;;  %v23351_v55 = vld [vmem:[#allocation103_spill] sm:$0xff] }
 0x270   : > { %9179 = vrot.lane.b32.xlu1 %v8398_v37, %s14453_s23  ;;  %v23339_v37 = vld [vmem:[#allocation69_spill] sm:$0xff]  ;;  %v8462_v11 = vrot.slane %v8455_v44, %v14577_v23  ;;  %v23347_v63 = vcombine.low %v23345_v21, %v23346_v40  ;;  %v23350_v44 = vld [vmem:[#allocation110_spill] sm:$0xff] }
 0x271   : > { %23338 = vst [vmem:[#allocation353_spill] sm:$0xff] %v19393_v10  ;;  %v8471_v47 = vcombine.low %v19383_v53, %v23339_v37  ;;  %v19404_v12 = vrot.slane %v23342_v58, %v14577_v23  ;;  %v7014_v53 = vpop.permute.xlu0 %7013  ;;  %v23352_v9 = vcombine.low %v23350_v44, %v23351_v55  ;;  %v23354_v40 = vld [vmem:[#allocation113_spill] sm:$0xff]  ;;  %v23359_v44 = vld [vmem:[#allocation134_spill] sm:$0xff]  ;;  %v23360_v55 = vld [vmem:[#allocation120_spill] sm:$0xff] }
 0x272   : > { %9181 = vrot.lane.b32.xlu0 %v8414_v18, %s14453_s23  ;;  %v8487_v18 = vcombine.low %v19393_v10, %v23344_v41  ;;  %v19415_v37 = vrot.slane %v23347_v63, %v14577_v23  ;;  %7114 = vst.msk [vmem:[#allocation2 + $0xbc] sm:$0xf] %vm7066_vm1, %v7014_v53  ;;  %v23355_v53 = vld [vmem:[#allocation105_spill] sm:$0xff]  ;;  %v23356_v63 = vld [vmem:[#allocation130_spill] sm:$0xff] }
 0x273   : > { %23343 = vst [vmem:[#allocation380_spill] sm:$0xff] %v19404_v12  ;;  %v8478_v58 = vrot.slane %v8471_v47, %v14577_v23  ;;  %v19426_v41 = vrot.slane %v23352_v9, %v14577_v23  ;;  %v23357_v47 = vcombine.low %v23355_v53, %v23356_v63  ;;  %v23361_v9 = vcombine.low %v23359_v44, %v23360_v55  ;;  %v23368_v55 = vld [vmem:[#allocation138_spill] sm:$0xff] }
 0x274   : > { %9183 = vrot.lane.b32.xlu1 %v8430_v25, %s14453_s23  ;;  %23348 = vst [vmem:[#allocation15_spill] sm:$0xff] %v19415_v37  ;;  %v23349_v25 = vld [vmem:[#allocation88_spill] sm:$0xff]  ;;  %v8494_v21 = vrot.slane %v8487_v18, %v14577_v23  ;;  %v23363_v18 = vld [vmem:[#allocation122_spill] sm:$0xff] }
 0x275   : > { %v8503_v7 = vcombine.low %v19404_v12, %v23349_v25  ;;  %23353 = vst [vmem:[#allocation395_spill] sm:$0xff] %v19426_v41  ;;  %v19436_v10 = vrot.slane %v23357_v47, %v14577_v23  ;;  %v7016_v25 = vpop.permute.xlu1 %7015  ;;  %v23364_v12 = vld [vmem:[#allocation147_spill] sm:$0xff] }
 0x276   : > { %9185 = vrot.lane.b32.xlu0 %v8446_v46, %s14453_s23  ;;  %v8519_v46 = vcombine.low %v19415_v37, %v23354_v40  ;;  %7115 = vst.msk [vmem:[#allocation2 + $0xc0] sm:$0xf] %vm7066_vm1, %v7016_v25  ;;  %v23365_v40 = vcombine.low %v23363_v18, %v23364_v12  ;;  %v8039_v53 = vpop.permute.xlu0 %8038  ;;  %v23367_v47 = vld [vmem:[#allocation107_spill] sm:$0xff]  ;;  %v23369_v18 = vld [vmem:[#allocation150_spill] sm:$0xff] }
 0x277   : > { %23358 = vst [vmem:[#allocation388_spill] sm:$0xff] %v19436_v10  ;;  %v8510_v63 = vrot.slane %v8503_v7, %v14577_v23  ;;  %v8535_v25 = vcombine.low %v19426_v41, %v23367_v47  ;;  %8186 = vst.msk [vmem:[#allocation2] sm:$0xf] %vm8185_vm2, %v8039_v53  ;;  %v23373_v7 = vld [vmem:[#allocation126_spill] sm:$0xff]  ;;  %v23376_v41 = vld [vmem:[#allocation165_spill] sm:$0xff] }
 0x278   : > { %9187 = vrot.lane.b32.xlu1 %v8462_v11, %s14453_s23  ;;  %v19443_v11 = vrot.slane %v23361_v9, %v14577_v23  ;;  %v19449_v37 = vrot.slane %v23365_v40, %v14577_v23  ;;  %v8526_v44 = vrot.slane %v8519_v46, %v14577_v23  ;;  %v8551_v9 = vcombine.low %v19436_v10, %v23368_v55  ;;  %v23370_v40 = vld [vmem:[#allocation141_spill] sm:$0xff]  ;;  %v23375_v46 = vld [vmem:[#allocation144_spill] sm:$0xff] }
 0x279   : > { %v8041_v12 = vpop.permute.xlu1 %8040  ;;  %v23377_v0 = vcombine.low %v23375_v46, %v23376_v41  ;;  %v23381_v41 = vld [vmem:[#allocation162_spill] sm:$0xff]  ;;  %v23385_v10 = vld [vmem:[#allocation188_spill] sm:$0xff] }
 0x27a   : > { %23362 = vst [vmem:[#allocation385_spill] sm:$0xff] %v19443_v11  ;;  %23366 = vst [vmem:[#allocation411_spill] sm:$0xff] %v19449_v37  ;;  %9189 = vrot.lane.b32.xlu0 %v8478_v58, %s14453_s23  ;;  %v23371_v58 = vcombine.low %v23369_v18, %v23370_v40  ;;  %v8567_v47 = vcombine.low %v19443_v11, %v23373_v7  ;;  %v8542_v18 = vrot.slane %v8535_v25, %v14577_v23  ;;  %v23384_v25 = vld [vmem:[#allocation164_spill] sm:$0xff] }
 0x27b   : > { %8187 = vst.msk [vmem:[#allocation2 + $0x4] sm:$0xf] %vm8185_vm2, %v8041_v12  ;;  %v19475_v55 = vrot.slane %v23377_v0, %v14577_v23  ;;  %v8238_v40 = vshrl.u32 %v18874_v22, 16  ;;  %v8243_v12 = vshll.u32 %v18885_v42, 16  ;;  %v23380_v0 = vld [vmem:[#allocation168_spill] sm:$0xff]  ;;  %v23386_v20 = vcombine.low %v23384_v25, %v23385_v10 }
 0x27c   : > { %9191 = vrot.lane.b32.xlu1 %v8494_v21, %s14453_s23  ;;  %v19464_v62 = vrot.slane %v23371_v58, %v14577_v23  ;;  %v23374_v21 = vld [vmem:[#allocation153_spill] sm:$0xff]  ;;  %v8558_v58 = vrot.slane %v8551_v9, %v14577_v23  ;;  %v8043_v7 = vpop.permute.xlu0 %8042  ;;  %v23382_v46 = vcombine.low %v23380_v0, %v23381_v41  ;;  %v23388_v9 = vld [vmem:[#allocation170_spill] sm:$0xff]  ;;  %v8246_v0 = vshrl.u32 %v18885_v42, 16 }
 0x27d   : > { %v8583_v53 = vcombine.low %v19449_v37, %v23374_v21  ;;  %23378 = vst [vmem:[#allocation231_spill] sm:$0xff] %v19475_v55  ;;  %v8045_v21 = vpop.permute.xlu1 %8044  ;;  %v23379_v37 = vld [vmem:[#allocation145_spill] sm:$0xff]  ;;  %v19495_v51 = vrot.slane %v23386_v20, %v14577_v23  ;;  %8188 = vst.msk [vmem:[#allocation2 + $0x8] sm:$0xf] %vm8185_vm2, %v8043_v7  ;;  %v19507_v10 = vsel %vm14628_vm14, %v8238_v40, %v8243_v12  ;;  %v8251_v20 = vshll.u32 %v18904_v13, 16  ;;  %v23390_v40 = vld [vmem:[#allocation166_spill] sm:$0xff] }
 0x27e   : > { %23372 = vst [vmem:[#allocation392_spill] sm:$0xff] %v19464_v62  ;;  %9193 = vrot.lane.b32.xlu0 %v8510_v63, %s14453_s23  ;;  %v8599_v11 = vcombine.low %v19464_v62, %v23379_v37  ;;  %v19489_v63 = vrot.slane %v23382_v46, %v14577_v23  ;;  %8189 = vst.msk [vmem:[#allocation2 + $0xc] sm:$0xf] %vm8185_vm2, %v8045_v21  ;;  %v8615_v62 = vcombine.low %v19475_v55, %v23388_v9  ;;  %v23391_v9 = vld [vmem:[#allocation192_spill] sm:$0xff] }
 0x27f   : > { %23387 = vst [vmem:[#allocation423_spill] sm:$0xff] %v19495_v51  ;;  %v8590_v37 = vrot.slane %v8583_v53, %v14577_v23  ;;  %23389 = vst [vmem:[#allocation426_spill] sm:$0xff] %v19507_v10  ;;  %v8254_v7 = vshrl.u32 %v18904_v13, 16  ;;  %v8259_v21 = vshll.u32 %v18908_v34, 16  ;;  %v8267_v53 = vshll.u32 %v18877_v3, 16 }
 0x280   : > { %9195 = vrot.lane.b32.xlu1 %v8526_v44, %s14453_s23  ;;  %23383 = vst [vmem:[#allocation232_spill] sm:$0xff] %v19489_v63  ;;  %v8574_v44 = vrot.slane %v8567_v47, %v14577_v23  ;;  %v8262_v47 = vshrl.u32 %v18908_v34, 16  ;;  %v8270_v41 = vshrl.u32 %v18877_v3, 16  ;;  %v8047_v46 = vpop.permute.xlu0 %8046  ;;  %v8631_v12 = vcombine.low %v19489_v63, %v23390_v40  ;;  %v23399_v3 = vld [vmem:[#allocation194_spill] sm:$0xff]  ;;  %v23400_v63 = vld [vmem:[#allocation203_spill] sm:$0xff] }
 0x281   : > { %v8049_v25 = vpop.permute.xlu1 %8048  ;;  %8190 = vst.msk [vmem:[#allocation2 + $0x10] sm:$0xf] %vm8185_vm2, %v8047_v46  ;;  %v8606_v46 = vrot.slane %v8599_v11, %v14577_v23  ;;  %v8647_v40 = vcombine.low %v19495_v51, %v23399_v3  ;;  %v19545_v45 = vsel %vm14628_vm14, %v8254_v7, %v8259_v21  ;;  %v23403_v11 = vld [vmem:[#allocation185_spill] sm:$0xff]  ;;  %v23502_v51 = vld [vmem:[#allocation382_spill] sm:$0xff] }
 0x282   : > { %9197 = vrot.lane.b32.xlu0 %v8542_v18, %s14453_s23  ;;  %v8275_v18 = vshll.u32 %v18912_v4, 16  ;;  %8191 = vst.msk [vmem:[#allocation2 + $0x14] sm:$0xf] %vm8185_vm2, %v8049_v25  ;;  %v8622_v25 = vrot.slane %v8615_v62, %v14577_v23  ;;  %23401 = vst [vmem:[#allocation24_spill] sm:$0xff] %v19545_v45  ;;  %v8269_v1 = vsel %vm14628_vm14, %v8262_v47, %v8267_v53 }
 0x284   : > { %9199 = vrot.lane.b32.xlu1 %v8558_v58, %s14453_s23  ;;  %v23392_v58 = vld [vmem:[#allocation177_spill] sm:$0xff]  ;;  %v19551_v57 = vsel %vm14628_vm14, %v8270_v41, %v8275_v18  ;;  %v8654_v41 = vrot.slane %v8647_v40, %v14577_v23  ;;  %v23408_v18 = vld [vmem:[#allocation212_spill] sm:$0xff] }
 0x285   : > { %v23393_v55 = vcombine.low %v23391_v9, %v23392_v58  ;;  %v8704_v9 = vcombine.low %v23400_v63, %v19507_v10  ;;  %23402 = vst [vmem:[#allocation36_spill] sm:$0xff] %v19551_v57  ;;  %v8728_v53 = vcombine.low %v19545_v45, %v19551_v57  ;;  %v8679_v58 = vcombine.low %v19531_v5, %v23408_v18  ;;  %v23413_v40 = vld [vmem:[#allocation204_spill] sm:$0xff]  ;;  %v23415_v18 = vld [vmem:[#allocation247_spill] sm:$0xff]  ;;  %v23500_v5 = vld [vmem:[#allocation397_spill] sm:$0xff] }
 0x286   : > { %9201 = vrot.lane.b32.xlu0 %v8574_v44, %s14453_s23 }
 0x287   : > { %v19525_v16 = vrot.slane %v23393_v55, %v14577_v23  ;;  %v8253_v55 = vsel %vm14628_vm14, %v8246_v0, %v8251_v20  ;;  %v8051_v3 = vpop.permute.xlu0 %8050  ;;  %v23404_v0 = vld [vmem:[#allocation209_spill] sm:$0xff]  ;;  %v23405_v20 = vld [vmem:[#allocation198_spill] sm:$0xff] }
 0x288   : > { %9203 = vrot.lane.b32.xlu1 %v8590_v37, %s14453_s23  ;;  %8192 = vst.msk [vmem:[#allocation2 + $0x18] sm:$0xf] %vm8185_vm2, %v8051_v3  ;;  %v8638_v37 = vrot.slane %v8631_v12, %v14577_v23  ;;  %v23406_v7 = vcombine.low %v23404_v0, %v23405_v20  ;;  %v8727_v47 = vcombine.low %v8253_v55, %v8269_v1  ;;  %v23410_v12 = vld [vmem:[#allocation218_spill] sm:$0xff] }
 0x289   : > { %23394 = vst [vmem:[#allocation16_spill] sm:$0xff] %v19525_v16  ;;  %v8053_v62 = vpop.permute.xlu1 %8052  ;;  %v8663_v44 = vcombine.low %v19525_v16, %v23403_v11  ;;  %v8718_v11 = vrot.slane %v8704_v9, %v14577_v23  ;;  %v23416_v9 = vld [vmem:[#allocation226_spill] sm:$0xff] }
 0x28a   : > { %8193 = vst.msk [vmem:[#allocation2 + $0x1c] sm:$0xf] %vm8185_vm2, %v8053_v62  ;;  %9205 = vrot.lane.b32.xlu0 %v8606_v46, %s14453_s23  ;;  %v19563_v21 = vrot.slane %v23406_v7, %v14577_v23  ;;  %v23409_v46 = vld [vmem:[#allocation202_spill] sm:$0xff]  ;;  %v19585_v20 = vrot.slane %v8727_v47, %v14577_v23  ;;  %v8742_v7 = vrot.slane %v8728_v53, %v14577_v23 }
 0x28b   : > { %v23411_v3 = vcombine.low %v23409_v46, %v23410_v12  ;;  %v8055_v0 = vpop.permute.xlu0 %8054  ;;  %v8791_v46 = vcombine.low %v23416_v9, %v23415_v18  ;;  %v8686_v12 = vrot.slane %v8679_v58, %v14577_v23  ;;  %v23495_v18 = vld [vmem:[#allocation377_spill] sm:$0xff] }
 0x28c   : > { %23407 = vst [vmem:[#allocation25_spill] sm:$0xff] %v19563_v21  ;;  %9207 = vrot.lane.b32.xlu1 %v8622_v25, %s14453_s23  ;;  %8194 = vst.msk [vmem:[#allocation2 + $0x20] sm:$0xf] %vm8185_vm2, %v8055_v0  ;;  %v8670_v25 = vrot.slane %v8663_v44, %v14577_v23  ;;  %v8695_v1 = vcombine.low %v19563_v21, %v23413_v40  ;;  %v8743_v53 = vcombine.low %v19585_v20, %v8742_v7  ;;  %v23417_v0 = vld [vmem:[#allocation233_spill] sm:$0xff] }
 0x28d   : > { %v19575_v62 = vrot.slane %v23411_v3, %v14577_v23  ;;  %v8057_v55 = vpop.permute.xlu1 %8056  ;;  %23414 = vst [vmem:[#allocation32_spill] sm:$0xff] %v19585_v20 }
 0x28e   : > { %8195 = vst.msk [vmem:[#allocation2 + $0x24] sm:$0xf] %vm8185_vm2, %v8057_v55  ;;  %9209 = vrot.lane.b32.xlu0 %v8638_v37, %s14453_s23  ;;  %v8702_v47 = vrot.slane %v8695_v1, %v14577_v23  ;;  %v23418_v55 = vld [vmem:[#allocation225_spill] sm:$0xff] }
 0x28f   : > { %23412 = vst [vmem:[#allocation39_spill] sm:$0xff] %v19575_v62  ;;  %v8719_v3 = vcombine.low %v19575_v62, %v8718_v11  ;;  %v8798_v11 = vrot.slane %v8791_v46, %v14577_v23  ;;  %v23420_v1 = vld [vmem:[#allocation229_spill] sm:$0xff]  ;;  %v23425_v46 = vcombine.low %v19235_v49, %v19238_v33 }
 0x290   : > { %9211 = vrot.lane.b32.xlu1 %v8654_v41, %s14453_s23  ;;  %v8059_v37 = vpop.permute.xlu0 %8058  ;;  %v23419_v41 = vcombine.low %v23417_v0, %v23418_v55  ;;  %v23422_v0 = vld [vmem:[#allocation243_spill] sm:$0xff]  ;;  %v23431_v49 = vld [vmem:[#allocation249_spill] sm:$0xff] }
 0x291   : > { %8196 = vst.msk [vmem:[#allocation2 + $0x28] sm:$0xf] %vm8185_vm2, %v8059_v37  ;;  %v8061_v44 = vpop.permute.xlu1 %8060  ;;  %v8726_v58 = vrot.slane %v8719_v3, %v14577_v23  ;;  %v8774_v3 = vrot.slane %v23425_v46, %v14577_v23  ;;  %v23496_v62 = vld [vmem:[#allocation401_spill] sm:$0xff] }
 0x292   : > { %8197 = vst.msk [vmem:[#allocation2 + $0x2c] sm:$0xf] %vm8185_vm2, %v8061_v44  ;;  %9213 = vrot.lane.b32.xlu0 %v8670_v25, %s14453_s23  ;;  %v8782_v40 = vrot.slane %v23419_v41, %v14577_v23  ;;  %v8750_v25 = vrot.slane %v8743_v53, %v14577_v23  ;;  %v23421_v44 = vld [vmem:[#allocation251_spill] sm:$0xff]  ;;  %v23426_v41 = vld [vmem:[#allocation252_spill] sm:$0xff]  ;;  %v23497_v57 = vcombine.low %v23495_v18, %v23496_v62  ;;  %v8327_v62 = vshrl.u32 %v19206_v56, 16 }
 0x293   : > { %v23428_v53 = vld [vmem:[#allocation268_spill] sm:$0xff]  ;;  %v8332_v18 = vshll.u32 %v19249_v8, 16 }
 0x294   : > { %9215 = vrot.lane.b32.xlu1 %v8686_v12, %s14453_s23  ;;  %v8063_v9 = vpop.permute.xlu0 %8062  ;;  %v8783_v7 = vcombine.low %v8782_v40, %v23420_v1  ;;  %v23423_v12 = vcombine.low %v23421_v44, %v23422_v0  ;;  %v23433_v0 = vld [vmem:[#allocation262_spill] sm:$0xff]  ;;  %v19782_v21 = vrot.slane %v23497_v57, %v14577_v23  ;;  %v8324_v57 = vshll.u32 %v19206_v56, 16 }
 0x295   : > { %8198 = vst.msk [vmem:[#allocation2 + $0x30] sm:$0xf] %vm8185_vm2, %v8063_v9  ;;  %v8799_v9 = vcombine.low %v8798_v11, %v23426_v41  ;;  %v23432_v11 = vld [vmem:[#allocation270_spill] sm:$0xff] }
 0x296   : > { %v8065_v37 = vpop.permute.xlu1 %8064  ;;  %9217 = vrot.lane.b32.xlu0 %v8702_v47, %s14453_s23  ;;  %v19614_v55 = vrot.slane %v23423_v12, %v14577_v23  ;;  %v23427_v47 = vld [vmem:[#allocation246_spill] sm:$0xff]  ;;  %v23434_v12 = vcombine.low %v23432_v11, %v23433_v0  ;;  %v23442_v0 = vld [vmem:[#allocation289_spill] sm:$0xff] }
 0x297   : > { %8199 = vst.msk [vmem:[#allocation2 + $0x34] sm:$0xf] %vm8185_vm2, %v8065_v37  ;;  %v23429_v37 = vcombine.low %v23427_v47, %v23428_v53  ;;  %v8806_v41 = vrot.slane %v8799_v9, %v14577_v23  ;;  %v23436_v47 = vld [vmem:[#allocation274_spill] sm:$0xff]  ;;  %v23441_v9 = vld [vmem:[#allocation267_spill] sm:$0xff] }
 0x298   : > { %23424 = vst [vmem:[#allocation19_spill] sm:$0xff] %v19614_v55  ;;  %9219 = vrot.lane.b32.xlu1 %v8726_v58, %s14453_s23  ;;  %v8067_v1 = vpop.permute.xlu0 %8066  ;;  %v8790_v58 = vrot.slane %v8783_v7, %v14577_v23  ;;  %v8815_v33 = vcombine.low %v19614_v55, %v23431_v49  ;;  %v19638_v46 = vrot.slane %v23434_v12, %v14577_v23  ;;  %v23443_v12 = vld [vmem:[#allocation282_spill] sm:$0xff] }
 0x299   : > { %v19626_v40 = vrot.slane %v23429_v37, %v14577_v23  ;;  %8200 = vst.msk [vmem:[#allocation2 + $0x38] sm:$0xf] %vm8185_vm2, %v8067_v1  ;;  %v23438_v37 = vld [vmem:[#allocation286_spill] sm:$0xff] }
 0x29a   : > { %v8069_v44 = vpop.permute.xlu1 %8068  ;;  %9221 = vrot.lane.b32.xlu0 %v8750_v25, %s14453_s23  ;;  %23435 = vst [vmem:[#allocation41_spill] sm:$0xff] %v19638_v46  ;;  %v23437_v25 = vld [vmem:[#allocation265_spill] sm:$0xff]  ;;  %v8847_v11 = vcombine.low %v19638_v46, %v23441_v9  ;;  %v23483_v55 = vld [vmem:[#allocation358_spill] sm:$0xff] }
 0x29b   : > { %23430 = vst [vmem:[#allocation18_spill] sm:$0xff] %v19626_v40  ;;  %8201 = vst.msk [vmem:[#allocation2 + $0x3c] sm:$0xf] %vm8185_vm2, %v8069_v44  ;;  %v8831_v53 = vcombine.low %v19626_v40, %v23436_v47  ;;  %v23439_v7 = vcombine.low %v23437_v25, %v23438_v37  ;;  %v23444_v47 = vcombine.low %v23442_v0, %v23443_v12  ;;  %v23452_v12 = vld [vmem:[#allocation310_spill] sm:$0xff] }
 0x29c   : > { %9223 = vrot.lane.b32.xlu1 %v8774_v3, %s14453_s23  ;;  %v8071_v44 = vpop.permute.xlu0 %8070  ;;  %v8822_v3 = vrot.slane %v8815_v33, %v14577_v23 }
 0x29d   : > { %v19648_v1 = vrot.slane %v23439_v7, %v14577_v23  ;;  %8202 = vst.msk [vmem:[#allocation2 + $0x40] sm:$0xf] %vm8185_vm2, %v8071_v44  ;;  %v19660_v25 = vrot.slane %v23444_v47, %v14577_v23  ;;  %v8838_v37 = vrot.slane %v8831_v53, %v14577_v23  ;;  %v23446_v7 = vld [vmem:[#allocation292_spill] sm:$0xff]  ;;  %v23451_v53 = vld [vmem:[#allocation287_spill] sm:$0xff]  ;;  %v23453_v47 = vld [vmem:[#allocation298_spill] sm:$0xff] }
 0x29e   : > { %v8073_v49 = vpop.permute.xlu1 %8072  ;;  %9225 = vrot.lane.b32.xlu0 %v8790_v58, %s14453_s23  ;;  %v23447_v58 = vld [vmem:[#allocation285_spill] sm:$0xff] }
 0x29f   : > { %23440 = vst [vmem:[#allocation35_spill] sm:$0xff] %v19648_v1  ;;  %8203 = vst.msk [vmem:[#allocation2 + $0x44] sm:$0xf] %vm8185_vm2, %v8073_v49  ;;  %v8863_v44 = vcombine.low %v19648_v1, %v23446_v7  ;;  %v23448_v49 = vld [vmem:[#allocation307_spill] sm:$0xff]  ;;  %v8879_v0 = vcombine.low %v19660_v25, %v23451_v53  ;;  %v23454_v7 = vcombine.low %v23452_v12, %v23453_v47 }
 0x2a0   : > { %23445 = vst [vmem:[#allocation54_spill] sm:$0xff] %v19660_v25  ;;  %9227 = vrot.lane.b32.xlu1 %v8806_v41, %s14453_s23  ;;  %v23449_v33 = vcombine.low %v23447_v58, %v23448_v49  ;;  %v8075_v9 = vpop.permute.xlu0 %8074  ;;  %v8854_v41 = vrot.slane %v8847_v11, %v14577_v23  ;;  %v23462_v47 = vld [vmem:[#allocation327_spill] sm:$0xff] }
 0x2a1   : > { %8204 = vst.msk [vmem:[#allocation2 + $0x48] sm:$0xf] %vm8185_vm2, %v8075_v9  ;;  %v19682_v58 = vrot.slane %v23454_v7, %v14577_v23  ;;  %v8870_v49 = vrot.slane %v8863_v44, %v14577_v23  ;;  %v23458_v9 = vld [vmem:[#allocation325_spill] sm:$0xff]  ;;  %v23461_v44 = vld [vmem:[#allocation304_spill] sm:$0xff]  ;;  %v23463_v7 = vld [vmem:[#allocation319_spill] sm:$0xff] }
 0x2a2   : > { %v19670_v40 = vrot.slane %v23449_v33, %v14577_v23  ;;  %v8077_v46 = vpop.permute.xlu1 %8076  ;;  %9229 = vrot.lane.b32.xlu0 %v8822_v3, %s14453_s23  ;;  %v23456_v33 = vld [vmem:[#allocation313_spill] sm:$0xff] }
 0x2a3   : > { %8205 = vst.msk [vmem:[#allocation2 + $0x4c] sm:$0xf] %vm8185_vm2, %v8077_v46  ;;  %23455 = vst [vmem:[#allocation56_spill] sm:$0xff] %v19682_v58  ;;  %v23457_v3 = vld [vmem:[#allocation301_spill] sm:$0xff]  ;;  %v8911_v12 = vcombine.low %v19682_v58, %v23461_v44 }
 0x2a4   : > { %23450 = vst [vmem:[#allocation37_spill] sm:$0xff] %v19670_v40  ;;  %9231 = vrot.lane.b32.xlu1 %v8838_v37, %s14453_s23  ;;  %v8895_v46 = vcombine.low %v19670_v40, %v23456_v33  ;;  %v23459_v11 = vcombine.low %v23457_v3, %v23458_v9  ;;  %v8079_v53 = vpop.permute.xlu0 %8078  ;;  %v8886_v37 = vrot.slane %v8879_v0, %v14577_v23 }
 0x2a5   : > { %8206 = vst.msk [vmem:[#allocation2 + $0x50] sm:$0xf] %vm8185_vm2, %v8079_v53  ;;  %v23464_v33 = vcombine.low %v23462_v47, %v23463_v7  ;;  %v23468_v53 = vld [vmem:[#allocation344_spill] sm:$0xff]  ;;  %v23471_v47 = vld [vmem:[#allocation346_spill] sm:$0xff]  ;;  %v23472_v7 = vld [vmem:[#allocation339_spill] sm:$0xff] }
 0x2a6   : > { %v19692_v1 = vrot.slane %v23459_v11, %v14577_v23  ;;  %v8081_v25 = vpop.permute.xlu1 %8080  ;;  %9233 = vrot.lane.b32.xlu0 %v8854_v41, %s14453_s23  ;;  %v8902_v9 = vrot.slane %v8895_v46, %v14577_v23  ;;  %v23466_v11 = vld [vmem:[#allocation330_spill] sm:$0xff]  ;;  %v8918_v46 = vrot.slane %v8911_v12, %v14577_v23  ;;  %v23481_v12 = vld [vmem:[#allocation343_spill] sm:$0xff] }
 0x2a7   : > { %8207 = vst.msk [vmem:[#allocation2 + $0x54] sm:$0xf] %vm8185_vm2, %v8081_v25  ;;  %v19704_v3 = vrot.slane %v23464_v33, %v14577_v23  ;;  %v23467_v41 = vld [vmem:[#allocation322_spill] sm:$0xff]  ;;  %v23473_v33 = vcombine.low %v23471_v47, %v23472_v7  ;;  %v23480_v7 = vld [vmem:[#allocation349_spill] sm:$0xff] }
 0x2a8   : > { %23460 = vst [vmem:[#allocation48_spill] sm:$0xff] %v19692_v1  ;;  %9235 = vrot.lane.b32.xlu1 %v8870_v49, %s14453_s23  ;;  %v8927_v25 = vcombine.low %v19692_v1, %v23466_v11  ;;  %v23469_v0 = vcombine.low %v23467_v41, %v23468_v53  ;;  %v8083_v44 = vpop.permute.xlu0 %8082  ;;  %v23475_v11 = vld [vmem:[#allocation323_spill] sm:$0xff]  ;;  %v23476_v53 = vld [vmem:[#allocation341_spill] sm:$0xff] }
 0x2a9   : > { %23465 = vst [vmem:[#allocation58_spill] sm:$0xff] %v19704_v3  ;;  %8208 = vst.msk [vmem:[#allocation2 + $0x58] sm:$0xf] %vm8185_vm2, %v8083_v44  ;;  %v19721_v49 = vrot.slane %v23473_v33, %v14577_v23  ;;  %v8943_v41 = vcombine.low %v19704_v3, %v23475_v11  ;;  %v23482_v3 = vld [vmem:[#allocation365_spill] sm:$0xff] }
 0x2aa   : > { %v19714_v40 = vrot.slane %v23469_v0, %v14577_v23  ;;  %v8085_v58 = vpop.permute.xlu1 %8084  ;;  %9237 = vrot.lane.b32.xlu0 %v8886_v37, %s14453_s23  ;;  %v23477_v0 = vld [vmem:[#allocation362_spill] sm:$0xff]  ;;  %v8934_v47 = vrot.slane %v8927_v25, %v14577_v23  ;;  %v23486_v25 = vld [vmem:[#allocation367_spill] sm:$0xff] }
 0x2ab   : > { %23474 = vst [vmem:[#allocation70_spill] sm:$0xff] %v19721_v49  ;;  %8209 = vst.msk [vmem:[#allocation2 + $0x5c] sm:$0xf] %vm8185_vm2, %v8085_v58  ;;  %v23478_v44 = vcombine.low %v23476_v53, %v23477_v0  ;;  %v8975_v11 = vcombine.low %v19721_v49, %v23481_v12  ;;  %v23484_v53 = vcombine.low %v23482_v3, %v23483_v55  ;;  %v8295_v49 = vshrl.u32 %v19172_v14, 16 }
 0x2ac   : > { %23470 = vst [vmem:[#allocation51_spill] sm:$0xff] %v19714_v40  ;;  %9239 = vrot.lane.b32.xlu1 %v8902_v9, %s14453_s23  ;;  %v8959_v58 = vcombine.low %v19714_v40, %v23480_v7  ;;  %v8087_v33 = vpop.permute.xlu0 %8086  ;;  %v8950_v9 = vrot.slane %v8943_v41, %v14577_v23  ;;  %v23487_v7 = vld [vmem:[#allocation360_spill] sm:$0xff]  ;;  %v8300_v3 = vshll.u32 %v19209_v50, 16  ;;  %v8308_v41 = vshll.u32 %v19213_v26, 16 }
 0x2ad   : > { %v19732_v1 = vrot.slane %v23478_v44, %v14577_v23  ;;  %8210 = vst.msk [vmem:[#allocation2 + $0x60] sm:$0xf] %vm8185_vm2, %v8087_v33  ;;  %v19745_v0 = vrot.slane %v23484_v53, %v14577_v23  ;;  %v23488_v33 = vld [vmem:[#allocation383_spill] sm:$0xff]  ;;  %v19766_v53 = vcombine.high %v19249_v8, %v19249_v8 }
 0x2ae   : > { %v8089_v37 = vpop.permute.xlu1 %8088  ;;  %9241 = vrot.lane.b32.xlu0 %v8918_v46, %s14453_s23  ;;  %v23489_v40 = vcombine.low %v23487_v7, %v23488_v33  ;;  %v8966_v55 = vrot.slane %v8959_v58, %v14577_v23  ;;  %v8303_v46 = vshrl.u32 %v19209_v50, 16  ;;  %v23491_v7 = vld [vmem:[#allocation363_spill] sm:$0xff]  ;;  %v23492_v58 = vld [vmem:[#allocation386_spill] sm:$0xff]  ;;  %v23493_v33 = vld [vmem:[#allocation376_spill] sm:$0xff]  ;;  %v19809_v63 = vsel %vm14628_vm14, %v8295_v49, %v8300_v3 }
 0x2af   : > { %23479 = vst [vmem:[#allocation53_spill] sm:$0xff] %v19732_v1  ;;  %23485 = vst [vmem:[#allocation72_spill] sm:$0xff] %v19745_v0  ;;  %v8991_v44 = vcombine.low %v19732_v1, %v23486_v25  ;;  %v8982_v25 = vrot.slane %v8975_v11, %v14577_v23  ;;  %v23494_v1 = vcombine.low %v23492_v58, %v23493_v33  ;;  %v8319_v58 = vshrl.u32 %v19246_v61, 16  ;;  %v23505_v3 = vld [vmem:[#allocation419_spill] sm:$0xff] }
 0x2b0   : > { %8211 = vst.msk [vmem:[#allocation2 + $0x64] sm:$0xf] %vm8185_vm2, %v8089_v37  ;;  %v19756_v12 = vrot.slane %v23489_v40, %v14577_v23  ;;  %9243 = vrot.lane.b32.xlu1 %v8934_v47, %s14453_s23  ;;  %v8091_v37 = vpop.permute.xlu0 %8090  ;;  %v9007_v47 = vcombine.low %v19745_v0, %v23491_v7  ;;  %v8311_v0 = vshrl.u32 %v19213_v26, 16  ;;  %v8343_v33 = vshrl.u32 %v19253_v48, 16 }
 0x2b1   : > { %8212 = vst.msk [vmem:[#allocation2 + $0x68] sm:$0xf] %vm8185_vm2, %v8091_v37  ;;  %v19776_v20 = vrot.slane %v23494_v1, %v14577_v23  ;;  %v8998_v11 = vrot.slane %v8991_v44, %v14577_v23  ;;  %v23498_v37 = vld [vmem:[#allocation389_spill] sm:$0xff]  ;;  %v8316_v1 = vshll.u32 %v19246_v61, 16  ;;  %v8335_v44 = vshrl.u32 %v19249_v8, 16 }
 0x2b2   : > { %23490 = vst [vmem:[#allocation65_spill] sm:$0xff] %v19756_v12  ;;  %v8093_v40 = vpop.permute.xlu1 %8092  ;;  %9245 = vrot.lane.b32.xlu0 %v8950_v9, %s14453_s23  ;;  %v9023_v7 = vcombine.low %v19756_v12, %v23498_v37  ;;  %v8348_v37 = vshll.u32 %v19766_v53, 16  ;;  %v23499_v12 = vld [vmem:[#allocation404_spill] sm:$0xff]  ;;  %v8310_v16 = vsel %vm14628_vm14, %v8303_v46, %v8308_v41 }
 0x2b3   : > { %8213 = vst.msk [vmem:[#allocation2 + $0x6c] sm:$0xf] %vm8185_vm2, %v8093_v40  ;;  %v8340_v40 = vshll.u32 %v19253_v48, 16  ;;  %v23501_v10 = vcombine.low %v23499_v12, %v23500_v5  ;;  %v9039_v48 = vcombine.low %v19776_v20, %v23502_v51  ;;  %v23504_v12 = vld [vmem:[#allocation399_spill] sm:$0xff]  ;;  %v8326_v51 = vsel %vm14628_vm14, %v8319_v58, %v8324_v57  ;;  %v23509_v57 = vld [vmem:[#allocation422_spill] sm:$0xff] }
 0x2b4   : > { %9247 = vrot.lane.b32.xlu1 %v8966_v55, %s14453_s23  ;;  %v8095_v9 = vpop.permute.xlu0 %8094  ;;  %v9030_v5 = vrot.slane %v9023_v7, %v14577_v23  ;;  %v23506_v46 = vcombine.low %v23504_v12, %v23505_v3 }
 0x2b5   : > { %8214 = vst.msk [vmem:[#allocation2 + $0x70] sm:$0xf] %vm8185_vm2, %v8095_v9  ;;  %v19805_v45 = vrot.slane %v23501_v10, %v14577_v23  ;;  %v9014_v9 = vrot.slane %v9007_v47, %v14577_v23  ;;  %v23503_v10 = vld [vmem:[#allocation407_spill] sm:$0xff]  ;;  %v8342_v7 = vsel %vm14628_vm14, %v8335_v44, %v8340_v40  ;;  %v9046_v58 = vrot.slane %v9039_v48, %v14577_v23  ;;  %v23513_v40 = vld [vmem:[#allocation428_spill] sm:$0xff]  ;;  %v23515_v48 = vld [vmem:[#allocation425_spill] sm:$0xff] }
 0x2b6   : > { %v8097_v55 = vpop.permute.xlu1 %8096  ;;  %9249 = vrot.lane.b32.xlu0 %v8982_v25, %s14453_s23  ;;  %v9055_v49 = vcombine.low %v19782_v21, %v23503_v10  ;;  %v19826_v41 = vrot.slane %v23506_v46, %v14577_v23  ;;  %v19830_v25 = vsel %vm14628_vm14, %v8311_v0, %v8316_v1  ;;  %v23507_v10 = vld [vmem:[#allocation430_spill] sm:$0xff] }
 0x2b7   : > { %8215 = vst.msk [vmem:[#allocation2 + $0x74] sm:$0xf] %vm8185_vm2, %v8097_v55  ;;  %v19842_v55 = vsel %vm14628_vm14, %v8343_v33, %v8348_v37  ;;  %v9127_v12 = vcombine.low %v23507_v10, %v8310_v16  ;;  %v23508_v1 = vld [vmem:[#allocation402_spill] sm:$0xff]  ;;  %v9128_v46 = vcombine.low %v19809_v63, %v19830_v25  ;;  %v9151_v10 = vcombine.low %v8326_v51, %v8342_v7 }
 0x2b8   : > { %9251 = vrot.lane.b32.xlu1 %v8998_v11, %s14453_s23  ;;  %v8099_v47 = vpop.permute.xlu0 %8098  ;;  %v19836_v11 = vsel %vm14628_vm14, %v8327_v62, %v8332_v18  ;;  %v9071_v3 = vcombine.low %v19805_v45, %v23508_v1  ;;  %v23510_v62 = vld [vmem:[#allocation415_spill] sm:$0xff]  ;;  %v23512_v16 = vld [vmem:[#allocation418_spill] sm:$0xff] }
 0x2b9   : > { %8216 = vst.msk [vmem:[#allocation2 + $0x78] sm:$0xf] %vm8185_vm2, %v8099_v47  ;;  %v23511_v18 = vcombine.low %v23509_v57, %v23510_v62  ;;  %v23514_v33 = vcombine.low %v23512_v16, %v23513_v40  ;;  %v9087_v47 = vcombine.low %v19826_v41, %v23515_v48  ;;  %v19880_v51 = vrot.slane %v9127_v12, %v14577_v23  ;;  %v23519_v48 = vld [vmem:[#allocation10_spill] sm:$0xff] }
 0x2ba   : > { %v8101_v0 = vpop.permute.xlu1 %8100  ;;  %9253 = vrot.lane.b32.xlu0 %v9014_v9, %s14453_s23  ;;  %v9062_v9 = vrot.slane %v9055_v49, %v14577_v23  ;;  %v9078_v62 = vrot.slane %v9071_v3, %v14577_v23  ;;  %v9142_v7 = vrot.slane %v9128_v46, %v14577_v23  ;;  %v19886_v3 = vrot.slane %v9151_v10, %v14577_v23 }
 0x2bb   : > { %8217 = vst.msk [vmem:[#allocation2 + $0x7c] sm:$0xf] %vm8185_vm2, %v8101_v0  ;;  %v19855_v44 = vrot.slane %v23511_v18, %v14577_v23  ;;  %v19861_v37 = vrot.slane %v23514_v33, %v14577_v23  ;;  %v9152_v0 = vcombine.low %v19836_v11, %v19842_v55  ;;  %v23517_v18 = vld [vmem:[#allocation431_spill] sm:$0xff]  ;;  %v9094_v40 = vrot.slane %v9087_v47, %v14577_v23  ;;  %v23518_v33 = vld [vmem:[#allocation14_spill] sm:$0xff] }
 0x2bc   : > { %9255 = vrot.lane.b32.xlu1 %v9030_v5, %s14453_s23  ;;  %v8103_v1 = vpop.permute.xlu0 %8102  ;;  %v23516_v5 = vld [vmem:[#allocation420_spill] sm:$0xff]  ;;  %v9143_v46 = vcombine.low %v19880_v51, %v9142_v7 }
 0x2bd   : > { %8218 = vst.msk [vmem:[#allocation2 + $0x80] sm:$0xf] %vm8185_vm2, %v8103_v1  ;;  %v9103_v49 = vcombine.low %v19855_v44, %v23516_v5  ;;  %v9119_v16 = vcombine.low %v19861_v37, %v23517_v18  ;;  %v9372_v1 = vcombine.low %v23519_v48, %v23518_v33  ;;  %v23520_v7 = vld [vmem:[#allocation432_spill] sm:$0xff] }
 0x2be   : > { %v8105_v57 = vpop.permute.xlu1 %8104  ;;  %9257 = vrot.lane.b32.xlu0 %v9046_v58, %s14453_s23  ;;  %v9166_v58 = vrot.slane %v9152_v0, %v14577_v23 }
 0x2bf   : > { %8219 = vst.msk [vmem:[#allocation2 + $0x84] sm:$0xf] %vm8185_vm2, %v8105_v57  ;;  %v9110_v12 = vrot.slane %v9103_v49, %v14577_v23  ;;  %v9379_v10 = vrot.slane %v9372_v1, %v14577_v23 }
 0x2c0   : > { %9259 = vrot.lane.b32.xlu1 %v9062_v9, %s14453_s23  ;;  %v8107_v57 = vpop.permute.xlu0 %8106  ;;  %v9126_v9 = vrot.slane %v9119_v16, %v14577_v23  ;;  %v9167_v47 = vcombine.low %v19886_v3, %v9166_v58  ;;  %v23522_v58 = vld [vmem:[#allocation46_spill] sm:$0xff] }
 0x2c1   : > { %8220 = vst.msk [vmem:[#allocation2 + $0x88] sm:$0xf] %vm8185_vm2, %v8107_v57  ;;  %v9380_v16 = vcombine.low %v9379_v10, %v23520_v7  ;;  %v23524_v10 = vld [vmem:[#allocation440_spill] sm:$0xff] }
 0x2c2   : > { %v8109_v5 = vpop.permute.xlu1 %8108  ;;  %9261 = vrot.lane.b32.xlu0 %v9078_v62, %s14453_s23  ;;  %v9150_v62 = vrot.slane %v9143_v46, %v14577_v23  ;;  %v9174_v49 = vrot.slane %v9167_v47, %v14577_v23  ;;  %v23527_v7 = vld [vmem:[#allocation436_spill] sm:$0xff] }
 0x2c3   : > { %8221 = vst.msk [vmem:[#allocation2 + $0x8c] sm:$0xf] %vm8185_vm2, %v8109_v5  ;;  %v9387_v57 = vrot.slane %v9380_v16, %v14577_v23  ;;  %v23523_v5 = vld [vmem:[#allocation434_spill] sm:$0xff] }
 0x2c4   : > { %9263 = vrot.lane.b32.xlu1 %v9094_v40, %s14453_s23  ;;  %v8111_v0 = vpop.permute.xlu0 %8110  ;;  %v23521_v40 = vld [vmem:[#allocation40_spill] sm:$0xff] }
 0x2c5   : > { %8222 = vst.msk [vmem:[#allocation2 + $0x90] sm:$0xf] %vm8185_vm2, %v8111_v0  ;;  %v13781_v33 = vcombine.high %v23522_v58, %v23521_v40  ;;  %v23525_v0 = vld [vmem:[#allocation82_spill] sm:$0xff] }
 0x2c6   : > { %v8113_v18 = vpop.permute.xlu1 %8112  ;;  %9265 = vrot.lane.b32.xlu0 %v9110_v12, %s14453_s23  ;;  %v9388_v12 = vcombine.low %v23122_v28, %v23523_v5  ;;  %v23529_v5 = vld [vmem:[#allocation437_spill] sm:$0xff] }
 0x2c7   : > { %8223 = vst.msk [vmem:[#allocation2 + $0x94] sm:$0xf] %vm8185_vm2, %v8113_v18  ;;  %v19917_v46 = vrot.slane %v13781_v33, %v14577_v23  ;;  %v23526_v18 = vld [vmem:[#allocation62_spill] sm:$0xff] }
 0x2c8   : > { %9267 = vrot.lane.b32.xlu1 %v9126_v9, %s14453_s23  ;;  %v8115_v48 = vpop.permute.xlu0 %8114 }
 0x2c9   : > { %8224 = vst.msk [vmem:[#allocation2 + $0x98] sm:$0xf] %vm8185_vm2, %v8115_v48  ;;  %v9404_v16 = vcombine.low %v19917_v46, %v23527_v7  ;;  %v23531_v7 = vld [vmem:[#allocation439_spill] sm:$0xff] }
 0x2ca   : > { %v8117_v1 = vpop.permute.xlu1 %8116  ;;  %9269 = vrot.lane.b32.xlu0 %v9150_v62, %s14453_s23  ;;  %v9420_v62 = vcombine.low %v23526_v18, %v23525_v0  ;;  %v23530_v0 = vld [vmem:[#allocation442_spill] sm:$0xff] }
 0x2cb   : > { %8225 = vst.msk [vmem:[#allocation2 + $0x9c] sm:$0xf] %vm8185_vm2, %v8117_v1  ;;  %v23528_v1 = vld [vmem:[#allocation124_spill] sm:$0xff] }
 0x2cc   : > { %9271 = vrot.lane.b32.xlu1 %v9174_v49, %s14453_s23  ;;  %v8119_v9 = vpop.permute.xlu0 %8118  ;;  %v9395_v49 = vrot.slane %v9388_v12, %v14577_v23  ;;  %s14457_s23 = smov 64  }
 0x2cd   : > { %8226 = vst.msk [vmem:[#allocation2 + $0xa0] sm:$0xf] %vm8185_vm2, %v8119_v9  ;;  %v9412_v9 = vcombine.low %v23144_v52, %v23529_v5  ;;  %v23534_v5 = vld [vmem:[#allocation76_spill] sm:$0xff] }
 0x2ce   : > { %v8121_v47 = vpop.permute.xlu1 %8120  ;;  %9756 = vrot.lane.b32.xlu0 %v23524_v10, %s14454_s26 }
 0x2cf   : > { %8227 = vst.msk [vmem:[#allocation2 + $0xa4] sm:$0xf] %vm8185_vm2, %v8121_v47  ;;  %v19936_v47 = vrot.slane %v9420_v62, %v14577_v23  ;;  %v9419_v18 = vrot.slane %v9412_v9, %v14577_v23  ;;  %v23532_v62 = vld [vmem:[#allocation119_spill] sm:$0xff]  ;;  %v9436_v9 = vcombine.low %v23156_v43, %v23534_v5  ;;  %v23540_v5 = vld [vmem:[#allocation186_spill] sm:$0xff] }
 0x2d0   : > { %9758 = vrot.lane.b32.xlu1 %v9387_v57, %s14454_s26  ;;  %v8123_v33 = vpop.permute.xlu0 %8122  ;;  %v9411_v57 = vrot.slane %v9404_v16, %v14577_v23 }
 0x2d1   : > { %8228 = vst.msk [vmem:[#allocation2 + $0xa8] sm:$0xf] %vm8185_vm2, %v8123_v33  ;;  %v9428_v52 = vcombine.low %v19936_v47, %v23531_v7  ;;  %v23533_v33 = vld [vmem:[#allocation95_spill] sm:$0xff] }
 0x2d2   : > { %v8125_v48 = vpop.permute.xlu1 %8124  ;;  %9760 = vrot.lane.b32.xlu0 %v23528_v1, %s14454_s26 }
 0x2d3   : > { %8229 = vst.msk [vmem:[#allocation2 + $0xac] sm:$0xf] %vm8185_vm2, %v8125_v48  ;;  %v13782_v48 = vcombine.high %v23533_v33, %v23532_v62  ;;  %v9435_v1 = vrot.slane %v9428_v52, %v14577_v23  ;;  %v23539_v52 = vld [vmem:[#allocation100_spill] sm:$0xff] }
 0x2d4   : > { %9762 = vrot.lane.b32.xlu1 %v9395_v49, %s14454_s26  ;;  %v8127_v12 = vpop.permute.xlu0 %8126 }
 0x2d5   : > { %8230 = vst.msk [vmem:[#allocation2 + $0xb0] sm:$0xf] %vm8185_vm2, %v8127_v12  ;;  %v19957_v12 = vrot.slane %v13782_v48, %v14577_v23 }
 0x2d6   : > { %v8129_v10 = vpop.permute.xlu1 %8128  ;;  %9764 = vrot.lane.b32.xlu0 %v23530_v0, %s14454_s26  ;;  %v23538_v0 = vld [vmem:[#allocation128_spill] sm:$0xff] }
 0x2d7   : > { %8231 = vst.msk [vmem:[#allocation2 + $0xb4] sm:$0xf] %vm8185_vm2, %v8129_v10  ;;  %23535 = vst [vmem:[#allocation74_spill] sm:$0xff] %v19957_v12  ;;  %v23536_v10 = vld [vmem:[#allocation152_spill] sm:$0xff]  ;;  %v9452_v48 = vcombine.low %v19957_v12, %v23539_v52  ;;  %v23543_v52 = vld [vmem:[#allocation445_spill] sm:$0xff] }
 0x2d8   : > { %9766 = vrot.lane.b32.xlu1 %v9411_v57, %s14454_s26  ;;  %v8131_v49 = vpop.permute.xlu0 %8130  ;;  %v23537_v57 = vld [vmem:[#allocation137_spill] sm:$0xff] }
 0x2d9   : > { %8232 = vst.msk [vmem:[#allocation2 + $0xb8] sm:$0xf] %vm8185_vm2, %v8131_v49  ;;  %v9468_v7 = vcombine.low %v23538_v0, %v23537_v57 }
 0x2da   : > { %v8133_v16 = vpop.permute.xlu1 %8132  ;;  %9768 = vrot.lane.b32.xlu0 %v9419_v18, %s14454_s26  ;;  %v9443_v18 = vrot.slane %v9436_v9, %v14577_v23  ;;  %v23542_v9 = vld [vmem:[#allocation184_spill] sm:$0xff] }
 0x2db   : > { %8233 = vst.msk [vmem:[#allocation2 + $0xbc] sm:$0xf] %vm8185_vm2, %v8133_v16  ;;  %v19974_v57 = vrot.slane %v9468_v7, %v14577_v23  ;;  %v23544_v7 = vld [vmem:[#allocation169_spill] sm:$0xff] }
 0x2dc   : > { %9770 = vrot.lane.b32.xlu1 %v23536_v10, %s14454_s26  ;;  %v8135_v49 = vpop.permute.xlu0 %8134  ;;  %v23541_v10 = vld [vmem:[#allocation116_spill] sm:$0xff] }
 0x2dd   : > { %8234 = vst.msk [vmem:[#allocation2 + $0xc0] sm:$0xf] %vm8185_vm2, %v8135_v49  ;;  %v9460_v43 = vcombine.low %v23176_v29, %v23541_v10  ;;  %v9476_v29 = vcombine.low %v19974_v57, %v23543_v52 }
 0x2de   : > { %v9176_v16 = vpop.permute.xlu1 %9175  ;;  %9772 = vrot.lane.b32.xlu0 %v9435_v1, %s14454_s26  ;;  %v9459_v1 = vrot.slane %v9452_v48, %v14577_v23  ;;  %v23546_v48 = vld [vmem:[#allocation159_spill] sm:$0xff] }
 0x2df   : > { %9323 = vst.msk [vmem:[#allocation2] sm:$0xf] %vm9322_vm3, %v9176_v16  ;;  %v9467_v16 = vrot.slane %v9460_v43, %v14577_v23  ;;  %v9484_v43 = vcombine.low %v23194_v59, %v23546_v48 }
 0x2e0   : > { %9774 = vrot.lane.b32.xlu1 %v23540_v5, %s14454_s26  ;;  %v9178_v0 = vpop.permute.xlu0 %9177  ;;  %v23545_v5 = vld [vmem:[#allocation181_spill] sm:$0xff] }
 0x2e1   : > { %9324 = vst.msk [vmem:[#allocation2 + $0x4] sm:$0xf] %vm9322_vm3, %v9178_v0  ;;  %v13783_v10 = vcombine.high %v23545_v5, %v23544_v7 }
 0x2e2   : > { %v9180_v49 = vpop.permute.xlu1 %9179  ;;  %9776 = vrot.lane.b32.xlu0 %v9443_v18, %s14454_s26  ;;  %v9483_v18 = vrot.slane %v9476_v29, %v14577_v23  ;;  %v9517_v29 = vcombine.low %v23203_v27, %v18885_v42  ;;  %v23552_v42 = vld [vmem:[#allocation201_spill] sm:$0xff] }
 0x2e3   : > { %9325 = vst.msk [vmem:[#allocation2 + $0x8] sm:$0xf] %vm9322_vm3, %v9180_v49  ;;  %v19995_v49 = vrot.slane %v13783_v10, %v14577_v23  ;;  %v9491_v10 = vrot.slane %v9484_v43, %v14577_v23  ;;  %v9508_v27 = vcombine.low %v23208_v31, %v23552_v42  ;;  %v23554_v31 = vld [vmem:[#allocation236_spill] sm:$0xff] }
 0x2e4   : > { %9778 = vrot.lane.b32.xlu1 %v23542_v9, %s14454_s26  ;;  %v9182_v12 = vpop.permute.xlu0 %9181  ;;  %v9531_v43 = vrot.slane %v9517_v29, %v14577_v23 }
 0x2e5   : > { %9326 = vst.msk [vmem:[#allocation2 + $0xc] sm:$0xf] %vm9322_vm3, %v9182_v12  ;;  %23547 = vst [vmem:[#allocation67_spill] sm:$0xff] %v19995_v49  ;;  %v23548_v12 = vld [vmem:[#allocation216_spill] sm:$0xff] }
 0x2e6   : > { %v9184_v0 = vpop.permute.xlu1 %9183  ;;  %9780 = vrot.lane.b32.xlu0 %v9459_v1, %s14454_s26  ;;  %v23549_v1 = vld [vmem:[#allocation215_spill] sm:$0xff] }
 0x2e7   : > { %9327 = vst.msk [vmem:[#allocation2 + $0x10] sm:$0xf] %vm9322_vm3, %v9184_v0  ;;  %v23550_v0 = vld [vmem:[#allocation172_spill] sm:$0xff] }
 0x2e8   : > { %9782 = vrot.lane.b32.xlu1 %v9467_v16, %s14454_s26  ;;  %v9186_v9 = vpop.permute.xlu0 %9185  ;;  %v9516_v16 = vcombine.low %v23205_v19, %v23549_v1  ;;  %v9500_v48 = vcombine.low %v19995_v49, %v23550_v0  ;;  %v23551_v19 = vld [vmem:[#allocation224_spill] sm:$0xff]  ;;  %v23767_v49 = vld [vmem:[#allocation199_spill] sm:$0xff] }
 0x2e9   : > { %9328 = vst.msk [vmem:[#allocation2 + $0x14] sm:$0xf] %vm9322_vm3, %v9186_v9  ;;  %v9540_v9 = vcombine.low %v18908_v34, %v18912_v4  ;;  %v13784_v34 = vcombine.high %v18912_v4, %v23209_v35 }
 0x2ea   : > { %v9188_v52 = vpop.permute.xlu1 %9187  ;;  %9784 = vrot.lane.b32.xlu0 %v23548_v12, %s14454_s26  ;;  %v9507_v1 = vrot.slane %v9500_v48, %v14577_v23 }
 0x2eb   : > { %9329 = vst.msk [vmem:[#allocation2 + $0x18] sm:$0xf] %vm9322_vm3, %v9188_v52  ;;  %v9547_v0 = vrot.slane %v9540_v9, %v14577_v23  ;;  %v9563_v35 = vrot.slane %v13784_v34, %v14577_v23 }
 0x2ec   : > { %9786 = vrot.lane.b32.xlu1 %v9483_v18, %s14454_s26  ;;  %v9190_v52 = vpop.permute.xlu0 %9189  ;;  %v20018_v18 = vrot.slane %v9516_v16, %v14577_v23  ;;  %v9515_v16 = vrot.slane %v9508_v27, %v14577_v23 }
 0x2ed   : > { %9330 = vst.msk [vmem:[#allocation2 + $0x1c] sm:$0xf] %vm9322_vm3, %v9190_v52  ;;  %v9548_v9 = vcombine.low %v18967_v32, %v9547_v0  ;;  %v23558_v32 = vld [vmem:[#allocation258_spill] sm:$0xff] }
 0x2ee   : > { %v9192_v12 = vpop.permute.xlu1 %9191  ;;  %9788 = vrot.lane.b32.xlu0 %v23551_v19, %s14454_s26  ;;  %23553 = vst [vmem:[#allocation89_spill] sm:$0xff] %v20018_v18  ;;  %v9532_v29 = vcombine.low %v20018_v18, %v9531_v43  ;;  %v23556_v19 = vld [vmem:[#allocation221_spill] sm:$0xff]  ;;  %v9564_v43 = vcombine.low %v18980_v17, %v9563_v35  ;;  %v23559_v0 = vld [vmem:[#allocation254_spill] sm:$0xff]  ;;  %v23561_v35 = vld [vmem:[#allocation240_spill] sm:$0xff] }
 0x2ef   : > { %9331 = vst.msk [vmem:[#allocation2 + $0x20] sm:$0xf] %vm9322_vm3, %v9192_v12 }
 0x2f0   : > { %9790 = vrot.lane.b32.xlu1 %v9491_v10, %s14454_s26  ;;  %v9194_v52 = vpop.permute.xlu0 %9193  ;;  %v23555_v10 = vld [vmem:[#allocation230_spill] sm:$0xff]  ;;  %v9539_v27 = vrot.slane %v9532_v29, %v14577_v23  ;;  %v9571_v17 = vrot.slane %v9564_v43, %v14577_v23 }
 0x2f1   : > { %9332 = vst.msk [vmem:[#allocation2 + $0x24] sm:$0xf] %vm9322_vm3, %v9194_v52  ;;  %v13785_v48 = vcombine.high %v23556_v19, %v23555_v10  ;;  %v23563_v43 = vld [vmem:[#allocation294_spill] sm:$0xff] }
 0x2f2   : > { %v9196_v12 = vpop.permute.xlu1 %9195  ;;  %9792 = vrot.lane.b32.xlu0 %v23554_v31, %s14454_s26  ;;  %v9596_v31 = vcombine.low %v23559_v0, %v23558_v32  ;;  %v23565_v32 = vld [vmem:[#allocation290_spill] sm:$0xff] }
 0x2f3   : > { %9333 = vst.msk [vmem:[#allocation2 + $0x28] sm:$0xf] %vm9322_vm3, %v9196_v12  ;;  %v9579_v34 = vrot.slane %v13785_v48, %v14577_v23  ;;  %v23557_v12 = vld [vmem:[#allocation273_spill] sm:$0xff]  ;;  %v9588_v48 = vcombine.low %v23232_v39, %v23561_v35  ;;  %v23566_v0 = vld [vmem:[#allocation302_spill] sm:$0xff] }
 0x2f4   : > { %9794 = vrot.lane.b32.xlu1 %v9507_v1, %s14454_s26  ;;  %v9198_v42 = vpop.permute.xlu0 %9197  ;;  %v9555_v1 = vrot.slane %v9548_v9, %v14577_v23  ;;  %v20057_v9 = vrot.slane %v9596_v31, %v14577_v23  ;;  %v13786_v31 = vcombine.high %v23566_v0, %v23565_v32 }
 0x2f5   : > { %9334 = vst.msk [vmem:[#allocation2 + $0x2c] sm:$0xf] %vm9322_vm3, %v9198_v42 }
 0x2f6   : > { %v9200_v52 = vpop.permute.xlu1 %9199  ;;  %9796 = vrot.lane.b32.xlu0 %v9515_v16, %s14454_s26  ;;  %v23560_v16 = vld [vmem:[#allocation214_spill] sm:$0xff]  ;;  %23562 = vst [vmem:[#allocation69_spill] sm:$0xff] %v20057_v9  ;;  %v20078_v35 = vrot.slane %v13786_v31, %v14577_v23 }
 0x2f7   : > { %9335 = vst.msk [vmem:[#allocation2 + $0x30] sm:$0xf] %vm9322_vm3, %v9200_v52  ;;  %v9580_v29 = vcombine.low %v9579_v34, %v23560_v16  ;;  %v9595_v34 = vrot.slane %v9588_v48, %v14577_v23  ;;  %v23567_v16 = vld [vmem:[#allocation211_spill] sm:$0xff] }
 0x2f8   : > { %9798 = vrot.lane.b32.xlu1 %v23557_v12, %s14454_s26  ;;  %v9202_v19 = vpop.permute.xlu0 %9201  ;;  %23568 = vst [vmem:[#allocation91_spill] sm:$0xff] %v20078_v35 }
 0x2f9   : > { %9336 = vst.msk [vmem:[#allocation2 + $0x34] sm:$0xf] %vm9322_vm3, %v9202_v19 }
 0x2fa   : > { %v9204_v42 = vpop.permute.xlu1 %9203  ;;  %9800 = vrot.lane.b32.xlu0 %v9539_v27, %s14454_s26  ;;  %v9587_v27 = vrot.slane %v9580_v29, %v14577_v23  ;;  %v9612_v29 = vcombine.low %v23245_v30, %v23567_v16  ;;  %v23573_v16 = vld [vmem:[#allocation372_spill] sm:$0xff] }
 0x2fb   : > { %9337 = vst.msk [vmem:[#allocation2 + $0x38] sm:$0xf] %vm9322_vm3, %v9204_v42 }
 0x2fc   : > { %9802 = vrot.lane.b32.xlu1 %v9555_v1, %s14454_s26  ;;  %v9206_v52 = vpop.permute.xlu0 %9205  ;;  %v23564_v1 = vld [vmem:[#allocation454_spill] sm:$0xff] }
 0x2fd   : > { %9338 = vst.msk [vmem:[#allocation2 + $0x3c] sm:$0xf] %vm9322_vm3, %v9206_v52  ;;  %v9604_v39 = vcombine.low %v20057_v9, %v23564_v1  ;;  %v9619_v1 = vrot.slane %v9612_v29, %v14577_v23  ;;  %v23643_v9 = vld [vmem:[#allocation191_spill] sm:$0xff] }
 0x2fe   : > { %v9208_v12 = vpop.permute.xlu1 %9207  ;;  %9804 = vrot.lane.b32.xlu0 %v9571_v17, %s14454_s26 }
 0x2ff   : > { %9339 = vst.msk [vmem:[#allocation2 + $0x40] sm:$0xf] %vm9322_vm3, %v9208_v12  ;;  %v9611_v17 = vrot.slane %v9604_v39, %v14577_v23  ;;  %v23569_v12 = vld [vmem:[#allocation347_spill] sm:$0xff]  ;;  %v23572_v39 = vld [vmem:[#allocation276_spill] sm:$0xff] }
 0x300   : > { %9806 = vrot.lane.b32.xlu1 %v23563_v43, %s14454_s26  ;;  %v9210_v19 = vpop.permute.xlu0 %9209  ;;  %v23571_v43 = vld [vmem:[#allocation316_spill] sm:$0xff]  ;;  %v9628_v31 = vcombine.low %v20078_v35, %v23572_v39 }
 0x301   : > { %9340 = vst.msk [vmem:[#allocation2 + $0x44] sm:$0xf] %vm9322_vm3, %v9210_v19 }
 0x302   : > { %v9212_v42 = vpop.permute.xlu1 %9211  ;;  %9808 = vrot.lane.b32.xlu0 %v9587_v27, %s14454_s26  ;;  %v23570_v27 = vld [vmem:[#allocation337_spill] sm:$0xff] }
 0x303   : > { %9341 = vst.msk [vmem:[#allocation2 + $0x48] sm:$0xf] %vm9322_vm3, %v9212_v42 }
 0x304   : > { %9810 = vrot.lane.b32.xlu1 %v9595_v34, %s14454_s26  ;;  %v9214_v48 = vpop.permute.xlu0 %9213  ;;  %v9644_v34 = vcombine.low %v23571_v43, %v23570_v27  ;;  %v23576_v43 = vld [vmem:[#allocation396_spill] sm:$0xff] }
 0x305   : > { %9342 = vst.msk [vmem:[#allocation2 + $0x4c] sm:$0xf] %vm9322_vm3, %v9214_v48  ;;  %v23574_v48 = vld [vmem:[#allocation293_spill] sm:$0xff] }
 0x306   : > { %v9216_v52 = vpop.permute.xlu1 %9215  ;;  %9812 = vrot.lane.b32.xlu0 %v23569_v12, %s14454_s26  ;;  %v20097_v12 = vrot.slane %v9644_v34, %v14577_v23  ;;  %v23578_v34 = vld [vmem:[#allocation373_spill] sm:$0xff] }
 0x307   : > { %9343 = vst.msk [vmem:[#allocation2 + $0x50] sm:$0xf] %vm9322_vm3, %v9216_v52  ;;  %v9636_v52 = vcombine.low %v18453_v60, %v23574_v48 }
 0x308   : > { %9814 = vrot.lane.b32.xlu1 %v9611_v17, %s14454_s26  ;;  %v9218_v19 = vpop.permute.xlu0 %9217  ;;  %23575 = vst [vmem:[#allocation84_spill] sm:$0xff] %v20097_v12  ;;  %v9635_v17 = vrot.slane %v9628_v31, %v14577_v23 }
 0x309   : > { %9344 = vst.msk [vmem:[#allocation2 + $0x54] sm:$0xf] %vm9322_vm3, %v9218_v19  ;;  %v9643_v39 = vrot.slane %v9636_v52, %v14577_v23  ;;  %v23577_v19 = vld [vmem:[#allocation455_spill] sm:$0xff] }
 0x30a   : > { %v9220_v42 = vpop.permute.xlu1 %9219  ;;  %9816 = vrot.lane.b32.xlu0 %v23573_v16, %s14454_s26  ;;  %v9652_v60 = vcombine.low %v20097_v12, %v23577_v19  ;;  %v23583_v19 = vld [vmem:[#allocation387_spill] sm:$0xff] }
 0x30b   : > { %9345 = vst.msk [vmem:[#allocation2 + $0x58] sm:$0xf] %vm9322_vm3, %v9220_v42  ;;  %v23579_v42 = vld [vmem:[#allocation352_spill] sm:$0xff] }
 0x30c   : > { %9818 = vrot.lane.b32.xlu1 %v9619_v1, %s14454_s26  ;;  %v9222_v29 = vpop.permute.xlu0 %9221  ;;  %v13787_v16 = vcombine.high %v23579_v42, %v23578_v34  ;;  %v9659_v48 = vrot.slane %v9652_v60, %v14577_v23  ;;  %v23585_v60 = vld [vmem:[#allocation356_spill] sm:$0xff] }
 0x30d   : > { %9346 = vst.msk [vmem:[#allocation2 + $0x5c] sm:$0xf] %vm9322_vm3, %v9222_v29  ;;  %v23580_v29 = vld [vmem:[#allocation350_spill] sm:$0xff] }
 0x30e   : > { %v9224_v27 = vpop.permute.xlu1 %9223  ;;  %9820 = vrot.lane.b32.xlu0 %v23576_v43, %s14454_s26  ;;  %v9660_v52 = vcombine.low %v18566_v15, %v23580_v29  ;;  %v23582_v43 = vld [vmem:[#allocation391_spill] sm:$0xff]  ;;  %v23639_v15 = vld [vmem:[#allocation200_spill] sm:$0xff] }
 0x30f   : > { %9347 = vst.msk [vmem:[#allocation2 + $0x60] sm:$0xf] %vm9322_vm3, %v9224_v27  ;;  %v20118_v27 = vrot.slane %v13787_v16, %v14577_v23  ;;  %v9692_v12 = vcombine.low %v23583_v19, %v23582_v43  ;;  %v23587_v43 = vld [vmem:[#allocation462_spill] sm:$0xff]  ;;  %v23588_v19 = vld [vmem:[#allocation371_spill] sm:$0xff] }
 0x310   : > { %9822 = vrot.lane.b32.xlu1 %v9635_v17, %s14454_s26  ;;  %v9226_v1 = vpop.permute.xlu0 %9225  ;;  %v23584_v17 = vld [vmem:[#allocation405_spill] sm:$0xff] }
 0x311   : > { %9348 = vst.msk [vmem:[#allocation2 + $0x64] sm:$0xf] %vm9322_vm3, %v9226_v1  ;;  %23581 = vst [vmem:[#allocation93_spill] sm:$0xff] %v20118_v27  ;;  %v9676_v16 = vcombine.low %v20118_v27, %v23585_v60  ;;  %v20131_v29 = vrot.slane %v9692_v12, %v14577_v23  ;;  %v23590_v60 = vld [vmem:[#allocation12_spill] sm:$0xff] }
 0x312   : > { %v9228_v31 = vpop.permute.xlu1 %9227  ;;  %9824 = vrot.lane.b32.xlu0 %v9643_v39, %s14454_s26  ;;  %v9667_v39 = vrot.slane %v9660_v52, %v14577_v23  ;;  %v23589_v52 = vld [vmem:[#allocation460_spill] sm:$0xff] }
 0x313   : > { %9349 = vst.msk [vmem:[#allocation2 + $0x68] sm:$0xf] %vm9322_vm3, %v9228_v31  ;;  %23586 = vst [vmem:[#allocation86_spill] sm:$0xff] %v20131_v29  ;;  %v9700_v12 = vcombine.low %v20131_v29, %v23589_v52 }
 0x314   : > { %9826 = vrot.lane.b32.xlu1 %v23584_v17, %s14454_s26  ;;  %v9230_v1 = vpop.permute.xlu0 %9229  ;;  %v9684_v17 = vcombine.low %v18597_v54, %v23588_v19  ;;  %v23591_v54 = vld [vmem:[#allocation424_spill] sm:$0xff] }
 0x315   : > { %9350 = vst.msk [vmem:[#allocation2 + $0x6c] sm:$0xf] %vm9322_vm3, %v9230_v1  ;;  %v13788_v19 = vcombine.high %v23591_v54, %v19172_v14 }
 0x316   : > { %v9232_v31 = vpop.permute.xlu1 %9231  ;;  %9828 = vrot.lane.b32.xlu0 %v9659_v48, %s14454_s26  ;;  %v9683_v48 = vrot.slane %v9676_v16, %v14577_v23  ;;  %v9707_v16 = vrot.slane %v9700_v12, %v14577_v23 }
 0x317   : > { %9351 = vst.msk [vmem:[#allocation2 + $0x70] sm:$0xf] %vm9322_vm3, %v9232_v31 }
 0x318   : > { %9830 = vrot.lane.b32.xlu1 %v23587_v43, %s14454_s26  ;;  %v9234_v1 = vpop.permute.xlu0 %9233  ;;  %v9691_v43 = vrot.slane %v9684_v17, %v14577_v23  ;;  %v23592_v17 = vld [vmem:[#allocation408_spill] sm:$0xff] }
 0x319   : > { %9352 = vst.msk [vmem:[#allocation2 + $0x74] sm:$0xf] %vm9322_vm3, %v9234_v1  ;;  %v9717_v1 = vcombine.low %v19209_v50, %v19246_v61  ;;  %v9708_v52 = vcombine.low %v18687_v2, %v23592_v17  ;;  %v20160_v50 = vrot.slane %v13788_v19, %v14577_v23  ;;  %v23635_v2 = vld [vmem:[#allocation173_spill] sm:$0xff] }
 0x31a   : > { %v9236_v31 = vpop.permute.xlu1 %9235  ;;  %9832 = vrot.lane.b32.xlu0 %v9667_v39, %s14454_s26 }
 0x31b   : > { %9353 = vst.msk [vmem:[#allocation2 + $0x78] sm:$0xf] %vm9322_vm3, %v9236_v31  ;;  %v9740_v31 = vcombine.low %v19249_v8, %v19766_v53  ;;  %23593 = vst [vmem:[#allocation108_spill] sm:$0xff] %v20160_v50  ;;  %v9731_v61 = vrot.slane %v9717_v1, %v14577_v23  ;;  %v23596_v53 = vld [vmem:[#allocation21_spill] sm:$0xff] }
 0x31c   : > { %9834 = vrot.lane.b32.xlu1 %v23590_v60, %s14454_s26  ;;  %v9238_v27 = vpop.permute.xlu0 %9237  ;;  %v23595_v60 = vld [vmem:[#allocation20_spill] sm:$0xff] }
 0x31d   : > { %9354 = vst.msk [vmem:[#allocation2 + $0x7c] sm:$0xf] %vm9322_vm3, %v9238_v27  ;;  %v23594_v27 = vld [vmem:[#allocation22_spill] sm:$0xff]  ;;  %v9747_v12 = vrot.slane %v9740_v31, %v14577_v23  ;;  %v9732_v19 = vcombine.low %v20160_v50, %v9731_v61 }
 0x31e   : > { %v9240_v39 = vpop.permute.xlu1 %9239  ;;  %9836 = vrot.lane.b32.xlu0 %v9683_v48, %s14454_s26 }
 0x31f   : > { %9355 = vst.msk [vmem:[#allocation2 + $0x80] sm:$0xf] %vm9322_vm3, %v9240_v39  ;;  %v10051_v39 = vcombine.low %v23595_v60, %v23594_v27  ;;  %v23597_v27 = vld [vmem:[#allocation412_spill] sm:$0xff]  ;;  %v9748_v60 = vcombine.low %v19299_v36, %v9747_v12  ;;  %v9739_v31 = vrot.slane %v9732_v19, %v14577_v23  ;;  %v23600_v12 = vld [vmem:[#allocation13_spill] sm:$0xff]  ;;  %v23602_v19 = vld [vmem:[#allocation11_spill] sm:$0xff] }
 0x320   : > { %9838 = vrot.lane.b32.xlu1 %v9691_v43, %s14454_s26  ;;  %v9242_v29 = vpop.permute.xlu0 %9241  ;;  %v9715_v43 = vrot.slane %v9708_v52, %v14577_v23  ;;  %v23598_v52 = vld [vmem:[#allocation8_spill] sm:$0xff] }
 0x321   : > { %9356 = vst.msk [vmem:[#allocation2 + $0x84] sm:$0xf] %vm9322_vm3, %v9242_v29  ;;  %v10058_v1 = vrot.slane %v10051_v39, %v14577_v23  ;;  %v9755_v36 = vrot.slane %v9748_v60, %v14577_v23 }
 0x322   : > { %v9244_v48 = vpop.permute.xlu1 %9243  ;;  %9840 = vrot.lane.b32.xlu0 %v23596_v53, %s14454_s26  ;;  %v23599_v53 = vld [vmem:[#allocation413_spill] sm:$0xff] }
 0x323   : > { %9357 = vst.msk [vmem:[#allocation2 + $0x88] sm:$0xf] %vm9322_vm3, %v9244_v48  ;;  %v10059_v61 = vcombine.low %v10058_v1, %v23598_v52  ;;  %v23603_v1 = vld [vmem:[#allocation435_spill] sm:$0xff] }
 0x324   : > { %9842 = vrot.lane.b32.xlu1 %v9707_v16, %s14454_s26  ;;  %v9246_v17 = vpop.permute.xlu0 %9245  ;;  %v10083_v16 = vcombine.low %v23522_v58, %v23521_v40 }
 0x325   : > { %9358 = vst.msk [vmem:[#allocation2 + $0x8c] sm:$0xf] %vm9322_vm3, %v9246_v17  ;;  %v23601_v17 = vld [vmem:[#allocation433_spill] sm:$0xff] }
 0x326   : > { %v9248_v29 = vpop.permute.xlu1 %9247  ;;  %9844 = vrot.lane.b32.xlu0 %v23597_v27, %s14454_s26  ;;  %v10067_v40 = vcombine.low %v23601_v17, %v23600_v12  ;;  %v10090_v58 = vrot.slane %v10083_v16, %v14577_v23  ;;  %v23605_v16 = vld [vmem:[#allocation77_spill] sm:$0xff]  ;;  %v23608_v17 = vld [vmem:[#allocation63_spill] sm:$0xff] }
 0x327   : > { %9359 = vst.msk [vmem:[#allocation2 + $0x90] sm:$0xf] %vm9322_vm3, %v9248_v29  ;;  %v10075_v29 = vcombine.low %v23603_v1, %v23602_v19  ;;  %v23607_v12 = vld [vmem:[#allocation29_spill] sm:$0xff] }
 0x328   : > { %9846 = vrot.lane.b32.xlu1 %v9715_v43, %s14454_s26  ;;  %v9250_v39 = vpop.permute.xlu0 %9249  ;;  %v10066_v43 = vrot.slane %v10059_v61, %v14577_v23  ;;  %v10074_v60 = vrot.slane %v10067_v40, %v14577_v23  ;;  %v10099_v19 = vcombine.low %v23608_v17, %v23607_v12  ;;  %v23609_v40 = vld [vmem:[#allocation42_spill] sm:$0xff]  ;;  %v10155_v17 = vcombine.low %v23533_v33, %v23532_v62 }
 0x329   : > { %9360 = vst.msk [vmem:[#allocation2 + $0x94] sm:$0xf] %vm9322_vm3, %v9250_v39  ;;  %v23604_v39 = vld [vmem:[#allocation441_spill] sm:$0xff]  ;;  %v10082_v61 = vrot.slane %v10075_v29, %v14577_v23 }
 0x32a   : > { %v9252_v48 = vpop.permute.xlu1 %9251  ;;  %9848 = vrot.lane.b32.xlu0 %v23599_v53, %s14454_s26  ;;  %v23606_v53 = vld [vmem:[#allocation73_spill] sm:$0xff]  ;;  %v10106_v29 = vrot.slane %v10099_v19, %v14577_v23  ;;  %v10162_v62 = vrot.slane %v10155_v17, %v14577_v23  ;;  %v23619_v17 = vld [vmem:[#allocation136_spill] sm:$0xff] }
 0x32b   : > { %9361 = vst.msk [vmem:[#allocation2 + $0x98] sm:$0xf] %vm9322_vm3, %v9252_v48  ;;  %v10091_v48 = vcombine.low %v10090_v58, %v23604_v39  ;;  %v23610_v58 = vld [vmem:[#allocation438_spill] sm:$0xff] }
 0x32c   : > { %9850 = vrot.lane.b32.xlu1 %v9739_v31, %s14454_s26  ;;  %v9254_v27 = vpop.permute.xlu0 %9253  ;;  %v10123_v31 = vcombine.low %v23606_v53, %v23605_v16  ;;  %v23611_v16 = vld [vmem:[#allocation49_spill] sm:$0xff] }
 0x32d   : > { %9362 = vst.msk [vmem:[#allocation2 + $0x9c] sm:$0xf] %vm9322_vm3, %v9254_v27  ;;  %v23612_v53 = vld [vmem:[#allocation61_spill] sm:$0xff] }
 0x32e   : > { %v9256_v52 = vpop.permute.xlu1 %9255  ;;  %9852 = vrot.lane.b32.xlu0 %v9755_v36, %s14454_s26  ;;  %v10098_v36 = vrot.slane %v10091_v48, %v14577_v23  ;;  %v10115_v12 = vcombine.low %v23612_v53, %v23611_v16 }
 0x32f   : > { %9363 = vst.msk [vmem:[#allocation2 + $0xa0] sm:$0xf] %vm9322_vm3, %v9256_v52  ;;  %v10107_v52 = vcombine.low %v23610_v58, %v23609_v40  ;;  %v23615_v40 = vld [vmem:[#allocation81_spill] sm:$0xff] }
 0x330   : > { %10635 = vrot.lane.b32.xlu1 %v10066_v43, %s14455_s27  ;;  %v9258_v1 = vpop.permute.xlu0 %9257  ;;  %v10130_v43 = vrot.slane %v10123_v31, %v14577_v23  ;;  %v23613_v31 = vld [vmem:[#allocation92_spill] sm:$0xff]  ;;  %v10122_v19 = vrot.slane %v10115_v12, %v14577_v23 }
 0x331   : > { %9364 = vst.msk [vmem:[#allocation2 + $0xa4] sm:$0xf] %vm9322_vm3, %v9258_v1  ;;  %v10114_v48 = vrot.slane %v10107_v52, %v14577_v23  ;;  %v23616_v52 = vld [vmem:[#allocation44_spill] sm:$0xff] }
 0x332   : > { %v9260_v27 = vpop.permute.xlu1 %9259  ;;  %10637 = vrot.lane.b32.xlu0 %v10074_v60, %s14455_s27 }
 0x333   : > { %9365 = vst.msk [vmem:[#allocation2 + $0xa8] sm:$0xf] %vm9322_vm3, %v9260_v27  ;;  %v23614_v27 = vld [vmem:[#allocation97_spill] sm:$0xff] }
 0x334   : > { %10639 = vrot.lane.b32.xlu1 %v10082_v61, %s14455_s27  ;;  %v9262_v1 = vpop.permute.xlu0 %9261  ;;  %v10131_v61 = vcombine.low %v10130_v43, %v23613_v31  ;;  %v10139_v58 = vcombine.low %v23615_v40, %v23614_v27  ;;  %v23617_v43 = vld [vmem:[#allocation96_spill] sm:$0xff] }
 0x335   : > { %9366 = vst.msk [vmem:[#allocation2 + $0xac] sm:$0xf] %vm9322_vm3, %v9262_v1  ;;  %v23618_v1 = vld [vmem:[#allocation78_spill] sm:$0xff]  ;;  %v23620_v31 = vld [vmem:[#allocation132_spill] sm:$0xff] }
 0x336   : > { %v9264_v60 = vpop.permute.xlu1 %9263  ;;  %10641 = vrot.lane.b32.xlu0 %v10098_v36, %s14455_s27  ;;  %v10138_v36 = vrot.slane %v10131_v61, %v14577_v23  ;;  %v10146_v12 = vrot.slane %v10139_v58, %v14577_v23  ;;  %v10195_v27 = vcombine.low %v23620_v31, %v23619_v17  ;;  %v23621_v61 = vld [vmem:[#allocation59_spill] sm:$0xff] }
 0x337   : > { %9367 = vst.msk [vmem:[#allocation2 + $0xb0] sm:$0xf] %vm9322_vm3, %v9264_v60  ;;  %v10163_v60 = vcombine.low %v10162_v62, %v23618_v1  ;;  %v23623_v62 = vld [vmem:[#allocation79_spill] sm:$0xff] }
 0x338   : > { %10643 = vrot.lane.b32.xlu1 %v10106_v29, %s14455_s27  ;;  %v9266_v33 = vpop.permute.xlu0 %9265  ;;  %v10147_v29 = vcombine.low %v23617_v43, %v23616_v52  ;;  %v23624_v52 = vld [vmem:[#allocation115_spill] sm:$0xff]  ;;  %v10202_v17 = vrot.slane %v10195_v27, %v14577_v23 }
 0x339   : > { %9368 = vst.msk [vmem:[#allocation2 + $0xb4] sm:$0xf] %vm9322_vm3, %v9266_v33  ;;  %v10170_v58 = vrot.slane %v10163_v60, %v14577_v23  ;;  %v10179_v43 = vcombine.low %v23624_v52, %v23623_v62  ;;  %v13789_v31 = vld.sshfl [vmem:[%s21516_s0 + $0x78] sm:$0x33 pattern:$0x75316420] }
 0x33a   : > { %v9268_v53 = vpop.permute.xlu1 %9267  ;;  %10645 = vrot.lane.b32.xlu0 %v10114_v48, %s14455_s27  ;;  %v10154_v48 = vrot.slane %v10147_v29, %v14577_v23  ;;  %v23625_v27 = vld [vmem:[#allocation75_spill] sm:$0xff] }
 0x33b   : > { %9369 = vst.msk [vmem:[#allocation2 + $0xb8] sm:$0xf] %vm9322_vm3, %v9268_v53  ;;  %v10186_v62 = vrot.slane %v10179_v43, %v14577_v23  ;;  %v23627_v52 = vld [vmem:[#allocation447_spill] sm:$0xff] }
 0x33c   : > { %10647 = vrot.lane.b32.xlu1 %v10122_v19, %s14455_s27  ;;  %v9270_v40 = vpop.permute.xlu0 %9269  ;;  %v23622_v19 = vld [vmem:[#allocation111_spill] sm:$0xff] }
 0x33d   : > { %9370 = vst.msk [vmem:[#allocation2 + $0xbc] sm:$0xf] %vm9322_vm3, %v9270_v40  ;;  %v10171_v53 = vcombine.low %v23622_v19, %v23621_v61  ;;  %v10227_v40 = vcombine.low %v23545_v5, %v23544_v7  ;;  %v9964_v19 = vcombine.high %v13789_v31, %v13789_v31  ;;  %v10203_v7 = vcombine.low %v10202_v17, %v23627_v52 }
 0x33e   : > { %v9272_v33 = vpop.permute.xlu1 %9271  ;;  %10649 = vrot.lane.b32.xlu0 %v10138_v36, %s14455_s27 }
 0x33f   : > { %9371 = vst.msk [vmem:[#allocation2 + $0xc0] sm:$0xf] %vm9322_vm3, %v9272_v33  ;;  %v10178_v60 = vrot.slane %v10171_v53, %v14577_v23  ;;  %v23626_v33 = vld [vmem:[#allocation143_spill] sm:$0xff]  ;;  %v23628_v53 = vld [vmem:[#allocation101_spill] sm:$0xff]  ;;  %v20277_v43 = vrot.slane %v9964_v19, %v23188_v6  ;;  %v10210_v52 = vrot.slane %v10203_v7, %v14577_v23 }
 0x340   : > { %10651 = vrot.lane.b32.xlu1 %v10146_v12, %s14455_s27  ;;  %v9757_v36 = vpop.permute.xlu0 %9756  ;;  %v13790_v12 = vld.sshfl [vmem:[%s21516_s0 + $0x7c] sm:$0x33 pattern:$0x75316420]  ;;  %v10187_v61 = vcombine.low %v23626_v33, %v23625_v27  ;;  %v23629_v33 = vld [vmem:[#allocation149_spill] sm:$0xff] }
 0x341   : > { %9904 = vst.msk [vmem:[#allocation2] sm:$0xf] %vm9903_vm4, %v9757_v36  ;;  %v9988_v36 = vcombine.high %v13790_v12, %v13790_v12  ;;  %23630 = vst [vmem:[#allocation88_spill] sm:$0xff] %v20277_v43  ;;  %v20280_v17 = vrot.slane %v13790_v12, %v23188_v6 }
 0x342   : > { %v9759_v29 = vpop.permute.xlu1 %9758  ;;  %10653 = vrot.lane.b32.xlu0 %v10154_v48, %s14455_s27  ;;  %v10194_v48 = vrot.slane %v10187_v61, %v14577_v23 }
 0x343   : > { %9905 = vst.msk [vmem:[#allocation2 + $0x4] sm:$0xf] %vm9903_vm4, %v9759_v29  ;;  %v10234_v29 = vrot.slane %v10227_v40, %v14577_v23  ;;  %v23631_v40 = vld [vmem:[#allocation123_spill] sm:$0xff]  ;;  %v20290_v8 = vrot.slane %v9988_v36, %v23188_v6 }
 0x344   : > { %10655 = vrot.lane.b32.xlu1 %v10170_v58, %s14455_s27  ;;  %v9761_v5 = vpop.permute.xlu0 %9760  ;;  %v10211_v58 = vcombine.low %v23629_v33, %v23628_v53  ;;  %v23633_v53 = vld [vmem:[#allocation99_spill] sm:$0xff] }
 0x345   : > { %9906 = vst.msk [vmem:[#allocation2 + $0x8] sm:$0xf] %vm9903_vm4, %v9761_v5  ;;  %v23632_v5 = vld [vmem:[#allocation157_spill] sm:$0xff]  ;;  %v10235_v12 = vcombine.low %v10234_v29, %v23633_v53  ;;  %v23634_v33 = vld [vmem:[#allocation131_spill] sm:$0xff] }
 0x346   : > { %v9763_v50 = vpop.permute.xlu1 %9762  ;;  %10657 = vrot.lane.b32.xlu0 %v10178_v60, %s14455_s27  ;;  %v20287_v60 = vrot.slane %v13789_v31, %v23188_v6  ;;  %v10218_v7 = vrot.slane %v10211_v58, %v14577_v23  ;;  %v10267_v31 = vcombine.low %v18874_v22, %v18904_v13  ;;  %v23766_v53 = vld [vmem:[#allocation203_spill] sm:$0xff] }
 0x347   : > { %9907 = vst.msk [vmem:[#allocation2 + $0xc] sm:$0xf] %vm9903_vm4, %v9763_v50  ;;  %v10219_v50 = vcombine.low %v23632_v5, %v23631_v40  ;;  %v20307_v40 = vcombine.high %v20277_v43, %v20277_v43  ;;  %v11268_v59 = vcombine.low %v23767_v49, %v23766_v53 }
 0x348   : > { %10659 = vrot.lane.b32.xlu1 %v10186_v62, %s14455_s27  ;;  %v9765_v61 = vpop.permute.xlu0 %9764  ;;  %v10243_v62 = vcombine.low %v23635_v2, %v23634_v33  ;;  %v20303_v36 = vcombine.high %v20287_v60, %v20287_v60  ;;  %v20311_v2 = vcombine.high %v20280_v17, %v20280_v17  ;;  %v10284_v22 = vcombine.low %v18912_v4, %v20287_v60  ;;  %v23638_v33 = vld [vmem:[#allocation448_spill] sm:$0xff] }
 0x349   : > { %9908 = vst.msk [vmem:[#allocation2 + $0x10] sm:$0xf] %vm9903_vm4, %v9765_v61  ;;  %23636 = vst [vmem:[#allocation110_spill] sm:$0xff] %v20307_v40  ;;  %v10226_v29 = vrot.slane %v10219_v50, %v14577_v23  ;;  %v10242_v61 = vrot.slane %v10235_v12, %v14577_v23  ;;  %v10251_v35 = vcombine.low %v23639_v15, %v23638_v33  ;;  %v23641_v50 = vld [vmem:[#allocation451_spill] sm:$0xff] }
 0x34a   : > { %v9767_v19 = vpop.permute.xlu1 %9766  ;;  %10661 = vrot.lane.b32.xlu0 %v10194_v48, %s14455_s27  ;;  %v23637_v48 = vld [vmem:[#allocation446_spill] sm:$0xff]  ;;  %v10274_v30 = vrot.slane %v10267_v31, %v14577_v23  ;;  %v10308_v12 = vcombine.low %v20303_v36, %v20280_v17  ;;  %v10298_v15 = vrot.slane %v10284_v22, %v14577_v23  ;;  %v10883_v53 = vshrl.u32 %v20311_v2, 16 }
 0x34b   : > { %9909 = vst.msk [vmem:[#allocation2 + $0x14] sm:$0xf] %vm9903_vm4, %v9767_v19  ;;  %v10283_v58 = vcombine.low %v23637_v48, %v18916_v24  ;;  %v10250_v19 = vrot.slane %v10243_v62, %v14577_v23  ;;  %v23763_v24 = vld [vmem:[#allocation179_spill] sm:$0xff] }
 0x34c   : > { %10663 = vrot.lane.b32.xlu1 %v10210_v52, %s14455_s27  ;;  %v9769_v13 = vpop.permute.xlu0 %9768  ;;  %v23640_v52 = vld [vmem:[#allocation135_spill] sm:$0xff] }
 0x34d   : > { %9910 = vst.msk [vmem:[#allocation2 + $0x18] sm:$0xf] %vm9903_vm4, %v9769_v13  ;;  %v10259_v48 = vcombine.low %v23641_v50, %v23640_v52  ;;  %v10307_v13 = vcombine.low %v20277_v43, %v20307_v40  ;;  %v10291_v62 = vrot.slane %v10283_v58, %v14577_v23  ;;  %v10275_v58 = vcombine.low %v10274_v30, %v23643_v9 }
 0x34e   : > { %v9771_v5 = vpop.permute.xlu1 %9770  ;;  %10665 = vrot.lane.b32.xlu0 %v10218_v7, %s14455_s27  ;;  %v10331_v7 = vcombine.low %v20290_v8, %v23555_v10  ;;  %v20347_v52 = vrot.slane %v10308_v12, %v14577_v23  ;;  %v23647_v12 = vld [vmem:[#allocation256_spill] sm:$0xff] }
 0x34f   : > { %9911 = vst.msk [vmem:[#allocation2 + $0x1c] sm:$0xf] %vm9903_vm4, %v9771_v5  ;;  %v23642_v5 = vld [vmem:[#allocation237_spill] sm:$0xff]  ;;  %v10315_v22 = vrot.slane %v10307_v13, %v14577_v23  ;;  %v10299_v10 = vcombine.low %v10291_v62, %v10298_v15  ;;  %v10282_v30 = vrot.slane %v10275_v58, %v14577_v23  ;;  %v23646_v13 = vld [vmem:[#allocation260_spill] sm:$0xff]  ;;  %v23649_v58 = vld [vmem:[#allocation223_spill] sm:$0xff] }
 0x350   : > { %10667 = vrot.lane.b32.xlu1 %v10226_v29, %s14455_s27  ;;  %v10332_v33 = vcombine.low %v20311_v2, %v23642_v5  ;;  %v9773_v50 = vpop.permute.xlu0 %9772  ;;  %v10258_v29 = vrot.slane %v10251_v35, %v14577_v23  ;;  %23644 = vst [vmem:[#allocation103_spill] sm:$0xff] %v20347_v52  ;;  %v10266_v5 = vrot.slane %v10259_v48, %v14577_v23 }
 0x351   : > { %9912 = vst.msk [vmem:[#allocation2 + $0x20] sm:$0xf] %vm9903_vm4, %v9773_v50  ;;  %v10339_v50 = vrot.slane %v10331_v7, %v14577_v23  ;;  %v10323_v9 = vcombine.low %v10315_v22, %v20347_v52  ;;  %v10379_v62 = vcombine.low %v23647_v12, %v23646_v13  ;;  %v23762_v52 = vld [vmem:[#allocation16_spill] sm:$0xff] }
 0x352   : > { %v9775_v31 = vpop.permute.xlu1 %9774  ;;  %10669 = vrot.lane.b32.xlu0 %v10242_v61, %s14455_s27 }
 0x353   : > { %9913 = vst.msk [vmem:[#allocation2 + $0x24] sm:$0xf] %vm9903_vm4, %v9775_v31  ;;  %v20353_v31 = vrot.slane %v10332_v33, %v14577_v23  ;;  %v10330_v33 = vrot.slane %v10323_v9, %v14577_v23  ;;  %v23652_v9 = vld [vmem:[#allocation210_spill] sm:$0xff] }
 0x354   : > { %10671 = vrot.lane.b32.xlu1 %v10250_v19, %s14455_s27  ;;  %v9777_v61 = vpop.permute.xlu0 %9776  ;;  %v10306_v19 = vrot.slane %v10299_v10, %v14577_v23 }
 0x355   : > { %23645 = vst [vmem:[#allocation113_spill] sm:$0xff] %v20353_v31  ;;  %9914 = vst.msk [vmem:[#allocation2 + $0x28] sm:$0xf] %vm9903_vm4, %v9777_v61  ;;  %v10347_v48 = vcombine.low %v10339_v50, %v20353_v31  ;;  %v23651_v50 = vld [vmem:[#allocation241_spill] sm:$0xff] }
 0x356   : > { %v9779_v35 = vpop.permute.xlu1 %9778  ;;  %10673 = vrot.lane.b32.xlu0 %v10258_v29, %s14455_s27  ;;  %v23648_v29 = vld [vmem:[#allocation178_spill] sm:$0xff] }
 0x357   : > { %9915 = vst.msk [vmem:[#allocation2 + $0x2c] sm:$0xf] %vm9903_vm4, %v9779_v35  ;;  %v10355_v22 = vcombine.low %v23649_v58, %v23648_v29  ;;  %v10354_v10 = vrot.slane %v10347_v48, %v14577_v23  ;;  %v10386_v35 = vrot.slane %v10379_v62, %v14577_v23  ;;  %v10411_v48 = vcombine.low %v23566_v0, %v23565_v32 }
 0x358   : > { %10675 = vrot.lane.b32.xlu1 %v10266_v5, %s14455_s27  ;;  %v9781_v15 = vpop.permute.xlu0 %9780  ;;  %v23650_v5 = vld [vmem:[#allocation158_spill] sm:$0xff] }
 0x359   : > { %9916 = vst.msk [vmem:[#allocation2 + $0x30] sm:$0xf] %vm9903_vm4, %v9781_v15  ;;  %v10363_v61 = vcombine.low %v23651_v50, %v23650_v5  ;;  %v23653_v15 = vld [vmem:[#allocation263_spill] sm:$0xff]  ;;  %v10418_v32 = vrot.slane %v10411_v48, %v14577_v23 }
 0x35a   : > { %v9783_v7 = vpop.permute.xlu1 %9782  ;;  %10677 = vrot.lane.b32.xlu0 %v10282_v30, %s14455_s27  ;;  %v10362_v30 = vrot.slane %v10355_v22, %v14577_v23  ;;  %v23655_v22 = vld [vmem:[#allocation7_spill] sm:$0xff] }
 0x35b   : > { %9917 = vst.msk [vmem:[#allocation2 + $0x34] sm:$0xf] %vm9903_vm4, %v9783_v7  ;;  %v10370_v62 = vrot.slane %v10363_v61, %v14577_v23  ;;  %v23654_v7 = vld [vmem:[#allocation171_spill] sm:$0xff] }
 0x35c   : > { %10679 = vrot.lane.b32.xlu1 %v10306_v19, %s14455_s27  ;;  %v9785_v13 = vpop.permute.xlu0 %9784  ;;  %v10371_v19 = vcombine.low %v23653_v15, %v23652_v9  ;;  %v10387_v29 = vcombine.low %v10386_v35, %v23654_v7  ;;  %v23656_v50 = vld [vmem:[#allocation271_spill] sm:$0xff] }
 0x35d   : > { %9918 = vst.msk [vmem:[#allocation2 + $0x38] sm:$0xf] %vm9903_vm4, %v9785_v13  ;;  %v10395_v13 = vcombine.low %v23656_v50, %v23655_v22  ;;  %v23658_v61 = vld [vmem:[#allocation275_spill] sm:$0xff]  ;;  %v23663_v22 = vld [vmem:[#allocation305_spill] sm:$0xff] }
 0x35e   : > { %v9787_v12 = vpop.permute.xlu1 %9786  ;;  %10681 = vrot.lane.b32.xlu0 %v10330_v33, %s14455_s27  ;;  %v10378_v33 = vrot.slane %v10371_v19, %v14577_v23  ;;  %v10394_v0 = vrot.slane %v10387_v29, %v14577_v23  ;;  %v23659_v19 = vld [vmem:[#allocation217_spill] sm:$0xff]  ;;  %v23660_v48 = vld [vmem:[#allocation331_spill] sm:$0xff] }
 0x35f   : > { %9919 = vst.msk [vmem:[#allocation2 + $0x3c] sm:$0xf] %vm9903_vm4, %v9787_v12  ;;  %v10419_v7 = vcombine.low %v10418_v32, %v23659_v19  ;;  %v23665_v32 = vld [vmem:[#allocation321_spill] sm:$0xff]  ;;  %v23689_v19 = vld [vmem:[#allocation312_spill] sm:$0xff] }
 0x360   : > { %10683 = vrot.lane.b32.xlu1 %v10354_v10, %s14455_s27  ;;  %v9789_v58 = vpop.permute.xlu0 %9788  ;;  %v23657_v10 = vld [vmem:[#allocation174_spill] sm:$0xff] }
 0x361   : > { %9920 = vst.msk [vmem:[#allocation2 + $0x40] sm:$0xf] %vm9903_vm4, %v9789_v58  ;;  %v10403_v35 = vcombine.low %v23658_v61, %v23657_v10  ;;  %v23661_v58 = vld [vmem:[#allocation328_spill] sm:$0xff] }
 0x362   : > { %v9791_v5 = vpop.permute.xlu1 %9790  ;;  %10685 = vrot.lane.b32.xlu0 %v10362_v30, %s14455_s27  ;;  %v10402_v30 = vrot.slane %v10395_v13, %v14577_v23  ;;  %v23664_v13 = vld [vmem:[#allocation234_spill] sm:$0xff] }
 0x363   : > { %9921 = vst.msk [vmem:[#allocation2 + $0x44] sm:$0xf] %vm9903_vm4, %v9791_v5  ;;  %v10410_v29 = vrot.slane %v10403_v35, %v14577_v23  ;;  %v23662_v5 = vld [vmem:[#allocation238_spill] sm:$0xff] }
 0x364   : > { %10687 = vrot.lane.b32.xlu1 %v10370_v62, %s14455_s27  ;;  %v9793_v12 = vpop.permute.xlu0 %9792  ;;  %v10451_v62 = vcombine.low %v23661_v58, %v23660_v48  ;;  %v10427_v50 = vcombine.low %v23663_v22, %v23662_v5  ;;  %v23667_v48 = vld [vmem:[#allocation314_spill] sm:$0xff]  ;;  %v10483_v5 = vcombine.low %v23579_v42, %v23578_v34 }
 0x365   : > { %9922 = vst.msk [vmem:[#allocation2 + $0x48] sm:$0xf] %vm9903_vm4, %v9793_v12  ;;  %v10435_v12 = vcombine.low %v23665_v32, %v23664_v13  ;;  %v13791_v32 = vld.sshfl [vmem:[%s21516_s0 + $0xf8] sm:$0x33 pattern:$0x75316420] }
 0x366   : > { %v9795_v15 = vpop.permute.xlu1 %9794  ;;  %10689 = vrot.lane.b32.xlu0 %v10378_v33, %s14455_s27  ;;  %v10426_v33 = vrot.slane %v10419_v7, %v14577_v23  ;;  %v10434_v35 = vrot.slane %v10427_v50, %v14577_v23  ;;  %v10490_v34 = vrot.slane %v10483_v5, %v14577_v23 }
 0x367   : > { %9923 = vst.msk [vmem:[#allocation2 + $0x4c] sm:$0xf] %vm9903_vm4, %v9795_v15  ;;  %v23666_v15 = vld [vmem:[#allocation195_spill] sm:$0xff]  ;;  %v10442_v7 = vrot.slane %v10435_v12, %v14577_v23  ;;  %v23671_v12 = vld [vmem:[#allocation393_spill] sm:$0xff] }
 0x368   : > { %10691 = vrot.lane.b32.xlu1 %v10394_v0, %s14455_s27  ;;  %v9797_v10 = vpop.permute.xlu0 %9796  ;;  %v10458_v0 = vrot.slane %v10451_v62, %v14577_v23  ;;  %v10443_v58 = vcombine.low %v23667_v48, %v23666_v15  ;;  %v23668_v62 = vld [vmem:[#allocation453_spill] sm:$0xff]  ;;  %v23672_v48 = vld [vmem:[#allocation390_spill] sm:$0xff] }
 0x369   : > { %9924 = vst.msk [vmem:[#allocation2 + $0x50] sm:$0xf] %vm9903_vm4, %v9797_v10  ;;  %v23669_v10 = vld [vmem:[#allocation220_spill] sm:$0xff] }
 0x36a   : > { %v9799_v61 = vpop.permute.xlu1 %9798  ;;  %10693 = vrot.lane.b32.xlu0 %v10402_v30, %s14455_s27  ;;  %v10450_v50 = vrot.slane %v10443_v58, %v14577_v23  ;;  %v23673_v58 = vld [vmem:[#allocation219_spill] sm:$0xff] }
 0x36b   : > { %9925 = vst.msk [vmem:[#allocation2 + $0x54] sm:$0xf] %vm9903_vm4, %v9799_v61  ;;  %v23670_v61 = vld [vmem:[#allocation332_spill] sm:$0xff] }
 0x36c   : > { %10695 = vrot.lane.b32.xlu1 %v10410_v29, %s14455_s27  ;;  %v9801_v22 = vpop.permute.xlu0 %9800  ;;  %v10459_v29 = vcombine.low %v10458_v0, %v23668_v62  ;;  %v10467_v13 = vcombine.low %v23670_v61, %v23669_v10  ;;  %v10523_v0 = vcombine.low %v23672_v48, %v23671_v12  ;;  %v23675_v62 = vld [vmem:[#allocation244_spill] sm:$0xff]  ;;  %v10011_v61 = vcombine.high %v13791_v32, %v13791_v32  ;;  %v23678_v48 = vld [vmem:[#allocation255_spill] sm:$0xff] }
 0x36d   : > { %9926 = vst.msk [vmem:[#allocation2 + $0x58] sm:$0xf] %vm9903_vm4, %v9801_v22  ;;  %v23674_v22 = vld [vmem:[#allocation351_spill] sm:$0xff]  ;;  %v10491_v10 = vcombine.low %v10490_v34, %v23675_v62  ;;  %v20459_v62 = vrot.slane %v13791_v32, %v23188_v6  ;;  %v23682_v32 = vld [vmem:[#allocation278_spill] sm:$0xff] }
 0x36e   : > { %v9803_v30 = vpop.permute.xlu1 %9802  ;;  %10697 = vrot.lane.b32.xlu0 %v10426_v33, %s14455_s27  ;;  %v10475_v5 = vcombine.low %v23674_v22, %v23673_v58  ;;  %v13792_v12 = vld.sshfl [vmem:[%s21516_s0 + $0xfc] sm:$0x33 pattern:$0x75316420]  ;;  %v23679_v58 = vld [vmem:[#allocation370_spill] sm:$0xff] }
 0x36f   : > { %9927 = vst.msk [vmem:[#allocation2 + $0x5c] sm:$0xf] %vm9903_vm4, %v9803_v30  ;;  %v10474_v30 = vrot.slane %v10467_v13, %v14577_v23  ;;  %v23676_v13 = vld [vmem:[#allocation280_spill] sm:$0xff]  ;;  %v10507_v22 = vcombine.low %v23679_v58, %v23678_v48  ;;  %v23681_v48 = vld [vmem:[#allocation458_spill] sm:$0xff] }
 0x370   : > { %10699 = vrot.lane.b32.xlu1 %v10434_v35, %s14455_s27  ;;  %v9805_v42 = vpop.permute.xlu0 %9804  ;;  %v10466_v35 = vrot.slane %v10459_v29, %v14577_v23  ;;  %v10530_v29 = vrot.slane %v10523_v0, %v14577_v23  ;;  %v20464_v0 = vrot.slane %v10011_v61, %v23188_v6  ;;  %v10555_v61 = vcombine.low %v23591_v54, %v19172_v14 }
 0x371   : > { %9928 = vst.msk [vmem:[#allocation2 + $0x60] sm:$0xf] %vm9903_vm4, %v9805_v42 }
 0x372   : > { %v9807_v33 = vpop.permute.xlu1 %9806  ;;  %10701 = vrot.lane.b32.xlu0 %v10442_v7, %s14455_s27  ;;  %v10531_v15 = vcombine.low %v10530_v29, %v23682_v32  ;;  %v10571_v29 = vcombine.low %v19213_v26, %v19206_v56  ;;  %v23683_v56 = vld [vmem:[#allocation257_spill] sm:$0xff] }
 0x373   : > { %9929 = vst.msk [vmem:[#allocation2 + $0x64] sm:$0xf] %vm9903_vm4, %v9807_v33  ;;  %v23677_v33 = vld [vmem:[#allocation366_spill] sm:$0xff]  ;;  %v23684_v26 = vld [vmem:[#allocation461_spill] sm:$0xff] }
 0x374   : > { %10703 = vrot.lane.b32.xlu1 %v10450_v50, %s14455_s27  ;;  %v9809_v42 = vpop.permute.xlu0 %9808  ;;  %v10482_v50 = vrot.slane %v10475_v5, %v14577_v23  ;;  %v10499_v34 = vcombine.low %v23677_v33, %v23676_v13  ;;  %v23680_v33 = vld [vmem:[#allocation253_spill] sm:$0xff] }
 0x375   : > { %9930 = vst.msk [vmem:[#allocation2 + $0x68] sm:$0xf] %vm9903_vm4, %v9809_v42  ;;  %v10498_v42 = vrot.slane %v10491_v10, %v14577_v23  ;;  %v10515_v58 = vcombine.low %v23681_v48, %v23680_v33  ;;  %v10514_v10 = vrot.slane %v10507_v22, %v14577_v23 }
 0x376   : > { %v9811_v7 = vpop.permute.xlu1 %9810  ;;  %10705 = vrot.lane.b32.xlu0 %v10466_v35, %s14455_s27  ;;  %v20467_v35 = vrot.slane %v13792_v12, %v23188_v6 }
 0x377   : > { %9931 = vst.msk [vmem:[#allocation2 + $0x6c] sm:$0xf] %vm9903_vm4, %v9811_v7  ;;  %v10035_v7 = vcombine.high %v13792_v12, %v13792_v12  ;;  %v20481_v12 = vcombine.high %v20459_v62, %v20459_v62  ;;  %v10522_v22 = vrot.slane %v10515_v58, %v14577_v23  ;;  %v23686_v58 = vld [vmem:[#allocation291_spill] sm:$0xff] }
 0x378   : > { %10707 = vrot.lane.b32.xlu1 %v10474_v30, %s14455_s27  ;;  %v9813_v5 = vpop.permute.xlu0 %9812  ;;  %v10506_v30 = vrot.slane %v10499_v34, %v14577_v23  ;;  %v20495_v34 = vcombine.high %v20467_v35, %v20467_v35 }
 0x379   : > { %9932 = vst.msk [vmem:[#allocation2 + $0x70] sm:$0xf] %vm9903_vm4, %v9813_v5  ;;  %v20488_v5 = vcombine.high %v20464_v0, %v20464_v0  ;;  %v10588_v32 = vcombine.low %v20459_v62, %v20481_v12 }
 0x37a   : > { %v9815_v13 = vpop.permute.xlu1 %9814  ;;  %10709 = vrot.lane.b32.xlu0 %v10482_v50, %s14455_s27  ;;  %v20491_v50 = vrot.slane %v10035_v7, %v23188_v6  ;;  %v10539_v6 = vcombine.low %v23684_v26, %v23683_v56  ;;  %v10562_v7 = vrot.slane %v10555_v61, %v14577_v23  ;;  %v10612_v56 = vcombine.low %v20467_v35, %v20495_v34 }
 0x37b   : > { %9933 = vst.msk [vmem:[#allocation2 + $0x74] sm:$0xf] %vm9903_vm4, %v9815_v13  ;;  %v23685_v13 = vld [vmem:[#allocation300_spill] sm:$0xff] }
 0x37c   : > { %10711 = vrot.lane.b32.xlu1 %v10498_v42, %s14455_s27  ;;  %v9817_v14 = vpop.permute.xlu0 %9816  ;;  %v10538_v42 = vrot.slane %v10531_v15, %v14577_v23  ;;  %v10587_v48 = vcombine.low %v23685_v13, %v20464_v0  ;;  %v23688_v13 = vld [vmem:[#allocation303_spill] sm:$0xff] }
 0x37d   : > { %9934 = vst.msk [vmem:[#allocation2 + $0x78] sm:$0xf] %vm9903_vm4, %v9817_v14  ;;  %v23687_v14 = vld [vmem:[#allocation409_spill] sm:$0xff] }
 0x37e   : > { %v9819_v54 = vpop.permute.xlu1 %9818  ;;  %10713 = vrot.lane.b32.xlu0 %v10506_v30, %s14455_s27  ;;  %v10547_v15 = vcombine.low %v23687_v14, %v23686_v58  ;;  %v10611_v30 = vcombine.low %v20488_v5, %v20491_v50  ;;  %v10563_v58 = vcombine.low %v10562_v7, %v23688_v13  ;;  %v10602_v14 = vrot.slane %v10588_v32, %v14577_v23  ;;  %v23692_v32 = vld [vmem:[#allocation34_spill] sm:$0xff] }
 0x37f   : > { %9935 = vst.msk [vmem:[#allocation2 + $0x7c] sm:$0xf] %vm9903_vm4, %v9819_v54  ;;  %v10578_v54 = vrot.slane %v10571_v29, %v14577_v23  ;;  %v10595_v29 = vrot.slane %v10587_v48, %v14577_v23  ;;  %v23691_v48 = vld [vmem:[#allocation23_spill] sm:$0xff] }
 0x380   : > { %10715 = vrot.lane.b32.xlu1 %v10514_v10, %s14455_s27  ;;  %v9821_v61 = vpop.permute.xlu0 %9820  ;;  %v10546_v10 = vrot.slane %v10539_v6, %v14577_v23  ;;  %v10554_v33 = vrot.slane %v10547_v15, %v14577_v23  ;;  %v10570_v7 = vrot.slane %v10563_v58, %v14577_v23 }
 0x381   : > { %9936 = vst.msk [vmem:[#allocation2 + $0x80] sm:$0xf] %vm9903_vm4, %v9821_v61  ;;  %v10579_v9 = vcombine.low %v10578_v54, %v23689_v19  ;;  %v10619_v61 = vrot.slane %v10611_v30, %v14577_v23  ;;  %v23693_v19 = vcombine.low %v23691_v48, %v23692_v32 }
 0x382   : > { %v9823_v26 = vpop.permute.xlu1 %9822  ;;  %10717 = vrot.lane.b32.xlu0 %v10522_v22, %s14455_s27 }
 0x383   : > { %9937 = vst.msk [vmem:[#allocation2 + $0x84] sm:$0xf] %vm9903_vm4, %v9823_v26  ;;  %v20529_v26 = vrot.slane %v10612_v56, %v14577_v23  ;;  %v10955_v15 = vrot.slane %v23693_v19, %v14577_v23  ;;  %v10586_v54 = vrot.slane %v10579_v9, %v14577_v23  ;;  %v23694_v56 = vld [vmem:[#allocation38_spill] sm:$0xff]  ;;  %v23698_v9 = vld [vmem:[#allocation33_spill] sm:$0xff] }
 0x384   : > { %10719 = vrot.lane.b32.xlu1 %v10538_v42, %s14455_s27  ;;  %v9825_v22 = vpop.permute.xlu0 %9824  ;;  %v10603_v42 = vcombine.low %v10595_v29, %v10602_v14 }
 0x385   : > { %23690 = vst [vmem:[#allocation105_spill] sm:$0xff] %v20529_v26  ;;  %9938 = vst.msk [vmem:[#allocation2 + $0x88] sm:$0xf] %vm9903_vm4, %v9825_v22  ;;  %v10627_v30 = vcombine.low %v10619_v61, %v20529_v26  ;;  %v23695_v22 = vld [vmem:[#allocation31_spill] sm:$0xff]  ;;  %v23699_v61 = vld [vmem:[#allocation52_spill] sm:$0xff] }
 0x386   : > { %v9827_v6 = vpop.permute.xlu1 %9826  ;;  %10721 = vrot.lane.b32.xlu0 %v10546_v10, %s14455_s27  ;;  %v10610_v29 = vrot.slane %v10603_v42, %v14577_v23  ;;  %v23700_v48 = vcombine.low %v23698_v9, %v23699_v61 }
 0x387   : > { %9939 = vst.msk [vmem:[#allocation2 + $0x8c] sm:$0xf] %vm9903_vm4, %v9827_v6  ;;  %v23696_v6 = vcombine.low %v23694_v56, %v23695_v22  ;;  %v10634_v19 = vrot.slane %v10627_v30, %v14577_v23  ;;  %v23701_v56 = vld [vmem:[#allocation378_spill] sm:$0xff] }
 0x388   : > { %10723 = vrot.lane.b32.xlu1 %v10554_v33, %s14455_s27  ;;  %v9829_v10 = vpop.permute.xlu0 %9828  ;;  %v23697_v33 = vld [vmem:[#allocation334_spill] sm:$0xff]  ;;  %v10987_v32 = vrot.slane %v23700_v48, %v14577_v23 }
 0x389   : > { %v10971_v13 = vrot.slane %v23696_v6, %v14577_v23  ;;  %9940 = vst.msk [vmem:[#allocation2 + $0x90] sm:$0xf] %vm9903_vm4, %v9829_v10  ;;  %v10956_v14 = vcombine.low %v10955_v15, %v23697_v33  ;;  %v23702_v6 = vld [vmem:[#allocation55_spill] sm:$0xff]  ;;  %v23706_v30 = vld [vmem:[#allocation50_spill] sm:$0xff] }
 0x38a   : > { %v9831_v58 = vpop.permute.xlu1 %9830  ;;  %10725 = vrot.lane.b32.xlu0 %v10570_v7, %s14455_s27  ;;  %v23703_v10 = vld [vmem:[#allocation47_spill] sm:$0xff] }
 0x38b   : > { %9941 = vst.msk [vmem:[#allocation2 + $0x94] sm:$0xf] %vm9903_vm4, %v9831_v58  ;;  %v10972_v22 = vcombine.low %v10971_v13, %v23701_v56  ;;  %v23704_v58 = vcombine.low %v23702_v6, %v23703_v10  ;;  %v10963_v15 = vrot.slane %v10956_v14, %v14577_v23  ;;  %v23707_v13 = vld [vmem:[#allocation68_spill] sm:$0xff]  ;;  %v23709_v56 = vld [vmem:[#allocation329_spill] sm:$0xff]  ;;  %v23710_v6 = vld [vmem:[#allocation71_spill] sm:$0xff] }
 0x38c   : > { %10727 = vrot.lane.b32.xlu1 %v10586_v54, %s14455_s27  ;;  %v9833_v26 = vpop.permute.xlu0 %9832  ;;  %v23705_v54 = vld [vmem:[#allocation333_spill] sm:$0xff]  ;;  %v23708_v9 = vcombine.low %v23706_v30, %v23707_v13  ;;  %v23711_v10 = vld [vmem:[#allocation64_spill] sm:$0xff] }
 0x38d   : > { %v11003_v7 = vrot.slane %v23704_v58, %v14577_v23  ;;  %9942 = vst.msk [vmem:[#allocation2 + $0x98] sm:$0xf] %vm9903_vm4, %v9833_v26  ;;  %v10988_v33 = vcombine.low %v10987_v32, %v23705_v54  ;;  %v10979_v48 = vrot.slane %v10972_v22, %v14577_v23  ;;  %v23712_v58 = vcombine.low %v23710_v6, %v23711_v10  ;;  %v23715_v54 = vld [vmem:[#allocation87_spill] sm:$0xff]  ;;  %v23718_v10 = vld [vmem:[#allocation90_spill] sm:$0xff] }
 0x38e   : > { %v9835_v42 = vpop.permute.xlu1 %9834  ;;  %10729 = vrot.lane.b32.xlu0 %v10610_v29, %s14455_s27  ;;  %v11019_v61 = vrot.slane %v23708_v9, %v14577_v23 }
 0x38f   : > { %9943 = vst.msk [vmem:[#allocation2 + $0x9c] sm:$0xf] %vm9903_vm4, %v9835_v42  ;;  %v11004_v26 = vcombine.low %v11003_v7, %v23709_v56  ;;  %v11035_v29 = vrot.slane %v23712_v58, %v14577_v23  ;;  %v10995_v32 = vrot.slane %v10988_v33, %v14577_v23  ;;  %v23714_v7 = vld [vmem:[#allocation66_spill] sm:$0xff]  ;;  %v23717_v56 = vld [vmem:[#allocation375_spill] sm:$0xff] }
 0x390   : > { %10731 = vrot.lane.b32.xlu1 %v10634_v19, %s14455_s27  ;;  %v9837_v42 = vpop.permute.xlu0 %9836  ;;  %v23713_v19 = vld [vmem:[#allocation348_spill] sm:$0xff]  ;;  %v23716_v30 = vcombine.low %v23714_v7, %v23715_v54  ;;  %v23719_v58 = vld [vmem:[#allocation83_spill] sm:$0xff] }
 0x391   : > { %9944 = vst.msk [vmem:[#allocation2 + $0xa0] sm:$0xf] %vm9903_vm4, %v9837_v42  ;;  %v11020_v22 = vcombine.low %v11019_v61, %v23713_v19  ;;  %v11011_v9 = vrot.slane %v11004_v26, %v14577_v23  ;;  %v11036_v6 = vcombine.low %v11035_v29, %v23717_v56  ;;  %v23720_v42 = vcombine.low %v23718_v10, %v23719_v58  ;;  %v23722_v26 = vld [vmem:[#allocation85_spill] sm:$0xff]  ;;  %v23723_v29 = vld [vmem:[#allocation106_spill] sm:$0xff]  ;;  %v23725_v56 = vld [vmem:[#allocation380_spill] sm:$0xff] }
 0x392   : > { %v9839_v14 = vpop.permute.xlu1 %9838  ;;  %11772 = vrot.lane.b32.xlu0 %v10963_v15, %s14456_s11  ;;  %v11051_v13 = vrot.slane %v23716_v30, %v14577_v23  ;;  %v23724_v7 = vcombine.low %v23722_v26, %v23723_v29  ;;  %v23726_v58 = vld [vmem:[#allocation109_spill] sm:$0xff] }
 0x393   : > { %9945 = vst.msk [vmem:[#allocation2 + $0xa4] sm:$0xf] %vm9903_vm4, %v9839_v14  ;;  %v11067_v15 = vrot.slane %v23720_v42, %v14577_v23  ;;  %v11027_v61 = vrot.slane %v11020_v22, %v14577_v23  ;;  %v11043_v30 = vrot.slane %v11036_v6, %v14577_v23  ;;  %v23727_v42 = vld [vmem:[#allocation102_spill] sm:$0xff]  ;;  %v23730_v6 = vld [vmem:[#allocation104_spill] sm:$0xff] }
 0x394   : > { %11774 = vrot.lane.b32.xlu1 %v10979_v48, %s14456_s11  ;;  %v9841_v14 = vpop.permute.xlu0 %9840  ;;  %v23721_v48 = vld [vmem:[#allocation353_spill] sm:$0xff]  ;;  %v11083_v54 = vrot.slane %v23724_v7, %v14577_v23 }
 0x395   : > { %9946 = vst.msk [vmem:[#allocation2 + $0xa8] sm:$0xf] %vm9903_vm4, %v9841_v14  ;;  %v11052_v19 = vcombine.low %v11051_v13, %v23721_v48  ;;  %v11068_v10 = vcombine.low %v11067_v15, %v23725_v56  ;;  %v23728_v14 = vcombine.low %v23726_v58, %v23727_v42  ;;  %v23731_v15 = vld [vmem:[#allocation129_spill] sm:$0xff]  ;;  %v23733_v56 = vld [vmem:[#allocation395_spill] sm:$0xff] }
 0x396   : > { %v9843_v33 = vpop.permute.xlu1 %9842  ;;  %11776 = vrot.lane.b32.xlu0 %v10995_v32, %s14456_s11  ;;  %v23732_v26 = vcombine.low %v23730_v6, %v23731_v15  ;;  %v23734_v42 = vld [vmem:[#allocation133_spill] sm:$0xff]  ;;  %v23741_v15 = vld [vmem:[#allocation139_spill] sm:$0xff] }
 0x397   : > { %9947 = vst.msk [vmem:[#allocation2 + $0xac] sm:$0xf] %vm9903_vm4, %v9843_v33  ;;  %v11099_v32 = vrot.slane %v23728_v14, %v14577_v23  ;;  %v11059_v13 = vrot.slane %v11052_v19, %v14577_v23  ;;  %v11075_v7 = vrot.slane %v11068_v10, %v14577_v23  ;;  %v23735_v14 = vld [vmem:[#allocation118_spill] sm:$0xff]  ;;  %v23737_v19 = vld [vmem:[#allocation121_spill] sm:$0xff] }
 0x398   : > { %11778 = vrot.lane.b32.xlu1 %v11011_v9, %s14456_s11  ;;  %v9845_v33 = vpop.permute.xlu0 %9844  ;;  %v23729_v9 = vld [vmem:[#allocation15_spill] sm:$0xff]  ;;  %v11115_v29 = vrot.slane %v23732_v26, %v14577_v23 }
 0x399   : > { %9948 = vst.msk [vmem:[#allocation2 + $0xb0] sm:$0xf] %vm9903_vm4, %v9845_v33  ;;  %v11084_v48 = vcombine.low %v11083_v54, %v23729_v9  ;;  %v11100_v58 = vcombine.low %v11099_v32, %v23733_v56  ;;  %v23736_v33 = vcombine.low %v23734_v42, %v23735_v14  ;;  %v23738_v54 = vld [vmem:[#allocation146_spill] sm:$0xff]  ;;  %v23743_v56 = vld [vmem:[#allocation388_spill] sm:$0xff] }
 0x39a   : > { %v9847_v22 = vpop.permute.xlu1 %9846  ;;  %11780 = vrot.lane.b32.xlu0 %v11027_v61, %s14456_s11  ;;  %v23739_v9 = vcombine.low %v23737_v19, %v23738_v54  ;;  %v11116_v42 = vcombine.low %v11115_v29, %v23743_v56  ;;  %v23745_v54 = vld [vmem:[#allocation411_spill] sm:$0xff] }
 0x39b   : > { %9949 = vst.msk [vmem:[#allocation2 + $0xb4] sm:$0xf] %vm9903_vm4, %v9847_v22  ;;  %v11131_v61 = vrot.slane %v23736_v33, %v14577_v23  ;;  %v11091_v32 = vrot.slane %v11084_v48, %v14577_v23  ;;  %v11107_v14 = vrot.slane %v11100_v58, %v14577_v23  ;;  %v23744_v33 = vld [vmem:[#allocation385_spill] sm:$0xff]  ;;  %v23750_v58 = vld [vmem:[#allocation167_spill] sm:$0xff] }
 0x39c   : > { %11782 = vrot.lane.b32.xlu1 %v11043_v30, %s14456_s11  ;;  %v9849_v22 = vpop.permute.xlu0 %9848  ;;  %v11147_v31 = vrot.slane %v23739_v9, %v14577_v23  ;;  %v23740_v30 = vld [vmem:[#allocation148_spill] sm:$0xff]  ;;  %v23748_v48 = vld [vmem:[#allocation161_spill] sm:$0xff] }
 0x39d   : > { %9950 = vst.msk [vmem:[#allocation2 + $0xb8] sm:$0xf] %vm9903_vm4, %v9849_v22  ;;  %v23742_v10 = vcombine.low %v23740_v30, %v23741_v15  ;;  %v11132_v22 = vcombine.low %v11131_v61, %v23744_v33  ;;  %v23751_v61 = vld [vmem:[#allocation160_spill] sm:$0xff]  ;;  %v10875_v33 = vshrl.u32 %v20290_v8, 16 }
 0x39e   : > { %v9851_v6 = vpop.permute.xlu1 %9850  ;;  %11784 = vrot.lane.b32.xlu0 %v11059_v13, %s14456_s11  ;;  %v11148_v9 = vcombine.low %v11147_v31, %v23745_v54  ;;  %v23747_v13 = vld [vmem:[#allocation142_spill] sm:$0xff]  ;;  %v23752_v31 = vcombine.low %v23750_v58, %v23751_v61 }
 0x39f   : > { %v11163_v26 = vrot.slane %v23742_v10, %v14577_v23  ;;  %9951 = vst.msk [vmem:[#allocation2 + $0xbc] sm:$0xf] %vm9903_vm4, %v9851_v6  ;;  %v23746_v6 = vld [vmem:[#allocation392_spill] sm:$0xff]  ;;  %v23749_v10 = vcombine.low %v23747_v13, %v23748_v48  ;;  %v23754_v13 = vld [vmem:[#allocation163_spill] sm:$0xff] }
 0x3a0   : > { %11786 = vrot.lane.b32.xlu1 %v11075_v7, %s14456_s11  ;;  %v9853_v19 = vpop.permute.xlu0 %9852  ;;  %v11123_v7 = vrot.slane %v11116_v42, %v14577_v23  ;;  %v11195_v56 = vrot.slane %v23752_v31, %v14577_v23  ;;  %v11155_v54 = vrot.slane %v11148_v9, %v14577_v23  ;;  %v23753_v42 = vld [vmem:[#allocation231_spill] sm:$0xff]  ;;  %v23760_v9 = vld [vmem:[#allocation232_spill] sm:$0xff] }
 0x3a1   : > { %9952 = vst.msk [vmem:[#allocation2 + $0xc0] sm:$0xf] %vm9903_vm4, %v9853_v19  ;;  %v11164_v15 = vcombine.low %v11163_v26, %v23746_v6  ;;  %v11179_v29 = vrot.slane %v23749_v10, %v14577_v23  ;;  %v11139_v26 = vrot.slane %v11132_v22, %v14577_v23  ;;  %v23755_v48 = vld [vmem:[#allocation187_spill] sm:$0xff]  ;;  %v23758_v22 = vld [vmem:[#allocation176_spill] sm:$0xff] }
 0x3a2   : > { %v10636_v30 = vpop.permute.xlu1 %10635  ;;  %11788 = vrot.lane.b32.xlu0 %v11091_v32, %s14456_s11  ;;  %v23756_v10 = vcombine.low %v23754_v13, %v23755_v48  ;;  %v10848_v13 = vshll.u32 %v20303_v36, 16  ;;  %v10851_v48 = vshrl.u32 %v20303_v36, 16  ;;  %v23761_v36 = vld [vmem:[#allocation423_spill] sm:$0xff] }
 0x3a3   : > { %10783 = vst.msk [vmem:[#allocation2] sm:$0xf] %vm10782_vm5, %v10636_v30  ;;  %v11171_v32 = vrot.slane %v11164_v15, %v14577_v23  ;;  %v11180_v6 = vcombine.low %v11179_v29, %v23753_v42  ;;  %v10835_v15 = vshrl.u32 %v20287_v60, 16  ;;  %v10840_v29 = vshll.u32 %v20277_v43, 16 }
 0x3a4   : > { %11790 = vrot.lane.b32.xlu1 %v11107_v14, %s14456_s11  ;;  %v10638_v19 = vpop.permute.xlu0 %10637  ;;  %v11211_v58 = vrot.slane %v23756_v10, %v14577_v23  ;;  %v23757_v14 = vld [vmem:[#allocation189_spill] sm:$0xff]  ;;  %v10843_v42 = vshrl.u32 %v20277_v43, 16  ;;  %v10856_v10 = vshll.u32 %v20307_v40, 16  ;;  %v10864_v60 = vshll.u32 %v20280_v17, 16 }
 0x3a5   : > { %10784 = vst.msk [vmem:[#allocation2 + $0x4] sm:$0xf] %vm10782_vm5, %v10638_v19  ;;  %v23759_v61 = vcombine.low %v23757_v14, %v23758_v22  ;;  %v11196_v19 = vcombine.low %v11195_v56, %v23760_v9  ;;  %v10859_v56 = vshrl.u32 %v20307_v40, 16  ;;  %v10867_v14 = vshrl.u32 %v20280_v17, 16  ;;  %v23764_v43 = vld [vmem:[#allocation205_spill] sm:$0xff] }
 0x3a6   : > { %v10640_v30 = vpop.permute.xlu1 %10639  ;;  %11792 = vrot.lane.b32.xlu0 %v11123_v7, %s14456_s11  ;;  %v10872_v22 = vshll.u32 %v20290_v8, 16  ;;  %v11212_v9 = vcombine.low %v11211_v58, %v23761_v36  ;;  %v23765_v4 = vcombine.low %v23763_v24, %v23764_v43  ;;  %v11187_v17 = vrot.slane %v11180_v6, %v14577_v23  ;;  %v23768_v58 = vld [vmem:[#allocation207_spill] sm:$0xff]  ;;  %v23769_v36 = vld [vmem:[#allocation197_spill] sm:$0xff]  ;;  %v23771_v24 = vld [vmem:[#allocation24_spill] sm:$0xff] }
 0x3a7   : > { %v11227_v31 = vrot.slane %v23759_v61, %v14577_v23  ;;  %10785 = vst.msk [vmem:[#allocation2 + $0x8] sm:$0xf] %vm10782_vm5, %v10640_v30  ;;  %v10832_v30 = vcombine.high %v20290_v8, %v20290_v8  ;;  %v10842_v49 = vsel %vm14628_vm14, %v10835_v15, %v10840_v29  ;;  %v10850_v6 = vsel %vm14628_vm14, %v10843_v42, %v10848_v13  ;;  %v23773_v42 = vld [vmem:[#allocation17_spill] sm:$0xff] }
 0x3a8   : > { %11794 = vrot.lane.b32.xlu1 %v11139_v26, %s14456_s11  ;;  %v10642_v7 = vpop.permute.xlu0 %10641  ;;  %v10880_v26 = vshll.u32 %v20311_v2, 16  ;;  %v11243_v40 = vrot.slane %v23765_v4, %v14577_v23  ;;  %v23772_v4 = vld [vmem:[#allocation426_spill] sm:$0xff]  ;;  %v11219_v15 = vrot.slane %v11212_v9, %v14577_v23 }
 0x3a9   : > { %10786 = vst.msk [vmem:[#allocation2 + $0xc] sm:$0xf] %vm10782_vm5, %v10642_v7  ;;  %v11228_v18 = vcombine.low %v11227_v31, %v23762_v52  ;;  %v11203_v7 = vrot.slane %v11196_v19, %v14577_v23  ;;  %v23770_v52 = vcombine.low %v23768_v58, %v23769_v36  ;;  %v11284_v43 = vcombine.low %v23772_v4, %v23771_v24 }
 0x3aa   : > { %v10644_v61 = vpop.permute.xlu1 %10643  ;;  %11796 = vrot.lane.b32.xlu0 %v11155_v54, %s14456_s11  ;;  %v10888_v54 = vshll.u32 %v10832_v30, 16  ;;  %v10858_v19 = vsel %vm14628_vm14, %v10851_v48, %v10856_v10  ;;  %v10866_v58 = vsel %vm14628_vm14, %v10859_v56, %v10864_v60  ;;  %v10882_v36 = vsel %vm14628_vm14, %v10875_v33, %v10880_v26  ;;  %v23774_v48 = vld [vmem:[#allocation25_spill] sm:$0xff]  ;;  %v23775_v56 = vld [vmem:[#allocation222_spill] sm:$0xff]  ;;  %v23776_v60 = vld [vmem:[#allocation36_spill] sm:$0xff] }
 0x3ab   : > { %10787 = vst.msk [vmem:[#allocation2 + $0x10] sm:$0xf] %vm10782_vm5, %v10644_v61  ;;  %v11259_v31 = vrot.slane %v23770_v52, %v14577_v23  ;;  %v11235_v29 = vrot.slane %v11228_v18, %v14577_v23  ;;  %v11244_v13 = vcombine.low %v11243_v40, %v23773_v42  ;;  %v11275_v30 = vrot.slane %v11268_v59, %v14577_v23 }
 0x3ac   : > { %11798 = vrot.lane.b32.xlu1 %v11171_v32, %s14456_s11  ;;  %v10646_v61 = vpop.permute.xlu0 %10645  ;;  %v10874_v32 = vsel %vm14628_vm14, %v10867_v14, %v10872_v22  ;;  %v11300_v33 = vcombine.low %v23776_v60, %v23775_v56  ;;  %v23777_v14 = vld [vmem:[#allocation228_spill] sm:$0xff]  ;;  %v11291_v26 = vrot.slane %v11284_v43, %v14577_v23  ;;  %v11324_v18 = vcombine.low %v10850_v6, %v10866_v58  ;;  %v23783_v56 = vld [vmem:[#allocation242_spill] sm:$0xff] }
 0x3ad   : > { %10788 = vst.msk [vmem:[#allocation2 + $0x14] sm:$0xf] %vm10782_vm5, %v10646_v61  ;;  %v11260_v10 = vcombine.low %v11259_v31, %v23774_v48  ;;  %v11301_v22 = vcombine.low %v23777_v14, %v10842_v49  ;;  %v11325_v9 = vcombine.low %v10858_v19, %v10874_v32  ;;  %v10890_v40 = vsel %vm14628_vm14, %v10883_v53, %v10888_v54  ;;  %v23780_v61 = vld [vmem:[#allocation247_spill] sm:$0xff]  ;;  %v23781_v6 = vld [vmem:[#allocation32_spill] sm:$0xff] }
 0x3ae   : > { %v10648_v2 = vpop.permute.xlu1 %10647  ;;  %11800 = vrot.lane.b32.xlu0 %v11187_v17, %s14456_s11  ;;  %v23778_v17 = vld [vmem:[#allocation248_spill] sm:$0xff]  ;;  %v11251_v31 = vrot.slane %v11244_v13, %v14577_v23  ;;  %v11308_v43 = vrot.slane %v11300_v33, %v14577_v23  ;;  %v11349_v53 = vcombine.low %v10890_v40, %v23780_v61  ;;  %v11292_v19 = vcombine.low %v11291_v26, %v23781_v6  ;;  %v23786_v40 = vld [vmem:[#allocation266_spill] sm:$0xff] }
 0x3af   : > { %10789 = vst.msk [vmem:[#allocation2 + $0x18] sm:$0xf] %vm10782_vm5, %v10648_v2  ;;  %v11348_v24 = vcombine.low %v10882_v36, %v23778_v17  ;;  %v11315_v49 = vrot.slane %v11301_v22, %v14577_v23  ;;  %v11267_v54 = vrot.slane %v11260_v10, %v14577_v23  ;;  %v11332_v58 = vrot.slane %v11324_v18, %v14577_v23  ;;  %v23792_v6 = vld [vmem:[#allocation18_spill] sm:$0xff] }
 0x3b0   : > { %11802 = vrot.lane.b32.xlu1 %v11203_v7, %s14456_s11  ;;  %v10650_v52 = vpop.permute.xlu0 %10649  ;;  %v23779_v7 = vld [vmem:[#allocation39_spill] sm:$0xff]  ;;  %v11339_v32 = vrot.slane %v11325_v9, %v14577_v23  ;;  %v11363_v13 = vrot.slane %v11349_v53, %v14577_v23  ;;  %v11299_v48 = vrot.slane %v11292_v19, %v14577_v23  ;;  %v23785_v9 = vld [vmem:[#allocation245_spill] sm:$0xff] }
 0x3b1   : > { %10790 = vst.msk [vmem:[#allocation2 + $0x1c] sm:$0xf] %vm10782_vm5, %v10650_v52  ;;  %v11276_v4 = vcombine.low %v11275_v30, %v23779_v7  ;;  %v11316_v42 = vcombine.low %v11308_v43, %v11315_v49  ;;  %v23782_v30 = vld [vmem:[#allocation250_spill] sm:$0xff]  ;;  %v23787_v52 = vcombine.low %v23785_v9, %v23786_v40  ;;  %v23789_v7 = vld [vmem:[#allocation269_spill] sm:$0xff] }
 0x3b2   : > { %v10652_v59 = vpop.permute.xlu1 %10651  ;;  %11804 = vrot.lane.b32.xlu0 %v11219_v15, %s14456_s11  ;;  %v11340_v10 = vcombine.low %v11332_v58, %v11339_v32  ;;  %v23784_v60 = vcombine.low %v23782_v30, %v23783_v56  ;;  %v23793_v58 = vld [vmem:[#allocation264_spill] sm:$0xff] }
 0x3b3   : > { %10791 = vst.msk [vmem:[#allocation2 + $0x20] sm:$0xf] %vm10782_vm5, %v10652_v59  ;;  %v11283_v15 = vrot.slane %v11276_v4, %v14577_v23  ;;  %v11323_v26 = vrot.slane %v11316_v42, %v14577_v23  ;;  %v11395_v17 = vrot.slane %v23787_v52, %v14577_v23  ;;  %v23788_v59 = vld [vmem:[#allocation19_spill] sm:$0xff]  ;;  %v23790_v4 = vld [vmem:[#allocation261_spill] sm:$0xff]  ;;  %v23794_v32 = vld [vmem:[#allocation284_spill] sm:$0xff] }
 0x3b4   : > { %11806 = vrot.lane.b32.xlu1 %v11235_v29, %s14456_s11  ;;  %v10654_v36 = vpop.permute.xlu0 %10653  ;;  %v11356_v29 = vrot.slane %v11348_v24, %v14577_v23  ;;  %v11379_v33 = vrot.slane %v23784_v60, %v14577_v23  ;;  %v11347_v24 = vrot.slane %v11340_v10, %v14577_v23  ;;  %v23791_v43 = vcombine.low %v23789_v7, %v23790_v4  ;;  %v23796_v42 = vld [vmem:[#allocation41_spill] sm:$0xff] }
 0x3b5   : > { %10792 = vst.msk [vmem:[#allocation2 + $0x24] sm:$0xf] %vm10782_vm5, %v10654_v36  ;;  %v11396_v19 = vcombine.low %v11395_v17, %v23792_v6  ;;  %v23795_v36 = vcombine.low %v23793_v58, %v23794_v32  ;;  %v23804_v17 = vld [vmem:[#allocation54_spill] sm:$0xff]  ;;  %v23809_v6 = vld [vmem:[#allocation299_spill] sm:$0xff] }
 0x3b6   : > { %v10656_v2 = vpop.permute.xlu1 %10655  ;;  %11808 = vrot.lane.b32.xlu0 %v11251_v31, %s14456_s11  ;;  %v11364_v18 = vcombine.low %v11356_v29, %v11363_v13  ;;  %v11380_v31 = vcombine.low %v11379_v33, %v23788_v59  ;;  %v11411_v49 = vrot.slane %v23791_v43, %v14577_v23  ;;  %v23797_v13 = vld [vmem:[#allocation288_spill] sm:$0xff] }
 0x3b7   : > { %10793 = vst.msk [vmem:[#allocation2 + $0x28] sm:$0xf] %vm10782_vm5, %v10656_v2  ;;  %v11427_v2 = vrot.slane %v23795_v36, %v14577_v23  ;;  %v11403_v33 = vrot.slane %v11396_v19, %v14577_v23  ;;  %v23805_v59 = vld [vmem:[#allocation308_spill] sm:$0xff]  ;;  %v23812_v36 = vld [vmem:[#allocation326_spill] sm:$0xff] }
 0x3b8   : > { %11810 = vrot.lane.b32.xlu1 %v11267_v54, %s14456_s11  ;;  %v10658_v14 = vpop.permute.xlu0 %10657  ;;  %v11371_v54 = vrot.slane %v11364_v18, %v14577_v23  ;;  %v11412_v29 = vcombine.low %v11411_v49, %v23796_v42  ;;  %v23802_v18 = vld [vmem:[#allocation306_spill] sm:$0xff]  ;;  %v23810_v19 = vld [vmem:[#allocation324_spill] sm:$0xff] }
 0x3b9   : > { %10794 = vst.msk [vmem:[#allocation2 + $0x2c] sm:$0xf] %vm10782_vm5, %v10658_v14  ;;  %v23800_v14 = vld [vmem:[#allocation35_spill] sm:$0xff]  ;;  %v23811_v58 = vcombine.low %v23809_v6, %v23810_v19  ;;  %v23826_v6 = vld [vmem:[#allocation361_spill] sm:$0xff] }
 0x3ba   : > { %v10660_v22 = vpop.permute.xlu1 %10659  ;;  %11812 = vrot.lane.b32.xlu0 %v11283_v15, %s14456_s11  ;;  %v11387_v15 = vrot.slane %v11380_v31, %v14577_v23  ;;  %v11419_v52 = vrot.slane %v11412_v29, %v14577_v23  ;;  %v23806_v31 = vld [vmem:[#allocation297_spill] sm:$0xff] }
 0x3bb   : > { %10795 = vst.msk [vmem:[#allocation2 + $0x30] sm:$0xf] %vm10782_vm5, %v10660_v22  ;;  %v11428_v22 = vcombine.low %v11427_v2, %v23800_v14  ;;  %v23807_v7 = vcombine.low %v23805_v59, %v23806_v31  ;;  %v11491_v32 = vrot.slane %v23811_v58, %v14577_v23  ;;  %v23813_v2 = vld [vmem:[#allocation317_spill] sm:$0xff]  ;;  %v23817_v14 = vld [vmem:[#allocation58_spill] sm:$0xff] }
 0x3bc   : > { %11814 = vrot.lane.b32.xlu1 %v11299_v48, %s14456_s11  ;;  %v10662_v61 = vpop.permute.xlu0 %10661  ;;  %v23798_v48 = vld [vmem:[#allocation281_spill] sm:$0xff] }
 0x3bd   : > { %10796 = vst.msk [vmem:[#allocation2 + $0x34] sm:$0xf] %vm10782_vm5, %v10662_v61  ;;  %v23799_v10 = vcombine.low %v23797_v13, %v23798_v48  ;;  %v11475_v4 = vrot.slane %v23807_v7, %v14577_v23  ;;  %v11435_v61 = vrot.slane %v11428_v22, %v14577_v23  ;;  %v23815_v13 = vld [vmem:[#allocation56_spill] sm:$0xff] }
 0x3be   : > { %v10664_v53 = vpop.permute.xlu1 %10663  ;;  %11816 = vrot.lane.b32.xlu0 %v11323_v26, %s14456_s11  ;;  %v23801_v26 = vld [vmem:[#allocation283_spill] sm:$0xff] }
 0x3bf   : > { %10797 = vst.msk [vmem:[#allocation2 + $0x38] sm:$0xf] %vm10782_vm5, %v10664_v53  ;;  %v11443_v30 = vrot.slane %v23799_v10, %v14577_v23  ;;  %v23803_v9 = vcombine.low %v23801_v26, %v23802_v18  ;;  %v23808_v53 = vld [vmem:[#allocation37_spill] sm:$0xff]  ;;  %v11476_v48 = vcombine.low %v11475_v4, %v23815_v13  ;;  %v23818_v26 = vld [vmem:[#allocation320_spill] sm:$0xff]  ;;  %v23819_v18 = vld [vmem:[#allocation342_spill] sm:$0xff] }
 0x3c0   : > { %11818 = vrot.lane.b32.xlu1 %v11347_v24, %s14456_s11  ;;  %v10666_v56 = vpop.permute.xlu0 %10665  ;;  %v23832_v13 = vld [vmem:[#allocation359_spill] sm:$0xff] }
 0x3c1   : > { %10798 = vst.msk [vmem:[#allocation2 + $0x3c] sm:$0xf] %vm10782_vm5, %v10666_v56  ;;  %v11459_v40 = vrot.slane %v23803_v9, %v14577_v23  ;;  %v11444_v24 = vcombine.low %v11443_v30, %v23804_v17  ;;  %v23820_v9 = vcombine.low %v23818_v26, %v23819_v18  ;;  %v23821_v17 = vld [vmem:[#allocation345_spill] sm:$0xff] }
 0x3c2   : > { %v10668_v60 = vpop.permute.xlu1 %10667  ;;  %11820 = vrot.lane.b32.xlu0 %v11371_v54, %s14456_s11 }
 0x3c3   : > { %10799 = vst.msk [vmem:[#allocation2 + $0x40] sm:$0xf] %vm10782_vm5, %v10668_v60  ;;  %v11460_v54 = vcombine.low %v11459_v40, %v23808_v53  ;;  %v11451_v29 = vrot.slane %v11444_v24, %v14577_v23  ;;  %v23816_v60 = vld [vmem:[#allocation48_spill] sm:$0xff]  ;;  %v11523_v40 = vrot.slane %v23820_v9, %v14577_v23  ;;  %v23822_v24 = vld [vmem:[#allocation338_spill] sm:$0xff]  ;;  %v23838_v9 = vld [vmem:[#allocation53_spill] sm:$0xff] }
 0x3c4   : > { %11822 = vrot.lane.b32.xlu1 %v11387_v15, %s14456_s11  ;;  %v10670_v43 = vpop.permute.xlu0 %10669  ;;  %v23814_v15 = vcombine.low %v23812_v36, %v23813_v2  ;;  %v23823_v59 = vcombine.low %v23821_v17, %v23822_v24  ;;  %v23829_v2 = vld [vmem:[#allocation364_spill] sm:$0xff] }
 0x3c5   : > { %10800 = vst.msk [vmem:[#allocation2 + $0x44] sm:$0xf] %vm10782_vm5, %v10670_v43  ;;  %v11467_v56 = vrot.slane %v11460_v54, %v14577_v23  ;;  %v23825_v54 = vld [vmem:[#allocation340_spill] sm:$0xff] }
 0x3c6   : > { %v10672_v49 = vpop.permute.xlu1 %10671  ;;  %11824 = vrot.lane.b32.xlu0 %v11403_v33, %s14456_s11  ;;  %v11507_v42 = vrot.slane %v23814_v15, %v14577_v23  ;;  %v11492_v33 = vcombine.low %v11491_v32, %v23816_v60  ;;  %v11539_v31 = vrot.slane %v23823_v59, %v14577_v23  ;;  %v23827_v19 = vcombine.low %v23825_v54, %v23826_v6  ;;  %v23828_v32 = vld [vmem:[#allocation70_spill] sm:$0xff]  ;;  %v23830_v15 = vld [vmem:[#allocation357_spill] sm:$0xff]  ;;  %v23839_v17 = vld [vmem:[#allocation72_spill] sm:$0xff] }
 0x3c7   : > { %10801 = vst.msk [vmem:[#allocation2 + $0x48] sm:$0xf] %vm10782_vm5, %v10672_v49  ;;  %v23836_v60 = vld [vmem:[#allocation374_spill] sm:$0xff]  ;;  %v23840_v59 = vld [vmem:[#allocation65_spill] sm:$0xff]  ;;  %v23842_v54 = vld [vmem:[#allocation400_spill] sm:$0xff] }
 0x3c8   : > { %11826 = vrot.lane.b32.xlu1 %v11419_v52, %s14456_s11  ;;  %v10674_v10 = vpop.permute.xlu0 %10673  ;;  %v11508_v22 = vcombine.low %v11507_v42, %v23817_v14  ;;  %v11483_v52 = vrot.slane %v11476_v48, %v14577_v23  ;;  %v11499_v43 = vrot.slane %v11492_v33, %v14577_v23  ;;  %v11555_v58 = vrot.slane %v23827_v19, %v14577_v23  ;;  %v23833_v48 = vld [vmem:[#allocation381_spill] sm:$0xff]  ;;  %v23845_v19 = vld [vmem:[#allocation394_spill] sm:$0xff] }
 0x3c9   : > { %10802 = vst.msk [vmem:[#allocation2 + $0x4c] sm:$0xf] %vm10782_vm5, %v10674_v10  ;;  %v11540_v36 = vcombine.low %v11539_v31, %v23828_v32  ;;  %v23831_v42 = vcombine.low %v23829_v2, %v23830_v15  ;;  %v23834_v10 = vcombine.low %v23832_v13, %v23833_v48  ;;  %v10905_v15 = vshll.u32 %v20481_v12, 16  ;;  %v23847_v48 = vld [vmem:[#allocation429_spill] sm:$0xff] }
 0x3ca   : > { %v10676_v30 = vpop.permute.xlu1 %10675  ;;  %11828 = vrot.lane.b32.xlu0 %v11435_v61, %s14456_s11  ;;  %v11515_v49 = vrot.slane %v11508_v22, %v14577_v23  ;;  %v23824_v61 = vld [vmem:[#allocation51_spill] sm:$0xff] }
 0x3cb   : > { %10803 = vst.msk [vmem:[#allocation2 + $0x50] sm:$0xf] %vm10782_vm5, %v10676_v30  ;;  %v11524_v53 = vcombine.low %v11523_v40, %v23824_v61  ;;  %v11587_v30 = vrot.slane %v23834_v10, %v14577_v23  ;;  %v11556_v40 = vcombine.low %v11555_v58, %v23838_v9  ;;  %v23841_v61 = vld [vmem:[#allocation379_spill] sm:$0xff]  ;;  %v11692_v10 = vcombine.low %v23847_v48, %v19809_v63  ;;  %v23849_v63 = vld [vmem:[#allocation417_spill] sm:$0xff] }
 0x3cc   : > { %11830 = vrot.lane.b32.xlu1 %v11451_v29, %s14456_s11  ;;  %v10678_v7 = vpop.permute.xlu0 %10677  ;;  %v11571_v29 = vrot.slane %v23831_v42, %v14577_v23  ;;  %v23843_v6 = vcombine.low %v23841_v61, %v23842_v54  ;;  %v10908_v42 = vshrl.u32 %v20481_v12, 16  ;;  %v20900_v12 = vcombine.high %v20491_v50, %v20491_v50 }
 0x3cd   : > { %10804 = vst.msk [vmem:[#allocation2 + $0x54] sm:$0xf] %vm10782_vm5, %v10678_v7  ;;  %v11531_v18 = vrot.slane %v11524_v53, %v14577_v23  ;;  %v11588_v31 = vcombine.low %v11587_v30, %v23840_v59  ;;  %v23844_v53 = vld [vmem:[#allocation403_spill] sm:$0xff]  ;;  %v11563_v13 = vrot.slane %v11556_v40, %v14577_v23  ;;  %v10924_v61 = vshrl.u32 %v20467_v35, 16 }
 0x3ce   : > { %v10680_v4 = vpop.permute.xlu1 %10679  ;;  %11832 = vrot.lane.b32.xlu0 %v11467_v56, %s14456_s11  ;;  %v23835_v56 = vld [vmem:[#allocation384_spill] sm:$0xff]  ;;  %v11572_v24 = vcombine.low %v11571_v29, %v23839_v17  ;;  %v23846_v58 = vcombine.low %v23844_v53, %v23845_v19  ;;  %v10913_v29 = vshll.u32 %v20488_v5, 16  ;;  %v23852_v17 = vld [vmem:[#allocation414_spill] sm:$0xff]  ;;  %v10929_v54 = vshll.u32 %v20491_v50, 16 }
 0x3cf   : > { %10805 = vst.msk [vmem:[#allocation2 + $0x58] sm:$0xf] %vm10782_vm5, %v10680_v4  ;;  %v23837_v33 = vcombine.low %v23835_v56, %v23836_v60  ;;  %v11595_v56 = vrot.slane %v11588_v31, %v14577_v23  ;;  %v10940_v53 = vshrl.u32 %v20495_v34, 16  ;;  %v10945_v19 = vshll.u32 %v20900_v12, 16 }
 0x3d0   : > { %11834 = vrot.lane.b32.xlu1 %v11483_v52, %s14456_s11  ;;  %v10682_v22 = vpop.permute.xlu0 %10681  ;;  %v11547_v52 = vrot.slane %v11540_v36, %v14577_v23  ;;  %v11635_v32 = vrot.slane %v23846_v58, %v14577_v23  ;;  %v10897_v36 = vshll.u32 %v20464_v0, 16  ;;  %v11579_v30 = vrot.slane %v11572_v24, %v14577_v23 }
 0x3d1   : > { %v11603_v14 = vrot.slane %v23837_v33, %v14577_v23  ;;  %10806 = vst.msk [vmem:[#allocation2 + $0x5c] sm:$0xf] %vm10782_vm5, %v10682_v22 }
 0x3d2   : > { %v10684_v26 = vpop.permute.xlu1 %10683  ;;  %11836 = vrot.lane.b32.xlu0 %v11499_v43, %s14456_s11  ;;  %v11619_v43 = vrot.slane %v23843_v6, %v14577_v23  ;;  %v11636_v22 = vcombine.low %v11635_v32, %v19805_v45  ;;  %v10915_v45 = vsel %vm14628_vm14, %v10908_v42, %v10913_v29  ;;  %v10932_v6 = vshrl.u32 %v20491_v50, 16 }
 0x3d3   : > { %10807 = vst.msk [vmem:[#allocation2 + $0x60] sm:$0xf] %vm10782_vm5, %v10684_v26  ;;  %v11604_v7 = vcombine.low %v11603_v14, %v19776_v20  ;;  %v10900_v20 = vshrl.u32 %v20464_v0, 16  ;;  %v23848_v26 = vld [vmem:[#allocation398_spill] sm:$0xff] }
 0x3d4   : > { %11838 = vrot.lane.b32.xlu1 %v11515_v49, %s14456_s11  ;;  %v10686_v4 = vpop.permute.xlu0 %10685  ;;  %v10892_v49 = vshrl.u32 %v20459_v62, 16  ;;  %v11620_v14 = vcombine.low %v11619_v43, %v19782_v21  ;;  %v10937_v43 = vshll.u32 %v20495_v34, 16  ;;  %v11699_v34 = vrot.slane %v11692_v10, %v14577_v23 }
 0x3d5   : > { %10808 = vst.msk [vmem:[#allocation2 + $0x64] sm:$0xf] %vm10782_vm5, %v10686_v4  ;;  %v11611_v33 = vrot.slane %v11604_v7, %v14577_v23  ;;  %v10907_v21 = vsel %vm14628_vm14, %v10900_v20, %v10905_v15  ;;  %v10916_v7 = vshrl.u32 %v20488_v5, 16  ;;  %v10921_v4 = vshll.u32 %v20467_v35, 16  ;;  %v23854_v20 = vld [vmem:[#allocation416_spill] sm:$0xff]  ;;  %v23855_v15 = vld [vmem:[#allocation427_spill] sm:$0xff] }
 0x3d6   : > { %v10688_v2 = vpop.permute.xlu1 %10687  ;;  %11840 = vrot.lane.b32.xlu0 %v11531_v18, %s14456_s11  ;;  %v23850_v18 = vcombine.low %v23848_v26, %v23849_v63  ;;  %v10899_v31 = vsel %vm14628_vm14, %v10892_v49, %v10897_v36  ;;  %v11627_v32 = vrot.slane %v11620_v14, %v14577_v23  ;;  %v11643_v35 = vrot.slane %v11636_v22, %v14577_v23 }
 0x3d7   : > { %10809 = vst.msk [vmem:[#allocation2 + $0x68] sm:$0xf] %vm10782_vm5, %v10688_v2  ;;  %v23856_v42 = vcombine.low %v23854_v20, %v23855_v15  ;;  %v11724_v48 = vcombine.low %v19842_v55, %v10907_v21  ;;  %v10947_v10 = vsel %vm14628_vm14, %v10940_v53, %v10945_v19  ;;  %v11700_v26 = vcombine.low %v11699_v34, %v19880_v51  ;;  %v23863_v34 = vld [vmem:[#allocation80_spill] sm:$0xff] }
 0x3d8   : > { %11842 = vrot.lane.b32.xlu1 %v11547_v52, %s14456_s11  ;;  %v10690_v60 = vpop.permute.xlu0 %10689  ;;  %v11651_v9 = vrot.slane %v23850_v18, %v14577_v23  ;;  %v23851_v52 = vld [vmem:[#allocation421_spill] sm:$0xff]  ;;  %v11985_v15 = vcombine.low %v23604_v39, %v19917_v46  ;;  %v23864_v46 = vld [vmem:[#allocation443_spill] sm:$0xff] }
 0x3d9   : > { %10810 = vst.msk [vmem:[#allocation2 + $0x6c] sm:$0xf] %vm10782_vm5, %v10690_v60  ;;  %v23853_v24 = vcombine.low %v23851_v52, %v23852_v17  ;;  %v11683_v29 = vrot.slane %v23856_v42, %v14577_v23  ;;  %v10939_v60 = vsel %vm14628_vm14, %v10932_v6, %v10937_v43  ;;  %v11732_v63 = vrot.slane %v11724_v48, %v14577_v23  ;;  %v23861_v42 = vld [vmem:[#allocation28_spill] sm:$0xff] }
 0x3da   : > { %v10692_v40 = vpop.permute.xlu1 %10691  ;;  %11844 = vrot.lane.b32.xlu0 %v11563_v13, %s14456_s11  ;;  %v11652_v36 = vcombine.low %v11651_v9, %v19826_v41  ;;  %v11708_v13 = vcombine.low %v19830_v25, %v19836_v11  ;;  %v10923_v41 = vsel %vm14628_vm14, %v10916_v7, %v10921_v4  ;;  %v11707_v21 = vrot.slane %v11700_v26, %v14577_v23 }
 0x3db   : > { %v11667_v59 = vrot.slane %v23853_v24, %v14577_v23  ;;  %10811 = vst.msk [vmem:[#allocation2 + $0x70] sm:$0xf] %vm10782_vm5, %v10692_v40  ;;  %v11684_v11 = vcombine.low %v11683_v29, %v19861_v37  ;;  %v11748_v14 = vcombine.low %v10923_v41, %v10939_v60  ;;  %v23857_v24 = vld [vmem:[#allocation30_spill] sm:$0xff]  ;;  %v11992_v41 = vrot.slane %v11985_v15, %v14577_v23  ;;  %v23880_v15 = vld [vmem:[#allocation67_spill] sm:$0xff] }
 0x3dc   : > { %11846 = vrot.lane.b32.xlu1 %v11579_v30, %s14456_s11  ;;  %v10694_v58 = vpop.permute.xlu0 %10693  ;;  %v11725_v30 = vcombine.low %v10899_v31, %v10915_v45  ;;  %v11659_v55 = vrot.slane %v11652_v36, %v14577_v23  ;;  %v23862_v29 = vld [vmem:[#allocation98_spill] sm:$0xff]  ;;  %v12009_v60 = vcombine.low %v23611_v16, %v19936_v47  ;;  %v23869_v16 = vld [vmem:[#allocation112_spill] sm:$0xff] }
 0x3dd   : > { %10812 = vst.msk [vmem:[#allocation2 + $0x74] sm:$0xf] %vm10782_vm5, %v10694_v58  ;;  %v11668_v2 = vcombine.low %v11667_v59, %v19855_v44  ;;  %v10931_v44 = vsel %vm14628_vm14, %v10924_v61, %v10929_v54  ;;  %v11691_v40 = vrot.slane %v11684_v11, %v14577_v23  ;;  %v11756_v17 = vrot.slane %v11748_v14, %v14577_v23  ;;  %v23858_v59 = vld [vmem:[#allocation26_spill] sm:$0xff]  ;;  %v23867_v14 = vld [vmem:[#allocation449_spill] sm:$0xff] }
 0x3de   : > { %v10696_v49 = vpop.permute.xlu1 %10695  ;;  %11848 = vrot.lane.b32.xlu0 %v11595_v56, %s14456_s11  ;;  %v11749_v22 = vcombine.low %v10931_v44, %v10947_v10  ;;  %v11739_v37 = vrot.slane %v11725_v30, %v14577_v23  ;;  %v11969_v31 = vcombine.low %v23858_v59, %v23857_v24  ;;  %v23865_v44 = vld [vmem:[#allocation45_spill] sm:$0xff]  ;;  %v23868_v47 = vld [vmem:[#allocation114_spill] sm:$0xff]  ;;  %v23872_v24 = vld [vmem:[#allocation155_spill] sm:$0xff] }
 0x3df   : > { %10813 = vst.msk [vmem:[#allocation2 + $0x78] sm:$0xf] %vm10782_vm5, %v10696_v49  ;;  %v11675_v38 = vrot.slane %v11668_v2, %v14577_v23  ;;  %v23860_v49 = vld [vmem:[#allocation43_spill] sm:$0xff] }
 0x3e0   : > { %11850 = vrot.lane.b32.xlu1 %v11611_v33, %s14456_s11  ;;  %v10698_v56 = vpop.permute.xlu0 %10697  ;;  %v11715_v33 = vrot.slane %v11708_v13, %v14577_v23  ;;  %v11763_v51 = vrot.slane %v11749_v22, %v14577_v23  ;;  %v11740_v45 = vcombine.low %v11732_v63, %v11739_v37  ;;  %v11976_v54 = vrot.slane %v11969_v31, %v14577_v23  ;;  %v23873_v59 = vld [vmem:[#allocation151_spill] sm:$0xff] }
 0x3e1   : > { %10814 = vst.msk [vmem:[#allocation2 + $0x7c] sm:$0xf] %vm10782_vm5, %v10698_v56  ;;  %v12017_v13 = vcombine.low %v23863_v34, %v23862_v29  ;;  %v12065_v31 = vcombine.low %v23873_v59, %v23872_v24  ;;  %v23882_v34 = vld [vmem:[#allocation125_spill] sm:$0xff]  ;;  %v23894_v24 = vld [vmem:[#allocation239_spill] sm:$0xff] }
 0x3e2   : > { %v10700_v25 = vpop.permute.xlu1 %10699  ;;  %11852 = vrot.lane.b32.xlu0 %v11627_v32, %s14456_s11  ;;  %v11716_v52 = vcombine.low %v11715_v33, %v19886_v3  ;;  %v11764_v61 = vcombine.low %v11756_v17, %v11763_v51  ;;  %v11747_v6 = vrot.slane %v11740_v45, %v14577_v23  ;;  %v11977_v58 = vcombine.low %v11976_v54, %v23122_v28  ;;  %v23859_v32 = vld [vmem:[#allocation57_spill] sm:$0xff]  ;;  %v23871_v51 = vld [vmem:[#allocation60_spill] sm:$0xff]  ;;  %v23895_v59 = vld [vmem:[#allocation235_spill] sm:$0xff] }
 0x3e3   : > { %10815 = vst.msk [vmem:[#allocation2 + $0x80] sm:$0xf] %vm10782_vm5, %v10700_v25  ;;  %v12024_v10 = vrot.slane %v12017_v13, %v14577_v23  ;;  %v12016_v33 = vrot.slane %v12009_v60, %v14577_v23  ;;  %v12072_v54 = vrot.slane %v12065_v31, %v14577_v23  ;;  %v23883_v13 = vld [vmem:[#allocation196_spill] sm:$0xff]  ;;  %v13811_v31 = vcombine.high %v23895_v59, %v23894_v24 }
 0x3e4   : > { %11854 = vrot.lane.b32.xlu1 %v11643_v35, %s14456_s11  ;;  %v10702_v18 = vpop.permute.xlu0 %10701  ;;  %v11723_v3 = vrot.slane %v11716_v52, %v14577_v23  ;;  %v11771_v19 = vrot.slane %v11764_v61, %v14577_v23  ;;  %v13807_v35 = vcombine.high %v23860_v49, %v23859_v32  ;;  %v11984_v20 = vrot.slane %v11977_v58, %v14577_v23  ;;  %v23877_v32 = vld [vmem:[#allocation213_spill] sm:$0xff] }
 0x3e5   : > { %10816 = vst.msk [vmem:[#allocation2 + $0x84] sm:$0xf] %vm10782_vm5, %v10702_v18  ;;  %v12025_v22 = vcombine.low %v12024_v10, %v23867_v14  ;;  %v23870_v18 = vld [vmem:[#allocation74_spill] sm:$0xff]  ;;  %v12057_v61 = vcombine.low %v23625_v27, %v19974_v57  ;;  %v12073_v49 = vcombine.low %v12072_v54, %v23877_v32  ;;  %v23878_v57 = vld [vmem:[#allocation183_spill] sm:$0xff]  ;;  %v23890_v14 = vld [vmem:[#allocation89_spill] sm:$0xff]  ;;  %v12176_v54 = vrot.slane %v13811_v31, %v14577_v23 }
 0x3e6   : > { %v10704_v9 = vpop.permute.xlu1 %10703  ;;  %11856 = vrot.lane.b32.xlu0 %v11659_v55, %s14456_s11  ;;  %v12000_v28 = vrot.slane %v13807_v35, %v14577_v23  ;;  %v23866_v55 = vld [vmem:[#allocation117_spill] sm:$0xff]  ;;  %v23879_v27 = vld [vmem:[#allocation175_spill] sm:$0xff]  ;;  %v23900_v32 = vld [vmem:[#allocation272_spill] sm:$0xff] }
 0x3e7   : > { %10817 = vst.msk [vmem:[#allocation2 + $0x88] sm:$0xf] %vm10782_vm5, %v10704_v9  ;;  %v12032_v37 = vrot.slane %v12025_v22, %v14577_v23  ;;  %v12033_v9 = vcombine.low %v23618_v1, %v23870_v18  ;;  %v23874_v1 = vld [vmem:[#allocation208_spill] sm:$0xff]  ;;  %v12064_v58 = vrot.slane %v12057_v61, %v14577_v23  ;;  %v13809_v35 = vcombine.high %v23879_v27, %v23878_v57  ;;  %v23891_v22 = vld [vmem:[#allocation135_spill] sm:$0xff] }
 0x3e8   : > { %11858 = vrot.lane.b32.xlu1 %v11675_v38, %s14456_s11  ;;  %v10706_v7 = vpop.permute.xlu0 %10705  ;;  %v12001_v39 = vcombine.low %v12000_v28, %v23864_v46  ;;  %v13808_v38 = vcombine.high %v23869_v16, %v23868_v47  ;;  %v23881_v28 = vld [vmem:[#allocation99_spill] sm:$0xff]  ;;  %v23886_v46 = vld [vmem:[#allocation140_spill] sm:$0xff]  ;;  %v12105_v47 = vcombine.low %v23891_v22, %v23890_v14  ;;  %v23910_v22 = vld [vmem:[#allocation190_spill] sm:$0xff] }
 0x3e9   : > { %10818 = vst.msk [vmem:[#allocation2 + $0x8c] sm:$0xf] %vm10782_vm5, %v10706_v7  ;;  %v12096_v29 = vrot.slane %v13809_v35, %v14577_v23  ;;  %v23901_v27 = vld [vmem:[#allocation336_spill] sm:$0xff] }
 0x3ea   : > { %v10708_v4 = vpop.permute.xlu1 %10707  ;;  %11860 = vrot.lane.b32.xlu0 %v11691_v40, %s14456_s11  ;;  %v12008_v11 = vrot.slane %v12001_v39, %v14577_v23  ;;  %v12048_v40 = vrot.slane %v13808_v38, %v14577_v23  ;;  %v12177_v35 = vcombine.low %v12176_v54, %v23901_v27  ;;  %v23923_v27 = vld [vmem:[#allocation259_spill] sm:$0xff] }
 0x3eb   : > { %10819 = vst.msk [vmem:[#allocation2 + $0x90] sm:$0xf] %vm10782_vm5, %v10708_v4 }
 0x3ec   : > { %11862 = vrot.lane.b32.xlu1 %v11707_v21, %s14456_s11  ;;  %v10710_v43 = vpop.permute.xlu0 %10709  ;;  %v12040_v21 = vrot.slane %v12033_v9, %v14577_v23  ;;  %v12049_v45 = vcombine.low %v12048_v40, %v23874_v1 }
 0x3ed   : > { %10820 = vst.msk [vmem:[#allocation2 + $0x94] sm:$0xf] %vm10782_vm5, %v10710_v43 }
 0x3ee   : > { %v10712_v53 = vpop.permute.xlu1 %10711  ;;  %11864 = vrot.lane.b32.xlu0 %v11723_v3, %s14456_s11  ;;  %v23875_v3 = vld [vmem:[#allocation444_spill] sm:$0xff] }
 0x3ef   : > { %10821 = vst.msk [vmem:[#allocation2 + $0x98] sm:$0xf] %vm10782_vm5, %v10712_v53 }
 0x3f0   : > { %11866 = vrot.lane.b32.xlu1 %v11747_v6, %s14456_s11  ;;  %v10714_v36 = vpop.permute.xlu0 %10713  ;;  %v12056_v6 = vrot.slane %v12049_v45, %v14577_v23  ;;  %v23896_v45 = vld [vmem:[#allocation103_spill] sm:$0xff] }
 0x3f1   : > { %10822 = vst.msk [vmem:[#allocation2 + $0x9c] sm:$0xf] %vm10782_vm5, %v10714_v36 }
 0x3f2   : > { %v10716_v2 = vpop.permute.xlu1 %10715  ;;  %11868 = vrot.lane.b32.xlu0 %v11771_v19, %s14456_s11  ;;  %v23876_v19 = vld [vmem:[#allocation94_spill] sm:$0xff] }
 0x3f3   : > { %10823 = vst.msk [vmem:[#allocation2 + $0xa0] sm:$0xf] %vm10782_vm5, %v10716_v2 }
 0x3f4   : > { %12353 = vrot.lane.b32.xlu1 %v23861_v42, %s14457_s23  ;;  %v10718_v48 = vpop.permute.xlu0 %10717  ;;  %v12081_v42 = vcombine.low %v23881_v28, %v23880_v15  ;;  %v23903_v15 = vld [vmem:[#allocation210_spill] sm:$0xff] }
 0x3f5   : > { %10824 = vst.msk [vmem:[#allocation2 + $0xa4] sm:$0xf] %vm10782_vm5, %v10718_v48  ;;  %v23884_v48 = vld [vmem:[#allocation127_spill] sm:$0xff] }
 0x3f6   : > { %v10720_v30 = vpop.permute.xlu1 %10719  ;;  %12355 = vrot.lane.b32.xlu0 %v11984_v20, %s14457_s23  ;;  %v12080_v20 = vrot.slane %v12073_v49, %v14577_v23  ;;  %v12088_v10 = vrot.slane %v12081_v42, %v14577_v23 }
 0x3f7   : > { %10825 = vst.msk [vmem:[#allocation2 + $0xa8] sm:$0xf] %vm10782_vm5, %v10720_v30  ;;  %v12113_v30 = vcombine.low %v23884_v48, %v23883_v13  ;;  %v23904_v48 = vld [vmem:[#allocation182_spill] sm:$0xff] }
 0x3f8   : > { %12357 = vrot.lane.b32.xlu1 %v23865_v44, %s14457_s23  ;;  %v10722_v56 = vpop.permute.xlu0 %10721 }
 0x3f9   : > { %10826 = vst.msk [vmem:[#allocation2 + $0xac] sm:$0xf] %vm10782_vm5, %v10722_v56  ;;  %v23887_v56 = vld [vmem:[#allocation452_spill] sm:$0xff]  ;;  %v12121_v16 = vrot.slane %v12113_v30, %v14577_v23 }
 0x3fa   : > { %v10724_v25 = vpop.permute.xlu1 %10723  ;;  %12359 = vrot.lane.b32.xlu0 %v11992_v41, %s14457_s23  ;;  %v23885_v41 = vld [vmem:[#allocation88_spill] sm:$0xff] }
 0x3fb   : > { %10827 = vst.msk [vmem:[#allocation2 + $0xb0] sm:$0xf] %vm10782_vm5, %v10724_v25  ;;  %v12114_v39 = vcombine.low %v23886_v46, %v23885_v41  ;;  %v12097_v25 = vcombine.low %v12096_v29, %v23887_v56  ;;  %v12184_v29 = vrot.slane %v12177_v35, %v14577_v23  ;;  %v23905_v41 = vld [vmem:[#allocation279_spill] sm:$0xff]  ;;  %v23924_v35 = vld [vmem:[#allocation410_spill] sm:$0xff] }
 0x3fc   : > { %12361 = vrot.lane.b32.xlu1 %v23866_v55, %s14457_s23  ;;  %v10726_v26 = vpop.permute.xlu0 %10725 }
 0x3fd   : > { %10828 = vst.msk [vmem:[#allocation2 + $0xb4] sm:$0xf] %vm10782_vm5, %v10726_v26  ;;  %v12128_v38 = vrot.slane %v12114_v39, %v14577_v23  ;;  %v23892_v26 = vld [vmem:[#allocation230_spill] sm:$0xff]  ;;  %v12104_v9 = vrot.slane %v12097_v25, %v14577_v23  ;;  %v23906_v39 = vld [vmem:[#allocation309_spill] sm:$0xff] }
 0x3fe   : > { %v10728_v63 = vpop.permute.xlu1 %10727  ;;  %12363 = vrot.lane.b32.xlu0 %v12008_v11, %s14457_s23  ;;  %v23888_v11 = vld [vmem:[#allocation110_spill] sm:$0xff] }
 0x3ff   : > { %10829 = vst.msk [vmem:[#allocation2 + $0xb8] sm:$0xf] %vm10782_vm5, %v10728_v63  ;;  %v12137_v55 = vcombine.low %v23888_v11, %v20290_v8  ;;  %v13810_v63 = vcombine.high %v20290_v8, %v23892_v26  ;;  %v23908_v11 = vld [vmem:[#allocation91_spill] sm:$0xff] }
 0x400   : > { %12365 = vrot.lane.b32.xlu1 %v12016_v33, %s14457_s23  ;;  %v10730_v52 = vpop.permute.xlu0 %10729  ;;  %v23889_v33 = vld [vmem:[#allocation156_spill] sm:$0xff] }
 0x401   : > { %10830 = vst.msk [vmem:[#allocation2 + $0xbc] sm:$0xf] %vm10782_vm5, %v10730_v52  ;;  %v12144_v40 = vrot.slane %v12137_v55, %v14577_v23  ;;  %v23893_v52 = vld [vmem:[#allocation450_spill] sm:$0xff]  ;;  %v12160_v8 = vrot.slane %v13810_v63, %v14577_v23  ;;  %v23909_v55 = vld [vmem:[#allocation217_spill] sm:$0xff] }
 0x402   : > { %v10732_v17 = vpop.permute.xlu1 %10731  ;;  %12367 = vrot.lane.b32.xlu0 %v23871_v51, %s14457_s23  ;;  %v12129_v51 = vcombine.low %v12121_v16, %v12128_v38  ;;  %v23912_v16 = vld [vmem:[#allocation335_spill] sm:$0xff] }
 0x403   : > { %10831 = vst.msk [vmem:[#allocation2 + $0xc0] sm:$0xf] %vm10782_vm5, %v10732_v17  ;;  %v12112_v17 = vrot.slane %v12105_v47, %v14577_v23  ;;  %v23911_v47 = vld [vmem:[#allocation355_spill] sm:$0xff] }
 0x404   : > { %12369 = vrot.lane.b32.xlu1 %v12032_v37, %s14457_s23  ;;  %v11773_v7 = vpop.permute.xlu0 %11772  ;;  %v12241_v38 = vcombine.low %v23912_v16, %v23911_v47 }
 0x405   : > { %11920 = vst.msk [vmem:[#allocation2] sm:$0xf] %vm11919_vm6, %v11773_v7  ;;  %v12145_v7 = vcombine.low %v23896_v45, %v12144_v40  ;;  %v23914_v40 = vld [vmem:[#allocation193_spill] sm:$0xff]  ;;  %v23918_v45 = vld [vmem:[#allocation354_spill] sm:$0xff] }
 0x406   : > { %v11775_v4 = vpop.permute.xlu1 %11774  ;;  %12371 = vrot.lane.b32.xlu0 %v23875_v3, %s14457_s23  ;;  %v23897_v3 = vld [vmem:[#allocation113_spill] sm:$0xff] }
 0x407   : > { %11921 = vst.msk [vmem:[#allocation2 + $0x4] sm:$0xf] %vm11919_vm6, %v11775_v4  ;;  %v12136_v4 = vrot.slane %v12129_v51, %v14577_v23  ;;  %v12161_v61 = vcombine.low %v23897_v3, %v12160_v8  ;;  %v12248_v8 = vrot.slane %v12241_v38, %v14577_v23  ;;  %v23920_v3 = vld [vmem:[#allocation369_spill] sm:$0xff]  ;;  %v23933_v38 = vld [vmem:[#allocation108_spill] sm:$0xff] }
 0x408   : > { %12373 = vrot.lane.b32.xlu1 %v12040_v21, %s14457_s23  ;;  %v11777_v43 = vpop.permute.xlu0 %11776 }
 0x409   : > { %11922 = vst.msk [vmem:[#allocation2 + $0x8] sm:$0xf] %vm11919_vm6, %v11777_v43  ;;  %v12168_v57 = vrot.slane %v12161_v61, %v14577_v23 }
 0x40a   : > { %v11779_v53 = vpop.permute.xlu1 %11778  ;;  %12375 = vrot.lane.b32.xlu0 %v23876_v19, %s14457_s23  ;;  %v12152_v19 = vrot.slane %v12145_v7, %v14577_v23  ;;  %v12249_v7 = vcombine.low %v12248_v8, %v23918_v45 }
 0x40b   : > { %11923 = vst.msk [vmem:[#allocation2 + $0xc] sm:$0xf] %vm11919_vm6, %v11779_v53  ;;  %v23898_v53 = vld [vmem:[#allocation154_spill] sm:$0xff] }
 0x40c   : > { %12377 = vrot.lane.b32.xlu1 %v12056_v6, %s14457_s23  ;;  %v11781_v36 = vpop.permute.xlu0 %11780 }
 0x40d   : > { %11924 = vst.msk [vmem:[#allocation2 + $0x10] sm:$0xf] %vm11919_vm6, %v11781_v36 }
 0x40e   : > { %v11783_v2 = vpop.permute.xlu1 %11782  ;;  %12379 = vrot.lane.b32.xlu0 %v12064_v58, %s14457_s23  ;;  %v23899_v58 = vld [vmem:[#allocation277_spill] sm:$0xff] }
 0x40f   : > { %11925 = vst.msk [vmem:[#allocation2 + $0x14] sm:$0xf] %vm11919_vm6, %v11783_v2  ;;  %v12193_v49 = vcombine.low %v23900_v32, %v23899_v58 }
 0x410   : > { %12381 = vrot.lane.b32.xlu1 %v23882_v34, %s14457_s23  ;;  %v11785_v44 = vpop.permute.xlu0 %11784 }
 0x411   : > { %11926 = vst.msk [vmem:[#allocation2 + $0x18] sm:$0xf] %vm11919_vm6, %v11785_v44  ;;  %v12200_v42 = vrot.slane %v12193_v49, %v14577_v23  ;;  %v23907_v44 = vld [vmem:[#allocation296_spill] sm:$0xff] }
 0x412   : > { %v11787_v60 = vpop.permute.xlu1 %11786  ;;  %12383 = vrot.lane.b32.xlu0 %v12080_v20, %s14457_s23  ;;  %v23902_v20 = vld [vmem:[#allocation69_spill] sm:$0xff] }
 0x413   : > { %11927 = vst.msk [vmem:[#allocation2 + $0x1c] sm:$0xf] %vm11919_vm6, %v11787_v60  ;;  %v12185_v28 = vcombine.low %v23903_v15, %v23902_v20  ;;  %v12201_v46 = vcombine.low %v12200_v42, %v23905_v41  ;;  %v13812_v60 = vcombine.high %v23907_v44, %v23906_v39  ;;  %v23926_v15 = vld [vmem:[#allocation9_spill] sm:$0xff] }
 0x414   : > { %12385 = vrot.lane.b32.xlu1 %v23889_v33, %s14457_s23  ;;  %v11789_v37 = vpop.permute.xlu0 %11788  ;;  %v12209_v33 = vcombine.low %v23909_v55, %v23908_v11  ;;  %v23932_v11 = vld [vmem:[#allocation311_spill] sm:$0xff] }
 0x415   : > { %11928 = vst.msk [vmem:[#allocation2 + $0x20] sm:$0xf] %vm11919_vm6, %v11789_v37  ;;  %v12192_v30 = vrot.slane %v12185_v28, %v14577_v23  ;;  %v12208_v25 = vrot.slane %v12201_v46, %v14577_v23  ;;  %v12224_v14 = vrot.slane %v13812_v60, %v14577_v23  ;;  %v23930_v60 = vld [vmem:[#allocation456_spill] sm:$0xff]  ;;  %v13814_v55 = vcombine.high %v23932_v11, %v20459_v62  ;;  %v23934_v62 = vld [vmem:[#allocation303_spill] sm:$0xff] }
 0x416   : > { %v11791_v18 = vpop.permute.xlu1 %11790  ;;  %12387 = vrot.lane.b32.xlu0 %v12088_v10, %s14457_s23  ;;  %v12216_v37 = vrot.slane %v12209_v33, %v14577_v23  ;;  %v12314_v33 = vcombine.low %v20464_v0, %v20488_v5 }
 0x417   : > { %11929 = vst.msk [vmem:[#allocation2 + $0x24] sm:$0xf] %vm11919_vm6, %v11791_v18  ;;  %v23913_v18 = vld [vmem:[#allocation459_spill] sm:$0xff]  ;;  %v12321_v0 = vrot.slane %v13814_v55, %v14577_v23 }
 0x418   : > { %12389 = vrot.lane.b32.xlu1 %v23893_v52, %s14457_s23  ;;  %v11793_v21 = vpop.permute.xlu0 %11792  ;;  %v23915_v52 = vld [vmem:[#allocation84_spill] sm:$0xff]  ;;  %v12328_v5 = vrot.slane %v12314_v33, %v14577_v23 }
 0x419   : > { %11930 = vst.msk [vmem:[#allocation2 + $0x28] sm:$0xf] %vm11919_vm6, %v11793_v21  ;;  %v23917_v21 = vld [vmem:[#allocation227_spill] sm:$0xff] }
 0x41a   : > { %v11795_v1 = vpop.permute.xlu1 %11794  ;;  %12391 = vrot.lane.b32.xlu0 %v12104_v9, %s14457_s23  ;;  %v12225_v9 = vcombine.low %v12224_v14, %v23913_v18  ;;  %v12337_v14 = vcombine.low %v20491_v50, %v20900_v12 }
 0x41b   : > { %11931 = vst.msk [vmem:[#allocation2 + $0x2c] sm:$0xf] %vm11919_vm6, %v11795_v1 }
 0x41c   : > { %12393 = vrot.lane.b32.xlu1 %v12112_v17, %s14457_s23  ;;  %v11797_v6 = vpop.permute.xlu0 %11796  ;;  %v23916_v17 = vld [vmem:[#allocation195_spill] sm:$0xff]  ;;  %v12232_v31 = vrot.slane %v12225_v9, %v14577_v23  ;;  %v12344_v50 = vrot.slane %v12337_v14, %v14577_v23  ;;  %v12329_v9 = vcombine.low %v12321_v0, %v12328_v5 }
 0x41d   : > { %11932 = vst.msk [vmem:[#allocation2 + $0x30] sm:$0xf] %vm11919_vm6, %v11797_v6  ;;  %v12233_v51 = vcombine.low %v23916_v17, %v23915_v52  ;;  %v23937_v52 = vld [vmem:[#allocation105_spill] sm:$0xff] }
 0x41e   : > { %v11799_v43 = vpop.permute.xlu1 %11798  ;;  %12395 = vrot.lane.b32.xlu0 %v23898_v53, %s14457_s23  ;;  %v23921_v53 = vld [vmem:[#allocation93_spill] sm:$0xff]  ;;  %v12345_v17 = vcombine.low %v23937_v52, %v12344_v50 }
 0x41f   : > { %11933 = vst.msk [vmem:[#allocation2 + $0x34] sm:$0xf] %vm11919_vm6, %v11799_v43  ;;  %v12240_v1 = vrot.slane %v12233_v51, %v14577_v23  ;;  %v12256_v43 = vrot.slane %v12249_v7, %v14577_v23 }
 0x420   : > { %12397 = vrot.lane.b32.xlu1 %v12136_v4, %s14457_s23  ;;  %v11801_v36 = vpop.permute.xlu0 %11800  ;;  %v23919_v4 = vld [vmem:[#allocation368_spill] sm:$0xff] }
 0x421   : > { %11934 = vst.msk [vmem:[#allocation2 + $0x38] sm:$0xf] %vm11919_vm6, %v11801_v36  ;;  %v13813_v61 = vcombine.high %v23920_v3, %v23919_v4  ;;  %v23925_v36 = vld [vmem:[#allocation406_spill] sm:$0xff] }
 0x422   : > { %v11803_v2 = vpop.permute.xlu1 %11802  ;;  %12399 = vrot.lane.b32.xlu0 %v12152_v19, %s14457_s23  ;;  %v23922_v19 = vld [vmem:[#allocation244_spill] sm:$0xff] }
 0x423   : > { %11935 = vst.msk [vmem:[#allocation2 + $0x3c] sm:$0xf] %vm11919_vm6, %v11803_v2  ;;  %v12257_v58 = vcombine.low %v23922_v19, %v23921_v53  ;;  %v12272_v32 = vrot.slane %v13813_v61, %v14577_v23  ;;  %v12289_v2 = vcombine.low %v23925_v36, %v23924_v35 }
 0x424   : > { %12401 = vrot.lane.b32.xlu1 %v12168_v57, %s14457_s23  ;;  %v11805_v34 = vpop.permute.xlu0 %11804 }
 0x425   : > { %11936 = vst.msk [vmem:[#allocation2 + $0x40] sm:$0xf] %vm11919_vm6, %v11805_v34  ;;  %v12264_v20 = vrot.slane %v12257_v58, %v14577_v23  ;;  %v12273_v28 = vcombine.low %v12272_v32, %v23926_v15  ;;  %v23927_v34 = vld [vmem:[#allocation318_spill] sm:$0xff]  ;;  %v12296_v41 = vrot.slane %v12289_v2, %v14577_v23 }
 0x426   : > { %v11807_v13 = vpop.permute.xlu1 %11806  ;;  %12403 = vrot.lane.b32.xlu0 %v23904_v48, %s14457_s23  ;;  %v23929_v48 = vld [vmem:[#allocation253_spill] sm:$0xff] }
 0x427   : > { %11937 = vst.msk [vmem:[#allocation2 + $0x44] sm:$0xf] %vm11919_vm6, %v11807_v13  ;;  %v23928_v13 = vld [vmem:[#allocation86_spill] sm:$0xff]  ;;  %v12280_v46 = vrot.slane %v12273_v28, %v14577_v23 }
 0x428   : > { %12405 = vrot.lane.b32.xlu1 %v12184_v29, %s14457_s23  ;;  %v11809_v10 = vpop.permute.xlu0 %11808 }
 0x429   : > { %11938 = vst.msk [vmem:[#allocation2 + $0x48] sm:$0xf] %vm11919_vm6, %v11809_v10 }
 0x42a   : > { %v11811_v56 = vpop.permute.xlu1 %11810  ;;  %12407 = vrot.lane.b32.xlu0 %v12192_v30, %s14457_s23  ;;  %v12281_v30 = vcombine.low %v23929_v48, %v23928_v13 }
 0x42b   : > { %11939 = vst.msk [vmem:[#allocation2 + $0x4c] sm:$0xf] %vm11919_vm6, %v11811_v56  ;;  %v23931_v56 = vld [vmem:[#allocation27_spill] sm:$0xff] }
 0x42c   : > { %12409 = vrot.lane.b32.xlu1 %v23910_v22, %s14457_s23  ;;  %v11813_v26 = vpop.permute.xlu0 %11812  ;;  %v12288_v10 = vrot.slane %v12281_v30, %v14577_v23 }
 0x42d   : > { %11940 = vst.msk [vmem:[#allocation2 + $0x50] sm:$0xf] %vm11919_vm6, %v11813_v26  ;;  %v12305_v26 = vcombine.low %v23934_v62, %v23933_v38 }
 0x42e   : > { %v11815_v63 = vpop.permute.xlu1 %11814  ;;  %12411 = vrot.lane.b32.xlu0 %v12208_v25, %s14457_s23  ;;  %v12297_v25 = vcombine.low %v12296_v41, %v23931_v56 }
 0x42f   : > { %11941 = vst.msk [vmem:[#allocation2 + $0x54] sm:$0xf] %vm11919_vm6, %v11815_v63  ;;  %v23935_v63 = vld [vmem:[#allocation295_spill] sm:$0xff]  ;;  %v12312_v18 = vrot.slane %v12305_v26, %v14577_v23 }
 0x430   : > { %12413 = vrot.lane.b32.xlu1 %v23914_v40, %s14457_s23  ;;  %v11817_v24 = vpop.permute.xlu0 %11816  ;;  %v12304_v16 = vrot.slane %v12297_v25, %v14577_v23  ;;  %v23936_v40 = vld [vmem:[#allocation457_spill] sm:$0xff] }
 0x431   : > { %11942 = vst.msk [vmem:[#allocation2 + $0x58] sm:$0xf] %vm11919_vm6, %v11817_v24  ;;  %v12336_v24 = vrot.slane %v12329_v9, %v14577_v23 }
 0x432   : > { %v11819_v59 = vpop.permute.xlu1 %11818  ;;  %12415 = vrot.lane.b32.xlu0 %v12216_v37, %s14457_s23 }
 0x433   : > { %11943 = vst.msk [vmem:[#allocation2 + $0x5c] sm:$0xf] %vm11919_vm6, %v11819_v59  ;;  %v23938_v59 = vld [vmem:[#allocation315_spill] sm:$0xff] }
 0x434   : > { %12417 = vrot.lane.b32.xlu1 %v23917_v21, %s14457_s23  ;;  %v11821_v54 = vpop.permute.xlu0 %11820 }
 0x435   : > { %11944 = vst.msk [vmem:[#allocation2 + $0x60] sm:$0xf] %vm11919_vm6, %v11821_v54 }
 0x436   : > { %v11823_v6 = vpop.permute.xlu1 %11822  ;;  %12419 = vrot.lane.b32.xlu0 %v12232_v31, %s14457_s23  ;;  %v12352_v31 = vrot.slane %v12345_v17, %v14577_v23 }
 0x437   : > { %11945 = vst.msk [vmem:[#allocation2 + $0x64] sm:$0xf] %vm11919_vm6, %v11823_v6 }
 0x438   : > { %12421 = vrot.lane.b32.xlu1 %v12240_v1, %s14457_s23  ;;  %v11825_v49 = vpop.permute.xlu0 %11824 }
 0x439   : > { %11946 = vst.msk [vmem:[#allocation2 + $0x68] sm:$0xf] %vm11919_vm6, %v11825_v49 }
 0x43a   : > { %v11827_v57 = vpop.permute.xlu1 %11826  ;;  %12423 = vrot.lane.b32.xlu0 %v23923_v27, %s14457_s23 }
 0x43b   : > { %11947 = vst.msk [vmem:[#allocation2 + $0x6c] sm:$0xf] %vm11919_vm6, %v11827_v57 }
 0x43c   : > { %12425 = vrot.lane.b32.xlu1 %v12256_v43, %s14457_s23  ;;  %v11829_v42 = vpop.permute.xlu0 %11828 }
 0x43d   : > { %11948 = vst.msk [vmem:[#allocation2 + $0x70] sm:$0xf] %vm11919_vm6, %v11829_v42 }
 0x43e   : > { %v11831_v29 = vpop.permute.xlu1 %11830  ;;  %12427 = vrot.lane.b32.xlu0 %v23927_v34, %s14457_s23 }
 0x43f   : > { %11949 = vst.msk [vmem:[#allocation2 + $0x74] sm:$0xf] %vm11919_vm6, %v11831_v29 }
 0x440   : > { %12429 = vrot.lane.b32.xlu1 %v12264_v20, %s14457_s23  ;;  %v11833_v39 = vpop.permute.xlu0 %11832 }
 0x441   : > { %11950 = vst.msk [vmem:[#allocation2 + $0x78] sm:$0xf] %vm11919_vm6, %v11833_v39 }
 0x442   : > { %v11835_v44 = vpop.permute.xlu1 %11834  ;;  %12431 = vrot.lane.b32.xlu0 %v23930_v60, %s14457_s23 }
 0x443   : > { %11951 = vst.msk [vmem:[#allocation2 + $0x7c] sm:$0xf] %vm11919_vm6, %v11835_v44 }
 0x444   : > { %12433 = vrot.lane.b32.xlu1 %v12280_v46, %s14457_s23  ;;  %v11837_v22 = vpop.permute.xlu0 %11836 }
 0x445   : > { %11952 = vst.msk [vmem:[#allocation2 + $0x80] sm:$0xf] %vm11919_vm6, %v11837_v22 }
 0x446   : > { %v11839_v47 = vpop.permute.xlu1 %11838  ;;  %12435 = vrot.lane.b32.xlu0 %v12288_v10, %s14457_s23 }
 0x447   : > { %11953 = vst.msk [vmem:[#allocation2 + $0x84] sm:$0xf] %vm11919_vm6, %v11839_v47 }
 0x448   : > { %12437 = vrot.lane.b32.xlu1 %v23935_v63, %s14457_s23  ;;  %v11841_v12 = vpop.permute.xlu0 %11840 }
 0x449   : > { %11954 = vst.msk [vmem:[#allocation2 + $0x88] sm:$0xf] %vm11919_vm6, %v11841_v12 }
 0x44a   : > { %v11843_v37 = vpop.permute.xlu1 %11842  ;;  %12439 = vrot.lane.b32.xlu0 %v12304_v16, %s14457_s23 }
 0x44b   : > { %11955 = vst.msk [vmem:[#allocation2 + $0x8c] sm:$0xf] %vm11919_vm6, %v11843_v37 }
 0x44c   : > { %12441 = vrot.lane.b32.xlu1 %v23936_v40, %s14457_s23  ;;  %v11845_v51 = vpop.permute.xlu0 %11844 }
 0x44d   : > { %11956 = vst.msk [vmem:[#allocation2 + $0x90] sm:$0xf] %vm11919_vm6, %v11845_v51 }
 0x44e   : > { %v11847_v8 = vpop.permute.xlu1 %11846  ;;  %12443 = vrot.lane.b32.xlu0 %v12312_v18, %s14457_s23 }
 0x44f   : > { %11957 = vst.msk [vmem:[#allocation2 + $0x94] sm:$0xf] %vm11919_vm6, %v11847_v8 }
 0x450   : > { %12445 = vrot.lane.b32.xlu1 %v23938_v59, %s14457_s23  ;;  %v11849_v21 = vpop.permute.xlu0 %11848 }
 0x451   : > { %11958 = vst.msk [vmem:[#allocation2 + $0x98] sm:$0xf] %vm11919_vm6, %v11849_v21 }
 0x452   : > { %v11851_v1 = vpop.permute.xlu1 %11850  ;;  %12447 = vrot.lane.b32.xlu0 %v12336_v24, %s14457_s23 }
 0x453   : > { %11959 = vst.msk [vmem:[#allocation2 + $0x9c] sm:$0xf] %vm11919_vm6, %v11851_v1 }
 0x454   : > { %12449 = vrot.lane.b32.xlu1 %v12352_v31, %s14457_s23  ;;  %v11853_v45 = vpop.permute.xlu0 %11852 }
 0x455   : > { %11960 = vst.msk [vmem:[#allocation2 + $0xa0] sm:$0xf] %vm11919_vm6, %v11853_v45 }
 0x456   : > { %v11855_v7 = vpop.permute.xlu1 %11854 }
 0x457   : > { %11961 = vst.msk [vmem:[#allocation2 + $0xa4] sm:$0xf] %vm11919_vm6, %v11855_v7 }
 0x458   : > { %v11857_v4 = vpop.permute.xlu0 %11856 }
 0x459   : > { %11962 = vst.msk [vmem:[#allocation2 + $0xa8] sm:$0xf] %vm11919_vm6, %v11857_v4 }
 0x45a   : > { %v11859_v23 = vpop.permute.xlu1 %11858 }
 0x45b   : > { %11963 = vst.msk [vmem:[#allocation2 + $0xac] sm:$0xf] %vm11919_vm6, %v11859_v23 }
 0x45c   : > { %v11861_v3 = vpop.permute.xlu0 %11860 }
 0x45d   : > { %11964 = vst.msk [vmem:[#allocation2 + $0xb0] sm:$0xf] %vm11919_vm6, %v11861_v3 }
 0x45e   : > { %v11863_v61 = vpop.permute.xlu1 %11862 }
 0x45f   : > { %11965 = vst.msk [vmem:[#allocation2 + $0xb4] sm:$0xf] %vm11919_vm6, %v11863_v61 }
 0x460   : > { %v11865_v54 = vpop.permute.xlu0 %11864 }
 0x461   : > { %11966 = vst.msk [vmem:[#allocation2 + $0xb8] sm:$0xf] %vm11919_vm6, %v11865_v54 }
 0x462   : > { %v11867_v6 = vpop.permute.xlu1 %11866 }
 0x463   : > { %11967 = vst.msk [vmem:[#allocation2 + $0xbc] sm:$0xf] %vm11919_vm6, %v11867_v6 }
 0x464   : > { %v11869_v43 = vpop.permute.xlu0 %11868 }
 0x465   : > { %11968 = vst.msk [vmem:[#allocation2 + $0xc0] sm:$0xf] %vm11919_vm6, %v11869_v43 }
 0x466   : > { %v12354_v53 = vpop.permute.xlu1 %12353 }
 0x467   : > { %12501 = vst.msk [vmem:[#allocation2] sm:$0xf] %vm12500_vm7, %v12354_v53 }
 0x468   : > { %v12356_v19 = vpop.permute.xlu0 %12355 }
 0x469   : > { %12502 = vst.msk [vmem:[#allocation2 + $0x4] sm:$0xf] %vm12500_vm7, %v12356_v19 }
 0x46a   : > { %v12358_v58 = vpop.permute.xlu1 %12357 }
 0x46b   : > { %12503 = vst.msk [vmem:[#allocation2 + $0x8] sm:$0xf] %vm12500_vm7, %v12358_v58 }
 0x46c   : > { %v12360_v32 = vpop.permute.xlu0 %12359 }
 0x46d   : > { %12504 = vst.msk [vmem:[#allocation2 + $0xc] sm:$0xf] %vm12500_vm7, %v12360_v32 }
 0x46e   : > { %v12362_v49 = vpop.permute.xlu1 %12361 }
 0x46f   : > { %12505 = vst.msk [vmem:[#allocation2 + $0x10] sm:$0xf] %vm12500_vm7, %v12362_v49 }
 0x470   : > { %v12364_v57 = vpop.permute.xlu0 %12363 }
 0x471   : > { %12506 = vst.msk [vmem:[#allocation2 + $0x14] sm:$0xf] %vm12500_vm7, %v12364_v57 }
 0x472   : > { %v12366_v27 = vpop.permute.xlu1 %12365 }
 0x473   : > { %12507 = vst.msk [vmem:[#allocation2 + $0x18] sm:$0xf] %vm12500_vm7, %v12366_v27 }
 0x474   : > { %v12368_v35 = vpop.permute.xlu0 %12367 }
 0x475   : > { %12508 = vst.msk [vmem:[#allocation2 + $0x1c] sm:$0xf] %vm12500_vm7, %v12368_v35 }
 0x476   : > { %v12370_v36 = vpop.permute.xlu1 %12369 }
 0x477   : > { %12509 = vst.msk [vmem:[#allocation2 + $0x20] sm:$0xf] %vm12500_vm7, %v12370_v36 }
 0x478   : > { %v12372_v2 = vpop.permute.xlu0 %12371 }
 0x479   : > { %12510 = vst.msk [vmem:[#allocation2 + $0x24] sm:$0xf] %vm12500_vm7, %v12372_v2 }
 0x47a   : > { %v12374_v20 = vpop.permute.xlu1 %12373 }
 0x47b   : > { %12511 = vst.msk [vmem:[#allocation2 + $0x28] sm:$0xf] %vm12500_vm7, %v12374_v20 }
 0x47c   : > { %v12376_v15 = vpop.permute.xlu0 %12375 }
 0x47d   : > { %12512 = vst.msk [vmem:[#allocation2 + $0x2c] sm:$0xf] %vm12500_vm7, %v12376_v15 }
 0x47e   : > { %v12378_v28 = vpop.permute.xlu1 %12377 }
 0x47f   : > { %12513 = vst.msk [vmem:[#allocation2 + $0x30] sm:$0xf] %vm12500_vm7, %v12378_v28 }
 0x480   : > { %v12380_v42 = vpop.permute.xlu0 %12379 }
 0x481   : > { %12514 = vst.msk [vmem:[#allocation2 + $0x34] sm:$0xf] %vm12500_vm7, %v12380_v42 }
 0x482   : > { %v12382_v29 = vpop.permute.xlu1 %12381 }
 0x483   : > { %12515 = vst.msk [vmem:[#allocation2 + $0x38] sm:$0xf] %vm12500_vm7, %v12382_v29 }
 0x484   : > { %v12384_v34 = vpop.permute.xlu0 %12383 }
 0x485   : > { %12516 = vst.msk [vmem:[#allocation2 + $0x3c] sm:$0xf] %vm12500_vm7, %v12384_v34 }
 0x486   : > { %v12386_v13 = vpop.permute.xlu1 %12385 }
 0x487   : > { %12517 = vst.msk [vmem:[#allocation2 + $0x40] sm:$0xf] %vm12500_vm7, %v12386_v13 }
 0x488   : > { %v12388_v48 = vpop.permute.xlu0 %12387 }
 0x489   : > { %12518 = vst.msk [vmem:[#allocation2 + $0x44] sm:$0xf] %vm12500_vm7, %v12388_v48 }
 0x48a   : > { %v12390_v30 = vpop.permute.xlu1 %12389 }
 0x48b   : > { %12519 = vst.msk [vmem:[#allocation2 + $0x48] sm:$0xf] %vm12500_vm7, %v12390_v30 }
 0x48c   : > { %v12392_v41 = vpop.permute.xlu0 %12391 }
 0x48d   : > { %12520 = vst.msk [vmem:[#allocation2 + $0x4c] sm:$0xf] %vm12500_vm7, %v12392_v41 }
 0x48e   : > { %v12394_v46 = vpop.permute.xlu1 %12393 }
 0x48f   : > { %12521 = vst.msk [vmem:[#allocation2 + $0x50] sm:$0xf] %vm12500_vm7, %v12394_v46 }
 0x490   : > { %v12396_v39 = vpop.permute.xlu0 %12395 }
 0x491   : > { %12522 = vst.msk [vmem:[#allocation2 + $0x54] sm:$0xf] %vm12500_vm7, %v12396_v39 }
 0x492   : > { %v12398_v44 = vpop.permute.xlu1 %12397 }
 0x493   : > { %12523 = vst.msk [vmem:[#allocation2 + $0x58] sm:$0xf] %vm12500_vm7, %v12398_v44 }
 0x494   : > { %v12400_v60 = vpop.permute.xlu0 %12399 }
 0x495   : > { %12524 = vst.msk [vmem:[#allocation2 + $0x5c] sm:$0xf] %vm12500_vm7, %v12400_v60 }
 0x496   : > { %v12402_v10 = vpop.permute.xlu1 %12401 }
 0x497   : > { %12525 = vst.msk [vmem:[#allocation2 + $0x60] sm:$0xf] %vm12500_vm7, %v12402_v10 }
 0x498   : > { %v12404_v56 = vpop.permute.xlu0 %12403 }
 0x499   : > { %12526 = vst.msk [vmem:[#allocation2 + $0x64] sm:$0xf] %vm12500_vm7, %v12404_v56 }
 0x49a   : > { %v12406_v25 = vpop.permute.xlu1 %12405 }
 0x49b   : > { %12527 = vst.msk [vmem:[#allocation2 + $0x68] sm:$0xf] %vm12500_vm7, %v12406_v25 }
 0x49c   : > { %v12408_v11 = vpop.permute.xlu0 %12407 }
 0x49d   : > { %12528 = vst.msk [vmem:[#allocation2 + $0x6c] sm:$0xf] %vm12500_vm7, %v12408_v11 }
 0x49e   : > { %v12410_v55 = vpop.permute.xlu1 %12409 }
 0x49f   : > { %12529 = vst.msk [vmem:[#allocation2 + $0x70] sm:$0xf] %vm12500_vm7, %v12410_v55 }
 0x4a0   : > { %v12412_v33 = vpop.permute.xlu0 %12411 }
 0x4a1   : > { %12530 = vst.msk [vmem:[#allocation2 + $0x74] sm:$0xf] %vm12500_vm7, %v12412_v33 }
 0x4a2   : > { %v12414_v14 = vpop.permute.xlu1 %12413 }
 0x4a3   : > { %12531 = vst.msk [vmem:[#allocation2 + $0x78] sm:$0xf] %vm12500_vm7, %v12414_v14 }
 0x4a4   : > { %v12416_v22 = vpop.permute.xlu0 %12415 }
 0x4a5   : > { %12532 = vst.msk [vmem:[#allocation2 + $0x7c] sm:$0xf] %vm12500_vm7, %v12416_v22 }
 0x4a6   : > { %v12418_v47 = vpop.permute.xlu1 %12417 }
 0x4a7   : > { %12533 = vst.msk [vmem:[#allocation2 + $0x80] sm:$0xf] %vm12500_vm7, %v12418_v47 }
 0x4a8   : > { %v12420_v16 = vpop.permute.xlu0 %12419 }
 0x4a9   : > { %12534 = vst.msk [vmem:[#allocation2 + $0x84] sm:$0xf] %vm12500_vm7, %v12420_v16 }
 0x4aa   : > { %v12422_v38 = vpop.permute.xlu1 %12421 }
 0x4ab   : > { %12535 = vst.msk [vmem:[#allocation2 + $0x88] sm:$0xf] %vm12500_vm7, %v12422_v38 }
 0x4ac   : > { %v12424_v62 = vpop.permute.xlu0 %12423 }
 0x4ad   : > { %12536 = vst.msk [vmem:[#allocation2 + $0x8c] sm:$0xf] %vm12500_vm7, %v12424_v62 }
 0x4ae   : > { %v12426_v26 = vpop.permute.xlu1 %12425 }
 0x4af   : > { %12537 = vst.msk [vmem:[#allocation2 + $0x90] sm:$0xf] %vm12500_vm7, %v12426_v26 }
 0x4b0   : > { %v12428_v0 = vpop.permute.xlu0 %12427 }
 0x4b1   : > { %12538 = vst.msk [vmem:[#allocation2 + $0x94] sm:$0xf] %vm12500_vm7, %v12428_v0 }
 0x4b2   : > { %v12430_v5 = vpop.permute.xlu1 %12429 }
 0x4b3   : > { %12539 = vst.msk [vmem:[#allocation2 + $0x98] sm:$0xf] %vm12500_vm7, %v12430_v5 }
 0x4b4   : > { %v12432_v63 = vpop.permute.xlu0 %12431 }
 0x4b5   : > { %12540 = vst.msk [vmem:[#allocation2 + $0x9c] sm:$0xf] %vm12500_vm7, %v12432_v63 }
 0x4b6   : > { %v12434_v50 = vpop.permute.xlu1 %12433 }
 0x4b7   : > { %12541 = vst.msk [vmem:[#allocation2 + $0xa0] sm:$0xf] %vm12500_vm7, %v12434_v50 }
 0x4b8   : > { %v12436_v12 = vpop.permute.xlu0 %12435 }
 0x4b9   : > { %12542 = vst.msk [vmem:[#allocation2 + $0xa4] sm:$0xf] %vm12500_vm7, %v12436_v12 }
 0x4ba   : > { %v12438_v37 = vpop.permute.xlu1 %12437 }
 0x4bb   : > { %12543 = vst.msk [vmem:[#allocation2 + $0xa8] sm:$0xf] %vm12500_vm7, %v12438_v37 }
 0x4bc   : > { %v12440_v18 = vpop.permute.xlu0 %12439 }
 0x4bd   : > { %12544 = vst.msk [vmem:[#allocation2 + $0xac] sm:$0xf] %vm12500_vm7, %v12440_v18 }
 0x4be   : > { %v12442_v9 = vpop.permute.xlu1 %12441 }
 0x4bf   : > { %12545 = vst.msk [vmem:[#allocation2 + $0xb0] sm:$0xf] %vm12500_vm7, %v12442_v9 }
 0x4c0   : > { %v12444_v40 = vpop.permute.xlu0 %12443 }
 0x4c1   : > { %12546 = vst.msk [vmem:[#allocation2 + $0xb4] sm:$0xf] %vm12500_vm7, %v12444_v40 }
 0x4c2   : > { %v12446_v52 = vpop.permute.xlu1 %12445 }
 0x4c3   : > { %12547 = vst.msk [vmem:[#allocation2 + $0xb8] sm:$0xf] %vm12500_vm7, %v12446_v52 }
 0x4c4   : > { %v12448_v17 = vpop.permute.xlu0 %12447 }
 0x4c5   : > { %12548 = vst.msk [vmem:[#allocation2 + $0xbc] sm:$0xf] %vm12500_vm7, %v12448_v17 }
 0x4c6   : > { %v12450_v51 = vpop.permute.xlu1 %12449 }
 0x4c7   : > { %12549 = vst.msk [vmem:[#allocation2 + $0xc0] sm:$0xf] %vm12500_vm7, %v12450_v51 }
 0x4c8 PF: > { %v14338_v8 = vld [vmem:[%s14561_s19] sm:$0xff]   ;;  %v14458_v24 = vmov 0.0   ;;  %v14339_v59 = vld [vmem:[%s14561_s19 + $0x8] sm:$0xff]   ;;  %vm14459_vm8 = vmmov 0   ;;  %v14340_v31 = vld [vmem:[%s14561_s19 + $0x10] sm:$0xff]   ;;  %vm12841_vm9 = vcmask 1043456  }
 0x4c9   : > { %14145 = vmatprep.subr.bf16.mxu0 %v14458_v24  ;;  %14255 = vmatprep.subr.bf16.mxu1 %v14458_v24  ;;  %v14341_v21 = vld [vmem:[%s14561_s19 + $0x18] sm:$0xff]   ;;  %v14342_v1 = vld [vmem:[%s14561_s19 + $0x20] ss:$0 sps:$4 sm:$0xff]   ;;  %vm12765_vm10 = vcmask 588800   ;;  %v14346_v3 = vld [vmem:[#allocation2 + $0x70] sm:$0xff]   ;;  %s13920_s9 = sshll.u32 %s14438_s15, 6 }
 0x4ca   : > { %14146 = vmatpush3.bf16.msra.mxu0 %v14338_v8  ;;  %14260 = vmatpush3.bf16.msra.mxu1 %v14338_v8  ;;  %v12843_v45 = vsel %vm12841_vm9, %v14342_v1, 0  ;;  %v14343_v7 = vld [vmem:[#allocation2] sm:$0xff]   ;;  %v14344_v4 = vld [vmem:[#allocation2 + $0x68] sm:$0xff]   ;;  %v14347_v61 = vld [vmem:[#allocation2 + $0x10] sm:$0xff]   ;;  %s21464_s28 = scalar_lea.hbm %s21519_s3, %s13920_s9  ;;  %s13373_s29 = scalar_lea.sflag [#allocation5], %s14549_s6 }
 0x4cb   : > { %14147 = vmatprep.subr.bf16.mxu0 %v14458_v24  ;;  %14256 = vmatprep.subr.bf16.mxu1 %v14458_v24  ;;  %v14345_v23 = vld [vmem:[#allocation2 + $0x8] sm:$0xff]   ;;  %v14348_v54 = vld [vmem:[#allocation2 + $0x78] sm:$0xff]   ;;  %v14350_v43 = vld [vmem:[#allocation2 + $0x80] sm:$0xff]   ;;  %s14460_s30 = smov [#allocation4]  }
 0x4cc   : > { %14155 = vmatprep.mubr.msk.bf16.mxu0 %vm14459_vm8, %v14458_v24  ;;  %14207 = vmatprep.mubr.msk.bf16.mxu1 %vm14459_vm8, %v14458_v24  ;;  %v14349_v6 = vld [vmem:[#allocation2 + $0x18] sm:$0xff]   ;;  %v14351_v53 = vld [vmem:[#allocation2 + $0x20] sm:$0xff]   ;;  %v14352_v19 = vld [vmem:[#allocation2 + $0x88] sm:$0xff]   ;;  %s14372_s4 = sshll.u32 %s14460_s30, 4  ;;  %s14373_s4 = int_to_ptr.vmem [resolvable:$false] %s14372_s4 }
 0x4cd   : > { %v14353_v58 = vld [vmem:[#allocation2 + $0x28] sm:$0xff]   ;;  %v14354_v32 = vld [vmem:[#allocation2 + $0x90] sm:$0xff]   ;;  %v14356_v57 = vld [vmem:[#allocation2 + $0x98] sm:$0xff]   ;;  %s14374_s5 = scalar_lea.vmem %s14373_s4, 6272 }
 0x4ce   : > { %14148 = vmatpush3.bf16.msra.mxu0 %v14339_v59  ;;  %14261 = vmatpush3.bf16.msra.mxu1 %v14339_v59  ;;  %v14355_v49 = vld [vmem:[#allocation2 + $0x30] sm:$0xff]   ;;  %v14357_v27 = vld [vmem:[#allocation2 + $0x38] sm:$0xff]   ;;  %v14358_v35 = vld [vmem:[#allocation2 + $0xa0] sm:$0xff]  }
 0x4cf   : > { %14149 = vmatprep.subr.bf16.mxu0 %v14458_v24  ;;  %14257 = vmatprep.subr.bf16.mxu1 %v14458_v24  ;;  %v14359_v36 = vld [vmem:[#allocation2 + $0x40] sm:$0xff]   ;;  %v14360_v2 = vld [vmem:[#allocation2 + $0xa8] sm:$0xff]   ;;  %v14362_v15 = vld [vmem:[#allocation2 + $0xb0] sm:$0xff]  }
 0x4d0   : > { %v14361_v20 = vld [vmem:[#allocation2 + $0x48] sm:$0xff]   ;;  %v14363_v28 = vld [vmem:[#allocation2 + $0x50] sm:$0xff]   ;;  %v14364_v42 = vld [vmem:[#allocation2 + $0xb8] sm:$0xff]  }
 0x4d1   : > { %v14365_v29 = vld [vmem:[#allocation2 + $0x58] sm:$0xff]   ;;  %v14366_v34 = vld [vmem:[#allocation2 + $0xc0] ss:$0 sps:$4 sm:$0xff]  }
 0x4d2   : > { %14150 = vmatpush3.bf16.msra.mxu0 %v14340_v31  ;;  %14262 = vmatpush3.bf16.msra.mxu1 %v14340_v31  ;;  %v14367_v13 = vld [vmem:[#allocation2 + $0x60] sm:$0xff]  }
 0x4d3   : > { %14151 = vmatprep.subr.bf16.mxu0 %v14458_v24  ;;  %14258 = vmatprep.subr.bf16.mxu1 %v14458_v24  ;;  %v21384_v48 = vld [vmem:[%s294_s18] ss:$0 sm:$0xff]  ;;  %s13387_s18 = sshll.u32 %s14563_s21, 4  ;;  %s21466_s18 = int_to_ptr.vmem [resolvable:$true] %s13387_s18 }
 0x4d4   : > { %s14368_s15 = scalar_lea.vmem %s21466_s18, 3136  ;;  %p14375_p6 = scmp.lt.s32.totalorder %s21466_s18, %s14373_s4 }
 0x4d5   : > { %p14369_p2 = scmp.ne.s32.totalorder %s21466_s18, %s14368_s15  ;;  %p14376_p7 = scmp.lt.s32.totalorder %s14374_s5, %s14368_s15 }
 0x4d6   : > { %14152 = vmatpush3.bf16.msra.mxu0 %v14341_v21  ;;  %14263 = vmatpush3.bf16.msra.mxu1 %v14341_v21 }
 0x4d7   : > { %14153 = vmatprep.subr.bf16.mxu0 %v14458_v24  ;;  %14259 = vmatprep.subr.bf16.mxu1 %v14458_v24  ;;  %p14370_p3 = pnand %p14369_p2, %p14523_p5  ;;  %p14377_p8 = por %p14376_p7, %p14375_p6 }
 0x4d9   : > { %p14371_p4 = pneg %p14370_p3 }
 0x4da   : > { %14154 = vmatpush3.bf16.msra.mxu0 %v12843_v45  ;;  %14264 = vmatpush3.bf16.msra.mxu1 %v12843_v45 }
 0x4db   : > { %p14378_p11 = pnand %p14377_p8, %p14371_p4 }
 0x4dd   : > { %14156 = vmatmul.mubr.msk.bf16.vlgmr.msra.gmra.mrb[0].mxu0 %vm12765_vm10, %v14343_v7  ;;  %14208 = vmatmul.mubr.msk.bf16.vlgmr.msra.gmra.mrb[0].mxu1 %vm12765_vm10, %v14344_v4 }
 0x4de   : > { %14159 = vmatprep.mubr.msk.bf16.mxu0 %vm14459_vm8, %v14458_v24  ;;  %14211 = vmatprep.mubr.msk.bf16.mxu1 %vm14459_vm8, %v14458_v24 }
 0x4e5   : > { %14160 = vmatmul.mubr.msk.bf16.gmra.mrb[4].mxu0 %vm12765_vm10, %v14345_v23  ;;  %14212 = vmatmul.mubr.msk.bf16.gmra.mrb[4].mxu1 %vm12765_vm10, %v14346_v3 }
 0x4e6   : > { %14163 = vmatprep.mubr.msk.bf16.mxu0 %vm14459_vm8, %v14458_v24  ;;  %14215 = vmatprep.mubr.msk.bf16.mxu1 %vm14459_vm8, %v14458_v24 }
 0x4ed   : > { %14164 = vmatmul.mubr.msk.bf16.gmra.mrb[8].mxu0 %vm12765_vm10, %v14347_v61  ;;  %14216 = vmatmul.mubr.msk.bf16.gmra.mrb[8].mxu1 %vm12765_vm10, %v14348_v54 }
 0x4ee   : > { %14167 = vmatprep.mubr.msk.bf16.mxu0 %vm14459_vm8, %v14458_v24  ;;  %14219 = vmatprep.mubr.msk.bf16.mxu1 %vm14459_vm8, %v14458_v24 }
 0x4f5   : > { %14168 = vmatmul.mubr.msk.bf16.gmra.mrb[12].mxu0 %vm12765_vm10, %v14349_v6  ;;  %14220 = vmatmul.mubr.msk.bf16.gmra.mrb[12].mxu1 %vm12765_vm10, %v14350_v43 }
 0x4f6   : > { %14171 = vmatprep.mubr.msk.bf16.mxu0 %vm14459_vm8, %v14458_v24  ;;  %14223 = vmatprep.mubr.msk.bf16.mxu1 %vm14459_vm8, %v14458_v24 }
 0x4fd   : > { %14172 = vmatmul.mubr.msk.bf16.gmra.mrb[16].mxu0 %vm12765_vm10, %v14351_v53  ;;  %14224 = vmatmul.mubr.msk.bf16.gmra.mrb[16].mxu1 %vm12765_vm10, %v14352_v19 }
 0x4fe   : > { %14175 = vmatprep.mubr.msk.bf16.mxu0 %vm14459_vm8, %v14458_v24  ;;  %14227 = vmatprep.mubr.msk.bf16.mxu1 %vm14459_vm8, %v14458_v24 }
 0x505   : > { %14176 = vmatmul.mubr.msk.bf16.gmra.mrb[20].mxu0 %vm12765_vm10, %v14353_v58  ;;  %14228 = vmatmul.mubr.msk.bf16.gmra.mrb[20].mxu1 %vm12765_vm10, %v14354_v32 }
 0x506   : > { %14179 = vmatprep.mubr.msk.bf16.mxu0 %vm14459_vm8, %v14458_v24  ;;  %14231 = vmatprep.mubr.msk.bf16.mxu1 %vm14459_vm8, %v14458_v24 }
 0x50d   : > { %14180 = vmatmul.mubr.msk.bf16.gmra.mrb[24].mxu0 %vm12765_vm10, %v14355_v49  ;;  %14232 = vmatmul.mubr.msk.bf16.gmra.mrb[24].mxu1 %vm12765_vm10, %v14356_v57 }
 0x50e   : > { %14183 = vmatprep.mubr.msk.bf16.mxu0 %vm14459_vm8, %v14458_v24  ;;  %14235 = vmatprep.mubr.msk.bf16.mxu1 %vm14459_vm8, %v14458_v24 }
 0x515   : > { %14184 = vmatmul.mubr.msk.bf16.gmra.mrb[28].mxu0 %vm12765_vm10, %v14357_v27  ;;  %14236 = vmatmul.mubr.msk.bf16.gmra.mrb[28].mxu1 %vm12765_vm10, %v14358_v35 }
 0x516   : > { %14187 = vmatprep.mubr.msk.bf16.mxu0 %vm14459_vm8, %v14458_v24  ;;  %14239 = vmatprep.mubr.msk.bf16.mxu1 %vm14459_vm8, %v14458_v24 }
 0x51d   : > { %14188 = vmatmul.mubr.msk.bf16.gmra.mrb[32].mxu0 %vm12765_vm10, %v14359_v36  ;;  %14240 = vmatmul.mubr.msk.bf16.gmra.mrb[32].mxu1 %vm12765_vm10, %v14360_v2 }
 0x51e   : > { %14191 = vmatprep.mubr.msk.bf16.mxu0 %vm14459_vm8, %v14458_v24  ;;  %14243 = vmatprep.mubr.msk.bf16.mxu1 %vm14459_vm8, %v14458_v24 }
 0x525   : > { %14192 = vmatmul.mubr.msk.bf16.gmra.mrb[36].mxu0 %vm12765_vm10, %v14361_v20  ;;  %14244 = vmatmul.mubr.msk.bf16.gmra.mrb[36].mxu1 %vm12765_vm10, %v14362_v15 }
 0x526   : > { %14195 = vmatprep.mubr.msk.bf16.mxu0 %vm14459_vm8, %v14458_v24  ;;  %14247 = vmatprep.mubr.msk.bf16.mxu1 %vm14459_vm8, %v14458_v24 }
 0x52d   : > { %14196 = vmatmul.mubr.msk.bf16.gmra.mrb[40].mxu0 %vm12765_vm10, %v14363_v28  ;;  %14248 = vmatmul.mubr.msk.bf16.gmra.mrb[40].mxu1 %vm12765_vm10, %v14364_v42 }
 0x52e   : > { %14199 = vmatprep.mubr.msk.bf16.mxu0 %vm14459_vm8, %v14458_v24  ;;  %14251 = vmatprep.mubr.msk.bf16.mxu1 %vm14459_vm8, %v14458_v24 }
 0x535   : > { %14200 = vmatmul.mubr.msk.bf16.gmra.mrb[44].mxu0 %vm12765_vm10, %v14365_v29  ;;  %14252 = vmatmul.mubr.msk.bf16.gmra.mrb[44].mxu1 %vm12765_vm10, %v14366_v34 }
 0x536   : > { %14203 = vmatprep.mubr.msk.bf16.mxu0 %vm14459_vm8, %v14458_v24 }
 0x53d   : > { %14204 = vmatmul.mubr.msk.bf16.gmra.mrb[48].mxu0 %vm12765_vm10, %v14367_v13 }
 0x5b0   : > { %v12879_v30 = vpop.f32.mrb[0].mxu0  ;;  %v12983_v41 = vpop.f32.mrb[0].mxu1 }
 0x5b1   : > { %v12880_v46 = vadd.f32 %v21384_v48, %v12879_v30  ;;  %v14157_v39 = vpop.f32.mrb[1].mxu0  ;;  %v12984_v44 = vadd.f32 %v21384_v48, %v12983_v41  ;;  %v14209_v60 = vpop.f32.mrb[1].mxu1 }
 0x5b2   : > { %v12882_v10 = vpop.f32.mrb[2].mxu0  ;;  %v12986_v56 = vpop.f32.mrb[2].mxu1 }
 0x5b3   : > { %v12883_v25 = vadd.f32 %v21384_v48, %v12882_v10  ;;  %v14158_v11 = vpop.f32.mrb[3].mxu0  ;;  %v13103_v55 = vmax.f32 %v12984_v44, 0.0  ;;  %v12987_v33 = vadd.f32 %v21384_v48, %v12986_v56  ;;  %v14210_v14 = vpop.f32.mrb[3].mxu1  ;;  %v13077_v22 = vmax.f32 %v12880_v46, 0.0 }
 0x5b5   : > { %v13078_v47 = vmax.f32 %v12883_v25, 0.0  ;;  %v13104_v16 = vmax.f32 %v12987_v33, 0.0 }
 0x5b7   : > { %v13975_v38 = vpack.c.bf16 %v13078_v47, %v13077_v22  ;;  %v14040_v62 = vpack.c.bf16 %v13104_v16, %v13103_v55 }
 0x5b8   : > { %v12887_v26 = vpop.f32.mrb[4].mxu0  ;;  %v12991_v0 = vpop.f32.mrb[4].mxu1 }
 0x5b9   : > { %13976 = vst [vmem:[%s14563_s21] sm:$0xff] %v13975_v38   ;;  %v12888_v5 = vadd.f32 %v21384_v48, %v12887_v26  ;;  %v14161_v63 = vpop.f32.mrb[5].mxu0  ;;  %14104 = vst [vmem:[%s14563_s21 + $0x68] sm:$0xff] %v14040_v62   ;;  %v12992_v50 = vadd.f32 %v21384_v48, %v12991_v0  ;;  %v14213_v12 = vpop.f32.mrb[5].mxu1 }
 0x5ba   : > { %v12890_v37 = vpop.f32.mrb[6].mxu0  ;;  %v12994_v18 = vpop.f32.mrb[6].mxu1 }
 0x5bb   : > { %v12891_v9 = vadd.f32 %v21384_v48, %v12890_v37  ;;  %v14162_v40 = vpop.f32.mrb[7].mxu0  ;;  %v13105_v52 = vmax.f32 %v12992_v50, 0.0  ;;  %v12995_v17 = vadd.f32 %v21384_v48, %v12994_v18  ;;  %v14214_v51 = vpop.f32.mrb[7].mxu1  ;;  %v13079_v8 = vmax.f32 %v12888_v5, 0.0 }
 0x5bd   : > { %v13080_v24 = vmax.f32 %v12891_v9, 0.0  ;;  %v13106_v59 = vmax.f32 %v12995_v17, 0.0 }
 0x5bf   : > { %v13980_v31 = vpack.c.bf16 %v13080_v24, %v13079_v8  ;;  %v14045_v21 = vpack.c.bf16 %v13106_v59, %v13105_v52 }
 0x5c0   : > { %v12895_v1 = vpop.f32.mrb[8].mxu0  ;;  %v12999_v45 = vpop.f32.mrb[8].mxu1 }
 0x5c1   : > { %14092 = vst [vmem:[%s14563_s21 + $0x8] sm:$0xff] %v13980_v31   ;;  %v12896_v7 = vadd.f32 %v21384_v48, %v12895_v1  ;;  %v14165_v4 = vpop.f32.mrb[9].mxu0  ;;  %14105 = vst [vmem:[%s14563_s21 + $0x70] sm:$0xff] %v14045_v21   ;;  %v13000_v23 = vadd.f32 %v21384_v48, %v12999_v45  ;;  %v14217_v3 = vpop.f32.mrb[9].mxu1 }
 0x5c2   : > { %v12898_v61 = vpop.f32.mrb[10].mxu0  ;;  %v13002_v54 = vpop.f32.mrb[10].mxu1 }
 0x5c3   : > { %v12899_v6 = vadd.f32 %v21384_v48, %v12898_v61  ;;  %v14166_v43 = vpop.f32.mrb[11].mxu0  ;;  %v13107_v53 = vmax.f32 %v13000_v23, 0.0  ;;  %v13003_v19 = vadd.f32 %v21384_v48, %v13002_v54  ;;  %v14218_v58 = vpop.f32.mrb[11].mxu1  ;;  %v13081_v32 = vmax.f32 %v12896_v7, 0.0 }
 0x5c5   : > { %v13082_v49 = vmax.f32 %v12899_v6, 0.0  ;;  %v13108_v57 = vmax.f32 %v13003_v19, 0.0 }
 0x5c7   : > { %v13985_v27 = vpack.c.bf16 %v13082_v49, %v13081_v32  ;;  %v14050_v35 = vpack.c.bf16 %v13108_v57, %v13107_v53 }
 0x5c8   : > { %v12903_v36 = vpop.f32.mrb[12].mxu0  ;;  %v13007_v2 = vpop.f32.mrb[12].mxu1 }
 0x5c9   : > { %14093 = vst [vmem:[%s14563_s21 + $0x10] sm:$0xff] %v13985_v27   ;;  %v12904_v20 = vadd.f32 %v21384_v48, %v12903_v36  ;;  %v14169_v15 = vpop.f32.mrb[13].mxu0  ;;  %14106 = vst [vmem:[%s14563_s21 + $0x78] sm:$0xff] %v14050_v35   ;;  %v13008_v28 = vadd.f32 %v21384_v48, %v13007_v2  ;;  %v14221_v42 = vpop.f32.mrb[13].mxu1 }
 0x5ca   : > { %v12906_v29 = vpop.f32.mrb[14].mxu0  ;;  %v13010_v34 = vpop.f32.mrb[14].mxu1 }
 0x5cb   : > { %v12907_v13 = vadd.f32 %v21384_v48, %v12906_v29  ;;  %v14170_v30 = vpop.f32.mrb[15].mxu0  ;;  %v13109_v41 = vmax.f32 %v13008_v28, 0.0  ;;  %v13011_v46 = vadd.f32 %v21384_v48, %v13010_v34  ;;  %v14222_v39 = vpop.f32.mrb[15].mxu1  ;;  %v13083_v44 = vmax.f32 %v12904_v20, 0.0 }
 0x5cd   : > { %v13084_v60 = vmax.f32 %v12907_v13, 0.0  ;;  %v13110_v10 = vmax.f32 %v13011_v46, 0.0 }
 0x5cf   : > { %v13990_v56 = vpack.c.bf16 %v13084_v60, %v13083_v44  ;;  %v14055_v25 = vpack.c.bf16 %v13110_v10, %v13109_v41 }
 0x5d0   : > { %v12911_v11 = vpop.f32.mrb[16].mxu0  ;;  %v13015_v55 = vpop.f32.mrb[16].mxu1 }
 0x5d1   : > { %14094 = vst [vmem:[%s14563_s21 + $0x18] sm:$0xff] %v13990_v56   ;;  %v12912_v33 = vadd.f32 %v21384_v48, %v12911_v11  ;;  %v14173_v14 = vpop.f32.mrb[17].mxu0  ;;  %14107 = vst [vmem:[%s14563_s21 + $0x80] sm:$0xff] %v14055_v25   ;;  %v13016_v22 = vadd.f32 %v21384_v48, %v13015_v55  ;;  %v14225_v47 = vpop.f32.mrb[17].mxu1 }
 0x5d2   : > { %v12914_v16 = vpop.f32.mrb[18].mxu0  ;;  %v13018_v38 = vpop.f32.mrb[18].mxu1 }
 0x5d3   : > { %v12915_v62 = vadd.f32 %v21384_v48, %v12914_v16  ;;  %v14174_v26 = vpop.f32.mrb[19].mxu0  ;;  %v13111_v0 = vmax.f32 %v13016_v22, 0.0  ;;  %v13019_v5 = vadd.f32 %v21384_v48, %v13018_v38  ;;  %v14226_v63 = vpop.f32.mrb[19].mxu1  ;;  %v13085_v50 = vmax.f32 %v12912_v33, 0.0 }
 0x5d5   : > { %v13086_v12 = vmax.f32 %v12915_v62, 0.0  ;;  %v13112_v37 = vmax.f32 %v13019_v5, 0.0 }
 0x5d7   : > { %v13995_v18 = vpack.c.bf16 %v13086_v12, %v13085_v50  ;;  %v14060_v9 = vpack.c.bf16 %v13112_v37, %v13111_v0 }
 0x5d8   : > { %v12919_v40 = vpop.f32.mrb[20].mxu0  ;;  %v13023_v52 = vpop.f32.mrb[20].mxu1 }
 0x5d9   : > { %14095 = vst [vmem:[%s14563_s21 + $0x20] sm:$0xff] %v13995_v18   ;;  %v12920_v17 = vadd.f32 %v21384_v48, %v12919_v40  ;;  %v14177_v51 = vpop.f32.mrb[21].mxu0  ;;  %14108 = vst [vmem:[%s14563_s21 + $0x88] sm:$0xff] %v14060_v9   ;;  %v13024_v8 = vadd.f32 %v21384_v48, %v13023_v52  ;;  %v14229_v24 = vpop.f32.mrb[21].mxu1 }
 0x5da   : > { %v12922_v59 = vpop.f32.mrb[22].mxu0  ;;  %v13026_v31 = vpop.f32.mrb[22].mxu1 }
 0x5db   : > { %v12923_v21 = vadd.f32 %v21384_v48, %v12922_v59  ;;  %v14178_v1 = vpop.f32.mrb[23].mxu0  ;;  %v13113_v45 = vmax.f32 %v13024_v8, 0.0  ;;  %v13027_v7 = vadd.f32 %v21384_v48, %v13026_v31  ;;  %v14230_v4 = vpop.f32.mrb[23].mxu1  ;;  %v13087_v23 = vmax.f32 %v12920_v17, 0.0 }
 0x5dd   : > { %v13088_v3 = vmax.f32 %v12923_v21, 0.0  ;;  %v13114_v61 = vmax.f32 %v13027_v7, 0.0 }
 0x5df   : > { %v14000_v54 = vpack.c.bf16 %v13088_v3, %v13087_v23  ;;  %v14065_v6 = vpack.c.bf16 %v13114_v61, %v13113_v45 }
 0x5e0   : > { %v12927_v43 = vpop.f32.mrb[24].mxu0  ;;  %v13031_v53 = vpop.f32.mrb[24].mxu1 }
 0x5e1   : > { %14096 = vst [vmem:[%s14563_s21 + $0x28] sm:$0xff] %v14000_v54   ;;  %v12928_v19 = vadd.f32 %v21384_v48, %v12927_v43  ;;  %v14181_v58 = vpop.f32.mrb[25].mxu0  ;;  %14109 = vst [vmem:[%s14563_s21 + $0x90] sm:$0xff] %v14065_v6   ;;  %v13032_v32 = vadd.f32 %v21384_v48, %v13031_v53  ;;  %v14233_v49 = vpop.f32.mrb[25].mxu1 }
 0x5e2   : > { %v12930_v57 = vpop.f32.mrb[26].mxu0  ;;  %v13034_v27 = vpop.f32.mrb[26].mxu1 }
 0x5e3   : > { %v12931_v35 = vadd.f32 %v21384_v48, %v12930_v57  ;;  %v14182_v36 = vpop.f32.mrb[27].mxu0  ;;  %v13115_v2 = vmax.f32 %v13032_v32, 0.0  ;;  %v13035_v20 = vadd.f32 %v21384_v48, %v13034_v27  ;;  %v14234_v15 = vpop.f32.mrb[27].mxu1  ;;  %v13089_v28 = vmax.f32 %v12928_v19, 0.0 }
 0x5e5   : > { %v13090_v42 = vmax.f32 %v12931_v35, 0.0  ;;  %v13116_v29 = vmax.f32 %v13035_v20, 0.0 }
 0x5e7   : > { %v14005_v34 = vpack.c.bf16 %v13090_v42, %v13089_v28  ;;  %v14070_v13 = vpack.c.bf16 %v13116_v29, %v13115_v2 }
 0x5e8   : > { %v12935_v30 = vpop.f32.mrb[28].mxu0  ;;  %v13039_v41 = vpop.f32.mrb[28].mxu1 }
 0x5e9   : > { %14097 = vst [vmem:[%s14563_s21 + $0x30] sm:$0xff] %v14005_v34   ;;  %v12936_v46 = vadd.f32 %v21384_v48, %v12935_v30  ;;  %v14185_v39 = vpop.f32.mrb[29].mxu0  ;;  %14110 = vst [vmem:[%s14563_s21 + $0x98] sm:$0xff] %v14070_v13   ;;  %v13040_v44 = vadd.f32 %v21384_v48, %v13039_v41  ;;  %v14237_v60 = vpop.f32.mrb[29].mxu1 }
 0x5ea   : > { %v12938_v10 = vpop.f32.mrb[30].mxu0  ;;  %v13042_v56 = vpop.f32.mrb[30].mxu1 }
 0x5eb   : > { %v12939_v25 = vadd.f32 %v21384_v48, %v12938_v10  ;;  %v14186_v11 = vpop.f32.mrb[31].mxu0  ;;  %v13117_v55 = vmax.f32 %v13040_v44, 0.0  ;;  %v13043_v33 = vadd.f32 %v21384_v48, %v13042_v56  ;;  %v14238_v14 = vpop.f32.mrb[31].mxu1  ;;  %v13091_v22 = vmax.f32 %v12936_v46, 0.0 }
 0x5ed   : > { %v13092_v47 = vmax.f32 %v12939_v25, 0.0  ;;  %v13118_v16 = vmax.f32 %v13043_v33, 0.0 }
 0x5ef   : > { %v14010_v38 = vpack.c.bf16 %v13092_v47, %v13091_v22  ;;  %v14075_v62 = vpack.c.bf16 %v13118_v16, %v13117_v55 }
 0x5f0   : > { %v12943_v26 = vpop.f32.mrb[32].mxu0  ;;  %v13047_v0 = vpop.f32.mrb[32].mxu1 }
 0x5f1   : > { %14098 = vst [vmem:[%s14563_s21 + $0x38] sm:$0xff] %v14010_v38   ;;  %v12944_v5 = vadd.f32 %v21384_v48, %v12943_v26  ;;  %v14189_v63 = vpop.f32.mrb[33].mxu0  ;;  %14111 = vst [vmem:[%s14563_s21 + $0xa0] sm:$0xff] %v14075_v62   ;;  %v13048_v50 = vadd.f32 %v21384_v48, %v13047_v0  ;;  %v14241_v12 = vpop.f32.mrb[33].mxu1 }
 0x5f2   : > { %v12946_v37 = vpop.f32.mrb[34].mxu0  ;;  %v13050_v18 = vpop.f32.mrb[34].mxu1 }
 0x5f3   : > { %v12947_v9 = vadd.f32 %v21384_v48, %v12946_v37  ;;  %v14190_v40 = vpop.f32.mrb[35].mxu0  ;;  %v13119_v52 = vmax.f32 %v13048_v50, 0.0  ;;  %v13051_v17 = vadd.f32 %v21384_v48, %v13050_v18  ;;  %v14242_v51 = vpop.f32.mrb[35].mxu1  ;;  %v13093_v8 = vmax.f32 %v12944_v5, 0.0 }
 0x5f5   : > { %v13094_v24 = vmax.f32 %v12947_v9, 0.0  ;;  %v13120_v59 = vmax.f32 %v13051_v17, 0.0 }
 0x5f7   : > { %v14015_v31 = vpack.c.bf16 %v13094_v24, %v13093_v8  ;;  %v14080_v21 = vpack.c.bf16 %v13120_v59, %v13119_v52 }
 0x5f8   : > { %v12951_v1 = vpop.f32.mrb[36].mxu0  ;;  %v13055_v45 = vpop.f32.mrb[36].mxu1 }
 0x5f9   : > { %14099 = vst [vmem:[%s14563_s21 + $0x40] sm:$0xff] %v14015_v31   ;;  %v12952_v7 = vadd.f32 %v21384_v48, %v12951_v1  ;;  %v14193_v4 = vpop.f32.mrb[37].mxu0  ;;  %14112 = vst [vmem:[%s14563_s21 + $0xa8] sm:$0xff] %v14080_v21   ;;  %v13056_v23 = vadd.f32 %v21384_v48, %v13055_v45  ;;  %v14245_v3 = vpop.f32.mrb[37].mxu1 }
 0x5fa   : > { %v12954_v61 = vpop.f32.mrb[38].mxu0  ;;  %v13058_v54 = vpop.f32.mrb[38].mxu1 }
 0x5fb   : > { %v12955_v6 = vadd.f32 %v21384_v48, %v12954_v61  ;;  %v14194_v43 = vpop.f32.mrb[39].mxu0  ;;  %v13121_v53 = vmax.f32 %v13056_v23, 0.0  ;;  %v13059_v19 = vadd.f32 %v21384_v48, %v13058_v54  ;;  %v14246_v58 = vpop.f32.mrb[39].mxu1  ;;  %v13095_v32 = vmax.f32 %v12952_v7, 0.0 }
 0x5fd   : > { %v13096_v49 = vmax.f32 %v12955_v6, 0.0  ;;  %v13122_v57 = vmax.f32 %v13059_v19, 0.0 }
 0x5ff   : > { %v14020_v27 = vpack.c.bf16 %v13096_v49, %v13095_v32  ;;  %v14085_v35 = vpack.c.bf16 %v13122_v57, %v13121_v53 }
 0x600   : > { %v12959_v36 = vpop.f32.mrb[40].mxu0  ;;  %v13063_v2 = vpop.f32.mrb[40].mxu1 }
 0x601   : > { %14100 = vst [vmem:[%s14563_s21 + $0x48] sm:$0xff] %v14020_v27   ;;  %v12960_v20 = vadd.f32 %v21384_v48, %v12959_v36  ;;  %v14197_v15 = vpop.f32.mrb[41].mxu0  ;;  %14113 = vst [vmem:[%s14563_s21 + $0xb0] sm:$0xff] %v14085_v35   ;;  %v13064_v28 = vadd.f32 %v21384_v48, %v13063_v2  ;;  %v14249_v42 = vpop.f32.mrb[41].mxu1 }
 0x602   : > { %v12962_v29 = vpop.f32.mrb[42].mxu0  ;;  %v13066_v34 = vpop.f32.mrb[42].mxu1 }
 0x603   : > { %v12963_v13 = vadd.f32 %v21384_v48, %v12962_v29  ;;  %v14198_v30 = vpop.f32.mrb[43].mxu0  ;;  %v13123_v41 = vmax.f32 %v13064_v28, 0.0  ;;  %v13067_v46 = vadd.f32 %v21384_v48, %v13066_v34  ;;  %v14250_v39 = vpop.f32.mrb[43].mxu1  ;;  %v13097_v44 = vmax.f32 %v12960_v20, 0.0 }
 0x605   : > { %v13098_v60 = vmax.f32 %v12963_v13, 0.0  ;;  %v13124_v10 = vmax.f32 %v13067_v46, 0.0 }
 0x607   : > { %v14025_v56 = vpack.c.bf16 %v13098_v60, %v13097_v44  ;;  %v14090_v25 = vpack.c.bf16 %v13124_v10, %v13123_v41 }
 0x608   : > { %v12967_v11 = vpop.f32.mrb[44].mxu0  ;;  %v13071_v55 = vpop.f32.mrb[44].mxu1 }
 0x609   : > { %14101 = vst [vmem:[%s14563_s21 + $0x50] sm:$0xff] %v14025_v56   ;;  %v12968_v33 = vadd.f32 %v21384_v48, %v12967_v11  ;;  %v14201_v14 = vpop.f32.mrb[45].mxu0  ;;  %14114 = vst [vmem:[%s14563_s21 + $0xb8] sm:$0xff] %v14090_v25   ;;  %v13072_v22 = vadd.f32 %v21384_v48, %v13071_v55  ;;  %v14253_v47 = vpop.f32.mrb[45].mxu1 }
 0x60a   : > { %v12970_v16 = vpop.f32.mrb[46].mxu0  ;;  %v13074_v38 = vpop.f32.mrb[46].mxu1 }
 0x60b   : > { %v12971_v62 = vadd.f32 %v21384_v48, %v12970_v16  ;;  %v14202_v26 = vpop.f32.mrb[47].mxu0  ;;  %v13125_v0 = vmax.f32 %v13072_v22, 0.0  ;;  %v14254_v5 = vpop.f32.mrb[47].mxu1  ;;  %v13099_v63 = vmax.f32 %v12968_v33, 0.0 }
 0x60d   : > { %v13100_v50 = vmax.f32 %v12971_v62, 0.0  ;;  %v13971_v12 = vpack.c.bf16 %v13125_v0, %v13125_v0 }
 0x60f   : > { %v14030_v37 = vpack.c.bf16 %v13100_v50, %v13099_v63  ;;  %13371 = vst [vmem:[%s14563_s21 + $0xc0] sm:$0xf] %v13971_v12 }
 0x610   : > { %v12975_v18 = vpop.f32.mrb[48].mxu0 }
 0x611   : > { %14102 = vst [vmem:[%s14563_s21 + $0x58] sm:$0xff] %v14030_v37   ;;  %v12976_v9 = vadd.f32 %v21384_v48, %v12975_v18  ;;  %v14205_v40 = vpop.f32.mrb[49].mxu0 }
 0x612   : > { %v12978_v52 = vpop.f32.mrb[50].mxu0 }
 0x613   : > { %v12979_v17 = vadd.f32 %v21384_v48, %v12978_v52  ;;  %v14206_v51 = vpop.f32.mrb[51].mxu0  ;;  %v13101_v8 = vmax.f32 %v12976_v9, 0.0 }
 0x615   : > { %v13102_v24 = vmax.f32 %v12979_v17, 0.0 }
 0x617   : > { %v14035_v59 = vpack.c.bf16 %v13102_v24, %v13101_v8 }
 0x619   : > { %14103 = vst [vmem:[%s14563_s21 + $0x60] sm:$0xff] %v14035_v59  }
 0x61a   : > { %14381 = shalt.err (!%p14378_p11)
}
 0x61b   : > { %s14382_s21 = scalar_lea.hbm %s21464_s28, 3136  ;;  %s14386_s11 = scalar_lea.hbm %s21519_s3, 6272 }
 0x61c   : > { %p14383_p12 = scmp.ne.s32.totalorder %s21464_s28, %s14382_s21  ;;  %p14387_p1 = scmp.lt.u32.totalorder %s21464_s28, %s21519_s3 }
 0x61d   : > { %p14388_p2 = scmp.lt.u32.totalorder %s14386_s11, %s14382_s21  ;;  %p14390_p4 = scmp.lt.u32.totalorder %s14382_s21, %s21464_s28 }
 0x61e   : > { %p14384_p13 = pnand %p14383_p12, %p14523_p5 }
 0x61f   : > { %p14389_p3 = por %p14388_p2, %p14387_p1 }
 0x620   : > { %p14385_p0 = pneg %p14384_p13 }
 0x621   : > { %p14391_p6 = por %p14390_p4, %p14389_p3 }
 0x623   : > { %p14392_p7 = pnand %p14391_p6, %p14385_p0 }
 0x625   : > { %14395 = shalt.err (!%p14392_p7)
}
 0x626   : > { %s14461_s26 = smov 64   ;;  %s14462_s9 = smov 128  }
 0x627   : > { %s14463_s27 = smov 4  }
 0x628   : > { %14268 = dma.vmem_to_hbm [thread:$0]  (%p14523_p5), %s21466_s18, 3136, %s21464_s28, %s13373_s29, %s14461_s26, %s14462_s9, %s14463_s27  }
 0x629 PF: > { %s13402_s10 = sand.u32 1, %s14426_s12   ;;  %p14271_p8 = pnand %p13493_p10, %p14534_p9 }
 0x62a   : > { %s13403_s15 = scalar_lea.sflag [#allocation5], %s13402_s10 }
 0x62b   : > { %14421 = dma.done.wait (!%p14271_p8), %s13403_s15, 3136  }
 0x62c   : > { %14423 = vsyncadd (!%p14271_p8), %s13403_s15, 4294964160  ;;  %s16_s17 = sadd.s32 1, %s14446_s17   ;;  %s23939_s12 = smov %s14430_s13 }
 0x62d   : > { %p13_p11 = scmp.ge.s32.totalorder %s16_s17, 4   ;;  %s23940_s13 = smov %s14434_s14 }
 0x62e   : > { %s23941_s14 = smov %s14532_s24  ;;  %s23942_s15 = smov %s14442_s16 }
 0x62f   : > { %s23943_s16 = smov %s23945_s20  ;;  %15 = sbr.rel (!%p13_p11) target bundleno = 4 (0x4), region = 123 }
 0x636   :  { %13408 = vsyncpa [#allocation5], 1 }
 0x637   :  { %13410 = vsyncpa [#allocation5 + $0x1], 1 }

</bundles_post_ra>
